<compile_context>
chip_gen: v7x
topology: tpu7x:2x2x1
jax: 0.10.0
libtpu: 0.0.40
codegen_flags: <defaults>
</compile_context>

<pallas_src>
import jax
import jax.numpy as jnp
from jax.experimental import pallas as pl
from jax.experimental.pallas import tpu as pltpu

NEG_BIG = -1e30  # "minus infinity" for padded logit lanes


def _round_up(n, m):
    return ((n + m - 1) // m) * m


def _num_tensorcores():
    """Best-effort: 2 TensorCores per chip on v7x, 1 on v5e/v6e."""
    try:
        kind = jax.devices()[0].device_kind.lower()
    except Exception:
        return 1
    return 2 if ("v7" in kind or "7x" in kind) else 1


def _pick_batch_tile(batch, block_m, n_tc):
    """Choose (tile_m, padded_batch) for the batch grid axis."""
    block_m = max(8, (block_m // 8) * 8)        # sublane-aligned cap
    b_al = _round_up(batch, 8)                  # minimum sublane alignment
    if n_tc <= 1:
        # Single TensorCore (v5e/v6e): one fat step when everything fits.
        cand = min(block_m, b_al)
    else:
        # v7x: at least n_tc tiles so both TensorCores get work.
        cand = min(block_m, _round_up(pl.cdiv(b_al, n_tc), 8))
    # Prefer a tile dividing the (8-aligned) batch so no x padding is needed,
    # but don't shrink below half the candidate (tiny tiles cost more than
    # the pad they avoid).
    tm = cand
    for t in range(cand, max(8, cand // 2) - 1, -8):
        if b_al % t == 0:
            tm = t
            break
    b_pad = _round_up(b_al, tm)
    return tm, b_pad


def mlp_kernel(x_ref, w1_ref, b1_ref, w2_ref, b2_ref, w3_ref, b3_ref, o_ref):
    # Layer 1: Linear (bf16 MXU, f32 accumulate) + ReLU (f32 VPU).
    x = x_ref[...].astype(jnp.bfloat16)
    h1 = jnp.dot(x, w1_ref[...], preferred_element_type=jnp.float32) + b1_ref[...]
    h1 = jnp.maximum(h1, 0.0).astype(jnp.bfloat16)

    # Layer 2: Linear + ReLU.
    h2 = jnp.dot(h1, w2_ref[...], preferred_element_type=jnp.float32) + b2_ref[...]
    h2 = jnp.maximum(h2, 0.0).astype(jnp.bfloat16)

    # Layer 3: Linear (output padded to 128 lanes; padded bias lanes = -1e30).
    logits = jnp.dot(h2, w3_ref[...], preferred_element_type=jnp.float32) + b3_ref[...]

    # LogSoftmax along the feature axis; padded lanes contribute exp(-huge)=0.
    m = jnp.max(logits, axis=-1, keepdims=True)
    shifted = logits - m
    lse = jnp.log(jnp.sum(jnp.exp(shifted), axis=-1, keepdims=True))
    o_ref[...] = (shifted - lse).astype(o_ref.dtype)


def mlp_forward(x, params, block_m=512, return_padded=False):
    """x: [B, input_dim] float32 (or bf16).  Returns [B, output_dim] float32
    log-probabilities (or the lane-dense [B_pad, 128] slab if return_padded)."""
    w1, b1, w2, b2 = params["w1"], params["b1"], params["w2"], params["b2"]
    # Hot path uses the final layer pre-padded once in init_params.
    w3p, b3p = params["w3_padded"], params["b3_padded"]
    out_dim = params["out_dim"]

    B, in_dim = x.shape
    hid = w1.shape[1]
    out_pad = w3p.shape[1]

    n_tc = _num_tensorcores()
    tm, b_pad = _pick_batch_tile(B, block_m, n_tc)
    xp = x if b_pad == B else jnp.pad(x, ((0, b_pad - B), (0, 0)))
    grid = (b_pad // tm,)

    # Resident-VMEM sanity check (per TensorCore).  At these shapes the
    # resident weights are <1 MiB; guard so a huge hidden_dim fails loudly.
    resident_bytes = sum(a.size * a.dtype.itemsize
                         for a in (w1, b1, w2, b2, w3p, b3p))
    if resident_bytes > 24 * 1024 * 1024:
        # TODO(synk): for very large hidden_dim, tile w2/w3 over an extra grid
        # axis instead of keeping them fully VMEM-resident (required on v7x).
        raise ValueError("hidden_dim too large for fully VMEM-resident weights")

    # Advisory cost estimate for XLA's scheduler.
    flops = 2 * b_pad * (in_dim * hid + hid * hid + hid * out_pad)
    bytes_accessed = (xp.size * xp.dtype.itemsize
                      + resident_bytes
                      + b_pad * out_pad * 4)
    cost = pl.CostEstimate(flops=flops,
                           transcendentals=b_pad * out_pad,
                           bytes_accessed=bytes_accessed)

    def build(resident_buffers):
        def resident(a):
            kw = {}
            if resident_buffers is not None:
                kw["pipeline_mode"] = pl.Buffered(resident_buffers)
            # Constant block index => stays VMEM-resident across grid steps.
            return pl.BlockSpec(a.shape, lambda i: (0, 0), **kw)

        return pl.pallas_call(
            mlp_kernel,
            out_shape=jax.ShapeDtypeStruct((b_pad, out_pad), jnp.float32),
            grid=grid,
            in_specs=[
                pl.BlockSpec((tm, in_dim), lambda i: (i, 0)),   # x: batch-tiled, pipelined
                resident(w1), resident(b1),
                resident(w2), resident(b2),
                resident(w3p), resident(b3p),
            ],
            out_specs=pl.BlockSpec((tm, out_pad), lambda i: (i, 0)),
            compiler_params=pltpu.CompilerParams(
                dimension_semantics=("parallel",)),
            cost_estimate=cost,
        )

    args = (xp, w1, b1, w2, b2, w3p, b3p)
    try:
        # Single-buffer the resident weights: no re-DMA happens, so a second
        # pipeline buffer would be pure VMEM waste.
        out = jax.block_until_ready(build(1)(*args))
    except Exception:
        # Fallback: default double-buffering (always supported).
        out = build(None)(*args)

    if return_padded:
        return out                 # lane-dense slab, no extra slice pass
    return out[:B, :out_dim]


def init_params(key, input_dim, hidden_dim, output_dim):
    """nn.Linear-style U(-1/sqrt(fan_in), 1/sqrt(fan_in)) init.

    Weights are stored transposed vs PyTorch ([in, out]) and cast to bf16;
    biases stay f32 with shape [1, out].  The final layer is additionally
    pre-padded once to a lane-dense 128-wide output so the per-call hot path
    is just the pallas_call."""
    ks = jax.random.split(key, 6)

    def linear(kw, kb, fan_in, fan_out):
        bound = 1.0 / jnp.sqrt(fan_in)
        w = jax.random.uniform(kw, (fan_in, fan_out), jnp.float32, -bound, bound)
        b = jax.random.uniform(kb, (1, fan_out), jnp.float32, -bound, bound)
        return w.astype(jnp.bfloat16), b

    w1, b1 = linear(ks[0], ks[1], input_dim, hidden_dim)
    w2, b2 = linear(ks[2], ks[3], hidden_dim, hidden_dim)
    w3, b3 = linear(ks[4], ks[5], hidden_dim, output_dim)

    out_pad = _round_up(output_dim, 128)
    w3p = jnp.zeros((hidden_dim, out_pad), w3.dtype).at[:, :output_dim].set(w3)
    b3p = jnp.full((1, out_pad), NEG_BIG, jnp.float32).at[:, :output_dim].set(b3)

    return {"w1": w1, "b1": b1, "w2": w2, "b2": b2,
            "w3": w3, "b3": b3,
            "w3_padded": w3p, "b3_padded": b3p, "out_dim": output_dim}


def mlp_reference(x, p):
    """Pure-JAX reference using the same bf16-compute / f32-accumulate recipe."""
    xb = x.astype(jnp.bfloat16)
    h1 = jnp.maximum(
        jnp.dot(xb, p["w1"], preferred_element_type=jnp.float32) + p["b1"], 0.0
    ).astype(jnp.bfloat16)
    h2 = jnp.maximum(
        jnp.dot(h1, p["w2"], preferred_element_type=jnp.float32) + p["b2"], 0.0
    ).astype(jnp.bfloat16)
    logits = jnp.dot(h2, p["w3"], preferred_element_type=jnp.float32) + p["b3"]
    return jax.nn.log_softmax(logits, axis=1)


if __name__ == "__main__":
    # Small shapes consistent with the module (real dims 784/1200/10 are ctor
    # args); batch chosen so the grid/tile logic is exercised on both single-
    # and dual-TensorCore chips.
    batch, input_dim, hidden_dim, output_dim = 256, 256, 512, 10

    key = jax.random.PRNGKey(0)
    k_x, k_p = jax.random.split(key)
    x = jax.random.normal(k_x, (batch, input_dim), jnp.float32)
    params = init_params(k_p, input_dim, hidden_dim, output_dim)

    out = mlp_forward(x, params)
    out = jax.block_until_ready(out)

    ref = mlp_reference(x, params)
    assert out.shape == (batch, output_dim)
    assert bool(jnp.all(jnp.isfinite(out))), "non-finite outputs"
    assert jnp.allclose(out, ref, atol=2e-3, rtol=2e-3), "mismatch vs reference"

    print("KERNEL_OK")
</pallas_src>

<mosaic_0001>
module attributes {stable_mosaic.version = 11 : i64} {
  func.func @mlp_kernel(%arg0: i32, %arg1: memref<256x256xf32, #tpu.memory_space<vmem>>, %arg2: memref<256x512xbf16, #tpu.memory_space<vmem>>, %arg3: memref<1x512xf32, #tpu.memory_space<vmem>>, %arg4: memref<512x512xbf16, #tpu.memory_space<vmem>>, %arg5: memref<1x512xf32, #tpu.memory_space<vmem>>, %arg6: memref<512x128xbf16, #tpu.memory_space<vmem>>, %arg7: memref<1x128xf32, #tpu.memory_space<vmem>>, %arg8: memref<256x128xf32, #tpu.memory_space<vmem>>) attributes {dimension_semantics = [#tpu.dimension_semantics<parallel>], iteration_bounds = array<i64: 1>, scalar_prefetch = 0 : i64, scratch_operands = 0 : i64, tpu.core_type = #tpu.core_type<tc>, window_params = [{transform_indices = @transform_0, window_bounds = array<i64: 256, 256>}, {pipeline_mode = #tpu.pipeline_mode<synchronous>, transform_indices = @transform_1, window_bounds = array<i64: 256, 512>}, {pipeline_mode = #tpu.pipeline_mode<synchronous>, transform_indices = @transform_2, window_bounds = array<i64: 1, 512>}, {pipeline_mode = #tpu.pipeline_mode<synchronous>, transform_indices = @transform_3, window_bounds = array<i64: 512, 512>}, {pipeline_mode = #tpu.pipeline_mode<synchronous>, transform_indices = @transform_4, window_bounds = array<i64: 1, 512>}, {pipeline_mode = #tpu.pipeline_mode<synchronous>, transform_indices = @transform_5, window_bounds = array<i64: 512, 128>}, {pipeline_mode = #tpu.pipeline_mode<synchronous>, transform_indices = @transform_6, window_bounds = array<i64: 1, 128>}, {transform_indices = @transform_7, window_bounds = array<i64: 256, 128>}]} {
    %c0 = arith.constant 0 : index
    %c0_0 = arith.constant 0 : index
    %0 = vector.load %arg1[%c0, %c0_0] : memref<256x256xf32, #tpu.memory_space<vmem>>, vector<256x256xf32>
    %1 = arith.truncf %0 : vector<256x256xf32> to vector<256x256xbf16>
    %c0_1 = arith.constant 0 : index
    %c0_2 = arith.constant 0 : index
    %2 = vector.load %arg2[%c0_1, %c0_2] : memref<256x512xbf16, #tpu.memory_space<vmem>>, vector<256x512xbf16>
    %cst = arith.constant dense<0.000000e+00> : vector<256x512xf32>
    %3 = tpu.matmul %1, %2, %cst {dimension_numbers = #tpu.dot_dimension_numbers<[1], [0], [0], [1], [0, 0, 1, 1], [], []>} : vector<256x256xbf16>, vector<256x512xbf16>, vector<256x512xf32> -> vector<256x512xf32>
    %c0_3 = arith.constant 0 : index
    %c0_4 = arith.constant 0 : index
    %4 = vector.load %arg3[%c0_3, %c0_4] : memref<1x512xf32, #tpu.memory_space<vmem>>, vector<1x512xf32>
    %5 = vector.broadcast %4 : vector<1x512xf32> to vector<256x512xf32>
    %6 = arith.addf %3, %5 : vector<256x512xf32>
    %cst_5 = arith.constant 0.000000e+00 : f32
    %7 = vector.broadcast %cst_5 : f32 to vector<256x512xf32>
    %8 = arith.maximumf %6, %7 : vector<256x512xf32>
    %9 = arith.truncf %8 : vector<256x512xf32> to vector<256x512xbf16>
    %c0_6 = arith.constant 0 : index
    %c0_7 = arith.constant 0 : index
    %10 = vector.load %arg4[%c0_6, %c0_7] : memref<512x512xbf16, #tpu.memory_space<vmem>>, vector<512x512xbf16>
    %cst_8 = arith.constant dense<0.000000e+00> : vector<256x512xf32>
    %11 = tpu.matmul %9, %10, %cst_8 {dimension_numbers = #tpu.dot_dimension_numbers<[1], [0], [0], [1], [0, 0, 1, 1], [], []>} : vector<256x512xbf16>, vector<512x512xbf16>, vector<256x512xf32> -> vector<256x512xf32>
    %c0_9 = arith.constant 0 : index
    %c0_10 = arith.constant 0 : index
    %12 = vector.load %arg5[%c0_9, %c0_10] : memref<1x512xf32, #tpu.memory_space<vmem>>, vector<1x512xf32>
    %13 = vector.broadcast %12 : vector<1x512xf32> to vector<256x512xf32>
    %14 = arith.addf %11, %13 : vector<256x512xf32>
    %cst_11 = arith.constant 0.000000e+00 : f32
    %15 = vector.broadcast %cst_11 : f32 to vector<256x512xf32>
    %16 = arith.maximumf %14, %15 : vector<256x512xf32>
    %17 = arith.truncf %16 : vector<256x512xf32> to vector<256x512xbf16>
    %c0_12 = arith.constant 0 : index
    %c0_13 = arith.constant 0 : index
    %18 = vector.load %arg6[%c0_12, %c0_13] : memref<512x128xbf16, #tpu.memory_space<vmem>>, vector<512x128xbf16>
    %cst_14 = arith.constant dense<0.000000e+00> : vector<256x128xf32>
    %19 = tpu.matmul %17, %18, %cst_14 {dimension_numbers = #tpu.dot_dimension_numbers<[1], [0], [0], [1], [0, 0, 1, 1], [], []>} : vector<256x512xbf16>, vector<512x128xbf16>, vector<256x128xf32> -> vector<256x128xf32>
    %c0_15 = arith.constant 0 : index
    %c0_16 = arith.constant 0 : index
    %20 = vector.load %arg7[%c0_15, %c0_16] : memref<1x128xf32, #tpu.memory_space<vmem>>, vector<1x128xf32>
    %21 = vector.broadcast %20 : vector<1x128xf32> to vector<256x128xf32>
    %22 = arith.addf %19, %21 : vector<256x128xf32>
    %cst_17 = arith.constant dense<0xFF800000> : vector<256xf32>
    %23 = vector.multi_reduction <maximumf>, %22, %cst_17 [1] : vector<256x128xf32> to vector<256xf32>
    %24 = vector.shape_cast %23 : vector<256xf32> to vector<256x1xf32>
    %25 = vector.broadcast %24 : vector<256x1xf32> to vector<256x128xf32>
    %26 = arith.subf %22, %25 : vector<256x128xf32>
    %27 = math.exp %26 : vector<256x128xf32>
    %cst_18 = arith.constant dense<0.000000e+00> : vector<256xf32>
    %28 = vector.multi_reduction <add>, %27, %cst_18 [1] : vector<256x128xf32> to vector<256xf32>
    %29 = vector.shape_cast %28 : vector<256xf32> to vector<256x1xf32>
    %30 = math.log %29 : vector<256x1xf32>
    %31 = vector.broadcast %30 : vector<256x1xf32> to vector<256x128xf32>
    %32 = arith.subf %26, %31 : vector<256x128xf32>
    %c0_19 = arith.constant 0 : index
    %c0_20 = arith.constant 0 : index
    %33 = vector.load %arg8[%c0_19, %c0_20] : memref<256x128xf32, #tpu.memory_space<vmem>>, vector<256x128xf32>
    tpu.vector_store %arg8[%c0_19, %c0_20], %32 {strides = array<i32>} : memref<256x128xf32, #tpu.memory_space<vmem>>, vector<256x128xf32>,
    return
  }
  func.func @transform_0(%arg0: i32) -> (i32, i32) {
    %c0_i32 = arith.constant 0 : i32
    %c0_i32_0 = arith.constant 0 : i32
    return %arg0, %c0_i32 : i32, i32
  }
  func.func @transform_1(%arg0: i32) -> (i32, i32) {
    %c0_i32 = arith.constant 0 : i32
    %c0_i32_0 = arith.constant 0 : i32
    %c0_i32_1 = arith.constant 0 : i32
    return %c0_i32, %c0_i32_0 : i32, i32
  }
  func.func @transform_2(%arg0: i32) -> (i32, i32) {
    %c0_i32 = arith.constant 0 : i32
    %c0_i32_0 = arith.constant 0 : i32
    %c0_i32_1 = arith.constant 0 : i32
    return %c0_i32, %c0_i32_0 : i32, i32
  }
  func.func @transform_3(%arg0: i32) -> (i32, i32) {
    %c0_i32 = arith.constant 0 : i32
    %c0_i32_0 = arith.constant 0 : i32
    %c0_i32_1 = arith.constant 0 : i32
    return %c0_i32, %c0_i32_0 : i32, i32
  }
  func.func @transform_4(%arg0: i32) -> (i32, i32) {
    %c0_i32 = arith.constant 0 : i32
    %c0_i32_0 = arith.constant 0 : i32
    %c0_i32_1 = arith.constant 0 : i32
    return %c0_i32, %c0_i32_0 : i32, i32
  }
  func.func @transform_5(%arg0: i32) -> (i32, i32) {
    %c0_i32 = arith.constant 0 : i32
    %c0_i32_0 = arith.constant 0 : i32
    %c0_i32_1 = arith.constant 0 : i32
    return %c0_i32, %c0_i32_0 : i32, i32
  }
  func.func @transform_6(%arg0: i32) -> (i32, i32) {
    %c0_i32 = arith.constant 0 : i32
    %c0_i32_0 = arith.constant 0 : i32
    %c0_i32_1 = arith.constant 0 : i32
    return %c0_i32, %c0_i32_0 : i32, i32
  }
  func.func @transform_7(%arg0: i32) -> (i32, i32) {
    %c0_i32 = arith.constant 0 : i32
    %c0_i32_0 = arith.constant 0 : i32
    return %arg0, %c0_i32 : i32, i32
  }
}

module attributes {stable_mosaic.version = 11 : i64} {
  func.func @mlp_kernel(%arg0: i32, %arg1: memref<256x256xf32, #tpu.memory_space<vmem>>, %arg2: memref<256x512xbf16, #tpu.memory_space<vmem>>, %arg3: memref<1x512xf32, #tpu.memory_space<vmem>>, %arg4: memref<512x512xbf16, #tpu.memory_space<vmem>>, %arg5: memref<1x512xf32, #tpu.memory_space<vmem>>, %arg6: memref<512x128xbf16, #tpu.memory_space<vmem>>, %arg7: memref<1x128xf32, #tpu.memory_space<vmem>>, %arg8: memref<256x128xf32, #tpu.memory_space<vmem>>) attributes {dimension_semantics = [#tpu.dimension_semantics<parallel>], iteration_bounds = array<i64: 1>, scalar_prefetch = 0 : i64, scratch_operands = 0 : i64, tpu.core_type = #tpu.core_type<tc>, window_params = [{transform_indices = @transform_0, window_bounds = array<i64: 256, 256>}, {pipeline_mode = #tpu.pipeline_mode<synchronous>, transform_indices = @transform_1, window_bounds = array<i64: 256, 512>}, {pipeline_mode = #tpu.pipeline_mode<synchronous>, transform_indices = @transform_2, window_bounds = array<i64: 1, 512>}, {pipeline_mode = #tpu.pipeline_mode<synchronous>, transform_indices = @transform_3, window_bounds = array<i64: 512, 512>}, {pipeline_mode = #tpu.pipeline_mode<synchronous>, transform_indices = @transform_4, window_bounds = array<i64: 1, 512>}, {pipeline_mode = #tpu.pipeline_mode<synchronous>, transform_indices = @transform_5, window_bounds = array<i64: 512, 128>}, {pipeline_mode = #tpu.pipeline_mode<synchronous>, transform_indices = @transform_6, window_bounds = array<i64: 1, 128>}, {transform_indices = @transform_7, window_bounds = array<i64: 256, 128>}]} {
    %c0 = arith.constant 0 : index
    %c0_0 = arith.constant 0 : index
    %0 = vector.load %arg1[%c0, %c0_0] : memref<256x256xf32, #tpu.memory_space<vmem>>, vector<256x256xf32>
    %1 = arith.truncf %0 : vector<256x256xf32> to vector<256x256xbf16>
    %c0_1 = arith.constant 0 : index
    %c0_2 = arith.constant 0 : index
    %2 = vector.load %arg2[%c0_1, %c0_2] : memref<256x512xbf16, #tpu.memory_space<vmem>>, vector<256x512xbf16>
    %cst = arith.constant dense<0.000000e+00> : vector<256x512xf32>
    %3 = tpu.matmul %1, %2, %cst {dimension_numbers = #tpu.dot_dimension_numbers<[1], [0], [0], [1], [0, 0, 1, 1], [], []>} : vector<256x256xbf16>, vector<256x512xbf16>, vector<256x512xf32> -> vector<256x512xf32>
    %c0_3 = arith.constant 0 : index
    %c0_4 = arith.constant 0 : index
    %4 = vector.load %arg3[%c0_3, %c0_4] : memref<1x512xf32, #tpu.memory_space<vmem>>, vector<1x512xf32>
    %5 = vector.broadcast %4 : vector<1x512xf32> to vector<256x512xf32>
    %6 = arith.addf %3, %5 : vector<256x512xf32>
    %cst_5 = arith.constant 0.000000e+00 : f32
    %7 = vector.broadcast %cst_5 : f32 to vector<256x512xf32>
    %8 = arith.maximumf %6, %7 : vector<256x512xf32>
    %9 = arith.truncf %8 : vector<256x512xf32> to vector<256x512xbf16>
    %c0_6 = arith.constant 0 : index
    %c0_7 = arith.constant 0 : index
    %10 = vector.load %arg4[%c0_6, %c0_7] : memref<512x512xbf16, #tpu.memory_space<vmem>>, vector<512x512xbf16>
    %cst_8 = arith.constant dense<0.000000e+00> : vector<256x512xf32>
    %11 = tpu.matmul %9, %10, %cst_8 {dimension_numbers = #tpu.dot_dimension_numbers<[1], [0], [0], [1], [0, 0, 1, 1], [], []>} : vector<256x512xbf16>, vector<512x512xbf16>, vector<256x512xf32> -> vector<256x512xf32>
    %c0_9 = arith.constant 0 : index
    %c0_10 = arith.constant 0 : index
    %12 = vector.load %arg5[%c0_9, %c0_10] : memref<1x512xf32, #tpu.memory_space<vmem>>, vector<1x512xf32>
    %13 = vector.broadcast %12 : vector<1x512xf32> to vector<256x512xf32>
    %14 = arith.addf %11, %13 : vector<256x512xf32>
    %cst_11 = arith.constant 0.000000e+00 : f32
    %15 = vector.broadcast %cst_11 : f32 to vector<256x512xf32>
    %16 = arith.maximumf %14, %15 : vector<256x512xf32>
    %17 = arith.truncf %16 : vector<256x512xf32> to vector<256x512xbf16>
    %c0_12 = arith.constant 0 : index
    %c0_13 = arith.constant 0 : index
    %18 = vector.load %arg6[%c0_12, %c0_13] : memref<512x128xbf16, #tpu.memory_space<vmem>>, vector<512x128xbf16>
    %cst_14 = arith.constant dense<0.000000e+00> : vector<256x128xf32>
    %19 = tpu.matmul %17, %18, %cst_14 {dimension_numbers = #tpu.dot_dimension_numbers<[1], [0], [0], [1], [0, 0, 1, 1], [], []>} : vector<256x512xbf16>, vector<512x128xbf16>, vector<256x128xf32> -> vector<256x128xf32>
    %c0_15 = arith.constant 0 : index
    %c0_16 = arith.constant 0 : index
    %20 = vector.load %arg7[%c0_15, %c0_16] : memref<1x128xf32, #tpu.memory_space<vmem>>, vector<1x128xf32>
    %21 = vector.broadcast %20 : vector<1x128xf32> to vector<256x128xf32>
    %22 = arith.addf %19, %21 : vector<256x128xf32>
    %cst_17 = arith.constant dense<0xFF800000> : vector<256xf32>
    %23 = vector.multi_reduction <maximumf>, %22, %cst_17 [1] : vector<256x128xf32> to vector<256xf32>
    %24 = vector.shape_cast %23 : vector<256xf32> to vector<256x1xf32>
    %25 = vector.broadcast %24 : vector<256x1xf32> to vector<256x128xf32>
    %26 = arith.subf %22, %25 : vector<256x128xf32>
    %27 = math.exp %26 : vector<256x128xf32>
    %cst_18 = arith.constant dense<0.000000e+00> : vector<256xf32>
    %28 = vector.multi_reduction <add>, %27, %cst_18 [1] : vector<256x128xf32> to vector<256xf32>
    %29 = vector.shape_cast %28 : vector<256xf32> to vector<256x1xf32>
    %30 = math.log %29 : vector<256x1xf32>
    %31 = vector.broadcast %30 : vector<256x1xf32> to vector<256x128xf32>
    %32 = arith.subf %26, %31 : vector<256x128xf32>
    %c0_19 = arith.constant 0 : index
    %c0_20 = arith.constant 0 : index
    %33 = vector.load %arg8[%c0_19, %c0_20] : memref<256x128xf32, #tpu.memory_space<vmem>>, vector<256x128xf32>
    tpu.vector_store %arg8[%c0_19, %c0_20], %32 {strides = array<i32>} : memref<256x128xf32, #tpu.memory_space<vmem>>, vector<256x128xf32>,
    return
  }
  func.func @transform_0(%arg0: i32) -> (i32, i32) {
    %c0_i32 = arith.constant 0 : i32
    %c0_i32_0 = arith.constant 0 : i32
    return %arg0, %c0_i32 : i32, i32
  }
  func.func @transform_1(%arg0: i32) -> (i32, i32) {
    %c0_i32 = arith.constant 0 : i32
    %c0_i32_0 = arith.constant 0 : i32
    %c0_i32_1 = arith.constant 0 : i32
    return %c0_i32, %c0_i32_0 : i32, i32
  }
  func.func @transform_2(%arg0: i32) -> (i32, i32) {
    %c0_i32 = arith.constant 0 : i32
    %c0_i32_0 = arith.constant 0 : i32
    %c0_i32_1 = arith.constant 0 : i32
    return %c0_i32, %c0_i32_0 : i32, i32
  }
  func.func @transform_3(%arg0: i32) -> (i32, i32) {
    %c0_i32 = arith.constant 0 : i32
    %c0_i32_0 = arith.constant 0 : i32
    %c0_i32_1 = arith.constant 0 : i32
    return %c0_i32, %c0_i32_0 : i32, i32
  }
  func.func @transform_4(%arg0: i32) -> (i32, i32) {
    %c0_i32 = arith.constant 0 : i32
    %c0_i32_0 = arith.constant 0 : i32
    %c0_i32_1 = arith.constant 0 : i32
    return %c0_i32, %c0_i32_0 : i32, i32
  }
  func.func @transform_5(%arg0: i32) -> (i32, i32) {
    %c0_i32 = arith.constant 0 : i32
    %c0_i32_0 = arith.constant 0 : i32
    %c0_i32_1 = arith.constant 0 : i32
    return %c0_i32, %c0_i32_0 : i32, i32
  }
  func.func @transform_6(%arg0: i32) -> (i32, i32) {
    %c0_i32 = arith.constant 0 : i32
    %c0_i32_0 = arith.constant 0 : i32
    %c0_i32_1 = arith.constant 0 : i32
    return %c0_i32, %c0_i32_0 : i32, i32
  }
  func.func @transform_7(%arg0: i32) -> (i32, i32) {
    %c0_i32 = arith.constant 0 : i32
    %c0_i32_0 = arith.constant 0 : i32
    return %arg0, %c0_i32 : i32, i32
  }
}

</mosaic_0001>

<bundles_post_ra>
// kernel: tpu_custom_call.1
= control target key start
LH: loop header
LB: loop body
LE: loop exit
PB: predicated region body
PF: predicated region fallthrough
CT: control target
= control target key end

     0   :  { %12 = vsyncpa [#allocation3], 0  ;;  %s6088_s0 = inlined_call_operand.hbm [shape: f32[256,256], index: 0, kind: input, shape index: {}]   ;;  %s6089_s1 = inlined_call_operand.hbm [shape: bf16[256,512], index: 1, kind: input, shape index: {}]   ;;  %s6090_s2 = inlined_call_operand.vmem [shape: f32[1,512], index: 2, kind: input, shape index: {}]   ;;  %s6091_s3 = inlined_call_operand.hbm [shape: bf16[512,512], index: 3, kind: input, shape index: {}]   ;;  %s6092_s4 = inlined_call_operand.vmem [shape: f32[1,512], index: 4, kind: input, shape index: {}]   ;;  %s6093_s5 = inlined_call_operand.hbm [shape: bf16[512,128], index: 5, kind: input, shape index: {}]   ;;  %s6094_s6 = inlined_call_operand.vmem [shape: f32[1,128], index: 6, kind: input, shape index: {}]   ;;  %s6095_s7 = inlined_call_operand.hbm [shape: f32[256,128], index: 7, kind: output, shape index: {}]  }
   0x1   :  { %13 = vsyncpa [#allocation6], 0 }
   0x2   :  { %14 = vsyncpa [#allocation9], 0 }
   0x3   :  { %15 = vsyncpa [#allocation4], 0  ;;  %s5155_s24 = smov [#allocation5]   ;;  %s5156_s26 = smov [#allocation2]  }
   0x4   :  { %s33_s25 = sshll.u32 %s5155_s24, 4  ;;  %s21_s27 = sshll.u32 %s5156_s26, 4  ;;  %s34_s25 = int_to_ptr.vmem [resolvable:$true] %s33_s25  ;;  %s5206_s27 = int_to_ptr.vmem [resolvable:$true] %s21_s27 }
   0x5   :  { %s5037_s30 = scalar_lea.hbm %s6089_s1, 8192 }
   0x6   :  { %p5038_p0 = scmp.ne.s32.totalorder %s6089_s1, %s5037_s30  ;;  %p5041_p1 = scmp.lt.u32.totalorder %s5037_s30, %s6089_s1 }
   0x8   :  { %p5043_p2 = pnand %p5041_p1, %p5038_p0 }
   0xa   :  { %5046 = shalt.err (!%p5043_p2)
}
   0xb   :  { %s5047_s12 = scalar_lea.vmem %s34_s25, 8192  ;;  %p5052_p4 = scmp.lt.s32.totalorder %s34_s25, %s34_s25 }
   0xc   :  { %p5048_p3 = scmp.ne.s32.totalorder %s34_s25, %s5047_s12  ;;  %p5053_p5 = scmp.lt.s32.totalorder %s5047_s12, %s5047_s12 }
   0xe   :  { %p5054_p6 = por %p5053_p5, %p5052_p4 }
  0x10   :  { %p5055_p7 = pnand %p5054_p6, %p5048_p3 }
  0x12   :  { %5058 = shalt.err (!%p5055_p7)
}
  0x13   :  { %s5157_s13 = smov 256   ;;  %s5158_s14 = smov 16  }
  0x14   :  { %39 = dma.hbm_to_vmem [thread:$0]  %s6089_s1, 8192, %s34_s25, [#allocation6], %s5157_s13, %s5157_s13, %s5158_s14  }
  0x15   :  { %s5059_s19 = scalar_lea.hbm %s6088_s0, 8192 }
  0x16   :  { %p5060_p8 = scmp.ne.s32.totalorder %s6088_s0, %s5059_s19  ;;  %p5063_p9 = scmp.lt.u32.totalorder %s5059_s19, %s6088_s0 }
  0x18   :  { %p5065_p10 = pnand %p5063_p9, %p5060_p8 }
  0x1a   :  { %5068 = shalt.err (!%p5065_p10)
}
  0x1b   :  { %s5069_s24 = scalar_lea.vmem %s5206_s27, 8192  ;;  %p5074_p12 = scmp.lt.s32.totalorder %s5206_s27, %s5206_s27 }
  0x1c   :  { %p5070_p11 = scmp.ne.s32.totalorder %s5206_s27, %s5069_s24  ;;  %p5075_p13 = scmp.lt.s32.totalorder %s5069_s24, %s5069_s24 }
  0x1e   :  { %p5076_p0 = por %p5075_p13, %p5074_p12 }
  0x20   :  { %p5077_p1 = pnand %p5076_p0, %p5070_p11 }
  0x22   :  { %5080 = shalt.err (!%p5077_p1)
}
  0x23   :  { %27 = dma.hbm_to_vmem [thread:$0]  %s6088_s0, 8192, %s5206_s27, [#allocation3], %s5157_s13, %s5157_s13, %s5158_s14  }
  0x24   :  { %s5159_s26 = smov [#allocation7]   ;;  %s5160_s29 = smov [#allocation8]  }
  0x25   :  { %s47_s28 = sshll.u32 %s5159_s26, 4  ;;  %s61_s30 = sshll.u32 %s5160_s29, 4  ;;  %s48_s28 = int_to_ptr.vmem [resolvable:$true] %s47_s28  ;;  %s5243_s30 = int_to_ptr.vmem [resolvable:$true] %s61_s30 }
  0x26   :  { %s5081_s10 = scalar_lea.hbm %s6091_s3, 16384 }
  0x27   :  { %p5082_p2 = scmp.ne.s32.totalorder %s6091_s3, %s5081_s10  ;;  %p5085_p3 = scmp.lt.u32.totalorder %s5081_s10, %s6091_s3 }
  0x29   :  { %p5087_p4 = pnand %p5085_p3, %p5082_p2 }
  0x2b   :  { %5090 = shalt.err (!%p5087_p4)
}
  0x2c   :  { %s5091_s0 = scalar_lea.vmem %s48_s28, 16384  ;;  %p5096_p6 = scmp.lt.s32.totalorder %s48_s28, %s48_s28 }
  0x2d   :  { %p5092_p5 = scmp.ne.s32.totalorder %s48_s28, %s5091_s0  ;;  %p5097_p7 = scmp.lt.s32.totalorder %s5091_s0, %s5091_s0 }
  0x2f   :  { %p5098_p8 = por %p5097_p7, %p5096_p6 }
  0x31   :  { %p5099_p9 = pnand %p5098_p8, %p5092_p5 }
  0x33   :  { %5102 = shalt.err (!%p5099_p9)
}
  0x34   :  { %53 = dma.hbm_to_vmem [thread:$0]  %s6091_s3, 16384, %s48_s28, [#allocation6], %s5157_s13, %s5157_s13, %s5158_s14  }
  0x35   :  { %s5103_s20 = scalar_lea.hbm %s6093_s5, 4096 }
  0x36   :  { %p5104_p10 = scmp.ne.s32.totalorder %s6093_s5, %s5103_s20  ;;  %p5107_p11 = scmp.lt.u32.totalorder %s5103_s20, %s6093_s5 }
  0x38   :  { %p5109_p12 = pnand %p5107_p11, %p5104_p10 }
  0x3a   :  { %5112 = shalt.err (!%p5109_p12)
}
  0x3b   :  { %s5113_s1 = scalar_lea.vmem %s5243_s30, 4096  ;;  %p5118_p0 = scmp.lt.s32.totalorder %s5243_s30, %s5243_s30 }
  0x3c   :  { %p5114_p13 = scmp.ne.s32.totalorder %s5243_s30, %s5113_s1  ;;  %p5119_p1 = scmp.lt.s32.totalorder %s5113_s1, %s5113_s1 }
  0x3e   :  { %p5120_p2 = por %p5119_p1, %p5118_p0 }
  0x40   :  { %p5121_p3 = pnand %p5120_p2, %p5114_p13 }
  0x42   :  { %5124 = shalt.err (!%p5121_p3)
}
  0x43   :  { %s5161_s3 = smov 64   ;;  %s5162_s13 = smov 4  }
  0x44   :  { %67 = dma.hbm_to_vmem [thread:$0]  %s6093_s5, 4096, %s5243_s30, [#allocation9], %s5161_s3, %s5161_s3, %s5162_s13  }
  0x45   :  { %5147 = dma.done.wait [#allocation3], 8192  }
  0x46   :  { %5148 = vsyncadd [#allocation3], 4294959104 }
  0x47   :  { %5149 = dma.done.wait [#allocation6], 24576  }
  0x48   :  { %5150 = vsyncadd [#allocation6], 4294942720 }
  0x49   :  { %5151 = dma.done.wait [#allocation9], 4096  }
  0x4a   :  { %5152 = vsyncadd [#allocation9], 4294963200  ;;  %v4589_v0 = vld [vmem:[#allocation5 + $0x4] ss:$16 sps:$4 sm:$0xff]   ;;  %v4591_v1 = vld [vmem:[#allocation5] ss:$16 sps:$4 sm:$0xff]  }
  0x4b   :  { %585 = vmatprep.subr.bf16.mxu0 %v4589_v0  ;;  %v4592_v2 = vld [vmem:[#allocation5 + $0x24] ss:$16 sps:$4 sm:$0xff]   ;;  %v4594_v3 = vld [vmem:[#allocation5 + $0x20] ss:$16 sps:$4 sm:$0xff]   ;;  %v84_v13 = vld [vmem:[#allocation2 + $0x8] sm:$0xff] }
  0x4c   :  { %586 = vmatpush1.bf16.msra.mxu0 %v4591_v1  ;;  %v4595_v4 = vld [vmem:[#allocation5 + $0x44] ss:$16 sps:$4 sm:$0xff]   ;;  %v4597_v5 = vld [vmem:[#allocation5 + $0x40] ss:$16 sps:$4 sm:$0xff]   ;;  %v86_v14 = vld [vmem:[#allocation2 + $0x18] sm:$0xff] }
  0x4d   :  { %587 = vmatprep.subr.bf16.mxu0 %v4592_v2  ;;  %v4598_v6 = vld [vmem:[#allocation5 + $0x64] ss:$16 sps:$4 sm:$0xff]   ;;  %v4600_v7 = vld [vmem:[#allocation5 + $0x60] ss:$16 sps:$4 sm:$0xff]   ;;  %v148_v15 = vpack.c.bf16 %v86_v14, %v84_v13  ;;  %v4637_v19 = vld [vmem:[#allocation5 + $0xc] ss:$16 sps:$4 sm:$0xff]  }
  0x4e   :  { %v4601_v8 = vld [vmem:[#allocation5 + $0x84] ss:$16 sps:$4 sm:$0xff]   ;;  %v4603_v9 = vld [vmem:[#allocation5 + $0x80] ss:$16 sps:$4 sm:$0xff]   ;;  %v4639_v20 = vld [vmem:[#allocation5 + $0x8] ss:$16 sps:$4 sm:$0xff]   ;;  %778 = vmatprep.subr.bf16.mxu1 %v4637_v19 }
  0x4f   :  { %v4604_v10 = vld [vmem:[#allocation5 + $0xa4] ss:$16 sps:$4 sm:$0xff]   ;;  %v4606_v11 = vld [vmem:[#allocation5 + $0xa0] ss:$16 sps:$4 sm:$0xff]   ;;  %617 = vmatprep.mubr.bf16.mxu0 %v148_v15  ;;  %810 = vmatprep.mubr.bf16.mxu1 %v148_v15  ;;  %v4640_v22 = vld [vmem:[#allocation5 + $0x2c] ss:$16 sps:$4 sm:$0xff]  }
  0x50   :  { %588 = vmatpush1.bf16.msra.mxu0 %v4594_v3  ;;  %v4607_v12 = vld [vmem:[#allocation5 + $0xc4] ss:$16 sps:$4 sm:$0xff]   ;;  %v4609_v16 = vld [vmem:[#allocation5 + $0xc0] ss:$16 sps:$4 sm:$0xff]   ;;  %779 = vmatpush1.bf16.msra.mxu1 %v4639_v20  ;;  %v4642_v23 = vld [vmem:[#allocation5 + $0x28] ss:$16 sps:$4 sm:$0xff]  }
  0x51   :  { %589 = vmatprep.subr.bf16.mxu0 %v4595_v4  ;;  %v4610_v17 = vld [vmem:[#allocation5 + $0xe4] ss:$16 sps:$4 sm:$0xff]   ;;  %v4612_v18 = vld [vmem:[#allocation5 + $0xe0] ss:$16 sps:$4 sm:$0xff]   ;;  %v4643_v25 = vld [vmem:[#allocation5 + $0x4c] ss:$16 sps:$4 sm:$0xff]   ;;  %780 = vmatprep.subr.bf16.mxu1 %v4640_v22 }
  0x52   :  { %v4613_v21 = vld [vmem:[#allocation5 + $0x104] ss:$16 sps:$4 sm:$0xff]   ;;  %v4615_v24 = vld [vmem:[#allocation5 + $0x100] ss:$16 sps:$4 sm:$0xff]   ;;  %v4645_v27 = vld [vmem:[#allocation5 + $0x48] ss:$16 sps:$4 sm:$0xff]  }
  0x53   :  { %v4616_v26 = vld [vmem:[#allocation5 + $0x124] ss:$16 sps:$4 sm:$0xff]   ;;  %v4618_v28 = vld [vmem:[#allocation5 + $0x120] ss:$16 sps:$4 sm:$0xff]   ;;  %v4646_v29 = vld [vmem:[#allocation5 + $0x6c] ss:$16 sps:$4 sm:$0xff]  }
  0x54   :  { %590 = vmatpush1.bf16.msra.mxu0 %v4597_v5  ;;  %781 = vmatpush1.bf16.msra.mxu1 %v4642_v23  ;;  %v4619_v30 = vld [vmem:[#allocation5 + $0x144] ss:$16 sps:$4 sm:$0xff]   ;;  %v4648_v31 = vld [vmem:[#allocation5 + $0x68] ss:$16 sps:$4 sm:$0xff]   ;;  %v4621_v32 = vld [vmem:[#allocation5 + $0x140] ss:$16 sps:$4 sm:$0xff]  }
  0x55   :  { %591 = vmatprep.subr.bf16.mxu0 %v4598_v6  ;;  %782 = vmatprep.subr.bf16.mxu1 %v4643_v25  ;;  %v4649_v33 = vld [vmem:[#allocation5 + $0x8c] ss:$16 sps:$4 sm:$0xff]   ;;  %v4622_v34 = vld [vmem:[#allocation5 + $0x164] ss:$16 sps:$4 sm:$0xff]   ;;  %v4651_v35 = vld [vmem:[#allocation5 + $0x88] ss:$16 sps:$4 sm:$0xff]  }
  0x56   :  { %v4624_v36 = vld [vmem:[#allocation5 + $0x160] ss:$16 sps:$4 sm:$0xff]   ;;  %v4652_v37 = vld [vmem:[#allocation5 + $0xac] ss:$16 sps:$4 sm:$0xff]   ;;  %v4625_v38 = vld [vmem:[#allocation5 + $0x184] ss:$16 sps:$4 sm:$0xff]  }
  0x57   :  { %v4654_v39 = vld [vmem:[#allocation5 + $0xa8] ss:$16 sps:$4 sm:$0xff]   ;;  %v4627_v40 = vld [vmem:[#allocation5 + $0x180] ss:$16 sps:$4 sm:$0xff]   ;;  %v4655_v41 = vld [vmem:[#allocation5 + $0xcc] ss:$16 sps:$4 sm:$0xff]  }
  0x58   :  { %592 = vmatpush1.bf16.msra.mxu0 %v4600_v7  ;;  %783 = vmatpush1.bf16.msra.mxu1 %v4645_v27  ;;  %v4628_v42 = vld [vmem:[#allocation5 + $0x1a4] ss:$16 sps:$4 sm:$0xff]   ;;  %v4657_v43 = vld [vmem:[#allocation5 + $0xc8] ss:$16 sps:$4 sm:$0xff]   ;;  %v4630_v44 = vld [vmem:[#allocation5 + $0x1a0] ss:$16 sps:$4 sm:$0xff]  }
  0x59   :  { %593 = vmatprep.subr.bf16.mxu0 %v4601_v8  ;;  %784 = vmatprep.subr.bf16.mxu1 %v4646_v29  ;;  %v4658_v45 = vld [vmem:[#allocation5 + $0xec] ss:$16 sps:$4 sm:$0xff]   ;;  %v4631_v46 = vld [vmem:[#allocation5 + $0x1c4] ss:$16 sps:$4 sm:$0xff]   ;;  %v4660_v47 = vld [vmem:[#allocation5 + $0xe8] ss:$16 sps:$4 sm:$0xff]  }
  0x5a   :  { %v4633_v48 = vld [vmem:[#allocation5 + $0x1c0] ss:$16 sps:$4 sm:$0xff]   ;;  %v4661_v49 = vld [vmem:[#allocation5 + $0x10c] ss:$16 sps:$4 sm:$0xff]   ;;  %v4634_v50 = vld [vmem:[#allocation5 + $0x1e4] ss:$16 sps:$4 sm:$0xff]  }
  0x5b   :  { %v4636_v51 = vld [vmem:[#allocation5 + $0x1e0] ss:$16 sps:$4 sm:$0xff]   ;;  %v4663_v54 = vld [vmem:[#allocation5 + $0x108] ss:$16 sps:$4 sm:$0xff]   ;;  %v4664_v56 = vld [vmem:[#allocation5 + $0x12c] ss:$16 sps:$4 sm:$0xff]  }
  0x5c   :  { %594 = vmatpush1.bf16.msra.mxu0 %v4603_v9  ;;  %785 = vmatpush1.bf16.msra.mxu1 %v4648_v31  ;;  %v83_v52 = vld [vmem:[#allocation2] sm:$0xff]  ;;  %v85_v53 = vld [vmem:[#allocation2 + $0x10] sm:$0xff]  ;;  %v88_v55 = vld [vmem:[#allocation2 + $0x28] sm:$0xff] }
  0x5d   :  { %595 = vmatprep.subr.bf16.mxu0 %v4604_v10  ;;  %786 = vmatprep.subr.bf16.mxu1 %v4649_v33  ;;  %v90_v57 = vld [vmem:[#allocation2 + $0x38] sm:$0xff]  ;;  %v4687_v58 = vld [vmem:[#allocation7 + $0x4] ss:$16 sps:$4 sm:$0xff]   ;;  %v5277_v59 = vpack.c.bf16 %v85_v53, %v83_v52  ;;  %v4685_v63 = vld [vmem:[#allocation7] ss:$16 sps:$4 sm:$0xff]  }
  0x5e   :  { %v4666_v60 = vld [vmem:[#allocation5 + $0x128] ss:$16 sps:$4 sm:$0xff]   ;;  %v5279_v61 = vpack.c.bf16 %v90_v57, %v88_v55  ;;  %v4667_v62 = vld [vmem:[#allocation5 + $0x14c] ss:$16 sps:$4 sm:$0xff]   ;;  %v87_v0 = vld [vmem:[#allocation2 + $0x20] sm:$0xff] }
  0x5f   :  { %v4693_v1 = vld [vmem:[#allocation7 + $0x24] ss:$16 sps:$4 sm:$0xff]   ;;  %v4669_v3 = vld [vmem:[#allocation5 + $0x148] ss:$16 sps:$4 sm:$0xff]   ;;  %v4670_v5 = vld [vmem:[#allocation5 + $0x16c] ss:$16 sps:$4 sm:$0xff]  }
  0x60   :  { %596 = vmatpush1.bf16.msra.mxu0 %v4606_v11  ;;  %787 = vmatpush1.bf16.msra.mxu1 %v4651_v35  ;;  %v89_v2 = vld [vmem:[#allocation2 + $0x30] sm:$0xff]  ;;  %v92_v4 = vld [vmem:[#allocation2 + $0x48] sm:$0xff]  ;;  %v94_v6 = vld [vmem:[#allocation2 + $0x58] sm:$0xff] }
  0x61   :  { %597 = vmatprep.subr.bf16.mxu0 %v4607_v12  ;;  %788 = vmatprep.subr.bf16.mxu1 %v4652_v37  ;;  %v4691_v7 = vld [vmem:[#allocation7 + $0x20] ss:$16 sps:$4 sm:$0xff]   ;;  %v4699_v8 = vld [vmem:[#allocation7 + $0x44] ss:$16 sps:$4 sm:$0xff]   ;;  %v5283_v9 = vpack.c.bf16 %v89_v2, %v87_v0  ;;  %v4672_v10 = vld [vmem:[#allocation5 + $0x168] ss:$16 sps:$4 sm:$0xff]   ;;  %v5285_v11 = vpack.c.bf16 %v94_v6, %v92_v4 }
  0x62   :  { %v4673_v12 = vld [vmem:[#allocation5 + $0x18c] ss:$16 sps:$4 sm:$0xff]   ;;  %v4697_v13 = vld [vmem:[#allocation7 + $0x40] ss:$16 sps:$4 sm:$0xff]   ;;  %v4711_v22 = vld [vmem:[#allocation7 + $0x84] ss:$16 sps:$4 sm:$0xff]  }
  0x63   :  { %v91_v14 = vld [vmem:[#allocation2 + $0x40] sm:$0xff]  ;;  %v93_v15 = vld [vmem:[#allocation2 + $0x50] sm:$0xff]  ;;  %v98_v19 = vld [vmem:[#allocation2 + $0x78] sm:$0xff] }
  0x64   :  { %598 = vmatpush1.bf16.msra.mxu0 %v4609_v16  ;;  %789 = vmatpush1.bf16.msra.mxu1 %v4654_v39  ;;  %v4705_v16 = vld [vmem:[#allocation7 + $0x64] ss:$16 sps:$4 sm:$0xff]   ;;  %v4676_v20 = vld [vmem:[#allocation5 + $0x1ac] ss:$16 sps:$4 sm:$0xff]   ;;  %v5289_v23 = vpack.c.bf16 %v93_v15, %v91_v14  ;;  %v4709_v27 = vld [vmem:[#allocation7 + $0x80] ss:$16 sps:$4 sm:$0xff]  }
  0x65   :  { %599 = vmatprep.subr.bf16.mxu0 %v4610_v17  ;;  %790 = vmatprep.subr.bf16.mxu1 %v4655_v41  ;;  %v96_v17 = vld [vmem:[#allocation2 + $0x68] sm:$0xff]  ;;  %v97_v29 = vld [vmem:[#allocation2 + $0x70] sm:$0xff]  ;;  %v102_v33 = vld [vmem:[#allocation2 + $0x98] sm:$0xff] }
  0x66   :  { %v5291_v25 = vpack.c.bf16 %v98_v19, %v96_v17  ;;  %v100_v31 = vld [vmem:[#allocation2 + $0x88] sm:$0xff]  ;;  %v4715_v35 = vld [vmem:[#allocation7 + $0xa0] ss:$16 sps:$4 sm:$0xff]   ;;  %v4747_v0 = vld [vmem:[#allocation7 + $0x144] ss:$16 sps:$4 sm:$0xff]  }
  0x67   :  { %v5297_v39 = vpack.c.bf16 %v102_v33, %v100_v31  ;;  %v4721_v41 = vld [vmem:[#allocation7 + $0xc0] ss:$16 sps:$4 sm:$0xff]   ;;  %v4694_v52 = vld [vmem:[#allocation7 + $0x28] ss:$16 sps:$4 sm:$0xff]   ;;  %v4714_v4 = vld [vmem:[#allocation7 + $0x8c] ss:$16 sps:$4 sm:$0xff]  }
  0x68   :  { %600 = vmatpush1.bf16.msra.mxu0 %v4612_v18  ;;  %791 = vmatpush1.bf16.msra.mxu1 %v4657_v43  ;;  %v4675_v18 = vld [vmem:[#allocation5 + $0x188] ss:$16 sps:$4 sm:$0xff]   ;;  %v101_v43 = vld [vmem:[#allocation2 + $0x90] sm:$0xff] }
  0x69   :  { %601 = vmatprep.subr.bf16.mxu0 %v4613_v21  ;;  %792 = vmatprep.subr.bf16.mxu1 %v4658_v45  ;;  %v4703_v21 = vld [vmem:[#allocation7 + $0x60] ss:$16 sps:$4 sm:$0xff]   ;;  %v104_v45 = vld [vmem:[#allocation2 + $0xa8] sm:$0xff]  ;;  %v4759_v14 = vld [vmem:[#allocation7 + $0x184] ss:$16 sps:$4 sm:$0xff]  }
  0x6a   :  { %v4733_v55 = vld [vmem:[#allocation7 + $0x100] ss:$16 sps:$4 sm:$0xff]   ;;  %v4706_v2 = vld [vmem:[#allocation7 + $0x68] ss:$16 sps:$4 sm:$0xff]  }
  0x6b   :  { %v105_v57 = vld [vmem:[#allocation2 + $0xb0] sm:$0xff]  ;;  %v4712_v6 = vld [vmem:[#allocation7 + $0x88] ss:$16 sps:$4 sm:$0xff]  }
  0x6c   :  { %602 = vmatpush1.bf16.msra.mxu0 %v4615_v24  ;;  %793 = vmatpush1.bf16.msra.mxu1 %v4660_v47  ;;  %v4678_v24 = vld [vmem:[#allocation5 + $0x1a8] ss:$16 sps:$4 sm:$0xff]  }
  0x6d   :  { %603 = vmatprep.subr.bf16.mxu0 %v4616_v26  ;;  %794 = vmatprep.subr.bf16.mxu1 %v4661_v49  ;;  %v4679_v26 = vld [vmem:[#allocation5 + $0x1cc] ss:$16 sps:$4 sm:$0xff]   ;;  %v4727_v49 = vld [vmem:[#allocation7 + $0xe0] ss:$16 sps:$4 sm:$0xff]   ;;  %v4718_v15 = vld [vmem:[#allocation7 + $0xa8] ss:$16 sps:$4 sm:$0xff]  }
  0x6e   :  { %v106_v47 = vld [vmem:[#allocation2 + $0xb8] sm:$0xff] }
  0x6f   :  { %v5305_v53 = vpack.c.bf16 %v106_v47, %v104_v45  ;;  %v119_v45 = vld [vmem:[#allocation2 + $0x120] sm:$0xff]  ;;  %v4756_v47 = vld [vmem:[#allocation7 + $0x16c] ss:$16 sps:$4 sm:$0xff]  }
  0x70   :  { %604 = vmatpush1.bf16.msra.mxu0 %v4618_v28  ;;  %795 = vmatpush1.bf16.msra.mxu1 %v4663_v54  ;;  %v95_v28 = vld [vmem:[#allocation2 + $0x60] sm:$0xff]  ;;  %v4702_v54 = vld [vmem:[#allocation7 + $0x4c] ss:$16 sps:$4 sm:$0xff]  }
  0x71   :  { %605 = vmatprep.subr.bf16.mxu0 %v4619_v30  ;;  %796 = vmatprep.subr.bf16.mxu1 %v4664_v56  ;;  %v4717_v30 = vld [vmem:[#allocation7 + $0xa4] ss:$16 sps:$4 sm:$0xff]   ;;  %v5295_v37 = vpack.c.bf16 %v97_v29, %v95_v28  ;;  %v4763_v28 = vld [vmem:[#allocation7 + $0x1a0] ss:$16 sps:$4 sm:$0xff]   ;;  %v4730_v29 = vld [vmem:[#allocation7 + $0xe8] ss:$16 sps:$4 sm:$0xff]  }
  0x72   :  { %v103_v56 = vld [vmem:[#allocation2 + $0xa0] sm:$0xff] }
  0x74   :  { %606 = vmatpush1.bf16.msra.mxu0 %v4621_v32  ;;  %797 = vmatpush1.bf16.msra.mxu1 %v4666_v60  ;;  %v4681_v32 = vld [vmem:[#allocation5 + $0x1c8] ss:$16 sps:$4 sm:$0xff]  }
  0x75   :  { %607 = vmatprep.subr.bf16.mxu0 %v4622_v34  ;;  %798 = vmatprep.subr.bf16.mxu1 %v4667_v62  ;;  %v4682_v34 = vld [vmem:[#allocation5 + $0x1ec] ss:$16 sps:$4 sm:$0xff]   ;;  %v4700_v60 = vld [vmem:[#allocation7 + $0x48] ss:$16 sps:$4 sm:$0xff]  }
  0x76   :  { %v110_v62 = vld [vmem:[#allocation2 + $0xd8] sm:$0xff] }
  0x78   :  { %608 = vmatpush1.bf16.msra.mxu0 %v4624_v36  ;;  %799 = vmatpush1.bf16.msra.mxu1 %v4669_v3  ;;  %v4723_v36 = vld [vmem:[#allocation7 + $0xc4] ss:$16 sps:$4 sm:$0xff]  }
  0x79   :  { %609 = vmatprep.subr.bf16.mxu0 %v4625_v38  ;;  %800 = vmatprep.subr.bf16.mxu1 %v4670_v5  ;;  %v4684_v38 = vld [vmem:[#allocation5 + $0x1e8] ss:$16 sps:$4 sm:$0xff]   ;;  %v4745_v5 = vld [vmem:[#allocation7 + $0x140] ss:$16 sps:$4 sm:$0xff]  }
  0x7c   :  { %610 = vmatpush1.bf16.msra.mxu0 %v4627_v40  ;;  %801 = vmatpush1.bf16.msra.mxu1 %v4672_v10  ;;  %v4690_v40 = vld [vmem:[#allocation7 + $0xc] ss:$16 sps:$4 sm:$0xff]   ;;  %v109_v10 = vld [vmem:[#allocation2 + $0xd0] sm:$0xff] }
  0x7d   :  { %611 = vmatprep.subr.bf16.mxu0 %v4628_v42  ;;  %802 = vmatprep.subr.bf16.mxu1 %v4673_v12  ;;  %v99_v42 = vld [vmem:[#allocation2 + $0x80] sm:$0xff]  ;;  %v4720_v12 = vld [vmem:[#allocation7 + $0xac] ss:$16 sps:$4 sm:$0xff]  }
  0x80   :  { %612 = vmatpush1.bf16.msra.mxu0 %v4630_v44  ;;  %803 = vmatpush1.bf16.msra.mxu1 %v4675_v18  ;;  %v4729_v44 = vld [vmem:[#allocation7 + $0xe4] ss:$16 sps:$4 sm:$0xff]   ;;  %v4757_v18 = vld [vmem:[#allocation7 + $0x180] ss:$16 sps:$4 sm:$0xff]  }
  0x81   :  { %613 = vmatprep.subr.bf16.mxu0 %v4631_v46  ;;  %804 = vmatprep.subr.bf16.mxu1 %v4676_v20  ;;  %v4688_v46 = vld [vmem:[#allocation7 + $0x8] ss:$16 sps:$4 sm:$0xff]   ;;  %v4765_v20 = vld [vmem:[#allocation7 + $0x1a4] ss:$16 sps:$4 sm:$0xff]  }
  0x84   :  { %614 = vmatpush1.bf16.msra.mxu0 %v4633_v48  ;;  %805 = vmatpush1.bf16.msra.mxu1 %v4678_v24  ;;  %v4696_v48 = vld [vmem:[#allocation7 + $0x2c] ss:$16 sps:$4 sm:$0xff]   ;;  %v113_v24 = vld [vmem:[#allocation2 + $0xf0] sm:$0xff] }
  0x85   :  { %615 = vmatprep.subr.bf16.mxu0 %v4634_v50  ;;  %806 = vmatprep.subr.bf16.mxu1 %v4679_v26  ;;  %v4735_v50 = vld [vmem:[#allocation7 + $0x104] ss:$16 sps:$4 sm:$0xff]   ;;  %v4732_v26 = vld [vmem:[#allocation7 + $0xec] ss:$16 sps:$4 sm:$0xff]  }
  0x88   :  { %616 = vmatpush1.bf16.msra.mxu0 %v4636_v51  ;;  %807 = vmatpush1.bf16.msra.mxu1 %v4681_v32  ;;  %v5302_v51 = vpack.c.bf16 %v101_v43, %v99_v42  ;;  %v4769_v32 = vld [vmem:[#allocation7 + $0x1c0] ss:$16 sps:$4 sm:$0xff]  }
  0x89   :  { %1953 = vmatprep.subr.bf16.mxu0 %v4687_v58  ;;  %808 = vmatprep.subr.bf16.mxu1 %v4682_v34  ;;  %v4741_v58 = vld [vmem:[#allocation7 + $0x124] ss:$16 sps:$4 sm:$0xff]   ;;  %v4736_v34 = vld [vmem:[#allocation7 + $0x108] ss:$16 sps:$4 sm:$0xff]  }
  0x8b   :  { %618 = vmatmul.mubr.bf16.vlgmr.msra.gmra.mrb[0].mxu0 %v5277_v59 }
  0x8c   :  { %627 = vmatprep.mubr.bf16.mxu0 %v5279_v61  ;;  %1954 = vmatpush1.bf16.msra.mxu0 %v4685_v63  ;;  %v4739_v63 = vld [vmem:[#allocation7 + $0x120] ss:$16 sps:$4 sm:$0xff]  }
  0x8d   :  { %1955 = vmatprep.subr.bf16.mxu0 %v4693_v1  ;;  %809 = vmatpush1.bf16.msra.mxu1 %v4684_v38  ;;  %v5310_v1 = vpack.c.bf16 %v105_v57, %v103_v56  ;;  %v4744_v38 = vld [vmem:[#allocation7 + $0x12c] ss:$16 sps:$4 sm:$0xff]   ;;  %v125_v56 = vld [vmem:[#allocation2 + $0x150] sm:$0xff] }
  0x8e   :  { %2339 = vmatprep.subr.bf16.mxu1 %v4690_v40  ;;  %v122_v40 = vld [vmem:[#allocation2 + $0x138] sm:$0xff] }
  0x8f   :  { %v4768_v57 = vld [vmem:[#allocation7 + $0x1ac] ss:$16 sps:$4 sm:$0xff]  }
  0x90   :  { %1956 = vmatpush1.bf16.msra.mxu0 %v4691_v7  ;;  %811 = vmatmul.mubr.bf16.vlgmr.msra.gmra.mrb[0].mxu1 %v5277_v59  ;;  %v108_v59 = vld [vmem:[#allocation2 + $0xc8] sm:$0xff]  ;;  %v4753_v7 = vld [vmem:[#allocation7 + $0x164] ss:$16 sps:$4 sm:$0xff]  }
  0x91   :  { %1957 = vmatprep.subr.bf16.mxu0 %v4699_v8  ;;  %2340 = vmatpush1.bf16.msra.mxu1 %v4688_v46  ;;  %v5313_v3 = vpack.c.bf16 %v110_v62, %v108_v59  ;;  %v107_v8 = vld [vmem:[#allocation2 + $0xc0] sm:$0xff]  ;;  %v121_v46 = vld [vmem:[#allocation2 + $0x130] sm:$0xff]  ;;  %v130_v59 = vld [vmem:[#allocation2 + $0x178] sm:$0xff] }
  0x92   :  { %820 = vmatprep.mubr.bf16.mxu1 %v5279_v61  ;;  %2341 = vmatprep.subr.bf16.mxu1 %v4696_v48  ;;  %v4708_v61 = vld [vmem:[#allocation7 + $0x6c] ss:$16 sps:$4 sm:$0xff]   ;;  %v5318_v17 = vpack.c.bf16 %v109_v10, %v107_v8  ;;  %v4777_v8 = vld [vmem:[#allocation7 + $0x1e4] ss:$16 sps:$4 sm:$0xff]  }
  0x93   :  { %628 = vmatmul.mubr.bf16.gmra.mrb[4].mxu0 %v5283_v9  ;;  %v124_v48 = vld [vmem:[#allocation2 + $0x148] sm:$0xff] }
  0x94   :  { %637 = vmatprep.mubr.bf16.mxu0 %v5285_v11  ;;  %1958 = vmatpush1.bf16.msra.mxu0 %v4697_v13  ;;  %v114_v13 = vld [vmem:[#allocation2 + $0xf8] sm:$0xff] }
  0x95   :  { %1959 = vmatprep.subr.bf16.mxu0 %v4705_v16  ;;  %2342 = vmatpush1.bf16.msra.mxu1 %v4694_v52  ;;  %v4726_v16 = vld [vmem:[#allocation7 + $0xcc] ss:$16 sps:$4 sm:$0xff]   ;;  %v165_v52 = vpack.c.bf16 %v121_v46, %v119_v45 }
  0x96   :  { %2343 = vmatprep.subr.bf16.mxu1 %v4702_v54  ;;  %v4760_v54 = vld [vmem:[#allocation7 + $0x188] ss:$16 sps:$4 sm:$0xff]   ;;  %v4774_v62 = vld [vmem:[#allocation7 + $0x1cc] ss:$16 sps:$4 sm:$0xff]  }
  0x97   :  { %v4780_v10 = vld [vmem:[#allocation7 + $0x1ec] ss:$16 sps:$4 sm:$0xff]  }
  0x98   :  { %1960 = vmatpush1.bf16.msra.mxu0 %v4703_v21  ;;  %821 = vmatmul.mubr.bf16.gmra.mrb[4].mxu1 %v5283_v9  ;;  %v112_v9 = vld [vmem:[#allocation2 + $0xe8] sm:$0xff] }
  0x99   :  { %1961 = vmatprep.subr.bf16.mxu0 %v4711_v22  ;;  %830 = vmatprep.mubr.bf16.mxu1 %v5285_v11  ;;  %v4751_v11 = vld [vmem:[#allocation7 + $0x160] ss:$16 sps:$4 sm:$0xff]   ;;  %v5321_v19 = vpack.c.bf16 %v114_v13, %v112_v9  ;;  %v4724_v21 = vld [vmem:[#allocation7 + $0xc8] ss:$16 sps:$4 sm:$0xff]  }
  0x9a   :  { %2344 = vmatpush1.bf16.msra.mxu1 %v4700_v60  ;;  %v111_v22 = vld [vmem:[#allocation2 + $0xe0] sm:$0xff]  ;;  %v4766_v60 = vld [vmem:[#allocation7 + $0x1a8] ss:$16 sps:$4 sm:$0xff]  }
  0x9b   :  { %638 = vmatmul.mubr.bf16.gmra.mrb[8].mxu0 %v5289_v23  ;;  %2345 = vmatprep.subr.bf16.mxu1 %v4708_v61  ;;  %v5326_v31 = vpack.c.bf16 %v113_v24, %v111_v22  ;;  %v4775_v9 = vld [vmem:[#allocation7 + $0x1e0] ss:$16 sps:$4 sm:$0xff]   ;;  %v4778_v13 = vld [vmem:[#allocation7 + $0x1e8] ss:$16 sps:$4 sm:$0xff]   ;;  %v4786_v22 = vld [vmem:[#allocation7 + $0x20c] ss:$16 sps:$4 sm:$0xff]  }
  0x9c   :  { %647 = vmatprep.mubr.bf16.mxu0 %v5291_v25  ;;  %1962 = vmatpush1.bf16.msra.mxu0 %v4709_v27  ;;  %v118_v27 = vld [vmem:[#allocation2 + $0x118] sm:$0xff] }
  0x9d   :  { %1963 = vmatprep.subr.bf16.mxu0 %v4717_v30  ;;  %v4738_v30 = vld [vmem:[#allocation7 + $0x10c] ss:$16 sps:$4 sm:$0xff]  }
  0x9e   :  { %2346 = vmatpush1.bf16.msra.mxu1 %v4706_v2  ;;  %v129_v2 = vld [vmem:[#allocation2 + $0x170] sm:$0xff] }
  0x9f   :  { %2347 = vmatprep.subr.bf16.mxu1 %v4714_v4  ;;  %v134_v4 = vld [vmem:[#allocation2 + $0x198] sm:$0xff] }
  0xa0   :  { %1964 = vmatpush1.bf16.msra.mxu0 %v4715_v35  ;;  %831 = vmatmul.mubr.bf16.gmra.mrb[8].mxu1 %v5289_v23  ;;  %v116_v23 = vld [vmem:[#allocation2 + $0x108] sm:$0xff]  ;;  %v115_v35 = vld [vmem:[#allocation2 + $0x100] sm:$0xff] }
  0xa1   :  { %1965 = vmatprep.subr.bf16.mxu0 %v4723_v36  ;;  %840 = vmatprep.mubr.bf16.mxu1 %v5291_v25  ;;  %v4771_v25 = vld [vmem:[#allocation7 + $0x1c4] ss:$16 sps:$4 sm:$0xff]   ;;  %v5329_v33 = vpack.c.bf16 %v118_v27, %v116_v23 }
  0xa2   :  { %2348 = vmatpush1.bf16.msra.mxu1 %v4712_v6  ;;  %v117_v36 = vld [vmem:[#allocation2 + $0x110] sm:$0xff]  ;;  %v139_v23 = vld [vmem:[#allocation2 + $0x1c0] sm:$0xff] }
  0xa3   :  { %648 = vmatmul.mubr.bf16.gmra.mrb[12].mxu0 %v5295_v37  ;;  %2349 = vmatprep.subr.bf16.mxu1 %v4720_v12  ;;  %v5334_v42 = vpack.c.bf16 %v117_v36, %v115_v35  ;;  %v133_v12 = vld [vmem:[#allocation2 + $0x190] sm:$0xff] }
  0xa4   :  { %657 = vmatprep.mubr.bf16.mxu0 %v5297_v39  ;;  %1966 = vmatpush1.bf16.msra.mxu0 %v4721_v41  ;;  %v4750_v41 = vld [vmem:[#allocation7 + $0x14c] ss:$16 sps:$4 sm:$0xff]   ;;  %v141_v27 = vld [vmem:[#allocation2 + $0x1d0] sm:$0xff] }
  0xa5   :  { %1967 = vmatprep.subr.bf16.mxu0 %v4729_v44  ;;  %v4748_v44 = vld [vmem:[#allocation7 + $0x148] ss:$16 sps:$4 sm:$0xff]  }
  0xa6   :  { %2350 = vmatpush1.bf16.msra.mxu1 %v4718_v15 }
  0xa7   :  { %2351 = vmatprep.subr.bf16.mxu1 %v4726_v16 }
  0xa8   :  { %1968 = vmatpush1.bf16.msra.mxu0 %v4727_v49  ;;  %841 = vmatmul.mubr.bf16.gmra.mrb[12].mxu1 %v5295_v37  ;;  %v120_v37 = vld [vmem:[#allocation2 + $0x128] sm:$0xff]  ;;  %v126_v49 = vld [vmem:[#allocation2 + $0x158] sm:$0xff] }
  0xa9   :  { %1969 = vmatprep.subr.bf16.mxu0 %v4735_v50  ;;  %850 = vmatprep.mubr.bf16.mxu1 %v5297_v39  ;;  %v4742_v39 = vld [vmem:[#allocation7 + $0x128] ss:$16 sps:$4 sm:$0xff]   ;;  %v5337_v43 = vpack.c.bf16 %v122_v40, %v120_v37 }
  0xaa   :  { %2352 = vmatpush1.bf16.msra.mxu1 %v4724_v21  ;;  %v4754_v50 = vld [vmem:[#allocation7 + $0x168] ss:$16 sps:$4 sm:$0xff]   ;;  %v4783_v21 = vld [vmem:[#allocation7 + $0x204] ss:$16 sps:$4 sm:$0xff]  }
  0xab   :  { %658 = vmatmul.mubr.bf16.gmra.mrb[16].mxu0 %v5302_v51  ;;  %2353 = vmatprep.subr.bf16.mxu1 %v4732_v26 }
  0xac   :  { %667 = vmatprep.mubr.bf16.mxu0 %v5305_v53  ;;  %1970 = vmatpush1.bf16.msra.mxu0 %v4733_v55  ;;  %v123_v55 = vld [vmem:[#allocation2 + $0x140] sm:$0xff] }
  0xad   :  { %1971 = vmatprep.subr.bf16.mxu0 %v4741_v58  ;;  %v128_v58 = vld [vmem:[#allocation2 + $0x168] sm:$0xff]  ;;  %v167_v61 = vpack.c.bf16 %v125_v56, %v123_v55  ;;  %v4781_v56 = vld [vmem:[#allocation7 + $0x200] ss:$16 sps:$4 sm:$0xff]  }
  0xae   :  { %2354 = vmatpush1.bf16.msra.mxu1 %v4730_v29  ;;  %v175_v29 = vpack.c.bf16 %v141_v27, %v139_v23  ;;  %v4802_v27 = vld [vmem:[#allocation7 + $0x268] ss:$16 sps:$4 sm:$0xff]  }
  0xaf   :  { %2355 = vmatprep.subr.bf16.mxu1 %v4738_v30 }
  0xb0   :  { %1972 = vmatpush1.bf16.msra.mxu0 %v4739_v63  ;;  %851 = vmatmul.mubr.bf16.gmra.mrb[16].mxu1 %v5302_v51  ;;  %v4762_v51 = vld [vmem:[#allocation7 + $0x18c] ss:$16 sps:$4 sm:$0xff]   ;;  %v170_v63 = vpack.c.bf16 %v130_v59, %v128_v58 }
  0xb1   :  { %1973 = vmatprep.subr.bf16.mxu0 %v4747_v0  ;;  %860 = vmatprep.mubr.bf16.mxu1 %v5305_v53  ;;  %v168_v53 = vpack.c.bf16 %v126_v49, %v124_v48  ;;  %v4772_v0 = vld [vmem:[#allocation7 + $0x1c8] ss:$16 sps:$4 sm:$0xff]  }
  0xb2   :  { %2356 = vmatpush1.bf16.msra.mxu1 %v4736_v34  ;;  %v245_v34 = vlaneseq }
  0xb3   :  { %668 = vmatmul.mubr.bf16.gmra.mrb[20].mxu0 %v5310_v1  ;;  %2357 = vmatprep.subr.bf16.mxu1 %v4744_v38  ;;  %v5355_v38 = vld [vmem:[%s6090_s2] sm:$0xf] }
  0xb4   :  { %677 = vmatprep.mubr.bf16.mxu0 %v5313_v3  ;;  %1974 = vmatpush1.bf16.msra.mxu0 %v4745_v5  ;;  %v5349_v35 = vshrl.u32 %v245_v34, 7 }
  0xb5   :  { %1975 = vmatprep.subr.bf16.mxu0 %v4753_v7  ;;  %v131_v7 = vld [vmem:[#allocation2 + $0x180] sm:$0xff] }
  0xb6   :  { %2358 = vmatpush1.bf16.msra.mxu1 %v4742_v39  ;;  %v171_v15 = vpack.c.bf16 %v133_v12, %v131_v7  ;;  %v247_v36 = vsub.s32 0, %v5349_v35  ;;  %v251_v37 = vsub.s32 1, %v5349_v35  ;;  %v4795_v7 = vld [vmem:[#allocation7 + $0x244] ss:$16 sps:$4 sm:$0xff]  }
  0xb7   :  { %2359 = vmatprep.subr.bf16.mxu1 %v4750_v41 }
  0xb8   :  { %1976 = vmatpush1.bf16.msra.mxu0 %v4751_v11  ;;  %861 = vmatmul.mubr.bf16.gmra.mrb[20].mxu1 %v5310_v1  ;;  %v127_v1 = vld [vmem:[#allocation2 + $0x160] sm:$0xff]  ;;  %v136_v11 = vld [vmem:[#allocation2 + $0x1a8] sm:$0xff]  ;;  %v5361_v40 = vrot.slane %v5355_v38, %v247_v36  ;;  %v5366_v39 = vrot.slane %v5355_v38, %v251_v37 }
  0xb9   :  { %1977 = vmatprep.subr.bf16.mxu0 %v4759_v14  ;;  %870 = vmatprep.mubr.bf16.mxu1 %v5313_v3  ;;  %v132_v3 = vld [vmem:[#allocation2 + $0x188] sm:$0xff]  ;;  %v169_v5 = vpack.c.bf16 %v129_v2, %v127_v1  ;;  %v138_v14 = vld [vmem:[#allocation2 + $0x1b8] sm:$0xff] }
  0xba   :  { %2360 = vmatpush1.bf16.msra.mxu1 %v4748_v44  ;;  %v172_v6 = vpack.c.bf16 %v134_v4, %v132_v3  ;;  %v174_v16 = vpack.c.bf16 %v138_v14, %v136_v11  ;;  %v4787_v3 = vld [vmem:[#allocation7 + $0x220] ss:$16 sps:$4 sm:$0xff]   ;;  %v4790_v4 = vld [vmem:[#allocation7 + $0x228] ss:$16 sps:$4 sm:$0xff]  }
  0xbb   :  { %678 = vmatmul.mubr.bf16.gmra.mrb[24].mxu0 %v5318_v17  ;;  %2361 = vmatprep.subr.bf16.mxu1 %v4756_v47  ;;  %v4793_v14 = vld [vmem:[#allocation7 + $0x240] ss:$16 sps:$4 sm:$0xff]  }
  0xbc   :  { %687 = vmatprep.mubr.bf16.mxu0 %v5321_v19  ;;  %1978 = vmatpush1.bf16.msra.mxu0 %v4757_v18  ;;  %v137_v18 = vld [vmem:[#allocation2 + $0x1b0] sm:$0xff] }
  0xbd   :  { %1979 = vmatprep.subr.bf16.mxu0 %v4765_v20  ;;  %v142_v20 = vld [vmem:[#allocation2 + $0x1d8] sm:$0xff] }
  0xbe   :  { %2362 = vmatpush1.bf16.msra.mxu1 %v4754_v50 }
  0xbf   :  { %2363 = vmatprep.subr.bf16.mxu1 %v4762_v51 }
  0xc0   :  { %1980 = vmatpush1.bf16.msra.mxu0 %v4763_v28  ;;  %871 = vmatmul.mubr.bf16.gmra.mrb[24].mxu1 %v5318_v17  ;;  %v135_v17 = vld [vmem:[#allocation2 + $0x1a0] sm:$0xff]  ;;  %v144_v28 = vld [vmem:[#allocation2 + $0x1e8] sm:$0xff] }
  0xc1   :  { %1981 = vmatprep.subr.bf16.mxu0 %v4771_v25  ;;  %880 = vmatprep.mubr.bf16.mxu1 %v5321_v19  ;;  %v140_v19 = vld [vmem:[#allocation2 + $0x1c8] sm:$0xff]  ;;  %v173_v24 = vpack.c.bf16 %v137_v18, %v135_v17  ;;  %v146_v25 = vld [vmem:[#allocation2 + $0x1f8] sm:$0xff]  ;;  %v4801_v18 = vld [vmem:[#allocation7 + $0x264] ss:$16 sps:$4 sm:$0xff]  }
  0xc2   :  { %2364 = vmatpush1.bf16.msra.mxu1 %v4760_v54  ;;  %v176_v26 = vpack.c.bf16 %v142_v20, %v140_v19  ;;  %v178_v30 = vpack.c.bf16 %v146_v25, %v144_v28  ;;  %v4804_v19 = vld [vmem:[#allocation7 + $0x26c] ss:$16 sps:$4 sm:$0xff]   ;;  %v4807_v28 = vld [vmem:[#allocation7 + $0x284] ss:$16 sps:$4 sm:$0xff]   ;;  %v255_v25 = vsub.s32 2, %v5349_v35 }
  0xc3   :  { %688 = vmatmul.mubr.bf16.gmra.mrb[28].mxu0 %v5326_v31  ;;  %2365 = vmatprep.subr.bf16.mxu1 %v4768_v57  ;;  %v4784_v57 = vld [vmem:[#allocation7 + $0x208] ss:$16 sps:$4 sm:$0xff]  }
  0xc4   :  { %697 = vmatprep.mubr.bf16.mxu0 %v5329_v33  ;;  %1982 = vmatpush1.bf16.msra.mxu0 %v4769_v32  ;;  %v145_v32 = vld [vmem:[#allocation2 + $0x1f0] sm:$0xff] }
  0xc5   :  { %1983 = vmatprep.subr.bf16.mxu0 %v4777_v8  ;;  %v4798_v8 = vld [vmem:[#allocation7 + $0x24c] ss:$16 sps:$4 sm:$0xff]  }
  0xc6   :  { %2366 = vmatpush1.bf16.msra.mxu1 %v4766_v60  ;;  %v4789_v60 = vld [vmem:[#allocation7 + $0x224] ss:$16 sps:$4 sm:$0xff]  }
  0xc7   :  { %2367 = vmatprep.subr.bf16.mxu1 %v4774_v62  ;;  %v4792_v62 = vld [vmem:[#allocation7 + $0x22c] ss:$16 sps:$4 sm:$0xff]  }
  0xc8   :  { %881 = vmatmul.mubr.bf16.gmra.mrb[28].mxu1 %v5326_v31  ;;  %1984 = vmatpush1.bf16.msra.mxu0 %v4775_v9  ;;  %v143_v31 = vld [vmem:[#allocation2 + $0x1e0] sm:$0xff] }
  0xc9   :  { %890 = vmatprep.mubr.bf16.mxu1 %v5329_v33  ;;  %2146 = vmatprep.subr.bf16.mxu0 %v4783_v21  ;;  %v177_v33 = vpack.c.bf16 %v145_v32, %v143_v31  ;;  %v4810_v31 = vld [vmem:[#allocation7 + $0x28c] ss:$16 sps:$4 sm:$0xff]   ;;  %v259_v32 = vsub.s32 3, %v5349_v35 }
  0xca   :  { %2368 = vmatpush1.bf16.msra.mxu1 %v4772_v0 }
  0xcb   :  { %698 = vmatmul.mubr.bf16.gmra.mrb[32].mxu0 %v5334_v42  ;;  %2369 = vmatprep.subr.bf16.mxu1 %v4780_v10 }
  0xcc   :  { %707 = vmatprep.mubr.bf16.mxu0 %v5337_v43 }
  0xce   :  { %2370 = vmatpush1.bf16.msra.mxu1 %v4778_v13 }
  0xcf   :  { %2532 = vmatprep.subr.bf16.mxu1 %v4786_v22 }
  0xd0   :  { %891 = vmatmul.mubr.bf16.gmra.mrb[32].mxu1 %v5334_v42 }
  0xd1   :  { %900 = vmatprep.mubr.bf16.mxu1 %v5337_v43 }
  0xd3   :  { %708 = vmatmul.mubr.bf16.gmra.mrb[36].mxu0 %v165_v52 }
  0xd4   :  { %717 = vmatprep.mubr.bf16.mxu0 %v168_v53 }
  0xd8   :  { %901 = vmatmul.mubr.bf16.gmra.mrb[36].mxu1 %v165_v52 }
  0xd9   :  { %910 = vmatprep.mubr.bf16.mxu1 %v168_v53 }
  0xdb   :  { %718 = vmatmul.mubr.bf16.gmra.mrb[40].mxu0 %v167_v61 }
  0xdc   :  { %727 = vmatprep.mubr.bf16.mxu0 %v170_v63 }
  0xe0   :  { %911 = vmatmul.mubr.bf16.gmra.mrb[40].mxu1 %v167_v61 }
  0xe1   :  { %920 = vmatprep.mubr.bf16.mxu1 %v170_v63 }
  0xe3   :  { %728 = vmatmul.mubr.bf16.gmra.mrb[44].mxu0 %v169_v5 }
  0xe4   :  { %737 = vmatprep.mubr.bf16.mxu0 %v172_v6 }
  0xe8   :  { %921 = vmatmul.mubr.bf16.gmra.mrb[44].mxu1 %v169_v5 }
  0xe9   :  { %930 = vmatprep.mubr.bf16.mxu1 %v172_v6 }
  0xeb   :  { %738 = vmatmul.mubr.bf16.gmra.mrb[48].mxu0 %v171_v15 }
  0xec   :  { %747 = vmatprep.mubr.bf16.mxu0 %v174_v16 }
  0xf0   :  { %931 = vmatmul.mubr.bf16.gmra.mrb[48].mxu1 %v171_v15  ;;  %v4796_v15 = vld [vmem:[#allocation7 + $0x248] ss:$16 sps:$4 sm:$0xff]  }
  0xf1   :  { %940 = vmatprep.mubr.bf16.mxu1 %v174_v16 }
  0xf3   :  { %748 = vmatmul.mubr.bf16.gmra.mrb[52].mxu0 %v173_v24 }
  0xf4   :  { %757 = vmatprep.mubr.bf16.mxu0 %v176_v26 }
  0xf8   :  { %941 = vmatmul.mubr.bf16.gmra.mrb[52].mxu1 %v173_v24 }
  0xf9   :  { %950 = vmatprep.mubr.bf16.mxu1 %v176_v26  ;;  %v4799_v26 = vld [vmem:[#allocation7 + $0x260] ss:$16 sps:$4 sm:$0xff]  }
  0xfb   :  { %758 = vmatmul.mubr.bf16.gmra.mrb[56].mxu0 %v175_v29 }
  0xfc   :  { %767 = vmatprep.mubr.bf16.mxu0 %v178_v30 }
 0x100   :  { %951 = vmatmul.mubr.bf16.gmra.mrb[56].mxu1 %v175_v29 }
 0x101   :  { %960 = vmatprep.mubr.bf16.mxu1 %v178_v30 }
 0x103   :  { %768 = vmatmul.mubr.bf16.gmra.mrb[60].mxu0 %v177_v33 }
 0x108   :  { %961 = vmatmul.mubr.bf16.gmra.mrb[60].mxu1 %v177_v33 }
 0x15e   :  { %v619_v41 = vpop.f32.mrb[0].mxu0 }
 0x15f   :  { %v620_v42 = vadd.f32 %v619_v41, %v5361_v40  ;;  %v621_v43 = vpop.f32.mrb[1].mxu0 }
 0x160   :  { %v622_v44 = vadd.f32 %v621_v43, %v5366_v39  ;;  %v623_v45 = vpop.f32.mrb[2].mxu0 }
 0x161   :  { %v624_v46 = vadd.f32 %v623_v45, %v5361_v40  ;;  %v625_v47 = vpop.f32.mrb[3].mxu0  ;;  %v971_v49 = vmax.f32 %v620_v42, 0.0  ;;  %v4808_v45 = vld [vmem:[#allocation7 + $0x288] ss:$16 sps:$4 sm:$0xff]  }
 0x162   :  { %v626_v48 = vadd.f32 %v625_v47, %v5366_v39  ;;  %v972_v51 = vmax.f32 %v622_v44, 0.0  ;;  %v4805_v44 = vld [vmem:[#allocation7 + $0x280] ss:$16 sps:$4 sm:$0xff]  }
 0x163   :  { %v975_v50 = vmax.f32 %v624_v46, 0.0  ;;  %v5385_v46 = vrot.slane %v5355_v38, %v255_v25 }
 0x164   :  { %v976_v52 = vmax.f32 %v626_v48, 0.0 }
 0x165   :  { %v1099_v53 = vpack.c.bf16 %v975_v50, %v971_v49  ;;  %v4813_v49 = vld [vmem:[#allocation7 + $0x2a4] ss:$16 sps:$4 sm:$0xff]   ;;  %v4816_v50 = vld [vmem:[#allocation7 + $0x2ac] ss:$16 sps:$4 sm:$0xff]  }
 0x166   :  { %v1100_v54 = vpack.c.bf16 %v976_v52, %v972_v51  ;;  %v629_v55 = vpop.f32.mrb[4].mxu0  ;;  %v5391_v51 = vrot.slane %v5355_v38, %v259_v32 }
 0x167   :  { %v630_v58 = vadd.f32 %v629_v55, %v5361_v40  ;;  %v631_v59 = vpop.f32.mrb[5].mxu0 }
 0x168   :  { %v632_v61 = vadd.f32 %v631_v59, %v5366_v39  ;;  %v633_v63 = vpop.f32.mrb[6].mxu0  ;;  %1985 = vmatprep.mubr.bf16.mxu0 %v1100_v54  ;;  %2371 = vmatprep.mubr.bf16.mxu1 %v1100_v54  ;;  %v4814_v59 = vld [vmem:[#allocation7 + $0x2a8] ss:$16 sps:$4 sm:$0xff]  }
 0x169   :  { %v634_v0 = vadd.f32 %v633_v63, %v5361_v40  ;;  %v635_v1 = vpop.f32.mrb[7].mxu0  ;;  %1986 = vmatmul.mubr.bf16.vlgmr.msra.gmra.mrb[64].mxu0 %v1099_v53  ;;  %2372 = vmatmul.mubr.bf16.vlgmr.msra.gmra.mrb[64].mxu1 %v1099_v53  ;;  %v979_v5 = vmax.f32 %v630_v58, 0.0 }
 0x16a   :  { %v636_v2 = vadd.f32 %v635_v1, %v5366_v39  ;;  %2147 = vmatpush1.bf16.msra.mxu0 %v4781_v56  ;;  %2533 = vmatpush1.bf16.msra.mxu1 %v4784_v57  ;;  %v980_v10 = vmax.f32 %v632_v61, 0.0  ;;  %v4811_v56 = vld [vmem:[#allocation7 + $0x2a0] ss:$16 sps:$4 sm:$0xff]   ;;  %v812_v57 = vpop.f32.mrb[0].mxu1 }
 0x16b   :  { %v983_v6 = vmax.f32 %v634_v0, 0.0  ;;  %2148 = vmatprep.subr.bf16.mxu0 %v4789_v60  ;;  %2534 = vmatprep.subr.bf16.mxu1 %v4792_v62  ;;  %v4819_v60 = vld [vmem:[#allocation7 + $0x2c4] ss:$16 sps:$4 sm:$0xff]   ;;  %v813_v38 = vadd.f32 %v812_v57, %v5385_v46  ;;  %v814_v62 = vpop.f32.mrb[1].mxu1  ;;  %v4822_v0 = vld [vmem:[#allocation7 + $0x2cc] ss:$16 sps:$4 sm:$0xff]  }
 0x16c   :  { %v984_v12 = vmax.f32 %v636_v2, 0.0  ;;  %v815_v1 = vadd.f32 %v814_v62, %v5391_v51  ;;  %v816_v2 = vpop.f32.mrb[2].mxu1 }
 0x16d   :  { %v1103_v9 = vpack.c.bf16 %v983_v6, %v979_v5  ;;  %v973_v5 = vmax.f32 %v813_v38, 0.0  ;;  %v817_v6 = vadd.f32 %v816_v2, %v5385_v46 }
 0x16e   :  { %v1104_v13 = vpack.c.bf16 %v984_v12, %v980_v10  ;;  %v639_v11 = vpop.f32.mrb[8].mxu0  ;;  %2149 = vmatpush1.bf16.msra.mxu0 %v4787_v3  ;;  %2535 = vmatpush1.bf16.msra.mxu1 %v4790_v4  ;;  %v974_v10 = vmax.f32 %v815_v1, 0.0 }
 0x16f   :  { %v640_v16 = vadd.f32 %v639_v11, %v5361_v40  ;;  %v641_v17 = vpop.f32.mrb[9].mxu0  ;;  %2150 = vmatprep.subr.bf16.mxu0 %v4795_v7  ;;  %2536 = vmatprep.subr.bf16.mxu1 %v4798_v8  ;;  %v818_v7 = vpop.f32.mrb[3].mxu1  ;;  %v4817_v11 = vld [vmem:[#allocation7 + $0x2c0] ss:$16 sps:$4 sm:$0xff]  }
 0x170   :  { %v642_v20 = vadd.f32 %v641_v17, %v5366_v39  ;;  %v643_v21 = vpop.f32.mrb[10].mxu0  ;;  %1995 = vmatprep.mubr.bf16.mxu0 %v1104_v13  ;;  %2381 = vmatprep.mubr.bf16.mxu1 %v1104_v13  ;;  %v819_v12 = vadd.f32 %v818_v7, %v5391_v51  ;;  %v4835_v7 = vld [vmem:[#allocation7 + $0x320] ss:$16 sps:$4 sm:$0xff]  }
 0x171   :  { %v644_v22 = vadd.f32 %v643_v21, %v5361_v40  ;;  %v645_v24 = vpop.f32.mrb[11].mxu0  ;;  %1996 = vmatmul.mubr.bf16.gmra.mrb[68].mxu0 %v1103_v9  ;;  %2382 = vmatmul.mubr.bf16.gmra.mrb[68].mxu1 %v1103_v9  ;;  %v987_v29 = vmax.f32 %v640_v16, 0.0 }
 0x172   :  { %v646_v23 = vadd.f32 %v645_v24, %v5366_v39  ;;  %2151 = vmatpush1.bf16.msra.mxu0 %v4793_v14  ;;  %2537 = vmatpush1.bf16.msra.mxu1 %v4796_v15  ;;  %v988_v33 = vmax.f32 %v642_v20, 0.0  ;;  %v4820_v14 = vld [vmem:[#allocation7 + $0x2c8] ss:$16 sps:$4 sm:$0xff]   ;;  %v977_v15 = vmax.f32 %v817_v6, 0.0  ;;  %v978_v20 = vmax.f32 %v819_v12, 0.0 }
 0x173   :  { %v991_v30 = vmax.f32 %v644_v22, 0.0  ;;  %2152 = vmatprep.subr.bf16.mxu0 %v4801_v18  ;;  %2538 = vmatprep.subr.bf16.mxu1 %v4804_v19  ;;  %v4825_v18 = vld [vmem:[#allocation7 + $0x2e4] ss:$16 sps:$4 sm:$0xff]   ;;  %v4828_v19 = vld [vmem:[#allocation7 + $0x2ec] ss:$16 sps:$4 sm:$0xff]  }
 0x174   :  { %v992_v34 = vmax.f32 %v646_v23, 0.0  ;;  %v5402_v24 = vpack.c.bf16 %v977_v15, %v973_v5 }
 0x175   :  { %v1107_v41 = vpack.c.bf16 %v991_v30, %v987_v29  ;;  %v822_v29 = vpop.f32.mrb[4].mxu1 }
 0x176   :  { %v1108_v42 = vpack.c.bf16 %v992_v34, %v988_v33  ;;  %v649_v43 = vpop.f32.mrb[12].mxu0  ;;  %2153 = vmatpush1.bf16.msra.mxu0 %v4799_v26  ;;  %2539 = vmatpush1.bf16.msra.mxu1 %v4802_v27  ;;  %v4823_v27 = vld [vmem:[#allocation7 + $0x2e0] ss:$16 sps:$4 sm:$0xff]   ;;  %v4831_v33 = vld [vmem:[#allocation7 + $0x304] ss:$16 sps:$4 sm:$0xff]   ;;  %v823_v34 = vadd.f32 %v822_v29, %v5385_v46 }
 0x177   :  { %v650_v47 = vadd.f32 %v649_v43, %v5361_v40  ;;  %v651_v48 = vpop.f32.mrb[13].mxu0  ;;  %2154 = vmatprep.subr.bf16.mxu0 %v4807_v28  ;;  %2540 = vmatprep.subr.bf16.mxu1 %v4810_v31  ;;  %v5405_v28 = vpack.c.bf16 %v978_v20, %v974_v10  ;;  %v4826_v31 = vld [vmem:[#allocation7 + $0x2e8] ss:$16 sps:$4 sm:$0xff]  }
 0x178   :  { %v652_v52 = vadd.f32 %v651_v48, %v5366_v39  ;;  %v653_v53 = vpop.f32.mrb[14].mxu0  ;;  %2005 = vmatprep.mubr.bf16.mxu0 %v1108_v42  ;;  %2391 = vmatprep.mubr.bf16.mxu1 %v1108_v42 }
 0x179   :  { %v654_v54 = vadd.f32 %v653_v53, %v5361_v40  ;;  %v655_v55 = vpop.f32.mrb[15].mxu0  ;;  %2006 = vmatmul.mubr.bf16.gmra.mrb[72].mxu0 %v1107_v41  ;;  %2392 = vmatmul.mubr.bf16.gmra.mrb[72].mxu1 %v1107_v41  ;;  %v995_v61 = vmax.f32 %v650_v47, 0.0  ;;  %v824_v41 = vpop.f32.mrb[5].mxu1 }
 0x17a   :  { %v656_v58 = vadd.f32 %v655_v55, %v5366_v39  ;;  %2155 = vmatpush1.bf16.msra.mxu0 %v4805_v44  ;;  %2541 = vmatpush1.bf16.msra.mxu1 %v4808_v45  ;;  %v996_v3 = vmax.f32 %v652_v52, 0.0  ;;  %v4834_v44 = vld [vmem:[#allocation7 + $0x30c] ss:$16 sps:$4 sm:$0xff]   ;;  %v825_v45 = vadd.f32 %v824_v41, %v5391_v51  ;;  %v826_v47 = vpop.f32.mrb[6].mxu1  ;;  %v4844_v41 = vld [vmem:[#allocation7 + $0x348] ss:$16 sps:$4 sm:$0xff]  }
 0x17b   :  { %v999_v63 = vmax.f32 %v654_v54, 0.0  ;;  %2156 = vmatprep.subr.bf16.mxu0 %v4813_v49  ;;  %2542 = vmatprep.subr.bf16.mxu1 %v4816_v50  ;;  %v981_v50 = vmax.f32 %v823_v34, 0.0  ;;  %v827_v52 = vadd.f32 %v826_v47, %v5385_v46  ;;  %v828_v53 = vpop.f32.mrb[7].mxu1  ;;  %v4841_v34 = vld [vmem:[#allocation7 + $0x340] ss:$16 sps:$4 sm:$0xff]  }
 0x17c   :  { %v1000_v4 = vmax.f32 %v656_v58, 0.0  ;;  %v982_v55 = vmax.f32 %v825_v45, 0.0  ;;  %v832_v10 = vpop.f32.mrb[8].mxu1  ;;  %v4849_v45 = vld [vmem:[#allocation7 + $0x364] ss:$16 sps:$4 sm:$0xff]  }
 0x17d   :  { %v1111_v8 = vpack.c.bf16 %v999_v63, %v995_v61  ;;  %v985_v38 = vmax.f32 %v827_v52, 0.0  ;;  %v4837_v63 = vld [vmem:[#allocation7 + $0x324] ss:$16 sps:$4 sm:$0xff]   ;;  %v4852_v47 = vld [vmem:[#allocation7 + $0x36c] ss:$16 sps:$4 sm:$0xff]  }
 0x17e   :  { %v1112_v9 = vpack.c.bf16 %v1000_v4, %v996_v3  ;;  %v659_v13 = vpop.f32.mrb[16].mxu0  ;;  %2157 = vmatpush1.bf16.msra.mxu0 %v4811_v56  ;;  %2543 = vmatpush1.bf16.msra.mxu1 %v4814_v59  ;;  %v829_v56 = vadd.f32 %v828_v53, %v5391_v51  ;;  %v4829_v59 = vld [vmem:[#allocation7 + $0x300] ss:$16 sps:$4 sm:$0xff]  }
 0x17f   :  { %v660_v16 = vadd.f32 %v659_v13, %v5361_v40  ;;  %v661_v17 = vpop.f32.mrb[17].mxu0  ;;  %2158 = vmatprep.subr.bf16.mxu0 %v4819_v60  ;;  %2544 = vmatprep.subr.bf16.mxu1 %v4822_v0  ;;  %v4832_v60 = vld [vmem:[#allocation7 + $0x308] ss:$16 sps:$4 sm:$0xff]   ;;  %v4840_v0 = vld [vmem:[#allocation7 + $0x32c] ss:$16 sps:$4 sm:$0xff]   ;;  %v5414_v4 = vpack.c.bf16 %v985_v38, %v981_v50 }
 0x180   :  { %v662_v21 = vadd.f32 %v661_v17, %v5366_v39  ;;  %v663_v22 = vpop.f32.mrb[18].mxu0  ;;  %2015 = vmatprep.mubr.bf16.mxu0 %v1112_v9  ;;  %2401 = vmatprep.mubr.bf16.mxu1 %v1112_v9  ;;  %v986_v1 = vmax.f32 %v829_v56, 0.0  ;;  %v4838_v9 = vld [vmem:[#allocation7 + $0x328] ss:$16 sps:$4 sm:$0xff]   ;;  %v4843_v13 = vld [vmem:[#allocation7 + $0x344] ss:$16 sps:$4 sm:$0xff]  }
 0x181   :  { %v664_v26 = vadd.f32 %v663_v22, %v5361_v40  ;;  %v665_v23 = vpop.f32.mrb[19].mxu0  ;;  %2016 = vmatmul.mubr.bf16.gmra.mrb[76].mxu0 %v1111_v8  ;;  %2402 = vmatmul.mubr.bf16.gmra.mrb[76].mxu1 %v1111_v8  ;;  %v1003_v42 = vmax.f32 %v660_v16, 0.0  ;;  %v4846_v17 = vld [vmem:[#allocation7 + $0x34c] ss:$16 sps:$4 sm:$0xff]  }
 0x182   :  { %v666_v30 = vadd.f32 %v665_v23, %v5366_v39  ;;  %2159 = vmatpush1.bf16.msra.mxu0 %v4817_v11  ;;  %2545 = vmatpush1.bf16.msra.mxu1 %v4820_v14  ;;  %v1004_v48 = vmax.f32 %v662_v21, 0.0  ;;  %v5417_v8 = vpack.c.bf16 %v986_v1, %v982_v55  ;;  %v833_v11 = vadd.f32 %v832_v10, %v5385_v46  ;;  %v834_v14 = vpop.f32.mrb[9].mxu1  ;;  %v4847_v55 = vld [vmem:[#allocation7 + $0x360] ss:$16 sps:$4 sm:$0xff]  }
 0x183   :  { %v1007_v43 = vmax.f32 %v664_v26, 0.0  ;;  %2160 = vmatprep.subr.bf16.mxu0 %v4825_v18  ;;  %2546 = vmatprep.subr.bf16.mxu1 %v4828_v19  ;;  %v835_v18 = vadd.f32 %v834_v14, %v5391_v51  ;;  %v836_v19 = vpop.f32.mrb[10].mxu1 }
 0x184   :  { %v1008_v49 = vmax.f32 %v666_v30, 0.0  ;;  %v989_v22 = vmax.f32 %v833_v11, 0.0  ;;  %v837_v26 = vadd.f32 %v836_v19, %v5385_v46  ;;  %v838_v23 = vpop.f32.mrb[11].mxu1 }
 0x185   :  { %v1115_v54 = vpack.c.bf16 %v1007_v43, %v1003_v42  ;;  %v990_v29 = vmax.f32 %v835_v18, 0.0  ;;  %v839_v30 = vadd.f32 %v838_v23, %v5391_v51 }
 0x186   :  { %v1116_v57 = vpack.c.bf16 %v1008_v49, %v1004_v48  ;;  %v669_v58 = vpop.f32.mrb[20].mxu0  ;;  %2161 = vmatpush1.bf16.msra.mxu0 %v4823_v27  ;;  %2547 = vmatpush1.bf16.msra.mxu1 %v4826_v31  ;;  %v993_v42 = vmax.f32 %v837_v26, 0.0 }
 0x187   :  { %v670_v62 = vadd.f32 %v669_v58, %v5361_v40  ;;  %v671_v61 = vpop.f32.mrb[21].mxu0  ;;  %2162 = vmatprep.subr.bf16.mxu0 %v4831_v33  ;;  %2548 = vmatprep.subr.bf16.mxu1 %v4834_v44  ;;  %v994_v48 = vmax.f32 %v839_v30, 0.0 }
 0x188   :  { %v672_v2 = vadd.f32 %v671_v61, %v5366_v39  ;;  %v673_v3 = vpop.f32.mrb[22].mxu0  ;;  %2025 = vmatprep.mubr.bf16.mxu0 %v1116_v57  ;;  %2411 = vmatprep.mubr.bf16.mxu1 %v1116_v57  ;;  %v5426_v52 = vpack.c.bf16 %v993_v42, %v989_v22  ;;  %v842_v57 = vpop.f32.mrb[12].mxu1  ;;  %v4862_v42 = vld [vmem:[#allocation7 + $0x3a8] ss:$16 sps:$4 sm:$0xff]  }
 0x189   :  { %v674_v5 = vadd.f32 %v673_v3, %v5361_v40  ;;  %v675_v6 = vpop.f32.mrb[23].mxu0  ;;  %2026 = vmatmul.mubr.bf16.gmra.mrb[80].mxu0 %v1115_v54  ;;  %2412 = vmatmul.mubr.bf16.gmra.mrb[80].mxu1 %v1115_v54  ;;  %v1011_v15 = vmax.f32 %v670_v62, 0.0  ;;  %v5429_v56 = vpack.c.bf16 %v994_v48, %v990_v29  ;;  %v843_v38 = vadd.f32 %v842_v57, %v5385_v46  ;;  %v844_v62 = vpop.f32.mrb[13].mxu1 }
 0x18a   :  { %v676_v12 = vadd.f32 %v675_v6, %v5366_v39  ;;  %2163 = vmatpush1.bf16.msra.mxu0 %v4829_v59  ;;  %2549 = vmatpush1.bf16.msra.mxu1 %v4832_v60  ;;  %v1012_v20 = vmax.f32 %v672_v2, 0.0  ;;  %v4850_v59 = vld [vmem:[#allocation7 + $0x368] ss:$16 sps:$4 sm:$0xff]   ;;  %v4855_v60 = vld [vmem:[#allocation7 + $0x384] ss:$16 sps:$4 sm:$0xff]   ;;  %v845_v1 = vadd.f32 %v844_v62, %v5391_v51  ;;  %v846_v2 = vpop.f32.mrb[14].mxu1 }
 0x18b   :  { %v1015_v16 = vmax.f32 %v674_v5, 0.0  ;;  %2164 = vmatprep.subr.bf16.mxu0 %v4837_v63  ;;  %2550 = vmatprep.subr.bf16.mxu1 %v4840_v0  ;;  %v4858_v0 = vld [vmem:[#allocation7 + $0x38c] ss:$16 sps:$4 sm:$0xff]   ;;  %v997_v6 = vmax.f32 %v843_v38, 0.0  ;;  %v848_v10 = vpop.f32.mrb[15].mxu1 }
 0x18c   :  { %v1016_v21 = vmax.f32 %v676_v12, 0.0 }
 0x18d   :  { %v1119_v27 = vpack.c.bf16 %v1015_v16, %v1011_v15  ;;  %v4853_v15 = vld [vmem:[#allocation7 + $0x380] ss:$16 sps:$4 sm:$0xff]   ;;  %v4856_v16 = vld [vmem:[#allocation7 + $0x388] ss:$16 sps:$4 sm:$0xff]  }
 0x18e   :  { %v1120_v31 = vpack.c.bf16 %v1016_v21, %v1012_v20  ;;  %v679_v33 = vpop.f32.mrb[24].mxu0  ;;  %2165 = vmatpush1.bf16.msra.mxu0 %v4835_v7  ;;  %2551 = vmatpush1.bf16.msra.mxu1 %v4838_v9  ;;  %v847_v7 = vadd.f32 %v846_v2, %v5385_v46  ;;  %v998_v9 = vmax.f32 %v845_v1, 0.0  ;;  %v4861_v20 = vld [vmem:[#allocation7 + $0x3a4] ss:$16 sps:$4 sm:$0xff]   ;;  %v4864_v21 = vld [vmem:[#allocation7 + $0x3ac] ss:$16 sps:$4 sm:$0xff]  }
 0x18f   :  { %v680_v43 = vadd.f32 %v679_v33, %v5361_v40  ;;  %v681_v44 = vpop.f32.mrb[25].mxu0  ;;  %2166 = vmatprep.subr.bf16.mxu0 %v4843_v13  ;;  %2552 = vmatprep.subr.bf16.mxu1 %v4846_v17  ;;  %v849_v13 = vadd.f32 %v848_v10, %v5391_v51  ;;  %v4868_v1 = vld [vmem:[#allocation7 + $0x3c8] ss:$16 sps:$4 sm:$0xff]   ;;  %v4876_v10 = vld [vmem:[#allocation7 + $0x3ec] ss:$16 sps:$4 sm:$0xff]  }
 0x190   :  { %v682_v49 = vadd.f32 %v681_v44, %v5366_v39  ;;  %v683_v50 = vpop.f32.mrb[26].mxu0  ;;  %2035 = vmatprep.mubr.bf16.mxu0 %v1120_v31  ;;  %2421 = vmatprep.mubr.bf16.mxu1 %v1120_v31  ;;  %v1001_v17 = vmax.f32 %v847_v7, 0.0  ;;  %v4859_v31 = vld [vmem:[#allocation7 + $0x3a0] ss:$16 sps:$4 sm:$0xff]   ;;  %v4873_v7 = vld [vmem:[#allocation7 + $0x3e4] ss:$16 sps:$4 sm:$0xff]  }
 0x191   :  { %v684_v53 = vadd.f32 %v683_v50, %v5361_v40  ;;  %v685_v54 = vpop.f32.mrb[27].mxu0  ;;  %2036 = vmatmul.mubr.bf16.gmra.mrb[84].mxu0 %v1119_v27  ;;  %2422 = vmatmul.mubr.bf16.gmra.mrb[84].mxu1 %v1119_v27  ;;  %v1019_v61 = vmax.f32 %v680_v43, 0.0  ;;  %v1002_v22 = vmax.f32 %v849_v13, 0.0  ;;  %v4867_v43 = vld [vmem:[#allocation7 + $0x3c4] ss:$16 sps:$4 sm:$0xff]  }
 0x192   :  { %v686_v58 = vadd.f32 %v685_v54, %v5366_v39  ;;  %2167 = vmatpush1.bf16.msra.mxu0 %v4841_v34  ;;  %2553 = vmatpush1.bf16.msra.mxu1 %v4844_v41  ;;  %v1020_v3 = vmax.f32 %v682_v49, 0.0  ;;  %v5438_v27 = vpack.c.bf16 %v1001_v17, %v997_v6  ;;  %v852_v34 = vpop.f32.mrb[16].mxu1  ;;  %v4870_v49 = vld [vmem:[#allocation7 + $0x3cc] ss:$16 sps:$4 sm:$0xff]  }
 0x193   :  { %v1023_v63 = vmax.f32 %v684_v53, 0.0  ;;  %2168 = vmatprep.subr.bf16.mxu0 %v4849_v45  ;;  %2554 = vmatprep.subr.bf16.mxu1 %v4852_v47  ;;  %v5441_v33 = vpack.c.bf16 %v1002_v22, %v998_v9  ;;  %v853_v44 = vadd.f32 %v852_v34, %v5385_v46  ;;  %v854_v45 = vpop.f32.mrb[17].mxu1 }
 0x194   :  { %v1024_v5 = vmax.f32 %v686_v58, 0.0  ;;  %v855_v50 = vadd.f32 %v854_v45, %v5391_v51  ;;  %v856_v53 = vpop.f32.mrb[18].mxu1 }
 0x195   :  { %v1123_v12 = vpack.c.bf16 %v1023_v63, %v1019_v61  ;;  %v1005_v57 = vmax.f32 %v853_v44, 0.0  ;;  %v857_v58 = vadd.f32 %v856_v53, %v5385_v46 }
 0x196   :  { %v1124_v11 = vpack.c.bf16 %v1024_v5, %v1020_v3  ;;  %v689_v14 = vpop.f32.mrb[28].mxu0  ;;  %2169 = vmatpush1.bf16.msra.mxu0 %v4847_v55  ;;  %2555 = vmatpush1.bf16.msra.mxu1 %v4850_v59  ;;  %v858_v59 = vpop.f32.mrb[19].mxu1  ;;  %v1006_v38 = vmax.f32 %v855_v50, 0.0 }
 0x197   :  { %v690_v18 = vadd.f32 %v689_v14, %v5361_v40  ;;  %v691_v19 = vpop.f32.mrb[29].mxu0  ;;  %2170 = vmatprep.subr.bf16.mxu0 %v4855_v60  ;;  %2556 = vmatprep.subr.bf16.mxu1 %v4858_v0  ;;  %v859_v62 = vadd.f32 %v858_v59, %v5391_v51  ;;  %v4865_v0 = vld [vmem:[#allocation7 + $0x3c0] ss:$16 sps:$4 sm:$0xff]   ;;  %v1009_v2 = vmax.f32 %v857_v58, 0.0 }
 0x198   :  { %v692_v26 = vadd.f32 %v691_v19, %v5366_v39  ;;  %v693_v23 = vpop.f32.mrb[30].mxu0  ;;  %2045 = vmatprep.mubr.bf16.mxu0 %v1124_v11  ;;  %2431 = vmatprep.mubr.bf16.mxu1 %v1124_v11  ;;  %v4874_v19 = vld [vmem:[#allocation7 + $0x3e8] ss:$16 sps:$4 sm:$0xff]  }
 0x199   :  { %v694_v29 = vadd.f32 %v693_v23, %v5361_v40  ;;  %v695_v30 = vpop.f32.mrb[31].mxu0  ;;  %2046 = vmatmul.mubr.bf16.gmra.mrb[88].mxu0 %v1123_v12  ;;  %2432 = vmatmul.mubr.bf16.gmra.mrb[88].mxu1 %v1123_v12  ;;  %v1027_v47 = vmax.f32 %v690_v18, 0.0  ;;  %v1010_v6 = vmax.f32 %v859_v62, 0.0  ;;  %v5450_v13 = vpack.c.bf16 %v1009_v2, %v1005_v57  ;;  %v4871_v18 = vld [vmem:[#allocation7 + $0x3e0] ss:$16 sps:$4 sm:$0xff]  }
 0x19a   :  { %v696_v41 = vadd.f32 %v695_v30, %v5366_v39  ;;  %2171 = vmatpush1.bf16.msra.mxu0 %v4853_v15  ;;  %2557 = vmatpush1.bf16.msra.mxu1 %v4856_v16  ;;  %v1028_v54 = vmax.f32 %v692_v26, 0.0  ;;  %v862_v16 = vpop.f32.mrb[20].mxu1 }
 0x19b   :  { %v1031_v48 = vmax.f32 %v694_v29, 0.0  ;;  %2172 = vmatprep.subr.bf16.mxu0 %v4861_v20  ;;  %2558 = vmatprep.subr.bf16.mxu1 %v4864_v21  ;;  %v5453_v15 = vpack.c.bf16 %v1010_v6, %v1006_v38  ;;  %v863_v20 = vadd.f32 %v862_v16, %v5385_v46  ;;  %v864_v21 = vpop.f32.mrb[21].mxu1 }
 0x19c   :  { %v1032_v55 = vmax.f32 %v696_v41, 0.0  ;;  %v865_v23 = vadd.f32 %v864_v21, %v5391_v51  ;;  %v866_v29 = vpop.f32.mrb[22].mxu1 }
 0x19d   :  { %v1127_v60 = vpack.c.bf16 %v1031_v48, %v1027_v47  ;;  %v1013_v34 = vmax.f32 %v863_v20, 0.0  ;;  %v867_v41 = vadd.f32 %v866_v29, %v5385_v46 }
 0x19e   :  { %v1128_v61 = vpack.c.bf16 %v1032_v55, %v1028_v54  ;;  %v699_v63 = vpop.f32.mrb[32].mxu0  ;;  %2173 = vmatpush1.bf16.msra.mxu0 %v4859_v31  ;;  %2559 = vmatpush1.bf16.msra.mxu1 %v4862_v42  ;;  %v868_v42 = vpop.f32.mrb[23].mxu1  ;;  %v1014_v44 = vmax.f32 %v865_v23, 0.0 }
 0x19f   :  { %v700_v3 = vadd.f32 %v699_v63, %v5361_v40  ;;  %v701_v5 = vpop.f32.mrb[33].mxu0  ;;  %2174 = vmatprep.subr.bf16.mxu0 %v4867_v43  ;;  %2560 = vmatprep.subr.bf16.mxu1 %v4870_v49  ;;  %v869_v45 = vadd.f32 %v868_v42, %v5391_v51  ;;  %v1017_v49 = vmax.f32 %v867_v41, 0.0  ;;  %v872_v62 = vpop.f32.mrb[24].mxu1 }
 0x1a0   :  { %v702_v12 = vadd.f32 %v701_v5, %v5366_v39  ;;  %v703_v9 = vpop.f32.mrb[34].mxu0  ;;  %2055 = vmatprep.mubr.bf16.mxu0 %v1128_v61  ;;  %2441 = vmatprep.mubr.bf16.mxu1 %v1128_v61  ;;  %v873_v63 = vadd.f32 %v872_v62, %v5385_v46 }
 0x1a1   :  { %v704_v11 = vadd.f32 %v703_v9, %v5361_v40  ;;  %v705_v14 = vpop.f32.mrb[35].mxu0  ;;  %2056 = vmatmul.mubr.bf16.gmra.mrb[92].mxu0 %v1127_v60  ;;  %2442 = vmatmul.mubr.bf16.gmra.mrb[92].mxu1 %v1127_v60  ;;  %v1035_v22 = vmax.f32 %v700_v3, 0.0  ;;  %v1018_v54 = vmax.f32 %v869_v45, 0.0  ;;  %v5462_v58 = vpack.c.bf16 %v1017_v49, %v1013_v34 }
 0x1a2   :  { %v706_v17 = vadd.f32 %v705_v14, %v5366_v39  ;;  %2175 = vmatpush1.bf16.msra.mxu0 %v4865_v0  ;;  %2561 = vmatpush1.bf16.msra.mxu1 %v4868_v1  ;;  %v1036_v30 = vmax.f32 %v702_v12, 0.0  ;;  %v874_v0 = vpop.f32.mrb[25].mxu1 }
 0x1a3   :  { %v1039_v26 = vmax.f32 %v704_v11, 0.0  ;;  %2176 = vmatprep.subr.bf16.mxu0 %v4873_v7  ;;  %2562 = vmatprep.subr.bf16.mxu1 %v4876_v10  ;;  %v5465_v38 = vpack.c.bf16 %v1018_v54, %v1014_v44  ;;  %v875_v3 = vadd.f32 %v874_v0, %v5391_v51  ;;  %v876_v5 = vpop.f32.mrb[26].mxu1  ;;  %v1021_v10 = vmax.f32 %v873_v63, 0.0 }
 0x1a4   :  { %v1040_v31 = vmax.f32 %v706_v17, 0.0  ;;  %v877_v12 = vadd.f32 %v876_v5, %v5385_v46  ;;  %v878_v9 = vpop.f32.mrb[27].mxu1 }
 0x1a5   :  { %v1131_v43 = vpack.c.bf16 %v1039_v26, %v1035_v22  ;;  %v1022_v14 = vmax.f32 %v875_v3, 0.0  ;;  %v879_v16 = vadd.f32 %v878_v9, %v5391_v51  ;;  %v882_v41 = vpop.f32.mrb[28].mxu1 }
 0x1a6   :  { %v1132_v47 = vpack.c.bf16 %v1040_v31, %v1036_v30  ;;  %v709_v48 = vpop.f32.mrb[36].mxu0  ;;  %2177 = vmatpush1.bf16.msra.mxu0 %v4871_v18  ;;  %2563 = vmatpush1.bf16.msra.mxu1 %v4874_v19  ;;  %v1025_v19 = vmax.f32 %v877_v12, 0.0  ;;  %v884_v44 = vpop.f32.mrb[29].mxu1 }
 0x1a7   :  { %v710_v50 = vadd.f32 %v709_v48, %v5361_v40  ;;  %v711_v53 = vpop.f32.mrb[37].mxu0  ;;  %v1026_v22 = vmax.f32 %v879_v16, 0.0  ;;  %v885_v48 = vadd.f32 %v884_v44, %v5391_v51  ;;  %v886_v49 = vpop.f32.mrb[30].mxu1 }
 0x1a8   :  { %v712_v55 = vadd.f32 %v711_v53, %v5366_v39  ;;  %v713_v57 = vpop.f32.mrb[38].mxu0  ;;  %2065 = vmatprep.mubr.bf16.mxu0 %v1132_v47  ;;  %2451 = vmatprep.mubr.bf16.mxu1 %v1132_v47  ;;  %v5474_v29 = vpack.c.bf16 %v1025_v19, %v1021_v10 }
 0x1a9   :  { %v714_v59 = vadd.f32 %v713_v57, %v5361_v40  ;;  %v715_v60 = vpop.f32.mrb[39].mxu0  ;;  %2066 = vmatmul.mubr.bf16.gmra.mrb[96].mxu0 %v1131_v43  ;;  %2452 = vmatmul.mubr.bf16.gmra.mrb[96].mxu1 %v1131_v43  ;;  %v1043_v1 = vmax.f32 %v710_v50, 0.0  ;;  %v5477_v34 = vpack.c.bf16 %v1026_v22, %v1022_v14  ;;  %v883_v43 = vadd.f32 %v882_v41, %v5385_v46  ;;  %v888_v57 = vpop.f32.mrb[31].mxu1 }
 0x1aa   :  { %v716_v61 = vadd.f32 %v715_v60, %v5366_v39  ;;  %v1044_v6 = vmax.f32 %v712_v55, 0.0  ;;  %v887_v55 = vadd.f32 %v886_v49, %v5385_v46  ;;  %v1030_v60 = vmax.f32 %v885_v48, 0.0 }
 0x1ab   :  { %v1047_v2 = vmax.f32 %v714_v59, 0.0  ;;  %v1029_v54 = vmax.f32 %v883_v43, 0.0  ;;  %v889_v62 = vadd.f32 %v888_v57, %v5391_v51 }
 0x1ac   :  { %v1048_v7 = vmax.f32 %v716_v61, 0.0  ;;  %v1033_v0 = vmax.f32 %v887_v55, 0.0 }
 0x1ad   :  { %v1135_v11 = vpack.c.bf16 %v1047_v2, %v1043_v1  ;;  %v1034_v3 = vmax.f32 %v889_v62, 0.0 }
 0x1ae   :  { %v1136_v17 = vpack.c.bf16 %v1048_v7, %v1044_v6  ;;  %v719_v18 = vpop.f32.mrb[40].mxu0  ;;  %v5486_v7 = vpack.c.bf16 %v1033_v0, %v1029_v54 }
 0x1af   :  { %v720_v20 = vadd.f32 %v719_v18, %v5361_v40  ;;  %v721_v21 = vpop.f32.mrb[41].mxu0  ;;  %v5489_v9 = vpack.c.bf16 %v1034_v3, %v1030_v60 }
 0x1b0   :  { %v722_v26 = vadd.f32 %v721_v21, %v5366_v39  ;;  %v723_v23 = vpop.f32.mrb[42].mxu0  ;;  %2075 = vmatprep.mubr.bf16.mxu0 %v1136_v17  ;;  %2461 = vmatprep.mubr.bf16.mxu1 %v1136_v17 }
 0x1b1   :  { %v724_v30 = vadd.f32 %v723_v23, %v5361_v40  ;;  %v725_v31 = vpop.f32.mrb[43].mxu0  ;;  %2076 = vmatmul.mubr.bf16.gmra.mrb[100].mxu0 %v1135_v11  ;;  %2462 = vmatmul.mubr.bf16.gmra.mrb[100].mxu1 %v1135_v11  ;;  %v1051_v45 = vmax.f32 %v720_v20, 0.0  ;;  %v892_v11 = vpop.f32.mrb[32].mxu1 }
 0x1b2   :  { %v726_v42 = vadd.f32 %v725_v31, %v5366_v39  ;;  %v1052_v50 = vmax.f32 %v722_v26, 0.0  ;;  %v893_v16 = vadd.f32 %v892_v11, %v5385_v46  ;;  %v894_v17 = vpop.f32.mrb[33].mxu1 }
 0x1b3   :  { %v1055_v47 = vmax.f32 %v724_v30, 0.0  ;;  %v895_v20 = vadd.f32 %v894_v17, %v5391_v51  ;;  %v896_v21 = vpop.f32.mrb[34].mxu1 }
 0x1b4   :  { %v1056_v53 = vmax.f32 %v726_v42, 0.0  ;;  %v1037_v23 = vmax.f32 %v893_v16, 0.0  ;;  %v897_v30 = vadd.f32 %v896_v21, %v5385_v46  ;;  %v898_v31 = vpop.f32.mrb[35].mxu1 }
 0x1b5   :  { %v1139_v59 = vpack.c.bf16 %v1055_v47, %v1051_v45  ;;  %v1038_v42 = vmax.f32 %v895_v20, 0.0  ;;  %v899_v43 = vadd.f32 %v898_v31, %v5391_v51  ;;  %v902_v62 = vpop.f32.mrb[36].mxu1 }
 0x1b6   :  { %v1140_v61 = vpack.c.bf16 %v1056_v53, %v1052_v50  ;;  %v729_v63 = vpop.f32.mrb[44].mxu0  ;;  %v1041_v47 = vmax.f32 %v897_v30, 0.0  ;;  %v904_v0 = vpop.f32.mrb[37].mxu1 }
 0x1b7   :  { %v730_v1 = vadd.f32 %v729_v63, %v5361_v40  ;;  %v731_v2 = vpop.f32.mrb[45].mxu0  ;;  %v1042_v50 = vmax.f32 %v899_v43, 0.0  ;;  %v903_v63 = vadd.f32 %v902_v62, %v5385_v46 }
 0x1b8   :  { %v732_v5 = vadd.f32 %v731_v2, %v5366_v39  ;;  %v733_v6 = vpop.f32.mrb[46].mxu0  ;;  %2085 = vmatprep.mubr.bf16.mxu0 %v1140_v61  ;;  %2471 = vmatprep.mubr.bf16.mxu1 %v1140_v61  ;;  %v5498_v55 = vpack.c.bf16 %v1041_v47, %v1037_v23  ;;  %v4879_v2 = vld [vmem:[#allocation8 + $0xc0] sm:$0xff]  }
 0x1b9   :  { %v734_v10 = vadd.f32 %v733_v6, %v5361_v40  ;;  %v735_v12 = vpop.f32.mrb[47].mxu0  ;;  %2086 = vmatmul.mubr.bf16.gmra.mrb[104].mxu0 %v1139_v59  ;;  %2472 = vmatmul.mubr.bf16.gmra.mrb[104].mxu1 %v1139_v59  ;;  %v1059_v18 = vmax.f32 %v730_v1, 0.0  ;;  %v5501_v60 = vpack.c.bf16 %v1042_v50, %v1038_v42  ;;  %v4877_v1 = vld [vmem:[#allocation8 + $0x40] sm:$0xff]   ;;  %v905_v6 = vadd.f32 %v904_v0, %v5391_v51 }
 0x1ba   :  { %v736_v14 = vadd.f32 %v735_v12, %v5366_v39  ;;  %v1060_v22 = vmax.f32 %v732_v5, 0.0  ;;  %4098 = vmatprep.subr.bf16.mxu0 %v4877_v1  ;;  %4210 = vmatprep.subr.bf16.mxu1 %v4879_v2 }
 0x1bb   :  { %v1063_v19 = vmax.f32 %v734_v10, 0.0  ;;  %v906_v10 = vpop.f32.mrb[38].mxu1 }
 0x1bc   :  { %v1064_v26 = vmax.f32 %v736_v14, 0.0  ;;  %v1045_v14 = vmax.f32 %v903_v63, 0.0  ;;  %v907_v16 = vadd.f32 %v906_v10, %v5385_v46  ;;  %v908_v17 = vpop.f32.mrb[39].mxu1 }
 0x1bd   :  { %v1143_v41 = vpack.c.bf16 %v1063_v19, %v1059_v18  ;;  %v1046_v19 = vmax.f32 %v905_v6, 0.0  ;;  %v909_v20 = vadd.f32 %v908_v17, %v5391_v51 }
 0x1be   :  { %v1144_v44 = vpack.c.bf16 %v1064_v26, %v1060_v22  ;;  %v739_v45 = vpop.f32.mrb[48].mxu0  ;;  %v1049_v26 = vmax.f32 %v907_v16, 0.0 }
 0x1bf   :  { %v740_v48 = vadd.f32 %v739_v45, %v5361_v40  ;;  %v741_v49 = vpop.f32.mrb[49].mxu0  ;;  %v1050_v31 = vmax.f32 %v909_v20, 0.0 }
 0x1c0   :  { %v742_v53 = vadd.f32 %v741_v49, %v5366_v39  ;;  %v743_v54 = vpop.f32.mrb[50].mxu0  ;;  %2095 = vmatprep.mubr.bf16.mxu0 %v1144_v44  ;;  %2481 = vmatprep.mubr.bf16.mxu1 %v1144_v44  ;;  %v5510_v43 = vpack.c.bf16 %v1049_v26, %v1045_v14 }
 0x1c1   :  { %v744_v57 = vadd.f32 %v743_v54, %v5361_v40  ;;  %v745_v59 = vpop.f32.mrb[51].mxu0  ;;  %2096 = vmatmul.mubr.bf16.gmra.mrb[108].mxu0 %v1143_v41  ;;  %2482 = vmatmul.mubr.bf16.gmra.mrb[108].mxu1 %v1143_v41  ;;  %v1067_v3 = vmax.f32 %v740_v48, 0.0  ;;  %v5513_v47 = vpack.c.bf16 %v1050_v31, %v1046_v19  ;;  %v912_v48 = vpop.f32.mrb[40].mxu1 }
 0x1c2   :  { %v746_v61 = vadd.f32 %v745_v59, %v5366_v39  ;;  %v1068_v12 = vmax.f32 %v742_v53, 0.0  ;;  %v913_v50 = vadd.f32 %v912_v48, %v5385_v46  ;;  %v914_v53 = vpop.f32.mrb[41].mxu1 }
 0x1c3   :  { %v1071_v5 = vmax.f32 %v744_v57, 0.0  ;;  %v915_v59 = vadd.f32 %v914_v53, %v5391_v51  ;;  %v916_v62 = vpop.f32.mrb[42].mxu1 }
 0x1c4   :  { %v1072_v11 = vmax.f32 %v746_v61, 0.0  ;;  %v1053_v0 = vmax.f32 %v913_v50, 0.0  ;;  %v917_v1 = vadd.f32 %v916_v62, %v5385_v46  ;;  %v918_v2 = vpop.f32.mrb[43].mxu1 }
 0x1c5   :  { %v1147_v18 = vpack.c.bf16 %v1071_v5, %v1067_v3  ;;  %v1054_v5 = vmax.f32 %v915_v59, 0.0  ;;  %v919_v6 = vadd.f32 %v918_v2, %v5391_v51 }
 0x1c6   :  { %v1148_v21 = vpack.c.bf16 %v1072_v11, %v1068_v12  ;;  %v749_v22 = vpop.f32.mrb[52].mxu0  ;;  %v1057_v11 = vmax.f32 %v917_v1, 0.0 }
 0x1c7   :  { %v750_v23 = vadd.f32 %v749_v22, %v5361_v40  ;;  %v751_v30 = vpop.f32.mrb[53].mxu0  ;;  %v1058_v17 = vmax.f32 %v919_v6, 0.0 }
 0x1c8   :  { %v752_v41 = vadd.f32 %v751_v30, %v5366_v39  ;;  %v753_v42 = vpop.f32.mrb[54].mxu0  ;;  %2105 = vmatprep.mubr.bf16.mxu0 %v1148_v21  ;;  %2491 = vmatprep.mubr.bf16.mxu1 %v1148_v21  ;;  %v5522_v20 = vpack.c.bf16 %v1057_v11, %v1053_v0 }
 0x1c9   :  { %v754_v44 = vadd.f32 %v753_v42, %v5361_v40  ;;  %v755_v45 = vpop.f32.mrb[55].mxu0  ;;  %2106 = vmatmul.mubr.bf16.gmra.mrb[112].mxu0 %v1147_v18  ;;  %2492 = vmatmul.mubr.bf16.gmra.mrb[112].mxu1 %v1147_v18  ;;  %v1075_v54 = vmax.f32 %v750_v23, 0.0  ;;  %v5525_v26 = vpack.c.bf16 %v1058_v17, %v1054_v5  ;;  %v922_v23 = vpop.f32.mrb[44].mxu1 }
 0x1ca   :  { %v756_v49 = vadd.f32 %v755_v45, %v5366_v39  ;;  %v1076_v61 = vmax.f32 %v752_v41, 0.0  ;;  %v923_v31 = vadd.f32 %v922_v23, %v5385_v46  ;;  %v924_v41 = vpop.f32.mrb[45].mxu1 }
 0x1cb   :  { %v1079_v57 = vmax.f32 %v754_v44, 0.0  ;;  %v925_v45 = vadd.f32 %v924_v41, %v5391_v51  ;;  %v926_v48 = vpop.f32.mrb[46].mxu1 }
 0x1cc   :  { %v1080_v63 = vmax.f32 %v756_v49, 0.0  ;;  %v1061_v53 = vmax.f32 %v923_v31, 0.0 }
 0x1cd   :  { %v1151_v3 = vpack.c.bf16 %v1079_v57, %v1075_v54  ;;  %v927_v54 = vadd.f32 %v926_v48, %v5385_v46  ;;  %v928_v57 = vpop.f32.mrb[47].mxu1  ;;  %v1062_v62 = vmax.f32 %v925_v45, 0.0 }
 0x1ce   :  { %v1152_v10 = vpack.c.bf16 %v1080_v63, %v1076_v61  ;;  %v759_v12 = vpop.f32.mrb[56].mxu0  ;;  %v929_v61 = vadd.f32 %v928_v57, %v5391_v51  ;;  %v932_v17 = vpop.f32.mrb[48].mxu1 }
 0x1cf   :  { %v760_v14 = vadd.f32 %v759_v12, %v5361_v40  ;;  %v761_v16 = vpop.f32.mrb[57].mxu0  ;;  %v1065_v1 = vmax.f32 %v927_v54, 0.0 }
 0x1d0   :  { %v762_v18 = vadd.f32 %v761_v16, %v5366_v39  ;;  %v763_v19 = vpop.f32.mrb[58].mxu0  ;;  %2115 = vmatprep.mubr.bf16.mxu0 %v1152_v10  ;;  %2501 = vmatprep.mubr.bf16.mxu1 %v1152_v10  ;;  %v1066_v5 = vmax.f32 %v929_v61, 0.0 }
 0x1d1   :  { %v764_v21 = vadd.f32 %v763_v19, %v5361_v40  ;;  %v765_v22 = vpop.f32.mrb[59].mxu0  ;;  %2116 = vmatmul.mubr.bf16.gmra.mrb[116].mxu0 %v1151_v3  ;;  %2502 = vmatmul.mubr.bf16.gmra.mrb[116].mxu1 %v1151_v3  ;;  %v1083_v42 = vmax.f32 %v760_v14, 0.0  ;;  %v5534_v12 = vpack.c.bf16 %v1065_v1, %v1061_v53  ;;  %v933_v19 = vadd.f32 %v932_v17, %v5385_v46  ;;  %v4878_v17 = vld [vmem:[#allocation8] sm:$0xff]  }
 0x1d2   :  { %v766_v30 = vadd.f32 %v765_v22, %v5366_v39  ;;  %v1084_v49 = vmax.f32 %v762_v18, 0.0  ;;  %v5537_v16 = vpack.c.bf16 %v1066_v5, %v1062_v62 }
 0x1d3   :  { %v1087_v44 = vmax.f32 %v764_v21, 0.0  ;;  %v934_v21 = vpop.f32.mrb[49].mxu1 }
 0x1d4   :  { %v1088_v50 = vmax.f32 %v766_v30, 0.0  ;;  %v935_v30 = vadd.f32 %v934_v21, %v5391_v51  ;;  %v936_v31 = vpop.f32.mrb[50].mxu1  ;;  %v4883_v21 = vld [vmem:[#allocation8 + $0xc8] sm:$0xff]  }
 0x1d5   :  { %v1155_v59 = vpack.c.bf16 %v1087_v44, %v1083_v42  ;;  %v1069_v44 = vmax.f32 %v933_v19, 0.0  ;;  %v938_v45 = vpop.f32.mrb[51].mxu1 }
 0x1d6   :  { %v1156_v63 = vpack.c.bf16 %v1088_v50, %v1084_v49  ;;  %v769_v0 = vpop.f32.mrb[60].mxu0  ;;  %v1070_v49 = vmax.f32 %v935_v30, 0.0  ;;  %v939_v50 = vadd.f32 %v938_v45, %v5391_v51  ;;  %v942_v62 = vpop.f32.mrb[52].mxu1 }
 0x1d7   :  { %v770_v2 = vadd.f32 %v769_v0, %v5361_v40  ;;  %v771_v3 = vpop.f32.mrb[61].mxu0  ;;  %v943_v61 = vadd.f32 %v942_v62, %v5385_v46  ;;  %v4886_v62 = vld [vmem:[#allocation8 + $0x10] sm:$0xff]  }
 0x1d8   :  { %v772_v6 = vadd.f32 %v771_v3, %v5366_v39  ;;  %v773_v10 = vpop.f32.mrb[62].mxu0  ;;  %2125 = vmatprep.mubr.bf16.mxu0 %v1156_v63  ;;  %2511 = vmatprep.mubr.bf16.mxu1 %v1156_v63  ;;  %v1074_v54 = vmax.f32 %v939_v50, 0.0  ;;  %v944_v63 = vpop.f32.mrb[53].mxu1  ;;  %v4887_v50 = vld [vmem:[#allocation8 + $0xd0] sm:$0xff]  }
 0x1d9   :  { %v774_v11 = vadd.f32 %v773_v10, %v5361_v40  ;;  %v775_v14 = vpop.f32.mrb[63].mxu0  ;;  %2126 = vmatmul.mubr.bf16.gmra.mrb[120].mxu0 %v1155_v59  ;;  %2512 = vmatmul.mubr.bf16.gmra.mrb[120].mxu1 %v1155_v59  ;;  %v1091_v22 = vmax.f32 %v770_v2, 0.0  ;;  %v937_v40 = vadd.f32 %v936_v31, %v5385_v46  ;;  %v945_v0 = vadd.f32 %v944_v63, %v5391_v51  ;;  %v946_v1 = vpop.f32.mrb[54].mxu1 }
 0x1da   :  { %v776_v18 = vadd.f32 %v775_v14, %v5366_v39  ;;  %v1092_v41 = vmax.f32 %v772_v6, 0.0  ;;  %v5546_v59 = vpack.c.bf16 %v1074_v54, %v1070_v49  ;;  %v1077_v2 = vmax.f32 %v943_v61, 0.0  ;;  %v948_v5 = vpop.f32.mrb[55].mxu1  ;;  %v4885_v49 = vld [vmem:[#allocation8 + $0x50] sm:$0xff]  }
 0x1db   :  { %v1095_v23 = vmax.f32 %v774_v11, 0.0  ;;  %v1073_v39 = vmax.f32 %v937_v40, 0.0  ;;  %v947_v3 = vadd.f32 %v946_v1, %v5385_v46  ;;  %v1078_v6 = vmax.f32 %v945_v0, 0.0  ;;  %v4884_v40 = vld [vmem:[#allocation8 + $0x88] sm:$0xff]   ;;  %v4888_v61 = vld [vmem:[#allocation8 + $0x90] sm:$0xff]   ;;  %v4889_v0 = vld [vmem:[#allocation8 + $0x58] sm:$0xff]  }
 0x1dc   :  { %v1096_v42 = vmax.f32 %v776_v18, 0.0  ;;  %v949_v10 = vadd.f32 %v948_v5, %v5391_v51  ;;  %v4880_v18 = vld [vmem:[#allocation8 + $0x80] sm:$0xff]   ;;  %v4891_v1 = vld [vmem:[#allocation8 + $0xd8] sm:$0xff]  }
 0x1dd   :  { %v1159_v48 = vpack.c.bf16 %v1095_v23, %v1091_v22  ;;  %v5544_v57 = vpack.c.bf16 %v1073_v39, %v1069_v44  ;;  %v1081_v11 = vmax.f32 %v947_v3, 0.0  ;;  %v952_v23 = vpop.f32.mrb[56].mxu1  ;;  %v4882_v44 = vld [vmem:[#allocation8 + $0x8] sm:$0xff]  }
 0x1de   :  { %v1160_v53 = vpack.c.bf16 %v1096_v42, %v1092_v41  ;;  %v1082_v14 = vmax.f32 %v949_v10, 0.0  ;;  %v953_v30 = vadd.f32 %v952_v23, %v5385_v46  ;;  %v954_v31 = vpop.f32.mrb[57].mxu1  ;;  %v4895_v23 = vld [vmem:[#allocation8 + $0xe0] sm:$0xff]  }
 0x1df   :  { %v5554_v19 = vpack.c.bf16 %v1081_v11, %v1077_v2  ;;  %v955_v41 = vadd.f32 %v954_v31, %v5391_v51  ;;  %v956_v42 = vpop.f32.mrb[58].mxu1 }
 0x1e0   :  { %2135 = vmatprep.mubr.bf16.mxu0 %v1160_v53  ;;  %2521 = vmatprep.mubr.bf16.mxu1 %v1160_v53  ;;  %v5558_v22 = vpack.c.bf16 %v1082_v14, %v1078_v6  ;;  %v1085_v45 = vmax.f32 %v953_v30, 0.0  ;;  %v4890_v14 = vld [vmem:[#allocation8 + $0x18] sm:$0xff]  }
 0x1e1   :  { %2136 = vmatmul.mubr.bf16.gmra.mrb[124].mxu0 %v1159_v48  ;;  %2522 = vmatmul.mubr.bf16.gmra.mrb[124].mxu1 %v1159_v48  ;;  %v958_v48 = vpop.f32.mrb[59].mxu1  ;;  %v1086_v53 = vmax.f32 %v955_v41, 0.0 }
 0x1e2   :  { %2178 = vmatprep.mubr.bf16.mxu0 %v5405_v28  ;;  %2564 = vmatprep.mubr.bf16.mxu1 %v5405_v28  ;;  %v4881_v28 = vld [vmem:[#allocation8 + $0x48] sm:$0xff]   ;;  %v962_v3 = vpop.f32.mrb[60].mxu1 }
 0x1e3   :  { %v963_v5 = vadd.f32 %v962_v3, %v5385_v46  ;;  %v964_v6 = vpop.f32.mrb[61].mxu1 }
 0x1e4   :  { %v965_v10 = vadd.f32 %v964_v6, %v5391_v51  ;;  %v966_v11 = vpop.f32.mrb[62].mxu1 }
 0x1e6   :  { %v1094_v30 = vmax.f32 %v965_v10, 0.0 }
 0x1e9   :  { %2179 = vmatmul.mubr.bf16.vlgmr.msra.gmra.mrb[64].mxu0 %v5402_v24  ;;  %2565 = vmatmul.mubr.bf16.vlgmr.msra.gmra.mrb[64].mxu1 %v5402_v24  ;;  %v957_v24 = vadd.f32 %v956_v42, %v5385_v46  ;;  %v4894_v42 = vld [vmem:[#allocation8 + $0x20] sm:$0xff]  }
 0x1ea   :  { %2188 = vmatprep.mubr.bf16.mxu0 %v5417_v8  ;;  %2574 = vmatprep.mubr.bf16.mxu1 %v5417_v8  ;;  %v959_v8 = vadd.f32 %v958_v48, %v5391_v51  ;;  %v4900_v48 = vld [vmem:[#allocation8 + $0xa8] sm:$0xff]  }
 0x1eb   :  { %4099 = vmatpush3.bf16.msra.mxu0 %v4878_v17  ;;  %4211 = vmatpush3.bf16.msra.mxu1 %v4880_v18  ;;  %v1089_v39 = vmax.f32 %v957_v24, 0.0  ;;  %v4892_v17 = vld [vmem:[#allocation8 + $0x98] sm:$0xff]   ;;  %v1093_v18 = vmax.f32 %v963_v5, 0.0 }
 0x1ec   :  { %4100 = vmatprep.subr.bf16.mxu0 %v4881_v28  ;;  %4212 = vmatprep.subr.bf16.mxu1 %v4883_v21  ;;  %v1090_v54 = vmax.f32 %v959_v8, 0.0  ;;  %v968_v28 = vpop.f32.mrb[63].mxu1  ;;  %v4893_v21 = vld [vmem:[#allocation8 + $0x60] sm:$0xff]   ;;  %v4904_v8 = vld [vmem:[#allocation8 + $0xb0] sm:$0xff]  }
 0x1ed   :  { %v5566_v63 = vpack.c.bf16 %v1089_v39, %v1085_v45  ;;  %v4897_v45 = vld [vmem:[#allocation8 + $0x68] sm:$0xff]   ;;  %v4907_v39 = vld [vmem:[#allocation8 + $0xf8] sm:$0xff]  }
 0x1ee   :  { %v5570_v2 = vpack.c.bf16 %v1090_v54, %v1086_v53  ;;  %v4902_v53 = vld [vmem:[#allocation8 + $0x30] sm:$0xff]   ;;  %v4908_v54 = vld [vmem:[#allocation8 + $0xb8] sm:$0xff]  }
 0x1ef   :  { %4101 = vmatpush3.bf16.msra.mxu0 %v4882_v44  ;;  %4213 = vmatpush3.bf16.msra.mxu1 %v4884_v40  ;;  %v4896_v44 = vld [vmem:[#allocation8 + $0xa0] sm:$0xff]  }
 0x1f0   :  { %4102 = vmatprep.subr.bf16.mxu0 %v4885_v49  ;;  %4214 = vmatprep.subr.bf16.mxu1 %v4887_v50  ;;  %v4901_v49 = vld [vmem:[#allocation8 + $0x70] sm:$0xff]  }
 0x1f1   :  { %2189 = vmatmul.mubr.bf16.gmra.mrb[68].mxu0 %v5414_v4  ;;  %2575 = vmatmul.mubr.bf16.gmra.mrb[68].mxu1 %v5414_v4  ;;  %v967_v4 = vadd.f32 %v966_v11, %v5385_v46  ;;  %v4899_v46 = vld [vmem:[#allocation8 + $0xe8] sm:$0xff]   ;;  %v4903_v50 = vld [vmem:[#allocation8 + $0xf0] sm:$0xff]  }
 0x1f2   :  { %2198 = vmatprep.mubr.bf16.mxu0 %v5429_v56  ;;  %2584 = vmatprep.mubr.bf16.mxu1 %v5429_v56  ;;  %v969_v56 = vadd.f32 %v968_v28, %v5391_v51  ;;  %v4898_v51 = vld [vmem:[#allocation8 + $0x28] sm:$0xff]  }
 0x1f3   :  { %4103 = vmatpush3.bf16.msra.mxu0 %v4886_v62  ;;  %4215 = vmatpush3.bf16.msra.mxu1 %v4888_v61  ;;  %v1097_v31 = vmax.f32 %v967_v4, 0.0 }
 0x1f4   :  { %4104 = vmatprep.subr.bf16.mxu0 %v4889_v0  ;;  %4216 = vmatprep.subr.bf16.mxu1 %v4891_v1  ;;  %v1098_v41 = vmax.f32 %v969_v56, 0.0 }
 0x1f5   :  { %v5578_v40 = vpack.c.bf16 %v1097_v31, %v1093_v18 }
 0x1f6   :  { %v5582_v24 = vpack.c.bf16 %v1098_v41, %v1094_v30 }
 0x1f7   :  { %4105 = vmatpush3.bf16.msra.mxu0 %v4890_v14  ;;  %4217 = vmatpush3.bf16.msra.mxu1 %v4892_v17 }
 0x1f8   :  { %4106 = vmatprep.subr.bf16.mxu0 %v4893_v21  ;;  %4218 = vmatprep.subr.bf16.mxu1 %v4895_v23 }
 0x1f9   :  { %2199 = vmatmul.mubr.bf16.gmra.mrb[72].mxu0 %v5426_v52  ;;  %2585 = vmatmul.mubr.bf16.gmra.mrb[72].mxu1 %v5426_v52  ;;  %v4905_v52 = vld [vmem:[#allocation8 + $0x78] sm:$0xff]  }
 0x1fa   :  { %2208 = vmatprep.mubr.bf16.mxu0 %v5441_v33  ;;  %2594 = vmatprep.mubr.bf16.mxu1 %v5441_v33  ;;  %v4906_v33 = vld [vmem:[#allocation8 + $0x38] sm:$0xff]  }
 0x1fb   :  { %4107 = vmatpush3.bf16.msra.mxu0 %v4894_v42  ;;  %4219 = vmatpush3.bf16.msra.mxu1 %v4896_v44 }
 0x1fc   :  { %4108 = vmatprep.subr.bf16.mxu0 %v4897_v45  ;;  %4220 = vmatprep.subr.bf16.mxu1 %v4899_v46 }
 0x1ff   :  { %4109 = vmatpush3.bf16.msra.mxu0 %v4898_v51  ;;  %4221 = vmatpush3.bf16.msra.mxu1 %v4900_v48 }
 0x200   :  { %4110 = vmatprep.subr.bf16.mxu0 %v4901_v49  ;;  %4222 = vmatprep.subr.bf16.mxu1 %v4903_v50 }
 0x201   :  { %2209 = vmatmul.mubr.bf16.gmra.mrb[76].mxu0 %v5438_v27  ;;  %2595 = vmatmul.mubr.bf16.gmra.mrb[76].mxu1 %v5438_v27  ;;  %v1291_v27 = vld [vmem:[%s6092_s4] sm:$0xf] }
 0x202   :  { %2218 = vmatprep.mubr.bf16.mxu0 %v5453_v15  ;;  %2604 = vmatprep.mubr.bf16.mxu1 %v5453_v15  ;;  %v5645_v15 = vrot.slane %v1291_v27, %v255_v25 }
 0x203   :  { %4111 = vmatpush3.bf16.msra.mxu0 %v4902_v53  ;;  %4223 = vmatpush3.bf16.msra.mxu1 %v4904_v8 }
 0x204   :  { %4112 = vmatprep.subr.bf16.mxu0 %v4905_v52  ;;  %4224 = vmatprep.subr.bf16.mxu1 %v4907_v39 }
 0x207   :  { %4113 = vmatpush3.bf16.msra.mxu0 %v4906_v33  ;;  %4225 = vmatpush3.bf16.msra.mxu1 %v4908_v54 }
 0x209   :  { %2219 = vmatmul.mubr.bf16.gmra.mrb[80].mxu0 %v5450_v13  ;;  %2605 = vmatmul.mubr.bf16.gmra.mrb[80].mxu1 %v5450_v13  ;;  %v5641_v13 = vrot.slane %v1291_v27, %v247_v36 }
 0x20a   :  { %2228 = vmatprep.mubr.bf16.mxu0 %v5465_v38  ;;  %2614 = vmatprep.mubr.bf16.mxu1 %v5465_v38  ;;  %v5653_v38 = vrot.slane %v1291_v27, %v259_v32 }
 0x211   :  { %2229 = vmatmul.mubr.bf16.gmra.mrb[84].mxu0 %v5462_v58  ;;  %2615 = vmatmul.mubr.bf16.gmra.mrb[84].mxu1 %v5462_v58  ;;  %v5649_v58 = vrot.slane %v1291_v27, %v251_v37 }
 0x212   :  { %2238 = vmatprep.mubr.bf16.mxu0 %v5477_v34  ;;  %2624 = vmatprep.mubr.bf16.mxu1 %v5477_v34 }
 0x219   :  { %2239 = vmatmul.mubr.bf16.gmra.mrb[88].mxu0 %v5474_v29  ;;  %2625 = vmatmul.mubr.bf16.gmra.mrb[88].mxu1 %v5474_v29 }
 0x21a   :  { %2248 = vmatprep.mubr.bf16.mxu0 %v5489_v9  ;;  %2634 = vmatprep.mubr.bf16.mxu1 %v5489_v9 }
 0x221   :  { %2249 = vmatmul.mubr.bf16.gmra.mrb[92].mxu0 %v5486_v7  ;;  %2635 = vmatmul.mubr.bf16.gmra.mrb[92].mxu1 %v5486_v7 }
 0x222   :  { %2258 = vmatprep.mubr.bf16.mxu0 %v5501_v60  ;;  %2644 = vmatprep.mubr.bf16.mxu1 %v5501_v60 }
 0x229   :  { %2259 = vmatmul.mubr.bf16.gmra.mrb[96].mxu0 %v5498_v55  ;;  %2645 = vmatmul.mubr.bf16.gmra.mrb[96].mxu1 %v5498_v55 }
 0x22a   :  { %2268 = vmatprep.mubr.bf16.mxu0 %v5513_v47  ;;  %2654 = vmatprep.mubr.bf16.mxu1 %v5513_v47 }
 0x231   :  { %2269 = vmatmul.mubr.bf16.gmra.mrb[100].mxu0 %v5510_v43  ;;  %2655 = vmatmul.mubr.bf16.gmra.mrb[100].mxu1 %v5510_v43 }
 0x232   :  { %2278 = vmatprep.mubr.bf16.mxu0 %v5525_v26  ;;  %2664 = vmatprep.mubr.bf16.mxu1 %v5525_v26 }
 0x239   :  { %2279 = vmatmul.mubr.bf16.gmra.mrb[104].mxu0 %v5522_v20  ;;  %2665 = vmatmul.mubr.bf16.gmra.mrb[104].mxu1 %v5522_v20 }
 0x23a   :  { %2288 = vmatprep.mubr.bf16.mxu0 %v5537_v16  ;;  %2674 = vmatprep.mubr.bf16.mxu1 %v5537_v16 }
 0x241   :  { %2289 = vmatmul.mubr.bf16.gmra.mrb[108].mxu0 %v5534_v12  ;;  %2675 = vmatmul.mubr.bf16.gmra.mrb[108].mxu1 %v5534_v12 }
 0x242   :  { %2298 = vmatprep.mubr.bf16.mxu0 %v5546_v59  ;;  %2684 = vmatprep.mubr.bf16.mxu1 %v5546_v59 }
 0x249   :  { %2299 = vmatmul.mubr.bf16.gmra.mrb[112].mxu0 %v5544_v57  ;;  %2685 = vmatmul.mubr.bf16.gmra.mrb[112].mxu1 %v5544_v57 }
 0x24a   :  { %2308 = vmatprep.mubr.bf16.mxu0 %v5558_v22  ;;  %2694 = vmatprep.mubr.bf16.mxu1 %v5558_v22 }
 0x251   :  { %2309 = vmatmul.mubr.bf16.gmra.mrb[116].mxu0 %v5554_v19  ;;  %2695 = vmatmul.mubr.bf16.gmra.mrb[116].mxu1 %v5554_v19 }
 0x252   :  { %2318 = vmatprep.mubr.bf16.mxu0 %v5570_v2  ;;  %2704 = vmatprep.mubr.bf16.mxu1 %v5570_v2 }
 0x259   :  { %2319 = vmatmul.mubr.bf16.gmra.mrb[120].mxu0 %v5566_v63  ;;  %2705 = vmatmul.mubr.bf16.gmra.mrb[120].mxu1 %v5566_v63 }
 0x25a   :  { %2328 = vmatprep.mubr.bf16.mxu0 %v5582_v24  ;;  %2714 = vmatprep.mubr.bf16.mxu1 %v5582_v24 }
 0x261   :  { %2329 = vmatmul.mubr.bf16.gmra.mrb[124].mxu0 %v5578_v40  ;;  %2715 = vmatmul.mubr.bf16.gmra.mrb[124].mxu1 %v5578_v40 }
 0x2bc   :  { %v2180_v29 = vpop.f32.mrb[64].mxu0  ;;  %v2566_v34 = vpop.f32.mrb[64].mxu1 }
 0x2bd   :  { %v4322_v7 = vadd.f32 %v2180_v29, %v5641_v13  ;;  %v4386_v9 = vadd.f32 %v2566_v34, %v5645_v15  ;;  %v2182_v36 = vpop.f32.mrb[65].mxu0  ;;  %v2568_v55 = vpop.f32.mrb[65].mxu1 }
 0x2be   :  { %v4323_v60 = vadd.f32 %v2182_v36, %v5649_v58  ;;  %v4387_v25 = vadd.f32 %v2568_v55, %v5653_v38  ;;  %v2184_v43 = vpop.f32.mrb[66].mxu0  ;;  %v2570_v47 = vpop.f32.mrb[66].mxu1 }
 0x2bf   :  { %v4324_v37 = vadd.f32 %v2184_v43, %v5641_v13  ;;  %v4388_v35 = vadd.f32 %v2570_v47, %v5645_v15  ;;  %v2186_v32 = vpop.f32.mrb[67].mxu0  ;;  %v2572_v20 = vpop.f32.mrb[67].mxu1  ;;  %v2725_v16 = vmax.f32 %v4322_v7, 0.0  ;;  %v2727_v57 = vmax.f32 %v4386_v9, 0.0 }
 0x2c0   :  { %v4325_v26 = vadd.f32 %v2186_v32, %v5649_v58  ;;  %v4389_v12 = vadd.f32 %v2572_v20, %v5653_v38  ;;  %v2726_v22 = vmax.f32 %v4323_v60, 0.0  ;;  %v2728_v62 = vmax.f32 %v4387_v25, 0.0 }
 0x2c1   :  { %v2729_v59 = vmax.f32 %v4324_v37, 0.0  ;;  %v2731_v19 = vmax.f32 %v4388_v35, 0.0 }
 0x2c2   :  { %v2730_v61 = vmax.f32 %v4325_v26, 0.0  ;;  %v2732_v63 = vmax.f32 %v4389_v12, 0.0 }
 0x2c3   :  { %v2853_v0 = vpack.c.bf16 %v2729_v59, %v2725_v16  ;;  %v2855_v1 = vpack.c.bf16 %v2731_v19, %v2727_v57 }
 0x2c4   :  { %v2854_v2 = vpack.c.bf16 %v2730_v61, %v2726_v22  ;;  %v2856_v3 = vpack.c.bf16 %v2732_v63, %v2728_v62  ;;  %v2190_v5 = vpop.f32.mrb[68].mxu0  ;;  %v2576_v6 = vpop.f32.mrb[68].mxu1 }
 0x2c5   :  { %v4326_v10 = vadd.f32 %v2190_v5, %v5641_v13  ;;  %v4390_v11 = vadd.f32 %v2576_v6, %v5645_v15  ;;  %v2192_v14 = vpop.f32.mrb[69].mxu0  ;;  %v2578_v17 = vpop.f32.mrb[69].mxu1 }
 0x2c6   :  { %v4327_v18 = vadd.f32 %v2192_v14, %v5649_v58  ;;  %v4391_v4 = vadd.f32 %v2578_v17, %v5653_v38  ;;  %v2194_v28 = vpop.f32.mrb[70].mxu0  ;;  %v2580_v21 = vpop.f32.mrb[70].mxu1  ;;  %3212 = vmatprep.mubr.bf16.mxu0 %v2854_v2  ;;  %3373 = vmatprep.mubr.bf16.mxu1 %v2856_v3 }
 0x2c7   :  { %v4328_v23 = vadd.f32 %v2194_v28, %v5641_v13  ;;  %v4392_v30 = vadd.f32 %v2580_v21, %v5645_v15  ;;  %v2196_v56 = vpop.f32.mrb[71].mxu0  ;;  %v2582_v31 = vpop.f32.mrb[71].mxu1  ;;  %3213 = vmatmul.mubr.bf16.vlgmr.msra.gmra.mrb[128].mxu0 %v2853_v0  ;;  %3374 = vmatmul.mubr.bf16.vlgmr.msra.gmra.mrb[128].mxu1 %v2855_v1  ;;  %v2733_v44 = vmax.f32 %v4326_v10, 0.0  ;;  %v2735_v40 = vmax.f32 %v4390_v11, 0.0 }
 0x2c8   :  { %v4329_v41 = vadd.f32 %v2196_v56, %v5649_v58  ;;  %v4393_v42 = vadd.f32 %v2582_v31, %v5653_v38  ;;  %v2734_v24 = vmax.f32 %v4327_v18, 0.0  ;;  %v2736_v51 = vmax.f32 %v4391_v4, 0.0 }
 0x2c9   :  { %v2737_v45 = vmax.f32 %v4328_v23, 0.0  ;;  %v2739_v46 = vmax.f32 %v4392_v30, 0.0 }
 0x2ca   :  { %v2738_v48 = vmax.f32 %v4329_v41, 0.0  ;;  %v2740_v49 = vmax.f32 %v4393_v42, 0.0 }
 0x2cb   :  { %v2857_v50 = vpack.c.bf16 %v2737_v45, %v2733_v44  ;;  %v2859_v53 = vpack.c.bf16 %v2739_v46, %v2735_v40 }
 0x2cc   :  { %v2858_v8 = vpack.c.bf16 %v2738_v48, %v2734_v24  ;;  %v2860_v52 = vpack.c.bf16 %v2740_v49, %v2736_v51  ;;  %v2200_v39 = vpop.f32.mrb[72].mxu0  ;;  %v2586_v33 = vpop.f32.mrb[72].mxu1 }
 0x2cd   :  { %v4330_v54 = vadd.f32 %v2200_v39, %v5641_v13  ;;  %v4394_v27 = vadd.f32 %v2586_v33, %v5645_v15  ;;  %v2202_v29 = vpop.f32.mrb[73].mxu0  ;;  %v2588_v34 = vpop.f32.mrb[73].mxu1 }
 0x2ce   :  { %v4331_v7 = vadd.f32 %v2202_v29, %v5649_v58  ;;  %v4395_v9 = vadd.f32 %v2588_v34, %v5653_v38  ;;  %v2204_v36 = vpop.f32.mrb[74].mxu0  ;;  %v2590_v55 = vpop.f32.mrb[74].mxu1  ;;  %3220 = vmatprep.mubr.bf16.mxu0 %v2858_v8  ;;  %3381 = vmatprep.mubr.bf16.mxu1 %v2860_v52 }
 0x2cf   :  { %v4332_v60 = vadd.f32 %v2204_v36, %v5641_v13  ;;  %v4396_v25 = vadd.f32 %v2590_v55, %v5645_v15  ;;  %v2206_v43 = vpop.f32.mrb[75].mxu0  ;;  %v2592_v47 = vpop.f32.mrb[75].mxu1  ;;  %3221 = vmatmul.mubr.bf16.gmra.mrb[132].mxu0 %v2857_v50  ;;  %3382 = vmatmul.mubr.bf16.gmra.mrb[132].mxu1 %v2859_v53  ;;  %v2741_v32 = vmax.f32 %v4330_v54, 0.0  ;;  %v2743_v20 = vmax.f32 %v4394_v27, 0.0 }
 0x2d0   :  { %v4333_v37 = vadd.f32 %v2206_v43, %v5649_v58  ;;  %v4397_v35 = vadd.f32 %v2592_v47, %v5653_v38  ;;  %v2742_v16 = vmax.f32 %v4331_v7, 0.0  ;;  %v2744_v57 = vmax.f32 %v4395_v9, 0.0 }
 0x2d1   :  { %v2745_v26 = vmax.f32 %v4332_v60, 0.0  ;;  %v2747_v12 = vmax.f32 %v4396_v25, 0.0 }
 0x2d2   :  { %v2746_v59 = vmax.f32 %v4333_v37, 0.0  ;;  %v2748_v19 = vmax.f32 %v4397_v35, 0.0 }
 0x2d3   :  { %v2861_v22 = vpack.c.bf16 %v2745_v26, %v2741_v32  ;;  %v2863_v62 = vpack.c.bf16 %v2747_v12, %v2743_v20 }
 0x2d4   :  { %v2862_v61 = vpack.c.bf16 %v2746_v59, %v2742_v16  ;;  %v2864_v63 = vpack.c.bf16 %v2748_v19, %v2744_v57  ;;  %v2210_v0 = vpop.f32.mrb[76].mxu0  ;;  %v2596_v1 = vpop.f32.mrb[76].mxu1 }
 0x2d5   :  { %v4334_v2 = vadd.f32 %v2210_v0, %v5641_v13  ;;  %v4398_v3 = vadd.f32 %v2596_v1, %v5645_v15  ;;  %v2212_v5 = vpop.f32.mrb[77].mxu0  ;;  %v2598_v6 = vpop.f32.mrb[77].mxu1 }
 0x2d6   :  { %v4335_v10 = vadd.f32 %v2212_v5, %v5649_v58  ;;  %v4399_v11 = vadd.f32 %v2598_v6, %v5653_v38  ;;  %v2214_v14 = vpop.f32.mrb[78].mxu0  ;;  %v2600_v17 = vpop.f32.mrb[78].mxu1  ;;  %3228 = vmatprep.mubr.bf16.mxu0 %v2862_v61  ;;  %3389 = vmatprep.mubr.bf16.mxu1 %v2864_v63 }
 0x2d7   :  { %v4336_v18 = vadd.f32 %v2214_v14, %v5641_v13  ;;  %v4400_v4 = vadd.f32 %v2600_v17, %v5645_v15  ;;  %v2216_v28 = vpop.f32.mrb[79].mxu0  ;;  %v2602_v21 = vpop.f32.mrb[79].mxu1  ;;  %3229 = vmatmul.mubr.bf16.gmra.mrb[136].mxu0 %v2861_v22  ;;  %3390 = vmatmul.mubr.bf16.gmra.mrb[136].mxu1 %v2863_v62  ;;  %v2749_v56 = vmax.f32 %v4334_v2, 0.0  ;;  %v2751_v31 = vmax.f32 %v4398_v3, 0.0 }
 0x2d8   :  { %v4337_v23 = vadd.f32 %v2216_v28, %v5649_v58  ;;  %v4401_v30 = vadd.f32 %v2602_v21, %v5653_v38  ;;  %v2750_v44 = vmax.f32 %v4335_v10, 0.0  ;;  %v2752_v40 = vmax.f32 %v4399_v11, 0.0 }
 0x2d9   :  { %v2753_v41 = vmax.f32 %v4336_v18, 0.0  ;;  %v2755_v42 = vmax.f32 %v4400_v4, 0.0 }
 0x2da   :  { %v2754_v45 = vmax.f32 %v4337_v23, 0.0  ;;  %v2756_v46 = vmax.f32 %v4401_v30, 0.0 }
 0x2db   :  { %v2865_v24 = vpack.c.bf16 %v2753_v41, %v2749_v56  ;;  %v2867_v51 = vpack.c.bf16 %v2755_v42, %v2751_v31 }
 0x2dc   :  { %v2866_v48 = vpack.c.bf16 %v2754_v45, %v2750_v44  ;;  %v2868_v49 = vpack.c.bf16 %v2756_v46, %v2752_v40  ;;  %v2220_v50 = vpop.f32.mrb[80].mxu0  ;;  %v2606_v53 = vpop.f32.mrb[80].mxu1 }
 0x2dd   :  { %v4338_v8 = vadd.f32 %v2220_v50, %v5641_v13  ;;  %v4402_v52 = vadd.f32 %v2606_v53, %v5645_v15  ;;  %v2222_v39 = vpop.f32.mrb[81].mxu0  ;;  %v2608_v33 = vpop.f32.mrb[81].mxu1 }
 0x2de   :  { %v4339_v54 = vadd.f32 %v2222_v39, %v5649_v58  ;;  %v4403_v27 = vadd.f32 %v2608_v33, %v5653_v38  ;;  %v2224_v29 = vpop.f32.mrb[82].mxu0  ;;  %v2610_v34 = vpop.f32.mrb[82].mxu1  ;;  %3236 = vmatprep.mubr.bf16.mxu0 %v2866_v48  ;;  %3397 = vmatprep.mubr.bf16.mxu1 %v2868_v49 }
 0x2df   :  { %v4340_v7 = vadd.f32 %v2224_v29, %v5641_v13  ;;  %v4404_v9 = vadd.f32 %v2610_v34, %v5645_v15  ;;  %v2226_v36 = vpop.f32.mrb[83].mxu0  ;;  %v2612_v55 = vpop.f32.mrb[83].mxu1  ;;  %3237 = vmatmul.mubr.bf16.gmra.mrb[140].mxu0 %v2865_v24  ;;  %3398 = vmatmul.mubr.bf16.gmra.mrb[140].mxu1 %v2867_v51  ;;  %v2757_v43 = vmax.f32 %v4338_v8, 0.0  ;;  %v2759_v47 = vmax.f32 %v4402_v52, 0.0 }
 0x2e0   :  { %v4341_v60 = vadd.f32 %v2226_v36, %v5649_v58  ;;  %v4405_v25 = vadd.f32 %v2612_v55, %v5653_v38  ;;  %v2758_v32 = vmax.f32 %v4339_v54, 0.0  ;;  %v2760_v20 = vmax.f32 %v4403_v27, 0.0 }
 0x2e1   :  { %v2761_v37 = vmax.f32 %v4340_v7, 0.0  ;;  %v2763_v35 = vmax.f32 %v4404_v9, 0.0 }
 0x2e2   :  { %v2762_v26 = vmax.f32 %v4341_v60, 0.0  ;;  %v2764_v12 = vmax.f32 %v4405_v25, 0.0 }
 0x2e3   :  { %v2869_v16 = vpack.c.bf16 %v2761_v37, %v2757_v43  ;;  %v2871_v57 = vpack.c.bf16 %v2763_v35, %v2759_v47 }
 0x2e4   :  { %v2870_v59 = vpack.c.bf16 %v2762_v26, %v2758_v32  ;;  %v2872_v19 = vpack.c.bf16 %v2764_v12, %v2760_v20  ;;  %v2230_v22 = vpop.f32.mrb[84].mxu0  ;;  %v2616_v62 = vpop.f32.mrb[84].mxu1 }
 0x2e5   :  { %v4342_v61 = vadd.f32 %v2230_v22, %v5641_v13  ;;  %v4406_v63 = vadd.f32 %v2616_v62, %v5645_v15  ;;  %v2232_v0 = vpop.f32.mrb[85].mxu0  ;;  %v2618_v1 = vpop.f32.mrb[85].mxu1 }
 0x2e6   :  { %v4343_v2 = vadd.f32 %v2232_v0, %v5649_v58  ;;  %v4407_v3 = vadd.f32 %v2618_v1, %v5653_v38  ;;  %v2234_v5 = vpop.f32.mrb[86].mxu0  ;;  %v2620_v6 = vpop.f32.mrb[86].mxu1  ;;  %3244 = vmatprep.mubr.bf16.mxu0 %v2870_v59  ;;  %3405 = vmatprep.mubr.bf16.mxu1 %v2872_v19 }
 0x2e7   :  { %v4344_v10 = vadd.f32 %v2234_v5, %v5641_v13  ;;  %v4408_v11 = vadd.f32 %v2620_v6, %v5645_v15  ;;  %v2236_v14 = vpop.f32.mrb[87].mxu0  ;;  %v2622_v17 = vpop.f32.mrb[87].mxu1  ;;  %3245 = vmatmul.mubr.bf16.gmra.mrb[144].mxu0 %v2869_v16  ;;  %3406 = vmatmul.mubr.bf16.gmra.mrb[144].mxu1 %v2871_v57  ;;  %v2765_v28 = vmax.f32 %v4342_v61, 0.0  ;;  %v2767_v21 = vmax.f32 %v4406_v63, 0.0 }
 0x2e8   :  { %v4345_v18 = vadd.f32 %v2236_v14, %v5649_v58  ;;  %v4409_v4 = vadd.f32 %v2622_v17, %v5653_v38  ;;  %v2766_v56 = vmax.f32 %v4343_v2, 0.0  ;;  %v2768_v31 = vmax.f32 %v4407_v3, 0.0 }
 0x2e9   :  { %v2769_v23 = vmax.f32 %v4344_v10, 0.0  ;;  %v2771_v30 = vmax.f32 %v4408_v11, 0.0 }
 0x2ea   :  { %v2770_v41 = vmax.f32 %v4345_v18, 0.0  ;;  %v2772_v42 = vmax.f32 %v4409_v4, 0.0 }
 0x2eb   :  { %v2873_v44 = vpack.c.bf16 %v2769_v23, %v2765_v28  ;;  %v2875_v40 = vpack.c.bf16 %v2771_v30, %v2767_v21 }
 0x2ec   :  { %v2874_v45 = vpack.c.bf16 %v2770_v41, %v2766_v56  ;;  %v2876_v46 = vpack.c.bf16 %v2772_v42, %v2768_v31  ;;  %v2240_v24 = vpop.f32.mrb[88].mxu0  ;;  %v2626_v51 = vpop.f32.mrb[88].mxu1 }
 0x2ed   :  { %v4346_v48 = vadd.f32 %v2240_v24, %v5641_v13  ;;  %v4410_v49 = vadd.f32 %v2626_v51, %v5645_v15  ;;  %v2242_v50 = vpop.f32.mrb[89].mxu0  ;;  %v2628_v53 = vpop.f32.mrb[89].mxu1 }
 0x2ee   :  { %v4347_v8 = vadd.f32 %v2242_v50, %v5649_v58  ;;  %v4411_v52 = vadd.f32 %v2628_v53, %v5653_v38  ;;  %v2244_v39 = vpop.f32.mrb[90].mxu0  ;;  %v2630_v33 = vpop.f32.mrb[90].mxu1  ;;  %3252 = vmatprep.mubr.bf16.mxu0 %v2874_v45  ;;  %3413 = vmatprep.mubr.bf16.mxu1 %v2876_v46 }
 0x2ef   :  { %v4348_v54 = vadd.f32 %v2244_v39, %v5641_v13  ;;  %v4412_v27 = vadd.f32 %v2630_v33, %v5645_v15  ;;  %v2246_v29 = vpop.f32.mrb[91].mxu0  ;;  %v2632_v34 = vpop.f32.mrb[91].mxu1  ;;  %3253 = vmatmul.mubr.bf16.gmra.mrb[148].mxu0 %v2873_v44  ;;  %3414 = vmatmul.mubr.bf16.gmra.mrb[148].mxu1 %v2875_v40  ;;  %v2773_v36 = vmax.f32 %v4346_v48, 0.0  ;;  %v2775_v55 = vmax.f32 %v4410_v49, 0.0 }
 0x2f0   :  { %v4349_v7 = vadd.f32 %v2246_v29, %v5649_v58  ;;  %v4413_v9 = vadd.f32 %v2632_v34, %v5653_v38  ;;  %v2774_v43 = vmax.f32 %v4347_v8, 0.0  ;;  %v2776_v47 = vmax.f32 %v4411_v52, 0.0 }
 0x2f1   :  { %v2777_v60 = vmax.f32 %v4348_v54, 0.0  ;;  %v2779_v25 = vmax.f32 %v4412_v27, 0.0 }
 0x2f2   :  { %v2778_v37 = vmax.f32 %v4349_v7, 0.0  ;;  %v2780_v35 = vmax.f32 %v4413_v9, 0.0 }
 0x2f3   :  { %v2877_v32 = vpack.c.bf16 %v2777_v60, %v2773_v36  ;;  %v2879_v20 = vpack.c.bf16 %v2779_v25, %v2775_v55 }
 0x2f4   :  { %v2878_v26 = vpack.c.bf16 %v2778_v37, %v2774_v43  ;;  %v2880_v12 = vpack.c.bf16 %v2780_v35, %v2776_v47  ;;  %v2250_v16 = vpop.f32.mrb[92].mxu0  ;;  %v2636_v57 = vpop.f32.mrb[92].mxu1 }
 0x2f5   :  { %v4350_v59 = vadd.f32 %v2250_v16, %v5641_v13  ;;  %v4414_v19 = vadd.f32 %v2636_v57, %v5645_v15  ;;  %v2252_v22 = vpop.f32.mrb[93].mxu0  ;;  %v2638_v62 = vpop.f32.mrb[93].mxu1 }
 0x2f6   :  { %v4351_v61 = vadd.f32 %v2252_v22, %v5649_v58  ;;  %v4415_v63 = vadd.f32 %v2638_v62, %v5653_v38  ;;  %v2254_v0 = vpop.f32.mrb[94].mxu0  ;;  %v2640_v1 = vpop.f32.mrb[94].mxu1  ;;  %3260 = vmatprep.mubr.bf16.mxu0 %v2878_v26  ;;  %3421 = vmatprep.mubr.bf16.mxu1 %v2880_v12 }
 0x2f7   :  { %v4352_v2 = vadd.f32 %v2254_v0, %v5641_v13  ;;  %v4416_v3 = vadd.f32 %v2640_v1, %v5645_v15  ;;  %v2256_v5 = vpop.f32.mrb[95].mxu0  ;;  %v2642_v6 = vpop.f32.mrb[95].mxu1  ;;  %3261 = vmatmul.mubr.bf16.gmra.mrb[152].mxu0 %v2877_v32  ;;  %3422 = vmatmul.mubr.bf16.gmra.mrb[152].mxu1 %v2879_v20  ;;  %v2781_v14 = vmax.f32 %v4350_v59, 0.0  ;;  %v2783_v17 = vmax.f32 %v4414_v19, 0.0 }
 0x2f8   :  { %v4353_v10 = vadd.f32 %v2256_v5, %v5649_v58  ;;  %v4417_v11 = vadd.f32 %v2642_v6, %v5653_v38  ;;  %v2782_v28 = vmax.f32 %v4351_v61, 0.0  ;;  %v2784_v21 = vmax.f32 %v4415_v63, 0.0 }
 0x2f9   :  { %v2785_v18 = vmax.f32 %v4352_v2, 0.0  ;;  %v2787_v4 = vmax.f32 %v4416_v3, 0.0 }
 0x2fa   :  { %v2786_v23 = vmax.f32 %v4353_v10, 0.0  ;;  %v2788_v30 = vmax.f32 %v4417_v11, 0.0 }
 0x2fb   :  { %v2881_v56 = vpack.c.bf16 %v2785_v18, %v2781_v14  ;;  %v2883_v31 = vpack.c.bf16 %v2787_v4, %v2783_v17 }
 0x2fc   :  { %v2882_v41 = vpack.c.bf16 %v2786_v23, %v2782_v28  ;;  %v2884_v42 = vpack.c.bf16 %v2788_v30, %v2784_v21  ;;  %v2260_v44 = vpop.f32.mrb[96].mxu0  ;;  %v2646_v40 = vpop.f32.mrb[96].mxu1 }
 0x2fd   :  { %v4354_v45 = vadd.f32 %v2260_v44, %v5641_v13  ;;  %v4418_v46 = vadd.f32 %v2646_v40, %v5645_v15  ;;  %v2262_v24 = vpop.f32.mrb[97].mxu0  ;;  %v2648_v51 = vpop.f32.mrb[97].mxu1 }
 0x2fe   :  { %v4355_v48 = vadd.f32 %v2262_v24, %v5649_v58  ;;  %v4419_v49 = vadd.f32 %v2648_v51, %v5653_v38  ;;  %v2264_v50 = vpop.f32.mrb[98].mxu0  ;;  %v2650_v53 = vpop.f32.mrb[98].mxu1  ;;  %3268 = vmatprep.mubr.bf16.mxu0 %v2882_v41  ;;  %3429 = vmatprep.mubr.bf16.mxu1 %v2884_v42 }
 0x2ff   :  { %v4356_v8 = vadd.f32 %v2264_v50, %v5641_v13  ;;  %v4420_v52 = vadd.f32 %v2650_v53, %v5645_v15  ;;  %v2266_v39 = vpop.f32.mrb[99].mxu0  ;;  %v2652_v33 = vpop.f32.mrb[99].mxu1  ;;  %3269 = vmatmul.mubr.bf16.gmra.mrb[156].mxu0 %v2881_v56  ;;  %3430 = vmatmul.mubr.bf16.gmra.mrb[156].mxu1 %v2883_v31  ;;  %v2789_v29 = vmax.f32 %v4354_v45, 0.0  ;;  %v2791_v34 = vmax.f32 %v4418_v46, 0.0 }
 0x300   :  { %v4357_v54 = vadd.f32 %v2266_v39, %v5649_v58  ;;  %v4421_v27 = vadd.f32 %v2652_v33, %v5653_v38  ;;  %v2790_v36 = vmax.f32 %v4355_v48, 0.0  ;;  %v2792_v55 = vmax.f32 %v4419_v49, 0.0 }
 0x301   :  { %v2793_v7 = vmax.f32 %v4356_v8, 0.0  ;;  %v2795_v9 = vmax.f32 %v4420_v52, 0.0 }
 0x302   :  { %v2794_v60 = vmax.f32 %v4357_v54, 0.0  ;;  %v2796_v25 = vmax.f32 %v4421_v27, 0.0 }
 0x303   :  { %v2885_v43 = vpack.c.bf16 %v2793_v7, %v2789_v29  ;;  %v2887_v47 = vpack.c.bf16 %v2795_v9, %v2791_v34 }
 0x304   :  { %v2886_v37 = vpack.c.bf16 %v2794_v60, %v2790_v36  ;;  %v2888_v35 = vpack.c.bf16 %v2796_v25, %v2792_v55  ;;  %v2270_v32 = vpop.f32.mrb[100].mxu0  ;;  %v2656_v20 = vpop.f32.mrb[100].mxu1 }
 0x305   :  { %v4358_v26 = vadd.f32 %v2270_v32, %v5641_v13  ;;  %v4422_v12 = vadd.f32 %v2656_v20, %v5645_v15  ;;  %v2272_v16 = vpop.f32.mrb[101].mxu0  ;;  %v2658_v57 = vpop.f32.mrb[101].mxu1 }
 0x306   :  { %v4359_v59 = vadd.f32 %v2272_v16, %v5649_v58  ;;  %v4423_v19 = vadd.f32 %v2658_v57, %v5653_v38  ;;  %v2274_v22 = vpop.f32.mrb[102].mxu0  ;;  %v2660_v62 = vpop.f32.mrb[102].mxu1  ;;  %3276 = vmatprep.mubr.bf16.mxu0 %v2886_v37  ;;  %3437 = vmatprep.mubr.bf16.mxu1 %v2888_v35 }
 0x307   :  { %v4360_v61 = vadd.f32 %v2274_v22, %v5641_v13  ;;  %v4424_v63 = vadd.f32 %v2660_v62, %v5645_v15  ;;  %v2276_v0 = vpop.f32.mrb[103].mxu0  ;;  %v2662_v1 = vpop.f32.mrb[103].mxu1  ;;  %3277 = vmatmul.mubr.bf16.gmra.mrb[160].mxu0 %v2885_v43  ;;  %3438 = vmatmul.mubr.bf16.gmra.mrb[160].mxu1 %v2887_v47  ;;  %v2797_v5 = vmax.f32 %v4358_v26, 0.0  ;;  %v2799_v6 = vmax.f32 %v4422_v12, 0.0 }
 0x308   :  { %v4361_v2 = vadd.f32 %v2276_v0, %v5649_v58  ;;  %v4425_v3 = vadd.f32 %v2662_v1, %v5653_v38  ;;  %v2798_v14 = vmax.f32 %v4359_v59, 0.0  ;;  %v2800_v17 = vmax.f32 %v4423_v19, 0.0 }
 0x309   :  { %v2801_v10 = vmax.f32 %v4360_v61, 0.0  ;;  %v2803_v11 = vmax.f32 %v4424_v63, 0.0 }
 0x30a   :  { %v2802_v18 = vmax.f32 %v4361_v2, 0.0  ;;  %v2804_v4 = vmax.f32 %v4425_v3, 0.0 }
 0x30b   :  { %v2889_v28 = vpack.c.bf16 %v2801_v10, %v2797_v5  ;;  %v2891_v21 = vpack.c.bf16 %v2803_v11, %v2799_v6 }
 0x30c   :  { %v2890_v23 = vpack.c.bf16 %v2802_v18, %v2798_v14  ;;  %v2892_v30 = vpack.c.bf16 %v2804_v4, %v2800_v17  ;;  %v2280_v56 = vpop.f32.mrb[104].mxu0  ;;  %v2666_v31 = vpop.f32.mrb[104].mxu1 }
 0x30d   :  { %v4362_v41 = vadd.f32 %v2280_v56, %v5641_v13  ;;  %v4426_v42 = vadd.f32 %v2666_v31, %v5645_v15  ;;  %v2282_v44 = vpop.f32.mrb[105].mxu0  ;;  %v2668_v40 = vpop.f32.mrb[105].mxu1 }
 0x30e   :  { %v4363_v45 = vadd.f32 %v2282_v44, %v5649_v58  ;;  %v4427_v46 = vadd.f32 %v2668_v40, %v5653_v38  ;;  %v2284_v24 = vpop.f32.mrb[106].mxu0  ;;  %v2670_v51 = vpop.f32.mrb[106].mxu1  ;;  %3284 = vmatprep.mubr.bf16.mxu0 %v2890_v23  ;;  %3445 = vmatprep.mubr.bf16.mxu1 %v2892_v30 }
 0x30f   :  { %v4364_v48 = vadd.f32 %v2284_v24, %v5641_v13  ;;  %v4428_v49 = vadd.f32 %v2670_v51, %v5645_v15  ;;  %v2286_v50 = vpop.f32.mrb[107].mxu0  ;;  %v2672_v53 = vpop.f32.mrb[107].mxu1  ;;  %3285 = vmatmul.mubr.bf16.gmra.mrb[164].mxu0 %v2889_v28  ;;  %3446 = vmatmul.mubr.bf16.gmra.mrb[164].mxu1 %v2891_v21  ;;  %v2805_v39 = vmax.f32 %v4362_v41, 0.0  ;;  %v2807_v33 = vmax.f32 %v4426_v42, 0.0 }
 0x310   :  { %v4365_v8 = vadd.f32 %v2286_v50, %v5649_v58  ;;  %v4429_v52 = vadd.f32 %v2672_v53, %v5653_v38  ;;  %v2806_v29 = vmax.f32 %v4363_v45, 0.0  ;;  %v2808_v34 = vmax.f32 %v4427_v46, 0.0 }
 0x311   :  { %v2809_v54 = vmax.f32 %v4364_v48, 0.0  ;;  %v2811_v27 = vmax.f32 %v4428_v49, 0.0 }
 0x312   :  { %v2810_v7 = vmax.f32 %v4365_v8, 0.0  ;;  %v2812_v9 = vmax.f32 %v4429_v52, 0.0 }
 0x313   :  { %v2893_v36 = vpack.c.bf16 %v2809_v54, %v2805_v39  ;;  %v2895_v55 = vpack.c.bf16 %v2811_v27, %v2807_v33 }
 0x314   :  { %v2894_v60 = vpack.c.bf16 %v2810_v7, %v2806_v29  ;;  %v2896_v25 = vpack.c.bf16 %v2812_v9, %v2808_v34  ;;  %v2290_v43 = vpop.f32.mrb[108].mxu0  ;;  %v2676_v47 = vpop.f32.mrb[108].mxu1 }
 0x315   :  { %v4366_v37 = vadd.f32 %v2290_v43, %v5641_v13  ;;  %v4430_v35 = vadd.f32 %v2676_v47, %v5645_v15  ;;  %v2292_v32 = vpop.f32.mrb[109].mxu0  ;;  %v2678_v20 = vpop.f32.mrb[109].mxu1 }
 0x316   :  { %v4367_v26 = vadd.f32 %v2292_v32, %v5649_v58  ;;  %v4431_v12 = vadd.f32 %v2678_v20, %v5653_v38  ;;  %v2294_v16 = vpop.f32.mrb[110].mxu0  ;;  %v2680_v57 = vpop.f32.mrb[110].mxu1  ;;  %3292 = vmatprep.mubr.bf16.mxu0 %v2894_v60  ;;  %3453 = vmatprep.mubr.bf16.mxu1 %v2896_v25 }
 0x317   :  { %v4368_v59 = vadd.f32 %v2294_v16, %v5641_v13  ;;  %v4432_v19 = vadd.f32 %v2680_v57, %v5645_v15  ;;  %v2296_v22 = vpop.f32.mrb[111].mxu0  ;;  %v2682_v62 = vpop.f32.mrb[111].mxu1  ;;  %3293 = vmatmul.mubr.bf16.gmra.mrb[168].mxu0 %v2893_v36  ;;  %3454 = vmatmul.mubr.bf16.gmra.mrb[168].mxu1 %v2895_v55  ;;  %v2813_v0 = vmax.f32 %v4366_v37, 0.0  ;;  %v2815_v1 = vmax.f32 %v4430_v35, 0.0 }
 0x318   :  { %v4369_v61 = vadd.f32 %v2296_v22, %v5649_v58  ;;  %v4433_v63 = vadd.f32 %v2682_v62, %v5653_v38  ;;  %v2814_v5 = vmax.f32 %v4367_v26, 0.0  ;;  %v2816_v6 = vmax.f32 %v4431_v12, 0.0 }
 0x319   :  { %v2817_v2 = vmax.f32 %v4368_v59, 0.0  ;;  %v2819_v3 = vmax.f32 %v4432_v19, 0.0 }
 0x31a   :  { %v2818_v10 = vmax.f32 %v4369_v61, 0.0  ;;  %v2820_v11 = vmax.f32 %v4433_v63, 0.0 }
 0x31b   :  { %v2897_v14 = vpack.c.bf16 %v2817_v2, %v2813_v0  ;;  %v2899_v17 = vpack.c.bf16 %v2819_v3, %v2815_v1 }
 0x31c   :  { %v2898_v18 = vpack.c.bf16 %v2818_v10, %v2814_v5  ;;  %v2900_v4 = vpack.c.bf16 %v2820_v11, %v2816_v6  ;;  %v2300_v28 = vpop.f32.mrb[112].mxu0  ;;  %v2686_v21 = vpop.f32.mrb[112].mxu1 }
 0x31d   :  { %v4370_v23 = vadd.f32 %v2300_v28, %v5641_v13  ;;  %v4434_v30 = vadd.f32 %v2686_v21, %v5645_v15  ;;  %v2302_v56 = vpop.f32.mrb[113].mxu0  ;;  %v2688_v31 = vpop.f32.mrb[113].mxu1 }
 0x31e   :  { %v4371_v41 = vadd.f32 %v2302_v56, %v5649_v58  ;;  %v4435_v42 = vadd.f32 %v2688_v31, %v5653_v38  ;;  %v2304_v44 = vpop.f32.mrb[114].mxu0  ;;  %v2690_v40 = vpop.f32.mrb[114].mxu1  ;;  %3300 = vmatprep.mubr.bf16.mxu0 %v2898_v18  ;;  %3461 = vmatprep.mubr.bf16.mxu1 %v2900_v4 }
 0x31f   :  { %v4372_v45 = vadd.f32 %v2304_v44, %v5641_v13  ;;  %v4436_v46 = vadd.f32 %v2690_v40, %v5645_v15  ;;  %v2306_v24 = vpop.f32.mrb[115].mxu0  ;;  %v2692_v51 = vpop.f32.mrb[115].mxu1  ;;  %3301 = vmatmul.mubr.bf16.gmra.mrb[172].mxu0 %v2897_v14  ;;  %3462 = vmatmul.mubr.bf16.gmra.mrb[172].mxu1 %v2899_v17  ;;  %v2821_v50 = vmax.f32 %v4370_v23, 0.0  ;;  %v2823_v53 = vmax.f32 %v4434_v30, 0.0 }
 0x320   :  { %v4373_v48 = vadd.f32 %v2306_v24, %v5649_v58  ;;  %v4437_v49 = vadd.f32 %v2692_v51, %v5653_v38  ;;  %v2822_v39 = vmax.f32 %v4371_v41, 0.0  ;;  %v2824_v33 = vmax.f32 %v4435_v42, 0.0 }
 0x321   :  { %v2825_v8 = vmax.f32 %v4372_v45, 0.0  ;;  %v2827_v52 = vmax.f32 %v4436_v46, 0.0 }
 0x322   :  { %v2826_v54 = vmax.f32 %v4373_v48, 0.0  ;;  %v2828_v27 = vmax.f32 %v4437_v49, 0.0 }
 0x323   :  { %v2901_v29 = vpack.c.bf16 %v2825_v8, %v2821_v50  ;;  %v2903_v34 = vpack.c.bf16 %v2827_v52, %v2823_v53 }
 0x324   :  { %v2902_v7 = vpack.c.bf16 %v2826_v54, %v2822_v39  ;;  %v2904_v9 = vpack.c.bf16 %v2828_v27, %v2824_v33  ;;  %v2310_v36 = vpop.f32.mrb[116].mxu0  ;;  %v2696_v55 = vpop.f32.mrb[116].mxu1 }
 0x325   :  { %v4374_v60 = vadd.f32 %v2310_v36, %v5641_v13  ;;  %v4438_v25 = vadd.f32 %v2696_v55, %v5645_v15  ;;  %v2312_v43 = vpop.f32.mrb[117].mxu0  ;;  %v2698_v47 = vpop.f32.mrb[117].mxu1 }
 0x326   :  { %v4375_v37 = vadd.f32 %v2312_v43, %v5649_v58  ;;  %v4439_v35 = vadd.f32 %v2698_v47, %v5653_v38  ;;  %v2314_v32 = vpop.f32.mrb[118].mxu0  ;;  %v2700_v20 = vpop.f32.mrb[118].mxu1  ;;  %3308 = vmatprep.mubr.bf16.mxu0 %v2902_v7  ;;  %3469 = vmatprep.mubr.bf16.mxu1 %v2904_v9 }
 0x327   :  { %v4376_v26 = vadd.f32 %v2314_v32, %v5641_v13  ;;  %v4440_v12 = vadd.f32 %v2700_v20, %v5645_v15  ;;  %v2316_v16 = vpop.f32.mrb[119].mxu0  ;;  %v2702_v57 = vpop.f32.mrb[119].mxu1  ;;  %3309 = vmatmul.mubr.bf16.gmra.mrb[176].mxu0 %v2901_v29  ;;  %3470 = vmatmul.mubr.bf16.gmra.mrb[176].mxu1 %v2903_v34  ;;  %v2829_v22 = vmax.f32 %v4374_v60, 0.0  ;;  %v2831_v62 = vmax.f32 %v4438_v25, 0.0 }
 0x328   :  { %v4377_v59 = vadd.f32 %v2316_v16, %v5649_v58  ;;  %v4441_v19 = vadd.f32 %v2702_v57, %v5653_v38  ;;  %v2830_v0 = vmax.f32 %v4375_v37, 0.0  ;;  %v2832_v1 = vmax.f32 %v4439_v35, 0.0 }
 0x329   :  { %v2833_v61 = vmax.f32 %v4376_v26, 0.0  ;;  %v2835_v63 = vmax.f32 %v4440_v12, 0.0 }
 0x32a   :  { %v2834_v2 = vmax.f32 %v4377_v59, 0.0  ;;  %v2836_v3 = vmax.f32 %v4441_v19, 0.0 }
 0x32b   :  { %v2905_v5 = vpack.c.bf16 %v2833_v61, %v2829_v22  ;;  %v2907_v6 = vpack.c.bf16 %v2835_v63, %v2831_v62 }
 0x32c   :  { %v2906_v10 = vpack.c.bf16 %v2834_v2, %v2830_v0  ;;  %v2908_v11 = vpack.c.bf16 %v2836_v3, %v2832_v1  ;;  %v2320_v14 = vpop.f32.mrb[120].mxu0  ;;  %v2706_v17 = vpop.f32.mrb[120].mxu1 }
 0x32d   :  { %v4378_v18 = vadd.f32 %v2320_v14, %v5641_v13  ;;  %v4442_v4 = vadd.f32 %v2706_v17, %v5645_v15  ;;  %v2322_v28 = vpop.f32.mrb[121].mxu0  ;;  %v2708_v21 = vpop.f32.mrb[121].mxu1 }
 0x32e   :  { %v4379_v23 = vadd.f32 %v2322_v28, %v5649_v58  ;;  %v4443_v30 = vadd.f32 %v2708_v21, %v5653_v38  ;;  %v2324_v56 = vpop.f32.mrb[122].mxu0  ;;  %v2710_v31 = vpop.f32.mrb[122].mxu1  ;;  %3316 = vmatprep.mubr.bf16.mxu0 %v2906_v10  ;;  %3477 = vmatprep.mubr.bf16.mxu1 %v2908_v11 }
 0x32f   :  { %v4380_v41 = vadd.f32 %v2324_v56, %v5641_v13  ;;  %v4444_v42 = vadd.f32 %v2710_v31, %v5645_v15  ;;  %v2326_v44 = vpop.f32.mrb[123].mxu0  ;;  %v2712_v40 = vpop.f32.mrb[123].mxu1  ;;  %3317 = vmatmul.mubr.bf16.gmra.mrb[180].mxu0 %v2905_v5  ;;  %3478 = vmatmul.mubr.bf16.gmra.mrb[180].mxu1 %v2907_v6  ;;  %v2837_v24 = vmax.f32 %v4378_v18, 0.0  ;;  %v2839_v51 = vmax.f32 %v4442_v4, 0.0 }
 0x330   :  { %v4381_v45 = vadd.f32 %v2326_v44, %v5649_v58  ;;  %v4445_v46 = vadd.f32 %v2712_v40, %v5653_v38  ;;  %v2838_v50 = vmax.f32 %v4379_v23, 0.0  ;;  %v2840_v53 = vmax.f32 %v4443_v30, 0.0 }
 0x331   :  { %v2841_v48 = vmax.f32 %v4380_v41, 0.0  ;;  %v2843_v49 = vmax.f32 %v4444_v42, 0.0 }
 0x332   :  { %v2842_v8 = vmax.f32 %v4381_v45, 0.0  ;;  %v2844_v52 = vmax.f32 %v4445_v46, 0.0 }
 0x333   :  { %v2909_v39 = vpack.c.bf16 %v2841_v48, %v2837_v24  ;;  %v2911_v33 = vpack.c.bf16 %v2843_v49, %v2839_v51 }
 0x334   :  { %v2910_v54 = vpack.c.bf16 %v2842_v8, %v2838_v50  ;;  %v2912_v27 = vpack.c.bf16 %v2844_v52, %v2840_v53  ;;  %v2330_v29 = vpop.f32.mrb[124].mxu0  ;;  %v2716_v34 = vpop.f32.mrb[124].mxu1 }
 0x335   :  { %v4382_v7 = vadd.f32 %v2330_v29, %v5641_v13  ;;  %v4446_v9 = vadd.f32 %v2716_v34, %v5645_v15  ;;  %v2332_v36 = vpop.f32.mrb[125].mxu0  ;;  %v2718_v55 = vpop.f32.mrb[125].mxu1 }
 0x336   :  { %v4383_v60 = vadd.f32 %v2332_v36, %v5649_v58  ;;  %v4447_v25 = vadd.f32 %v2718_v55, %v5653_v38  ;;  %v2334_v43 = vpop.f32.mrb[126].mxu0  ;;  %v2720_v47 = vpop.f32.mrb[126].mxu1  ;;  %3324 = vmatprep.mubr.bf16.mxu0 %v2910_v54  ;;  %3485 = vmatprep.mubr.bf16.mxu1 %v2912_v27 }
 0x337   :  { %v4384_v37 = vadd.f32 %v2334_v43, %v5641_v13  ;;  %v4448_v35 = vadd.f32 %v2720_v47, %v5645_v15  ;;  %v2336_v32 = vpop.f32.mrb[127].mxu0  ;;  %v2722_v20 = vpop.f32.mrb[127].mxu1  ;;  %3325 = vmatmul.mubr.bf16.gmra.mrb[184].mxu0 %v2909_v39  ;;  %3486 = vmatmul.mubr.bf16.gmra.mrb[184].mxu1 %v2911_v33  ;;  %v2845_v16 = vmax.f32 %v4382_v7, 0.0  ;;  %v2847_v57 = vmax.f32 %v4446_v9, 0.0 }
 0x338   :  { %v4385_v26 = vadd.f32 %v2336_v32, %v5649_v58  ;;  %v4449_v12 = vadd.f32 %v2722_v20, %v5653_v38  ;;  %v2846_v22 = vmax.f32 %v4383_v60, 0.0  ;;  %v2848_v62 = vmax.f32 %v4447_v25, 0.0  ;;  %v5786_v38 = vld [vmem:[%s6094_s6] ss:$0 sm:$0xff]  ;;  %s5163_s6 = smov [#allocation10]  }
 0x339   :  { %v2849_v59 = vmax.f32 %v4384_v37, 0.0  ;;  %v2851_v19 = vmax.f32 %v4448_v35, 0.0  ;;  %s3859_s30 = sshll.u32 %s5163_s6, 4  ;;  %s3860_s30 = int_to_ptr.vmem [resolvable:$true] %s3859_s30 }
 0x33a   :  { %v2850_v61 = vmax.f32 %v4385_v26, 0.0  ;;  %v2852_v63 = vmax.f32 %v4449_v12, 0.0  ;;  %s5125_s8 = scalar_lea.vmem %s3860_s30, 4096  ;;  %p5130_p5 = scmp.lt.s32.totalorder %s3860_s30, %s3860_s30 }
 0x33b   :  { %v2913_v0 = vpack.c.bf16 %v2849_v59, %v2845_v16  ;;  %v2915_v13 = vpack.c.bf16 %v2851_v19, %v2847_v57  ;;  %p5126_p4 = scmp.ne.s32.totalorder %s3860_s30, %s5125_s8  ;;  %p5131_p6 = scmp.lt.s32.totalorder %s5125_s8, %s5125_s8 }
 0x33c   :  { %v2914_v1 = vpack.c.bf16 %v2850_v61, %v2846_v22  ;;  %v2916_v15 = vpack.c.bf16 %v2852_v63, %v2848_v62 }
 0x33d   :  { %p5132_p7 = por %p5131_p6, %p5130_p5 }
 0x33e   :  { %3332 = vmatprep.mubr.bf16.mxu0 %v2914_v1  ;;  %3493 = vmatprep.mubr.bf16.mxu1 %v2916_v15 }
 0x33f   :  { %3333 = vmatmul.mubr.bf16.gmra.mrb[188].mxu0 %v2913_v0  ;;  %3494 = vmatmul.mubr.bf16.gmra.mrb[188].mxu1 %v2915_v13  ;;  %p5133_p8 = pnand %p5132_p7, %p5126_p4 }
 0x39a   :  { %v4114_v2 = vpop.f32.mrb[128].mxu0  ;;  %v4226_v58 = vpop.f32.mrb[128].mxu1 }
 0x39b   :  { %v4115_v3 = vpop.f32.mrb[129].mxu0  ;;  %v4227_v5 = vpop.f32.mrb[129].mxu1 }
 0x39c   :  { %v4116_v6 = vadd.f32 %v4115_v3, %v4114_v2  ;;  %v4228_v10 = vadd.f32 %v4227_v5, %v4226_v58  ;;  %v4117_v11 = vpop.f32.mrb[130].mxu0  ;;  %v4229_v14 = vpop.f32.mrb[130].mxu1 }
 0x39d   :  { %v4118_v17 = vpop.f32.mrb[131].mxu0  ;;  %v4230_v18 = vpop.f32.mrb[131].mxu1 }
 0x39e   :  { %v3215_v4 = vadd.f32 %v4116_v6, %v5786_v38  ;;  %v4119_v28 = vadd.f32 %v4118_v17, %v4117_v11  ;;  %v4231_v21 = vadd.f32 %v4230_v18, %v4229_v14 }
 0x3a0   :  { %v3218_v23 = vadd.f32 %v4119_v28, %v5786_v38  ;;  %v5790_v30 = vadd.f32 %v4228_v10, %v3215_v4 }
 0x3a2   :  { %v4120_v56 = vpop.f32.mrb[132].mxu0  ;;  %v4232_v31 = vpop.f32.mrb[132].mxu1  ;;  %3502 = vmax.xlane.f32.xlu0 %v5790_v30  ;;  %v5793_v41 = vadd.f32 %v4231_v21, %v3218_v23 }
 0x3a3   :  { %v4121_v42 = vpop.f32.mrb[133].mxu0  ;;  %v4233_v44 = vpop.f32.mrb[133].mxu1 }
 0x3a4   :  { %v4122_v40 = vadd.f32 %v4121_v42, %v4120_v56  ;;  %v4234_v45 = vadd.f32 %v4233_v44, %v4232_v31  ;;  %v4123_v46 = vpop.f32.mrb[134].mxu0  ;;  %v4235_v24 = vpop.f32.mrb[134].mxu1 }
 0x3a5   :  { %v4124_v51 = vpop.f32.mrb[135].mxu0  ;;  %v4236_v48 = vpop.f32.mrb[135].mxu1 }
 0x3a6   :  { %v3223_v49 = vadd.f32 %v4122_v40, %v5786_v38  ;;  %v4125_v50 = vadd.f32 %v4124_v51, %v4123_v46  ;;  %v4237_v53 = vadd.f32 %v4236_v48, %v4235_v24  ;;  %3504 = vmax.xlane.f32.xlu0 %v5793_v41 }
 0x3a8   :  { %v3226_v8 = vadd.f32 %v4125_v50, %v5786_v38  ;;  %v5798_v52 = vadd.f32 %v4234_v45, %v3223_v49 }
 0x3aa   :  { %v4126_v39 = vpop.f32.mrb[136].mxu0  ;;  %v4238_v33 = vpop.f32.mrb[136].mxu1  ;;  %3506 = vmax.xlane.f32.xlu1 %v5798_v52  ;;  %v5801_v54 = vadd.f32 %v4237_v53, %v3226_v8 }
 0x3ab   :  { %v4127_v27 = vpop.f32.mrb[137].mxu0  ;;  %v4239_v29 = vpop.f32.mrb[137].mxu1 }
 0x3ac   :  { %v4128_v34 = vadd.f32 %v4127_v27, %v4126_v39  ;;  %v4240_v7 = vadd.f32 %v4239_v29, %v4238_v33  ;;  %v4129_v9 = vpop.f32.mrb[138].mxu0  ;;  %v4241_v36 = vpop.f32.mrb[138].mxu1 }
 0x3ad   :  { %v4130_v55 = vpop.f32.mrb[139].mxu0  ;;  %v4242_v60 = vpop.f32.mrb[139].mxu1 }
 0x3ae   :  { %v3231_v25 = vadd.f32 %v4128_v34, %v5786_v38  ;;  %v4131_v43 = vadd.f32 %v4130_v55, %v4129_v9  ;;  %v4243_v47 = vadd.f32 %v4242_v60, %v4241_v36  ;;  %3508 = vmax.xlane.f32.xlu1 %v5801_v54 }
 0x3b0   :  { %v3234_v37 = vadd.f32 %v4131_v43, %v5786_v38  ;;  %v5806_v35 = vadd.f32 %v4240_v7, %v3231_v25 }
 0x3b2   :  { %v4132_v32 = vpop.f32.mrb[140].mxu0  ;;  %v4244_v20 = vpop.f32.mrb[140].mxu1  ;;  %3510 = vmax.xlane.f32.xlu0 %v5806_v35  ;;  %v5809_v26 = vadd.f32 %v4243_v47, %v3234_v37 }
 0x3b3   :  { %v4133_v12 = vpop.f32.mrb[141].mxu0  ;;  %v4245_v16 = vpop.f32.mrb[141].mxu1 }
 0x3b4   :  { %v4134_v57 = vadd.f32 %v4133_v12, %v4132_v32  ;;  %v4246_v59 = vadd.f32 %v4245_v16, %v4244_v20  ;;  %v4135_v19 = vpop.f32.mrb[142].mxu0  ;;  %v4247_v22 = vpop.f32.mrb[142].mxu1  ;;  %3512 = vmax.xlane.f32.xlu1 %v5809_v26 }
 0x3b5   :  { %v4136_v62 = vpop.f32.mrb[143].mxu0  ;;  %v4248_v61 = vpop.f32.mrb[143].mxu1 }
 0x3b6   :  { %v3239_v63 = vadd.f32 %v4134_v57, %v5786_v38  ;;  %v4137_v0 = vadd.f32 %v4136_v62, %v4135_v19  ;;  %v4249_v13 = vadd.f32 %v4248_v61, %v4247_v22 }
 0x3b8   :  { %v3242_v1 = vadd.f32 %v4137_v0, %v5786_v38  ;;  %v5814_v15 = vadd.f32 %v4246_v59, %v3239_v63 }
 0x3ba   :  { %v4138_v2 = vpop.f32.mrb[144].mxu0  ;;  %v4250_v58 = vpop.f32.mrb[144].mxu1  ;;  %3514 = vmax.xlane.f32.xlu0 %v5814_v15  ;;  %v5817_v3 = vadd.f32 %v4249_v13, %v3242_v1 }
 0x3bb   :  { %v4139_v5 = vpop.f32.mrb[145].mxu0  ;;  %v4251_v6 = vpop.f32.mrb[145].mxu1 }
 0x3bc   :  { %v4140_v10 = vadd.f32 %v4139_v5, %v4138_v2  ;;  %v4252_v11 = vadd.f32 %v4251_v6, %v4250_v58  ;;  %v4141_v14 = vpop.f32.mrb[146].mxu0  ;;  %v4253_v17 = vpop.f32.mrb[146].mxu1  ;;  %3516 = vmax.xlane.f32.xlu1 %v5817_v3 }
 0x3bd   :  { %v4142_v18 = vpop.f32.mrb[147].mxu0  ;;  %v4254_v4 = vpop.f32.mrb[147].mxu1 }
 0x3be   :  { %v3247_v28 = vadd.f32 %v4140_v10, %v5786_v38  ;;  %v4143_v21 = vadd.f32 %v4142_v18, %v4141_v14  ;;  %v4255_v23 = vadd.f32 %v4254_v4, %v4253_v17 }
 0x3c0   :  { %v3250_v56 = vadd.f32 %v4143_v21, %v5786_v38  ;;  %v5822_v31 = vadd.f32 %v4252_v11, %v3247_v28 }
 0x3c2   :  { %v4144_v42 = vpop.f32.mrb[148].mxu0  ;;  %v4256_v44 = vpop.f32.mrb[148].mxu1  ;;  %3518 = vmax.xlane.f32.xlu0 %v5822_v31  ;;  %v5825_v40 = vadd.f32 %v4255_v23, %v3250_v56 }
 0x3c3   :  { %v4145_v45 = vpop.f32.mrb[149].mxu0  ;;  %v4257_v46 = vpop.f32.mrb[149].mxu1 }
 0x3c4   :  { %v4146_v24 = vadd.f32 %v4145_v45, %v4144_v42  ;;  %v4258_v51 = vadd.f32 %v4257_v46, %v4256_v44  ;;  %v4147_v48 = vpop.f32.mrb[150].mxu0  ;;  %v4259_v49 = vpop.f32.mrb[150].mxu1  ;;  %3520 = vmax.xlane.f32.xlu1 %v5825_v40 }
 0x3c5   :  { %v4148_v50 = vpop.f32.mrb[151].mxu0  ;;  %v4260_v53 = vpop.f32.mrb[151].mxu1 }
 0x3c6   :  { %v3255_v8 = vadd.f32 %v4146_v24, %v5786_v38  ;;  %v4149_v39 = vadd.f32 %v4148_v50, %v4147_v48  ;;  %v4261_v33 = vadd.f32 %v4260_v53, %v4259_v49 }
 0x3c8   :  { %v3258_v27 = vadd.f32 %v4149_v39, %v5786_v38  ;;  %v5830_v29 = vadd.f32 %v4258_v51, %v3255_v8 }
 0x3ca   :  { %v4150_v34 = vpop.f32.mrb[152].mxu0  ;;  %v4262_v7 = vpop.f32.mrb[152].mxu1  ;;  %3522 = vmax.xlane.f32.xlu0 %v5830_v29  ;;  %v5833_v9 = vadd.f32 %v4261_v33, %v3258_v27 }
 0x3cb   :  { %v4151_v36 = vpop.f32.mrb[153].mxu0  ;;  %v4263_v55 = vpop.f32.mrb[153].mxu1 }
 0x3cc   :  { %v4152_v60 = vadd.f32 %v4151_v36, %v4150_v34  ;;  %v4264_v25 = vadd.f32 %v4263_v55, %v4262_v7  ;;  %v4153_v43 = vpop.f32.mrb[154].mxu0  ;;  %v4265_v47 = vpop.f32.mrb[154].mxu1  ;;  %3524 = vmax.xlane.f32.xlu1 %v5833_v9 }
 0x3cd   :  { %v4154_v37 = vpop.f32.mrb[155].mxu0  ;;  %v4266_v32 = vpop.f32.mrb[155].mxu1 }
 0x3ce   :  { %v3263_v20 = vadd.f32 %v4152_v60, %v5786_v38  ;;  %v4155_v12 = vadd.f32 %v4154_v37, %v4153_v43  ;;  %v4267_v16 = vadd.f32 %v4266_v32, %v4265_v47 }
 0x3d0   :  { %v3266_v57 = vadd.f32 %v4155_v12, %v5786_v38  ;;  %v5838_v59 = vadd.f32 %v4264_v25, %v3263_v20 }
 0x3d2   :  { %v4156_v19 = vpop.f32.mrb[156].mxu0  ;;  %v4268_v22 = vpop.f32.mrb[156].mxu1  ;;  %3526 = vmax.xlane.f32.xlu0 %v5838_v59  ;;  %v5841_v62 = vadd.f32 %v4267_v16, %v3266_v57 }
 0x3d3   :  { %v4157_v61 = vpop.f32.mrb[157].mxu0  ;;  %v4269_v63 = vpop.f32.mrb[157].mxu1 }
 0x3d4   :  { %v4158_v0 = vadd.f32 %v4157_v61, %v4156_v19  ;;  %v4270_v13 = vadd.f32 %v4269_v63, %v4268_v22  ;;  %v4159_v1 = vpop.f32.mrb[158].mxu0  ;;  %v4271_v2 = vpop.f32.mrb[158].mxu1  ;;  %3528 = vmax.xlane.f32.xlu1 %v5841_v62 }
 0x3d5   :  { %v4160_v58 = vpop.f32.mrb[159].mxu0  ;;  %v4272_v5 = vpop.f32.mrb[159].mxu1 }
 0x3d6   :  { %v3271_v6 = vadd.f32 %v4158_v0, %v5786_v38  ;;  %v4161_v10 = vadd.f32 %v4160_v58, %v4159_v1  ;;  %v4273_v11 = vadd.f32 %v4272_v5, %v4271_v2 }
 0x3d8   :  { %v3274_v14 = vadd.f32 %v4161_v10, %v5786_v38  ;;  %v5846_v17 = vadd.f32 %v4270_v13, %v3271_v6 }
 0x3da   :  { %v4162_v18 = vpop.f32.mrb[160].mxu0  ;;  %v4274_v4 = vpop.f32.mrb[160].mxu1  ;;  %3530 = vmax.xlane.f32.xlu0 %v5846_v17  ;;  %v5849_v28 = vadd.f32 %v4273_v11, %v3274_v14 }
 0x3db   :  { %v4163_v21 = vpop.f32.mrb[161].mxu0  ;;  %v4275_v23 = vpop.f32.mrb[161].mxu1 }
 0x3dc   :  { %v4164_v56 = vadd.f32 %v4163_v21, %v4162_v18  ;;  %v4276_v42 = vadd.f32 %v4275_v23, %v4274_v4  ;;  %v4165_v44 = vpop.f32.mrb[162].mxu0  ;;  %v4277_v45 = vpop.f32.mrb[162].mxu1  ;;  %3532 = vmax.xlane.f32.xlu1 %v5849_v28 }
 0x3dd   :  { %v4166_v46 = vpop.f32.mrb[163].mxu0  ;;  %v4278_v24 = vpop.f32.mrb[163].mxu1 }
 0x3de   :  { %v3279_v51 = vadd.f32 %v4164_v56, %v5786_v38  ;;  %v4167_v48 = vadd.f32 %v4166_v46, %v4165_v44  ;;  %v4279_v49 = vadd.f32 %v4278_v24, %v4277_v45 }
 0x3e0   :  { %v3282_v50 = vadd.f32 %v4167_v48, %v5786_v38  ;;  %v5854_v53 = vadd.f32 %v4276_v42, %v3279_v51 }
 0x3e2   :  { %v4168_v8 = vpop.f32.mrb[164].mxu0  ;;  %v4280_v39 = vpop.f32.mrb[164].mxu1  ;;  %3534 = vmax.xlane.f32.xlu0 %v5854_v53  ;;  %v5857_v33 = vadd.f32 %v4279_v49, %v3282_v50 }
 0x3e3   :  { %v4169_v27 = vpop.f32.mrb[165].mxu0  ;;  %v4281_v34 = vpop.f32.mrb[165].mxu1 }
 0x3e4   :  { %v4170_v7 = vadd.f32 %v4169_v27, %v4168_v8  ;;  %v4282_v36 = vadd.f32 %v4281_v34, %v4280_v39  ;;  %v4171_v55 = vpop.f32.mrb[166].mxu0  ;;  %v4283_v60 = vpop.f32.mrb[166].mxu1  ;;  %3536 = vmax.xlane.f32.xlu1 %v5857_v33 }
 0x3e5   :  { %v4172_v25 = vpop.f32.mrb[167].mxu0  ;;  %v4284_v43 = vpop.f32.mrb[167].mxu1 }
 0x3e6   :  { %v3287_v47 = vadd.f32 %v4170_v7, %v5786_v38  ;;  %v4173_v37 = vadd.f32 %v4172_v25, %v4171_v55  ;;  %v4285_v32 = vadd.f32 %v4284_v43, %v4283_v60 }
 0x3e8   :  { %v3290_v20 = vadd.f32 %v4173_v37, %v5786_v38  ;;  %v5862_v12 = vadd.f32 %v4282_v36, %v3287_v47 }
 0x3ea   :  { %v4174_v16 = vpop.f32.mrb[168].mxu0  ;;  %v4286_v57 = vpop.f32.mrb[168].mxu1  ;;  %3538 = vmax.xlane.f32.xlu0 %v5862_v12  ;;  %v5865_v19 = vadd.f32 %v4285_v32, %v3290_v20 }
 0x3eb   :  { %v4175_v22 = vpop.f32.mrb[169].mxu0  ;;  %v4287_v61 = vpop.f32.mrb[169].mxu1 }
 0x3ec   :  { %v4176_v63 = vadd.f32 %v4175_v22, %v4174_v16  ;;  %v4288_v0 = vadd.f32 %v4287_v61, %v4286_v57  ;;  %v4177_v13 = vpop.f32.mrb[170].mxu0  ;;  %v4289_v1 = vpop.f32.mrb[170].mxu1  ;;  %3540 = vmax.xlane.f32.xlu1 %v5865_v19 }
 0x3ed   :  { %v4178_v2 = vpop.f32.mrb[171].mxu0  ;;  %v4290_v58 = vpop.f32.mrb[171].mxu1 }
 0x3ee   :  { %v3295_v5 = vadd.f32 %v4176_v63, %v5786_v38  ;;  %v4179_v6 = vadd.f32 %v4178_v2, %v4177_v13  ;;  %v4291_v10 = vadd.f32 %v4290_v58, %v4289_v1 }
 0x3f0   :  { %v3298_v11 = vadd.f32 %v4179_v6, %v5786_v38  ;;  %v5870_v14 = vadd.f32 %v4288_v0, %v3295_v5 }
 0x3f2   :  { %v4180_v18 = vpop.f32.mrb[172].mxu0  ;;  %v4292_v4 = vpop.f32.mrb[172].mxu1  ;;  %3542 = vmax.xlane.f32.xlu0 %v5870_v14  ;;  %v5873_v21 = vadd.f32 %v4291_v10, %v3298_v11 }
 0x3f3   :  { %v4181_v23 = vpop.f32.mrb[173].mxu0  ;;  %v4293_v56 = vpop.f32.mrb[173].mxu1 }
 0x3f4   :  { %v4182_v42 = vadd.f32 %v4181_v23, %v4180_v18  ;;  %v4294_v44 = vadd.f32 %v4293_v56, %v4292_v4  ;;  %v4183_v45 = vpop.f32.mrb[174].mxu0  ;;  %v4295_v46 = vpop.f32.mrb[174].mxu1  ;;  %3544 = vmax.xlane.f32.xlu1 %v5873_v21 }
 0x3f5   :  { %v4184_v24 = vpop.f32.mrb[175].mxu0  ;;  %v4296_v51 = vpop.f32.mrb[175].mxu1 }
 0x3f6   :  { %v3303_v48 = vadd.f32 %v4182_v42, %v5786_v38  ;;  %v4185_v49 = vadd.f32 %v4184_v24, %v4183_v45  ;;  %v4297_v50 = vadd.f32 %v4296_v51, %v4295_v46 }
 0x3f8   :  { %v3306_v8 = vadd.f32 %v4185_v49, %v5786_v38  ;;  %v5878_v39 = vadd.f32 %v4294_v44, %v3303_v48 }
 0x3fa   :  { %v4186_v27 = vpop.f32.mrb[176].mxu0  ;;  %v4298_v34 = vpop.f32.mrb[176].mxu1  ;;  %3546 = vmax.xlane.f32.xlu0 %v5878_v39  ;;  %v5881_v7 = vadd.f32 %v4297_v50, %v3306_v8 }
 0x3fb   :  { %v4187_v36 = vpop.f32.mrb[177].mxu0  ;;  %v4299_v55 = vpop.f32.mrb[177].mxu1 }
 0x3fc   :  { %v4188_v60 = vadd.f32 %v4187_v36, %v4186_v27  ;;  %v4300_v25 = vadd.f32 %v4299_v55, %v4298_v34  ;;  %v4189_v43 = vpop.f32.mrb[178].mxu0  ;;  %v4301_v47 = vpop.f32.mrb[178].mxu1  ;;  %3548 = vmax.xlane.f32.xlu1 %v5881_v7 }
 0x3fd   :  { %v4190_v37 = vpop.f32.mrb[179].mxu0  ;;  %v4302_v32 = vpop.f32.mrb[179].mxu1 }
 0x3fe   :  { %v3311_v20 = vadd.f32 %v4188_v60, %v5786_v38  ;;  %v4191_v16 = vadd.f32 %v4190_v37, %v4189_v43  ;;  %v4303_v57 = vadd.f32 %v4302_v32, %v4301_v47 }
 0x400   :  { %v3314_v22 = vadd.f32 %v4191_v16, %v5786_v38  ;;  %v5886_v61 = vadd.f32 %v4300_v25, %v3311_v20 }
 0x402   :  { %v4192_v63 = vpop.f32.mrb[180].mxu0  ;;  %v4304_v0 = vpop.f32.mrb[180].mxu1  ;;  %3550 = vmax.xlane.f32.xlu0 %v5886_v61  ;;  %v5889_v13 = vadd.f32 %v4303_v57, %v3314_v22 }
 0x403   :  { %v4193_v1 = vpop.f32.mrb[181].mxu0  ;;  %v4305_v2 = vpop.f32.mrb[181].mxu1 }
 0x404   :  { %v4194_v58 = vadd.f32 %v4193_v1, %v4192_v63  ;;  %v4306_v5 = vadd.f32 %v4305_v2, %v4304_v0  ;;  %v4195_v6 = vpop.f32.mrb[182].mxu0  ;;  %v4307_v10 = vpop.f32.mrb[182].mxu1  ;;  %3552 = vmax.xlane.f32.xlu1 %v5889_v13 }
 0x405   :  { %v4196_v11 = vpop.f32.mrb[183].mxu0  ;;  %v4308_v18 = vpop.f32.mrb[183].mxu1 }
 0x406   :  { %v3319_v4 = vadd.f32 %v4194_v58, %v5786_v38  ;;  %v4197_v23 = vadd.f32 %v4196_v11, %v4195_v6  ;;  %v4309_v56 = vadd.f32 %v4308_v18, %v4307_v10 }
 0x408   :  { %v3322_v42 = vadd.f32 %v4197_v23, %v5786_v38  ;;  %v5894_v44 = vadd.f32 %v4306_v5, %v3319_v4 }
 0x40a   :  { %v4198_v45 = vpop.f32.mrb[184].mxu0  ;;  %v4310_v46 = vpop.f32.mrb[184].mxu1  ;;  %3554 = vmax.xlane.f32.xlu0 %v5894_v44  ;;  %v5897_v24 = vadd.f32 %v4309_v56, %v3322_v42 }
 0x40b   :  { %v4199_v51 = vpop.f32.mrb[185].mxu0  ;;  %v4311_v48 = vpop.f32.mrb[185].mxu1 }
 0x40c   :  { %v4200_v49 = vadd.f32 %v4199_v51, %v4198_v45  ;;  %v4312_v50 = vadd.f32 %v4311_v48, %v4310_v46  ;;  %v4201_v8 = vpop.f32.mrb[186].mxu0  ;;  %v4313_v27 = vpop.f32.mrb[186].mxu1  ;;  %3556 = vmax.xlane.f32.xlu1 %v5897_v24 }
 0x40d   :  { %v4202_v34 = vpop.f32.mrb[187].mxu0  ;;  %v4314_v36 = vpop.f32.mrb[187].mxu1 }
 0x40e   :  { %v3327_v55 = vadd.f32 %v4200_v49, %v5786_v38  ;;  %v4203_v60 = vadd.f32 %v4202_v34, %v4201_v8  ;;  %v4315_v25 = vadd.f32 %v4314_v36, %v4313_v27 }
 0x410   :  { %v3330_v43 = vadd.f32 %v4203_v60, %v5786_v38  ;;  %v5902_v47 = vadd.f32 %v4312_v50, %v3327_v55 }
 0x412   :  { %v4204_v37 = vpop.f32.mrb[188].mxu0  ;;  %v4316_v32 = vpop.f32.mrb[188].mxu1  ;;  %3558 = vmax.xlane.f32.xlu0 %v5902_v47  ;;  %v5905_v20 = vadd.f32 %v4315_v25, %v3330_v43 }
 0x413   :  { %v4205_v16 = vpop.f32.mrb[189].mxu0  ;;  %v4317_v57 = vpop.f32.mrb[189].mxu1 }
 0x414   :  { %v4206_v22 = vadd.f32 %v4205_v16, %v4204_v37  ;;  %v4318_v63 = vadd.f32 %v4317_v57, %v4316_v32  ;;  %v4207_v0 = vpop.f32.mrb[190].mxu0  ;;  %v4319_v1 = vpop.f32.mrb[190].mxu1  ;;  %3560 = vmax.xlane.f32.xlu1 %v5905_v20 }
 0x415   :  { %v4208_v2 = vpop.f32.mrb[191].mxu0  ;;  %v4320_v58 = vpop.f32.mrb[191].mxu1 }
 0x416   :  { %v3335_v5 = vadd.f32 %v4206_v22, %v5786_v38  ;;  %v4209_v6 = vadd.f32 %v4208_v2, %v4207_v0  ;;  %v4321_v10 = vadd.f32 %v4320_v58, %v4319_v1 }
 0x418   :  { %v3338_v11 = vadd.f32 %v4209_v6, %v5786_v38  ;;  %v5910_v18 = vadd.f32 %v4318_v63, %v3335_v5 }
 0x41a   :  { %3562 = vmax.xlane.f32.xlu0 %v5910_v18  ;;  %v5913_v4 = vadd.f32 %v4321_v10, %v3338_v11 }
 0x41c   :  { %3564 = vmax.xlane.f32.xlu1 %v5913_v4 }
 0x42f   :  { %v3503_v23 = vpop.xlane.xlu0 %3502 }
 0x430   :  { %v5917_v56 = vsub.f32 %v5790_v30, %v3503_v23 }
 0x432   :  { %v3598_v42 = vmul.f32 1.442695, %v5917_v56 }
 0x433   :  { %v3505_v45 = vpop.xlane.xlu0 %3504 }
 0x434   :  { %4909 = vpow2.f32 %v3598_v42  ;;  %v5921_v46 = vsub.f32 %v5793_v41, %v3505_v45 }
 0x436   :  { %v3600_v38 = vmul.f32 1.442695, %v5921_v46 }
 0x437   :  { %v3507_v51 = vpop.xlane.xlu1 %3506 }
 0x438   :  { %4911 = vpow2.f32 %v3600_v38  ;;  %v5925_v48 = vsub.f32 %v5798_v52, %v3507_v51 }
 0x43a   :  { %v3602_v49 = vmul.f32 1.442695, %v5925_v48 }
 0x43b   :  { %v3509_v50 = vpop.xlane.xlu1 %3508 }
 0x43c   :  { %4913 = vpow2.f32 %v3602_v49  ;;  %v5929_v30 = vsub.f32 %v5801_v54, %v3509_v50 }
 0x43e   :  { %v4910_v8 = vpop.eup %4909  ;;  %v3604_v27 = vmul.f32 1.442695, %v5929_v30 }
 0x43f   :  { %3662 = vadd.xlane.f32.xlu0 %v4910_v8  ;;  %v3511_v41 = vpop.xlane.xlu0 %3510 }
 0x440   :  { %4915 = vpow2.f32 %v3604_v27  ;;  %v5933_v34 = vsub.f32 %v5806_v35, %v3511_v41 }
 0x441   :  { %v3513_v36 = vpop.xlane.xlu1 %3512 }
 0x442   :  { %v4912_v55 = vpop.eup %4911  ;;  %v3606_v52 = vmul.f32 1.442695, %v5933_v34  ;;  %v5937_v60 = vsub.f32 %v5809_v26, %v3513_v36 }
 0x443   :  { %3664 = vadd.xlane.f32.xlu1 %v4912_v55 }
 0x444   :  { %4917 = vpow2.f32 %v3606_v52  ;;  %v3608_v54 = vmul.f32 1.442695, %v5937_v60 }
 0x446   :  { %v4914_v25 = vpop.eup %4913  ;;  %4919 = vpow2.f32 %v3608_v54 }
 0x447   :  { %3666 = vadd.xlane.f32.xlu0 %v4914_v25  ;;  %v3515_v43 = vpop.xlane.xlu0 %3514 }
 0x448   :  { %v5941_v37 = vsub.f32 %v5814_v15, %v3515_v43 }
 0x449   :  { %v3517_v35 = vpop.xlane.xlu1 %3516 }
 0x44a   :  { %v4916_v32 = vpop.eup %4915  ;;  %v3610_v16 = vmul.f32 1.442695, %v5941_v37  ;;  %v5945_v57 = vsub.f32 %v5817_v3, %v3517_v35 }
 0x44b   :  { %3668 = vadd.xlane.f32.xlu1 %v4916_v32 }
 0x44c   :  { %4921 = vpow2.f32 %v3610_v16  ;;  %v3612_v26 = vmul.f32 1.442695, %v5945_v57 }
 0x44e   :  { %v4918_v22 = vpop.eup %4917  ;;  %4923 = vpow2.f32 %v3612_v26 }
 0x44f   :  { %3670 = vadd.xlane.f32.xlu0 %v4918_v22  ;;  %v3519_v63 = vpop.xlane.xlu0 %3518 }
 0x450   :  { %v4920_v0 = vpop.eup %4919  ;;  %v5949_v1 = vsub.f32 %v5822_v31, %v3519_v63 }
 0x451   :  { %v3521_v15 = vpop.xlane.xlu1 %3520  ;;  %3672 = vadd.xlane.f32.xlu1 %v4920_v0 }
 0x452   :  { %v3614_v2 = vmul.f32 1.442695, %v5949_v1  ;;  %v5953_v58 = vsub.f32 %v5825_v40, %v3521_v15 }
 0x454   :  { %4925 = vpow2.f32 %v3614_v2  ;;  %v3616_v3 = vmul.f32 1.442695, %v5953_v58 }
 0x456   :  { %v4922_v5 = vpop.eup %4921  ;;  %4927 = vpow2.f32 %v3616_v3 }
 0x457   :  { %3674 = vadd.xlane.f32.xlu0 %v4922_v5  ;;  %v3523_v6 = vpop.xlane.xlu0 %3522 }
 0x458   :  { %v4924_v10 = vpop.eup %4923  ;;  %v5957_v11 = vsub.f32 %v5830_v29, %v3523_v6 }
 0x459   :  { %v3525_v31 = vpop.xlane.xlu1 %3524  ;;  %3676 = vadd.xlane.f32.xlu1 %v4924_v10 }
 0x45a   :  { %v3618_v23 = vmul.f32 1.442695, %v5957_v11  ;;  %v5961_v42 = vsub.f32 %v5833_v9, %v3525_v31 }
 0x45c   :  { %4929 = vpow2.f32 %v3618_v23  ;;  %v3620_v40 = vmul.f32 1.442695, %v5961_v42 }
 0x45e   :  { %v4926_v45 = vpop.eup %4925  ;;  %4931 = vpow2.f32 %v3620_v40 }
 0x45f   :  { %3678 = vadd.xlane.f32.xlu0 %v4926_v45  ;;  %v3527_v38 = vpop.xlane.xlu0 %3526 }
 0x460   :  { %v4928_v51 = vpop.eup %4927  ;;  %v5965_v49 = vsub.f32 %v5838_v59, %v3527_v38 }
 0x461   :  { %v3529_v29 = vpop.xlane.xlu1 %3528  ;;  %3680 = vadd.xlane.f32.xlu1 %v4928_v51 }
 0x462   :  { %v3622_v50 = vmul.f32 1.442695, %v5965_v49  ;;  %v5969_v8 = vsub.f32 %v5841_v62, %v3529_v29 }
 0x464   :  { %4933 = vpow2.f32 %v3622_v50  ;;  %v3624_v9 = vmul.f32 1.442695, %v5969_v8 }
 0x466   :  { %v4930_v27 = vpop.eup %4929  ;;  %4935 = vpow2.f32 %v3624_v9 }
 0x467   :  { %3682 = vadd.xlane.f32.xlu0 %v4930_v27  ;;  %v3531_v41 = vpop.xlane.xlu0 %3530 }
 0x468   :  { %v4932_v36 = vpop.eup %4931  ;;  %v5973_v55 = vsub.f32 %v5846_v17, %v3531_v41 }
 0x469   :  { %v3533_v59 = vpop.xlane.xlu1 %3532  ;;  %3684 = vadd.xlane.f32.xlu1 %v4932_v36 }
 0x46a   :  { %v3626_v52 = vmul.f32 1.442695, %v5973_v55  ;;  %v5977_v54 = vsub.f32 %v5849_v28, %v3533_v59 }
 0x46c   :  { %4937 = vpow2.f32 %v3626_v52  ;;  %v3628_v62 = vmul.f32 1.442695, %v5977_v54 }
 0x46e   :  { %v4934_v25 = vpop.eup %4933  ;;  %4939 = vpow2.f32 %v3628_v62 }
 0x46f   :  { %3686 = vadd.xlane.f32.xlu0 %v4934_v25  ;;  %v3535_v43 = vpop.xlane.xlu0 %3534 }
 0x470   :  { %v4936_v35 = vpop.eup %4935  ;;  %v5981_v32 = vsub.f32 %v5854_v53, %v3535_v43 }
 0x471   :  { %v3537_v17 = vpop.xlane.xlu1 %3536  ;;  %3688 = vadd.xlane.f32.xlu1 %v4936_v35 }
 0x472   :  { %v3630_v16 = vmul.f32 1.442695, %v5981_v32  ;;  %v5985_v26 = vsub.f32 %v5857_v33, %v3537_v17 }
 0x474   :  { %4941 = vpow2.f32 %v3630_v16  ;;  %v3632_v28 = vmul.f32 1.442695, %v5985_v26 }
 0x476   :  { %v4938_v22 = vpop.eup %4937  ;;  %4943 = vpow2.f32 %v3632_v28 }
 0x477   :  { %3690 = vadd.xlane.f32.xlu0 %v4938_v22  ;;  %v3539_v63 = vpop.xlane.xlu0 %3538 }
 0x478   :  { %v4940_v0 = vpop.eup %4939  ;;  %v5989_v15 = vsub.f32 %v5862_v12, %v3539_v63 }
 0x479   :  { %v3541_v53 = vpop.xlane.xlu1 %3540  ;;  %3692 = vadd.xlane.f32.xlu1 %v4940_v0 }
 0x47a   :  { %v3634_v2 = vmul.f32 1.442695, %v5989_v15  ;;  %v5993_v3 = vsub.f32 %v5865_v19, %v3541_v53 }
 0x47c   :  { %4945 = vpow2.f32 %v3634_v2  ;;  %v3636_v33 = vmul.f32 1.442695, %v5993_v3 }
 0x47e   :  { %v4942_v5 = vpop.eup %4941  ;;  %4947 = vpow2.f32 %v3636_v33 }
 0x47f   :  { %3694 = vadd.xlane.f32.xlu0 %v4942_v5  ;;  %v3543_v6 = vpop.xlane.xlu0 %3542 }
 0x480   :  { %v4944_v10 = vpop.eup %4943  ;;  %v5997_v31 = vsub.f32 %v5870_v14, %v3543_v6 }
 0x481   :  { %v3545_v12 = vpop.xlane.xlu1 %3544  ;;  %3696 = vadd.xlane.f32.xlu1 %v4944_v10 }
 0x482   :  { %v3638_v23 = vmul.f32 1.442695, %v5997_v31  ;;  %v6001_v40 = vsub.f32 %v5873_v21, %v3545_v12 }
 0x484   :  { %4949 = vpow2.f32 %v3638_v23  ;;  %v3640_v19 = vmul.f32 1.442695, %v6001_v40 }
 0x486   :  { %v4946_v45 = vpop.eup %4945  ;;  %4951 = vpow2.f32 %v3640_v19 }
 0x487   :  { %3698 = vadd.xlane.f32.xlu0 %v4946_v45  ;;  %v3547_v38 = vpop.xlane.xlu0 %3546 }
 0x488   :  { %v4948_v51 = vpop.eup %4947  ;;  %v6005_v29 = vsub.f32 %v5878_v39, %v3547_v38 }
 0x489   :  { %v3549_v14 = vpop.xlane.xlu1 %3548  ;;  %3700 = vadd.xlane.f32.xlu1 %v4948_v51 }
 0x48a   :  { %v3642_v50 = vmul.f32 1.442695, %v6005_v29  ;;  %v6009_v9 = vsub.f32 %v5881_v7, %v3549_v14 }
 0x48c   :  { %4953 = vpow2.f32 %v3642_v50  ;;  %v3644_v21 = vmul.f32 1.442695, %v6009_v9 }
 0x48e   :  { %v4950_v27 = vpop.eup %4949  ;;  %4955 = vpow2.f32 %v3644_v21 }
 0x48f   :  { %3702 = vadd.xlane.f32.xlu0 %v4950_v27  ;;  %v3551_v41 = vpop.xlane.xlu0 %3550 }
 0x490   :  { %v4952_v36 = vpop.eup %4951  ;;  %v6013_v59 = vsub.f32 %v5886_v61, %v3551_v41 }
 0x491   :  { %v3553_v39 = vpop.xlane.xlu1 %3552  ;;  %3704 = vadd.xlane.f32.xlu1 %v4952_v36 }
 0x492   :  { %v3646_v52 = vmul.f32 1.442695, %v6013_v59  ;;  %v6017_v62 = vsub.f32 %v5889_v13, %v3553_v39 }
 0x494   :  { %4957 = vpow2.f32 %v3646_v52  ;;  %v3648_v7 = vmul.f32 1.442695, %v6017_v62 }
 0x496   :  { %v4954_v25 = vpop.eup %4953  ;;  %4959 = vpow2.f32 %v3648_v7 }
 0x497   :  { %3706 = vadd.xlane.f32.xlu0 %v4954_v25  ;;  %v3555_v43 = vpop.xlane.xlu0 %3554 }
 0x498   :  { %v4956_v35 = vpop.eup %4955  ;;  %v6021_v17 = vsub.f32 %v5894_v44, %v3555_v43 }
 0x499   :  { %v3557_v61 = vpop.xlane.xlu1 %3556  ;;  %3708 = vadd.xlane.f32.xlu1 %v4956_v35 }
 0x49a   :  { %v3650_v16 = vmul.f32 1.442695, %v6021_v17  ;;  %v6025_v28 = vsub.f32 %v5897_v24, %v3557_v61 }
 0x49c   :  { %4961 = vpow2.f32 %v3650_v16  ;;  %v3652_v13 = vmul.f32 1.442695, %v6025_v28 }
 0x49e   :  { %v4958_v22 = vpop.eup %4957  ;;  %4963 = vpow2.f32 %v3652_v13 }
 0x49f   :  { %3710 = vadd.xlane.f32.xlu0 %v4958_v22  ;;  %v3559_v63 = vpop.xlane.xlu0 %3558 }
 0x4a0   :  { %v4960_v0 = vpop.eup %4959  ;;  %v6029_v53 = vsub.f32 %v5902_v47, %v3559_v63 }
 0x4a1   :  { %v3561_v44 = vpop.xlane.xlu1 %3560  ;;  %3712 = vadd.xlane.f32.xlu1 %v4960_v0 }
 0x4a2   :  { %v3654_v2 = vmul.f32 1.442695, %v6029_v53  ;;  %v6033_v33 = vsub.f32 %v5905_v20, %v3561_v44 }
 0x4a4   :  { %4965 = vpow2.f32 %v3654_v2  ;;  %v3656_v24 = vmul.f32 1.442695, %v6033_v33 }
 0x4a6   :  { %v4962_v5 = vpop.eup %4961  ;;  %4967 = vpow2.f32 %v3656_v24 }
 0x4a7   :  { %3714 = vadd.xlane.f32.xlu0 %v4962_v5  ;;  %v3563_v6 = vpop.xlane.xlu0 %3562 }
 0x4a8   :  { %v4964_v10 = vpop.eup %4963  ;;  %v6037_v12 = vsub.f32 %v5910_v18, %v3563_v6 }
 0x4a9   :  { %v3565_v47 = vpop.xlane.xlu1 %3564  ;;  %3716 = vadd.xlane.f32.xlu1 %v4964_v10 }
 0x4aa   :  { %v3658_v23 = vmul.f32 1.442695, %v6037_v12  ;;  %v6041_v19 = vsub.f32 %v5913_v4, %v3565_v47 }
 0x4ac   :  { %4969 = vpow2.f32 %v3658_v23  ;;  %v3660_v20 = vmul.f32 1.442695, %v6041_v19 }
 0x4ae   :  { %v4966_v45 = vpop.eup %4965  ;;  %4971 = vpow2.f32 %v3660_v20 }
 0x4af   :  { %3718 = vadd.xlane.f32.xlu0 %v4966_v45 }
 0x4b0   :  { %v4968_v38 = vpop.eup %4967 }
 0x4b1   :  { %3720 = vadd.xlane.f32.xlu1 %v4968_v38 }
 0x4b6   :  { %v4970_v51 = vpop.eup %4969 }
 0x4b7   :  { %3722 = vadd.xlane.f32.xlu0 %v4970_v51 }
 0x4b8   :  { %v4972_v14 = vpop.eup %4971 }
 0x4b9   :  { %3724 = vadd.xlane.f32.xlu1 %v4972_v14 }
 0x4cc   :  { %v3663_v18 = vpop.xlane.xlu0 %3662 }
 0x4cd   :  { %4973 = vlog2.f32 %v3663_v18 }
 0x4d0   :  { %v3665_v50 = vpop.xlane.xlu1 %3664 }
 0x4d1   :  { %4975 = vlog2.f32 %v3665_v50 }
 0x4d4   :  { %v3667_v21 = vpop.xlane.xlu0 %3666 }
 0x4d5   :  { %4977 = vlog2.f32 %v3667_v21 }
 0x4d7   :  { %v4974_v4 = vpop.eup %4973 }
 0x4d8   :  { %v3727_v27 = vmul.f32 0.6931472, %v4974_v4  ;;  %v3669_v41 = vpop.xlane.xlu1 %3668 }
 0x4d9   :  { %4979 = vlog2.f32 %v3669_v41 }
 0x4da   :  { %v3790_v36 = vsub.f32 %v5917_v56, %v3727_v27 }
 0x4db   :  { %v4976_v39 = vpop.eup %4975 }
 0x4dc   :  { %3822 = vst [vmem:[#allocation10] sm:$0xff] %v3790_v36  ;;  %v3729_v52 = vmul.f32 0.6931472, %v4976_v39  ;;  %v3671_v7 = vpop.xlane.xlu0 %3670 }
 0x4dd   :  { %4981 = vlog2.f32 %v3671_v7 }
 0x4de   :  { %v3791_v25 = vsub.f32 %v5921_v46, %v3729_v52  ;;  %v3673_v43 = vpop.xlane.xlu1 %3672 }
 0x4df   :  { %v4978_v35 = vpop.eup %4977  ;;  %4983 = vlog2.f32 %v3673_v43 }
 0x4e0   :  { %3823 = vst [vmem:[#allocation10 + $0x8] sm:$0xff] %v3791_v25  ;;  %v3731_v61 = vmul.f32 0.6931472, %v4978_v35 }
 0x4e2   :  { %v3792_v16 = vsub.f32 %v5925_v48, %v3731_v61 }
 0x4e3   :  { %v4980_v13 = vpop.eup %4979 }
 0x4e4   :  { %3824 = vst [vmem:[#allocation10 + $0x10] sm:$0xff] %v3792_v16  ;;  %v3733_v22 = vmul.f32 0.6931472, %v4980_v13  ;;  %v3675_v63 = vpop.xlane.xlu0 %3674 }
 0x4e5   :  { %4985 = vlog2.f32 %v3675_v63 }
 0x4e6   :  { %v3793_v56 = vsub.f32 %v5929_v30, %v3733_v22  ;;  %v3677_v0 = vpop.xlane.xlu1 %3676 }
 0x4e7   :  { %v4982_v44 = vpop.eup %4981  ;;  %4987 = vlog2.f32 %v3677_v0 }
 0x4e8   :  { %3825 = vst [vmem:[#allocation10 + $0x18] sm:$0xff] %v3793_v56  ;;  %v3735_v2 = vmul.f32 0.6931472, %v4982_v44 }
 0x4e9   :  { %v4984_v46 = vpop.eup %4983 }
 0x4ea   :  { %v3794_v24 = vsub.f32 %v5933_v34, %v3735_v2  ;;  %v3737_v5 = vmul.f32 0.6931472, %v4984_v46 }
 0x4ec   :  { %3826 = vst [vmem:[#allocation10 + $0x20] sm:$0xff] %v3794_v24  ;;  %v3795_v6 = vsub.f32 %v5937_v60, %v3737_v5  ;;  %v3679_v48 = vpop.xlane.xlu0 %3678 }
 0x4ed   :  { %4989 = vlog2.f32 %v3679_v48 }
 0x4ee   :  { %3827 = vst [vmem:[#allocation10 + $0x28] sm:$0xff] %v3795_v6  ;;  %v3681_v10 = vpop.xlane.xlu1 %3680 }
 0x4ef   :  { %v4986_v47 = vpop.eup %4985  ;;  %4991 = vlog2.f32 %v3681_v10 }
 0x4f0   :  { %v3739_v23 = vmul.f32 0.6931472, %v4986_v47 }
 0x4f1   :  { %v4988_v30 = vpop.eup %4987 }
 0x4f2   :  { %v3796_v20 = vsub.f32 %v5941_v37, %v3739_v23  ;;  %v3741_v45 = vmul.f32 0.6931472, %v4988_v30 }
 0x4f4   :  { %3828 = vst [vmem:[#allocation10 + $0x30] sm:$0xff] %v3796_v20  ;;  %v3797_v38 = vsub.f32 %v5945_v57, %v3741_v45  ;;  %v3683_v51 = vpop.xlane.xlu0 %3682 }
 0x4f5   :  { %4993 = vlog2.f32 %v3683_v51 }
 0x4f6   :  { %3829 = vst [vmem:[#allocation10 + $0x38] sm:$0xff] %v3797_v38  ;;  %v3685_v34 = vpop.xlane.xlu1 %3684 }
 0x4f7   :  { %v4990_v14 = vpop.eup %4989  ;;  %4995 = vlog2.f32 %v3685_v34 }
 0x4f8   :  { %v3743_v60 = vmul.f32 0.6931472, %v4990_v14 }
 0x4f9   :  { %v4992_v18 = vpop.eup %4991 }
 0x4fa   :  { %v3798_v50 = vsub.f32 %v5949_v1, %v3743_v60  ;;  %v3745_v21 = vmul.f32 0.6931472, %v4992_v18 }
 0x4fc   :  { %3830 = vst [vmem:[#allocation10 + $0x40] sm:$0xff] %v3798_v50  ;;  %v3799_v4 = vsub.f32 %v5953_v58, %v3745_v21  ;;  %v3687_v27 = vpop.xlane.xlu0 %3686 }
 0x4fd   :  { %4997 = vlog2.f32 %v3687_v27 }
 0x4fe   :  { %3831 = vst [vmem:[#allocation10 + $0x48] sm:$0xff] %v3799_v4  ;;  %v3689_v37 = vpop.xlane.xlu1 %3688 }
 0x4ff   :  { %v4994_v41 = vpop.eup %4993  ;;  %4999 = vlog2.f32 %v3689_v37 }
 0x500   :  { %v3747_v57 = vmul.f32 0.6931472, %v4994_v41 }
 0x501   :  { %v4996_v36 = vpop.eup %4995 }
 0x502   :  { %v3800_v39 = vsub.f32 %v5957_v11, %v3747_v57  ;;  %v3749_v52 = vmul.f32 0.6931472, %v4996_v36 }
 0x504   :  { %3832 = vst [vmem:[#allocation10 + $0x50] sm:$0xff] %v3800_v39  ;;  %v3801_v7 = vsub.f32 %v5961_v42, %v3749_v52  ;;  %v3691_v25 = vpop.xlane.xlu0 %3690 }
 0x505   :  { %5001 = vlog2.f32 %v3691_v25 }
 0x506   :  { %3833 = vst [vmem:[#allocation10 + $0x58] sm:$0xff] %v3801_v7  ;;  %v3693_v1 = vpop.xlane.xlu1 %3692 }
 0x507   :  { %v4998_v43 = vpop.eup %4997  ;;  %5003 = vlog2.f32 %v3693_v1 }
 0x508   :  { %v3751_v58 = vmul.f32 0.6931472, %v4998_v43 }
 0x509   :  { %v5000_v35 = vpop.eup %4999 }
 0x50a   :  { %v3802_v61 = vsub.f32 %v5965_v49, %v3751_v58  ;;  %v3753_v16 = vmul.f32 0.6931472, %v5000_v35 }
 0x50c   :  { %3834 = vst [vmem:[#allocation10 + $0x60] sm:$0xff] %v3802_v61  ;;  %v3803_v13 = vsub.f32 %v5969_v8, %v3753_v16  ;;  %v3695_v22 = vpop.xlane.xlu0 %3694 }
 0x50d   :  { %5005 = vlog2.f32 %v3695_v22 }
 0x50e   :  { %3835 = vst [vmem:[#allocation10 + $0x68] sm:$0xff] %v3803_v13  ;;  %v3697_v11 = vpop.xlane.xlu1 %3696 }
 0x50f   :  { %v5002_v63 = vpop.eup %5001  ;;  %5007 = vlog2.f32 %v3697_v11 }
 0x510   :  { %v3755_v42 = vmul.f32 0.6931472, %v5002_v63 }
 0x511   :  { %v5004_v56 = vpop.eup %5003 }
 0x512   :  { %v3804_v0 = vsub.f32 %v5973_v55, %v3755_v42  ;;  %v3757_v44 = vmul.f32 0.6931472, %v5004_v56 }
 0x514   :  { %3836 = vst [vmem:[#allocation10 + $0x70] sm:$0xff] %v3804_v0  ;;  %v3805_v2 = vsub.f32 %v5977_v54, %v3757_v44  ;;  %v3699_v46 = vpop.xlane.xlu0 %3698 }
 0x515   :  { %5009 = vlog2.f32 %v3699_v46 }
 0x516   :  { %3837 = vst [vmem:[#allocation10 + $0x78] sm:$0xff] %v3805_v2  ;;  %v3701_v49 = vpop.xlane.xlu1 %3700 }
 0x517   :  { %v5006_v24 = vpop.eup %5005  ;;  %5011 = vlog2.f32 %v3701_v49 }
 0x518   :  { %v3759_v8 = vmul.f32 0.6931472, %v5006_v24 }
 0x519   :  { %v5008_v5 = vpop.eup %5007 }
 0x51a   :  { %v3806_v6 = vsub.f32 %v5981_v32, %v3759_v8  ;;  %v3761_v48 = vmul.f32 0.6931472, %v5008_v5 }
 0x51c   :  { %3838 = vst [vmem:[#allocation10 + $0x80] sm:$0xff] %v3806_v6  ;;  %v3807_v10 = vsub.f32 %v5985_v26, %v3761_v48  ;;  %v3703_v47 = vpop.xlane.xlu0 %3702 }
 0x51d   :  { %5013 = vlog2.f32 %v3703_v47 }
 0x51e   :  { %3839 = vst [vmem:[#allocation10 + $0x88] sm:$0xff] %v3807_v10  ;;  %v3705_v55 = vpop.xlane.xlu1 %3704 }
 0x51f   :  { %v5010_v23 = vpop.eup %5009  ;;  %5015 = vlog2.f32 %v3705_v55 }
 0x520   :  { %v3763_v54 = vmul.f32 0.6931472, %v5010_v23 }
 0x521   :  { %v5012_v30 = vpop.eup %5011 }
 0x522   :  { %v3808_v20 = vsub.f32 %v5989_v15, %v3763_v54  ;;  %v3765_v45 = vmul.f32 0.6931472, %v5012_v30 }
 0x524   :  { %3840 = vst [vmem:[#allocation10 + $0x90] sm:$0xff] %v3808_v20  ;;  %v3809_v38 = vsub.f32 %v5993_v3, %v3765_v45  ;;  %v3707_v51 = vpop.xlane.xlu0 %3706 }
 0x525   :  { %5017 = vlog2.f32 %v3707_v51 }
 0x526   :  { %3841 = vst [vmem:[#allocation10 + $0x98] sm:$0xff] %v3809_v38  ;;  %v3709_v32 = vpop.xlane.xlu1 %3708 }
 0x527   :  { %v5014_v34 = vpop.eup %5013  ;;  %5019 = vlog2.f32 %v3709_v32 }
 0x528   :  { %v3767_v26 = vmul.f32 0.6931472, %v5014_v34 }
 0x529   :  { %v5016_v14 = vpop.eup %5015 }
 0x52a   :  { %v3810_v60 = vsub.f32 %v5997_v31, %v3767_v26  ;;  %v3769_v18 = vmul.f32 0.6931472, %v5016_v14 }
 0x52c   :  { %3842 = vst [vmem:[#allocation10 + $0xa0] sm:$0xff] %v3810_v60  ;;  %v3811_v50 = vsub.f32 %v6001_v40, %v3769_v18  ;;  %v3711_v21 = vpop.xlane.xlu0 %3710 }
 0x52d   :  { %5021 = vlog2.f32 %v3711_v21 }
 0x52e   :  { %3843 = vst [vmem:[#allocation10 + $0xa8] sm:$0xff] %v3811_v50  ;;  %v3713_v15 = vpop.xlane.xlu1 %3712 }
 0x52f   :  { %v5018_v4 = vpop.eup %5017  ;;  %5023 = vlog2.f32 %v3713_v15 }
 0x530   :  { %v3771_v3 = vmul.f32 0.6931472, %v5018_v4 }
 0x531   :  { %v5020_v27 = vpop.eup %5019 }
 0x532   :  { %v3812_v37 = vsub.f32 %v6005_v29, %v3771_v3  ;;  %v3773_v41 = vmul.f32 0.6931472, %v5020_v27 }
 0x534   :  { %3844 = vst [vmem:[#allocation10 + $0xb0] sm:$0xff] %v3812_v37  ;;  %v3813_v57 = vsub.f32 %v6009_v9, %v3773_v41  ;;  %v3715_v36 = vpop.xlane.xlu0 %3714 }
 0x535   :  { %5025 = vlog2.f32 %v3715_v36 }
 0x536   :  { %3845 = vst [vmem:[#allocation10 + $0xb8] sm:$0xff] %v3813_v57  ;;  %v3717_v31 = vpop.xlane.xlu1 %3716 }
 0x537   :  { %v5022_v39 = vpop.eup %5021  ;;  %5027 = vlog2.f32 %v3717_v31 }
 0x538   :  { %v3775_v40 = vmul.f32 0.6931472, %v5022_v39 }
 0x539   :  { %v5024_v52 = vpop.eup %5023 }
 0x53a   :  { %v3814_v7 = vsub.f32 %v6013_v59, %v3775_v40  ;;  %v3777_v25 = vmul.f32 0.6931472, %v5024_v52 }
 0x53c   :  { %3846 = vst [vmem:[#allocation10 + $0xc0] sm:$0xff] %v3814_v7  ;;  %v3815_v1 = vsub.f32 %v6017_v62, %v3777_v25  ;;  %v3719_v43 = vpop.xlane.xlu0 %3718 }
 0x53d   :  { %5029 = vlog2.f32 %v3719_v43 }
 0x53e   :  { %3847 = vst [vmem:[#allocation10 + $0xc8] sm:$0xff] %v3815_v1  ;;  %v3721_v29 = vpop.xlane.xlu1 %3720 }
 0x53f   :  { %v5026_v58 = vpop.eup %5025  ;;  %5031 = vlog2.f32 %v3721_v29 }
 0x540   :  { %v3779_v9 = vmul.f32 0.6931472, %v5026_v58 }
 0x541   :  { %v5028_v35 = vpop.eup %5027 }
 0x542   :  { %v3816_v61 = vsub.f32 %v6021_v17, %v3779_v9  ;;  %v3781_v16 = vmul.f32 0.6931472, %v5028_v35 }
 0x544   :  { %3848 = vst [vmem:[#allocation10 + $0xd0] sm:$0xff] %v3816_v61  ;;  %v3817_v13 = vsub.f32 %v6025_v28, %v3781_v16  ;;  %v3723_v22 = vpop.xlane.xlu0 %3722 }
 0x545   :  { %5033 = vlog2.f32 %v3723_v22 }
 0x546   :  { %3849 = vst [vmem:[#allocation10 + $0xd8] sm:$0xff] %v3817_v13  ;;  %v3725_v59 = vpop.xlane.xlu1 %3724 }
 0x547   :  { %v5030_v11 = vpop.eup %5029  ;;  %5035 = vlog2.f32 %v3725_v59 }
 0x548   :  { %v3783_v62 = vmul.f32 0.6931472, %v5030_v11 }
 0x549   :  { %v5032_v63 = vpop.eup %5031 }
 0x54a   :  { %v3818_v42 = vsub.f32 %v6029_v53, %v3783_v62  ;;  %v3785_v56 = vmul.f32 0.6931472, %v5032_v63 }
 0x54c   :  { %3850 = vst [vmem:[#allocation10 + $0xe0] sm:$0xff] %v3818_v42  ;;  %v3819_v0 = vsub.f32 %v6033_v33, %v3785_v56 }
 0x54e   :  { %3851 = vst [vmem:[#allocation10 + $0xe8] sm:$0xff] %v3819_v0 }
 0x54f   :  { %v5034_v17 = vpop.eup %5033 }
 0x550   :  { %v3787_v44 = vmul.f32 0.6931472, %v5034_v17 }
 0x551   :  { %v5036_v28 = vpop.eup %5035 }
 0x552   :  { %v3820_v2 = vsub.f32 %v6037_v12, %v3787_v44  ;;  %v3789_v46 = vmul.f32 0.6931472, %v5036_v28 }
 0x554   :  { %3852 = vst [vmem:[#allocation10 + $0xf0] sm:$0xff] %v3820_v2  ;;  %v3821_v49 = vsub.f32 %v6041_v19, %v3789_v46 }
 0x556   :  { %3853 = vst [vmem:[#allocation10 + $0xf8] sm:$0xff] %v3821_v49 }
 0x557   :  { %5136 = shalt.err (!%p5133_p8)
}
 0x558   :  { %s5137_s11 = scalar_lea.hbm %s6095_s7, 4096 }
 0x559   :  { %p5138_p9 = scmp.ne.s32.totalorder %s6095_s7, %s5137_s11  ;;  %p5141_p10 = scmp.lt.u32.totalorder %s5137_s11, %s6095_s7 }
 0x55b   :  { %p5143_p11 = pnand %p5141_p10, %p5138_p9 }
 0x55d   :  { %5146 = shalt.err (!%p5143_p11)
}
 0x55e   :  { %s5164_s27 = smov 128   ;;  %s5165_s17 = smov 8  }
 0x55f   :  { %3865 = dma.vmem_to_hbm [thread:$0]  %s3860_s30, 4096, %s6095_s7, [#allocation4], %s5164_s27, %s5164_s27, %s5165_s17  }
 0x560   :  { %5153 = dma.done.wait [#allocation4], 4096  }
 0x561   :  { %5154 = vsyncadd [#allocation4], 4294963200 }
 0x562   :  { %3869 = vsyncpa [#allocation3], 1 }
 0x563   :  { %3870 = vsyncpa [#allocation6], 1 }
 0x564   :  { %3871 = vsyncpa [#allocation9], 1 }
 0x565   :  { %3872 = vsyncpa [#allocation4], 1 }

// kernel: tpu_custom_call.1
= control target key start
LH: loop header
LB: loop body
LE: loop exit
PB: predicated region body
PF: predicated region fallthrough
CT: control target
= control target key end

     0   :  { %12 = vsyncpa [#allocation3], 0  ;;  %s6088_s0 = inlined_call_operand.hbm [shape: f32[256,256], index: 0, kind: input, shape index: {}]   ;;  %s6089_s1 = inlined_call_operand.hbm [shape: bf16[256,512], index: 1, kind: input, shape index: {}]   ;;  %s6090_s2 = inlined_call_operand.vmem [shape: f32[1,512], index: 2, kind: input, shape index: {}]   ;;  %s6091_s3 = inlined_call_operand.hbm [shape: bf16[512,512], index: 3, kind: input, shape index: {}]   ;;  %s6092_s4 = inlined_call_operand.vmem [shape: f32[1,512], index: 4, kind: input, shape index: {}]   ;;  %s6093_s5 = inlined_call_operand.hbm [shape: bf16[512,128], index: 5, kind: input, shape index: {}]   ;;  %s6094_s6 = inlined_call_operand.vmem [shape: f32[1,128], index: 6, kind: input, shape index: {}]   ;;  %s6095_s7 = inlined_call_operand.hbm [shape: f32[256,128], index: 7, kind: output, shape index: {}]  }
   0x1   :  { %13 = vsyncpa [#allocation6], 0 }
   0x2   :  { %14 = vsyncpa [#allocation9], 0 }
   0x3   :  { %15 = vsyncpa [#allocation4], 0  ;;  %s5155_s24 = smov [#allocation5]   ;;  %s5156_s26 = smov [#allocation2]  }
   0x4   :  { %s33_s25 = sshll.u32 %s5155_s24, 4  ;;  %s21_s27 = sshll.u32 %s5156_s26, 4  ;;  %s34_s25 = int_to_ptr.vmem [resolvable:$true] %s33_s25  ;;  %s5206_s27 = int_to_ptr.vmem [resolvable:$true] %s21_s27 }
   0x5   :  { %s5037_s30 = scalar_lea.hbm %s6089_s1, 8192 }
   0x6   :  { %p5038_p0 = scmp.ne.s32.totalorder %s6089_s1, %s5037_s30  ;;  %p5041_p1 = scmp.lt.u32.totalorder %s5037_s30, %s6089_s1 }
   0x8   :  { %p5043_p2 = pnand %p5041_p1, %p5038_p0 }
   0xa   :  { %5046 = shalt.err (!%p5043_p2)
}
   0xb   :  { %s5047_s12 = scalar_lea.vmem %s34_s25, 8192  ;;  %p5052_p4 = scmp.lt.s32.totalorder %s34_s25, %s34_s25 }
   0xc   :  { %p5048_p3 = scmp.ne.s32.totalorder %s34_s25, %s5047_s12  ;;  %p5053_p5 = scmp.lt.s32.totalorder %s5047_s12, %s5047_s12 }
   0xe   :  { %p5054_p6 = por %p5053_p5, %p5052_p4 }
  0x10   :  { %p5055_p7 = pnand %p5054_p6, %p5048_p3 }
  0x12   :  { %5058 = shalt.err (!%p5055_p7)
}
  0x13   :  { %s5157_s13 = smov 256   ;;  %s5158_s14 = smov 16  }
  0x14   :  { %39 = dma.hbm_to_vmem [thread:$0]  %s6089_s1, 8192, %s34_s25, [#allocation6], %s5157_s13, %s5157_s13, %s5158_s14  }
  0x15   :  { %s5059_s19 = scalar_lea.hbm %s6088_s0, 8192 }
  0x16   :  { %p5060_p8 = scmp.ne.s32.totalorder %s6088_s0, %s5059_s19  ;;  %p5063_p9 = scmp.lt.u32.totalorder %s5059_s19, %s6088_s0 }
  0x18   :  { %p5065_p10 = pnand %p5063_p9, %p5060_p8 }
  0x1a   :  { %5068 = shalt.err (!%p5065_p10)
}
  0x1b   :  { %s5069_s24 = scalar_lea.vmem %s5206_s27, 8192  ;;  %p5074_p12 = scmp.lt.s32.totalorder %s5206_s27, %s5206_s27 }
  0x1c   :  { %p5070_p11 = scmp.ne.s32.totalorder %s5206_s27, %s5069_s24  ;;  %p5075_p13 = scmp.lt.s32.totalorder %s5069_s24, %s5069_s24 }
  0x1e   :  { %p5076_p0 = por %p5075_p13, %p5074_p12 }
  0x20   :  { %p5077_p1 = pnand %p5076_p0, %p5070_p11 }
  0x22   :  { %5080 = shalt.err (!%p5077_p1)
}
  0x23   :  { %27 = dma.hbm_to_vmem [thread:$0]  %s6088_s0, 8192, %s5206_s27, [#allocation3], %s5157_s13, %s5157_s13, %s5158_s14  }
  0x24   :  { %s5159_s26 = smov [#allocation7]   ;;  %s5160_s29 = smov [#allocation8]  }
  0x25   :  { %s47_s28 = sshll.u32 %s5159_s26, 4  ;;  %s61_s30 = sshll.u32 %s5160_s29, 4  ;;  %s48_s28 = int_to_ptr.vmem [resolvable:$true] %s47_s28  ;;  %s5243_s30 = int_to_ptr.vmem [resolvable:$true] %s61_s30 }
  0x26   :  { %s5081_s10 = scalar_lea.hbm %s6091_s3, 16384 }
  0x27   :  { %p5082_p2 = scmp.ne.s32.totalorder %s6091_s3, %s5081_s10  ;;  %p5085_p3 = scmp.lt.u32.totalorder %s5081_s10, %s6091_s3 }
  0x29   :  { %p5087_p4 = pnand %p5085_p3, %p5082_p2 }
  0x2b   :  { %5090 = shalt.err (!%p5087_p4)
}
  0x2c   :  { %s5091_s0 = scalar_lea.vmem %s48_s28, 16384  ;;  %p5096_p6 = scmp.lt.s32.totalorder %s48_s28, %s48_s28 }
  0x2d   :  { %p5092_p5 = scmp.ne.s32.totalorder %s48_s28, %s5091_s0  ;;  %p5097_p7 = scmp.lt.s32.totalorder %s5091_s0, %s5091_s0 }
  0x2f   :  { %p5098_p8 = por %p5097_p7, %p5096_p6 }
  0x31   :  { %p5099_p9 = pnand %p5098_p8, %p5092_p5 }
  0x33   :  { %5102 = shalt.err (!%p5099_p9)
}
  0x34   :  { %53 = dma.hbm_to_vmem [thread:$0]  %s6091_s3, 16384, %s48_s28, [#allocation6], %s5157_s13, %s5157_s13, %s5158_s14  }
  0x35   :  { %s5103_s20 = scalar_lea.hbm %s6093_s5, 4096 }
  0x36   :  { %p5104_p10 = scmp.ne.s32.totalorder %s6093_s5, %s5103_s20  ;;  %p5107_p11 = scmp.lt.u32.totalorder %s5103_s20, %s6093_s5 }
  0x38   :  { %p5109_p12 = pnand %p5107_p11, %p5104_p10 }
  0x3a   :  { %5112 = shalt.err (!%p5109_p12)
}
  0x3b   :  { %s5113_s1 = scalar_lea.vmem %s5243_s30, 4096  ;;  %p5118_p0 = scmp.lt.s32.totalorder %s5243_s30, %s5243_s30 }
  0x3c   :  { %p5114_p13 = scmp.ne.s32.totalorder %s5243_s30, %s5113_s1  ;;  %p5119_p1 = scmp.lt.s32.totalorder %s5113_s1, %s5113_s1 }
  0x3e   :  { %p5120_p2 = por %p5119_p1, %p5118_p0 }
  0x40   :  { %p5121_p3 = pnand %p5120_p2, %p5114_p13 }
  0x42   :  { %5124 = shalt.err (!%p5121_p3)
}
  0x43   :  { %s5161_s3 = smov 64   ;;  %s5162_s13 = smov 4  }
  0x44   :  { %67 = dma.hbm_to_vmem [thread:$0]  %s6093_s5, 4096, %s5243_s30, [#allocation9], %s5161_s3, %s5161_s3, %s5162_s13  }
  0x45   :  { %5147 = dma.done.wait [#allocation3], 8192  }
  0x46   :  { %5148 = vsyncadd [#allocation3], 4294959104 }
  0x47   :  { %5149 = dma.done.wait [#allocation6], 24576  }
  0x48   :  { %5150 = vsyncadd [#allocation6], 4294942720 }
  0x49   :  { %5151 = dma.done.wait [#allocation9], 4096  }
  0x4a   :  { %5152 = vsyncadd [#allocation9], 4294963200  ;;  %v4589_v0 = vld [vmem:[#allocation5 + $0x4] ss:$16 sps:$4 sm:$0xff]   ;;  %v4591_v1 = vld [vmem:[#allocation5] ss:$16 sps:$4 sm:$0xff]  }
  0x4b   :  { %585 = vmatprep.subr.bf16.mxu0 %v4589_v0  ;;  %v4592_v2 = vld [vmem:[#allocation5 + $0x24] ss:$16 sps:$4 sm:$0xff]   ;;  %v4594_v3 = vld [vmem:[#allocation5 + $0x20] ss:$16 sps:$4 sm:$0xff]   ;;  %v84_v13 = vld [vmem:[#allocation2 + $0x8] sm:$0xff] }
  0x4c   :  { %586 = vmatpush1.bf16.msra.mxu0 %v4591_v1  ;;  %v4595_v4 = vld [vmem:[#allocation5 + $0x44] ss:$16 sps:$4 sm:$0xff]   ;;  %v4597_v5 = vld [vmem:[#allocation5 + $0x40] ss:$16 sps:$4 sm:$0xff]   ;;  %v86_v14 = vld [vmem:[#allocation2 + $0x18] sm:$0xff] }
  0x4d   :  { %587 = vmatprep.subr.bf16.mxu0 %v4592_v2  ;;  %v4598_v6 = vld [vmem:[#allocation5 + $0x64] ss:$16 sps:$4 sm:$0xff]   ;;  %v4600_v7 = vld [vmem:[#allocation5 + $0x60] ss:$16 sps:$4 sm:$0xff]   ;;  %v148_v15 = vpack.c.bf16 %v86_v14, %v84_v13  ;;  %v4637_v19 = vld [vmem:[#allocation5 + $0xc] ss:$16 sps:$4 sm:$0xff]  }
  0x4e   :  { %v4601_v8 = vld [vmem:[#allocation5 + $0x84] ss:$16 sps:$4 sm:$0xff]   ;;  %v4603_v9 = vld [vmem:[#allocation5 + $0x80] ss:$16 sps:$4 sm:$0xff]   ;;  %v4639_v20 = vld [vmem:[#allocation5 + $0x8] ss:$16 sps:$4 sm:$0xff]   ;;  %778 = vmatprep.subr.bf16.mxu1 %v4637_v19 }
  0x4f   :  { %v4604_v10 = vld [vmem:[#allocation5 + $0xa4] ss:$16 sps:$4 sm:$0xff]   ;;  %v4606_v11 = vld [vmem:[#allocation5 + $0xa0] ss:$16 sps:$4 sm:$0xff]   ;;  %617 = vmatprep.mubr.bf16.mxu0 %v148_v15  ;;  %810 = vmatprep.mubr.bf16.mxu1 %v148_v15  ;;  %v4640_v22 = vld [vmem:[#allocation5 + $0x2c] ss:$16 sps:$4 sm:$0xff]  }
  0x50   :  { %588 = vmatpush1.bf16.msra.mxu0 %v4594_v3  ;;  %v4607_v12 = vld [vmem:[#allocation5 + $0xc4] ss:$16 sps:$4 sm:$0xff]   ;;  %v4609_v16 = vld [vmem:[#allocation5 + $0xc0] ss:$16 sps:$4 sm:$0xff]   ;;  %779 = vmatpush1.bf16.msra.mxu1 %v4639_v20  ;;  %v4642_v23 = vld [vmem:[#allocation5 + $0x28] ss:$16 sps:$4 sm:$0xff]  }
  0x51   :  { %589 = vmatprep.subr.bf16.mxu0 %v4595_v4  ;;  %v4610_v17 = vld [vmem:[#allocation5 + $0xe4] ss:$16 sps:$4 sm:$0xff]   ;;  %v4612_v18 = vld [vmem:[#allocation5 + $0xe0] ss:$16 sps:$4 sm:$0xff]   ;;  %v4643_v25 = vld [vmem:[#allocation5 + $0x4c] ss:$16 sps:$4 sm:$0xff]   ;;  %780 = vmatprep.subr.bf16.mxu1 %v4640_v22 }
  0x52   :  { %v4613_v21 = vld [vmem:[#allocation5 + $0x104] ss:$16 sps:$4 sm:$0xff]   ;;  %v4615_v24 = vld [vmem:[#allocation5 + $0x100] ss:$16 sps:$4 sm:$0xff]   ;;  %v4645_v27 = vld [vmem:[#allocation5 + $0x48] ss:$16 sps:$4 sm:$0xff]  }
  0x53   :  { %v4616_v26 = vld [vmem:[#allocation5 + $0x124] ss:$16 sps:$4 sm:$0xff]   ;;  %v4618_v28 = vld [vmem:[#allocation5 + $0x120] ss:$16 sps:$4 sm:$0xff]   ;;  %v4646_v29 = vld [vmem:[#allocation5 + $0x6c] ss:$16 sps:$4 sm:$0xff]  }
  0x54   :  { %590 = vmatpush1.bf16.msra.mxu0 %v4597_v5  ;;  %781 = vmatpush1.bf16.msra.mxu1 %v4642_v23  ;;  %v4619_v30 = vld [vmem:[#allocation5 + $0x144] ss:$16 sps:$4 sm:$0xff]   ;;  %v4648_v31 = vld [vmem:[#allocation5 + $0x68] ss:$16 sps:$4 sm:$0xff]   ;;  %v4621_v32 = vld [vmem:[#allocation5 + $0x140] ss:$16 sps:$4 sm:$0xff]  }
  0x55   :  { %591 = vmatprep.subr.bf16.mxu0 %v4598_v6  ;;  %782 = vmatprep.subr.bf16.mxu1 %v4643_v25  ;;  %v4649_v33 = vld [vmem:[#allocation5 + $0x8c] ss:$16 sps:$4 sm:$0xff]   ;;  %v4622_v34 = vld [vmem:[#allocation5 + $0x164] ss:$16 sps:$4 sm:$0xff]   ;;  %v4651_v35 = vld [vmem:[#allocation5 + $0x88] ss:$16 sps:$4 sm:$0xff]  }
  0x56   :  { %v4624_v36 = vld [vmem:[#allocation5 + $0x160] ss:$16 sps:$4 sm:$0xff]   ;;  %v4652_v37 = vld [vmem:[#allocation5 + $0xac] ss:$16 sps:$4 sm:$0xff]   ;;  %v4625_v38 = vld [vmem:[#allocation5 + $0x184] ss:$16 sps:$4 sm:$0xff]  }
  0x57   :  { %v4654_v39 = vld [vmem:[#allocation5 + $0xa8] ss:$16 sps:$4 sm:$0xff]   ;;  %v4627_v40 = vld [vmem:[#allocation5 + $0x180] ss:$16 sps:$4 sm:$0xff]   ;;  %v4655_v41 = vld [vmem:[#allocation5 + $0xcc] ss:$16 sps:$4 sm:$0xff]  }
  0x58   :  { %592 = vmatpush1.bf16.msra.mxu0 %v4600_v7  ;;  %783 = vmatpush1.bf16.msra.mxu1 %v4645_v27  ;;  %v4628_v42 = vld [vmem:[#allocation5 + $0x1a4] ss:$16 sps:$4 sm:$0xff]   ;;  %v4657_v43 = vld [vmem:[#allocation5 + $0xc8] ss:$16 sps:$4 sm:$0xff]   ;;  %v4630_v44 = vld [vmem:[#allocation5 + $0x1a0] ss:$16 sps:$4 sm:$0xff]  }
  0x59   :  { %593 = vmatprep.subr.bf16.mxu0 %v4601_v8  ;;  %784 = vmatprep.subr.bf16.mxu1 %v4646_v29  ;;  %v4658_v45 = vld [vmem:[#allocation5 + $0xec] ss:$16 sps:$4 sm:$0xff]   ;;  %v4631_v46 = vld [vmem:[#allocation5 + $0x1c4] ss:$16 sps:$4 sm:$0xff]   ;;  %v4660_v47 = vld [vmem:[#allocation5 + $0xe8] ss:$16 sps:$4 sm:$0xff]  }
  0x5a   :  { %v4633_v48 = vld [vmem:[#allocation5 + $0x1c0] ss:$16 sps:$4 sm:$0xff]   ;;  %v4661_v49 = vld [vmem:[#allocation5 + $0x10c] ss:$16 sps:$4 sm:$0xff]   ;;  %v4634_v50 = vld [vmem:[#allocation5 + $0x1e4] ss:$16 sps:$4 sm:$0xff]  }
  0x5b   :  { %v4636_v51 = vld [vmem:[#allocation5 + $0x1e0] ss:$16 sps:$4 sm:$0xff]   ;;  %v4663_v54 = vld [vmem:[#allocation5 + $0x108] ss:$16 sps:$4 sm:$0xff]   ;;  %v4664_v56 = vld [vmem:[#allocation5 + $0x12c] ss:$16 sps:$4 sm:$0xff]  }
  0x5c   :  { %594 = vmatpush1.bf16.msra.mxu0 %v4603_v9  ;;  %785 = vmatpush1.bf16.msra.mxu1 %v4648_v31  ;;  %v83_v52 = vld [vmem:[#allocation2] sm:$0xff]  ;;  %v85_v53 = vld [vmem:[#allocation2 + $0x10] sm:$0xff]  ;;  %v88_v55 = vld [vmem:[#allocation2 + $0x28] sm:$0xff] }
  0x5d   :  { %595 = vmatprep.subr.bf16.mxu0 %v4604_v10  ;;  %786 = vmatprep.subr.bf16.mxu1 %v4649_v33  ;;  %v90_v57 = vld [vmem:[#allocation2 + $0x38] sm:$0xff]  ;;  %v4687_v58 = vld [vmem:[#allocation7 + $0x4] ss:$16 sps:$4 sm:$0xff]   ;;  %v5277_v59 = vpack.c.bf16 %v85_v53, %v83_v52  ;;  %v4685_v63 = vld [vmem:[#allocation7] ss:$16 sps:$4 sm:$0xff]  }
  0x5e   :  { %v4666_v60 = vld [vmem:[#allocation5 + $0x128] ss:$16 sps:$4 sm:$0xff]   ;;  %v5279_v61 = vpack.c.bf16 %v90_v57, %v88_v55  ;;  %v4667_v62 = vld [vmem:[#allocation5 + $0x14c] ss:$16 sps:$4 sm:$0xff]   ;;  %v87_v0 = vld [vmem:[#allocation2 + $0x20] sm:$0xff] }
  0x5f   :  { %v4693_v1 = vld [vmem:[#allocation7 + $0x24] ss:$16 sps:$4 sm:$0xff]   ;;  %v4669_v3 = vld [vmem:[#allocation5 + $0x148] ss:$16 sps:$4 sm:$0xff]   ;;  %v4670_v5 = vld [vmem:[#allocation5 + $0x16c] ss:$16 sps:$4 sm:$0xff]  }
  0x60   :  { %596 = vmatpush1.bf16.msra.mxu0 %v4606_v11  ;;  %787 = vmatpush1.bf16.msra.mxu1 %v4651_v35  ;;  %v89_v2 = vld [vmem:[#allocation2 + $0x30] sm:$0xff]  ;;  %v92_v4 = vld [vmem:[#allocation2 + $0x48] sm:$0xff]  ;;  %v94_v6 = vld [vmem:[#allocation2 + $0x58] sm:$0xff] }
  0x61   :  { %597 = vmatprep.subr.bf16.mxu0 %v4607_v12  ;;  %788 = vmatprep.subr.bf16.mxu1 %v4652_v37  ;;  %v4691_v7 = vld [vmem:[#allocation7 + $0x20] ss:$16 sps:$4 sm:$0xff]   ;;  %v4699_v8 = vld [vmem:[#allocation7 + $0x44] ss:$16 sps:$4 sm:$0xff]   ;;  %v5283_v9 = vpack.c.bf16 %v89_v2, %v87_v0  ;;  %v4672_v10 = vld [vmem:[#allocation5 + $0x168] ss:$16 sps:$4 sm:$0xff]   ;;  %v5285_v11 = vpack.c.bf16 %v94_v6, %v92_v4 }
  0x62   :  { %v4673_v12 = vld [vmem:[#allocation5 + $0x18c] ss:$16 sps:$4 sm:$0xff]   ;;  %v4697_v13 = vld [vmem:[#allocation7 + $0x40] ss:$16 sps:$4 sm:$0xff]   ;;  %v4711_v22 = vld [vmem:[#allocation7 + $0x84] ss:$16 sps:$4 sm:$0xff]  }
  0x63   :  { %v91_v14 = vld [vmem:[#allocation2 + $0x40] sm:$0xff]  ;;  %v93_v15 = vld [vmem:[#allocation2 + $0x50] sm:$0xff]  ;;  %v98_v19 = vld [vmem:[#allocation2 + $0x78] sm:$0xff] }
  0x64   :  { %598 = vmatpush1.bf16.msra.mxu0 %v4609_v16  ;;  %789 = vmatpush1.bf16.msra.mxu1 %v4654_v39  ;;  %v4705_v16 = vld [vmem:[#allocation7 + $0x64] ss:$16 sps:$4 sm:$0xff]   ;;  %v4676_v20 = vld [vmem:[#allocation5 + $0x1ac] ss:$16 sps:$4 sm:$0xff]   ;;  %v5289_v23 = vpack.c.bf16 %v93_v15, %v91_v14  ;;  %v4709_v27 = vld [vmem:[#allocation7 + $0x80] ss:$16 sps:$4 sm:$0xff]  }
  0x65   :  { %599 = vmatprep.subr.bf16.mxu0 %v4610_v17  ;;  %790 = vmatprep.subr.bf16.mxu1 %v4655_v41  ;;  %v96_v17 = vld [vmem:[#allocation2 + $0x68] sm:$0xff]  ;;  %v97_v29 = vld [vmem:[#allocation2 + $0x70] sm:$0xff]  ;;  %v102_v33 = vld [vmem:[#allocation2 + $0x98] sm:$0xff] }
  0x66   :  { %v5291_v25 = vpack.c.bf16 %v98_v19, %v96_v17  ;;  %v100_v31 = vld [vmem:[#allocation2 + $0x88] sm:$0xff]  ;;  %v4715_v35 = vld [vmem:[#allocation7 + $0xa0] ss:$16 sps:$4 sm:$0xff]   ;;  %v4747_v0 = vld [vmem:[#allocation7 + $0x144] ss:$16 sps:$4 sm:$0xff]  }
  0x67   :  { %v5297_v39 = vpack.c.bf16 %v102_v33, %v100_v31  ;;  %v4721_v41 = vld [vmem:[#allocation7 + $0xc0] ss:$16 sps:$4 sm:$0xff]   ;;  %v4694_v52 = vld [vmem:[#allocation7 + $0x28] ss:$16 sps:$4 sm:$0xff]   ;;  %v4714_v4 = vld [vmem:[#allocation7 + $0x8c] ss:$16 sps:$4 sm:$0xff]  }
  0x68   :  { %600 = vmatpush1.bf16.msra.mxu0 %v4612_v18  ;;  %791 = vmatpush1.bf16.msra.mxu1 %v4657_v43  ;;  %v4675_v18 = vld [vmem:[#allocation5 + $0x188] ss:$16 sps:$4 sm:$0xff]   ;;  %v101_v43 = vld [vmem:[#allocation2 + $0x90] sm:$0xff] }
  0x69   :  { %601 = vmatprep.subr.bf16.mxu0 %v4613_v21  ;;  %792 = vmatprep.subr.bf16.mxu1 %v4658_v45  ;;  %v4703_v21 = vld [vmem:[#allocation7 + $0x60] ss:$16 sps:$4 sm:$0xff]   ;;  %v104_v45 = vld [vmem:[#allocation2 + $0xa8] sm:$0xff]  ;;  %v4759_v14 = vld [vmem:[#allocation7 + $0x184] ss:$16 sps:$4 sm:$0xff]  }
  0x6a   :  { %v4733_v55 = vld [vmem:[#allocation7 + $0x100] ss:$16 sps:$4 sm:$0xff]   ;;  %v4706_v2 = vld [vmem:[#allocation7 + $0x68] ss:$16 sps:$4 sm:$0xff]  }
  0x6b   :  { %v105_v57 = vld [vmem:[#allocation2 + $0xb0] sm:$0xff]  ;;  %v4712_v6 = vld [vmem:[#allocation7 + $0x88] ss:$16 sps:$4 sm:$0xff]  }
  0x6c   :  { %602 = vmatpush1.bf16.msra.mxu0 %v4615_v24  ;;  %793 = vmatpush1.bf16.msra.mxu1 %v4660_v47  ;;  %v4678_v24 = vld [vmem:[#allocation5 + $0x1a8] ss:$16 sps:$4 sm:$0xff]  }
  0x6d   :  { %603 = vmatprep.subr.bf16.mxu0 %v4616_v26  ;;  %794 = vmatprep.subr.bf16.mxu1 %v4661_v49  ;;  %v4679_v26 = vld [vmem:[#allocation5 + $0x1cc] ss:$16 sps:$4 sm:$0xff]   ;;  %v4727_v49 = vld [vmem:[#allocation7 + $0xe0] ss:$16 sps:$4 sm:$0xff]   ;;  %v4718_v15 = vld [vmem:[#allocation7 + $0xa8] ss:$16 sps:$4 sm:$0xff]  }
  0x6e   :  { %v106_v47 = vld [vmem:[#allocation2 + $0xb8] sm:$0xff] }
  0x6f   :  { %v5305_v53 = vpack.c.bf16 %v106_v47, %v104_v45  ;;  %v119_v45 = vld [vmem:[#allocation2 + $0x120] sm:$0xff]  ;;  %v4756_v47 = vld [vmem:[#allocation7 + $0x16c] ss:$16 sps:$4 sm:$0xff]  }
  0x70   :  { %604 = vmatpush1.bf16.msra.mxu0 %v4618_v28  ;;  %795 = vmatpush1.bf16.msra.mxu1 %v4663_v54  ;;  %v95_v28 = vld [vmem:[#allocation2 + $0x60] sm:$0xff]  ;;  %v4702_v54 = vld [vmem:[#allocation7 + $0x4c] ss:$16 sps:$4 sm:$0xff]  }
  0x71   :  { %605 = vmatprep.subr.bf16.mxu0 %v4619_v30  ;;  %796 = vmatprep.subr.bf16.mxu1 %v4664_v56  ;;  %v4717_v30 = vld [vmem:[#allocation7 + $0xa4] ss:$16 sps:$4 sm:$0xff]   ;;  %v5295_v37 = vpack.c.bf16 %v97_v29, %v95_v28  ;;  %v4763_v28 = vld [vmem:[#allocation7 + $0x1a0] ss:$16 sps:$4 sm:$0xff]   ;;  %v4730_v29 = vld [vmem:[#allocation7 + $0xe8] ss:$16 sps:$4 sm:$0xff]  }
  0x72   :  { %v103_v56 = vld [vmem:[#allocation2 + $0xa0] sm:$0xff] }
  0x74   :  { %606 = vmatpush1.bf16.msra.mxu0 %v4621_v32  ;;  %797 = vmatpush1.bf16.msra.mxu1 %v4666_v60  ;;  %v4681_v32 = vld [vmem:[#allocation5 + $0x1c8] ss:$16 sps:$4 sm:$0xff]  }
  0x75   :  { %607 = vmatprep.subr.bf16.mxu0 %v4622_v34  ;;  %798 = vmatprep.subr.bf16.mxu1 %v4667_v62  ;;  %v4682_v34 = vld [vmem:[#allocation5 + $0x1ec] ss:$16 sps:$4 sm:$0xff]   ;;  %v4700_v60 = vld [vmem:[#allocation7 + $0x48] ss:$16 sps:$4 sm:$0xff]  }
  0x76   :  { %v110_v62 = vld [vmem:[#allocation2 + $0xd8] sm:$0xff] }
  0x78   :  { %608 = vmatpush1.bf16.msra.mxu0 %v4624_v36  ;;  %799 = vmatpush1.bf16.msra.mxu1 %v4669_v3  ;;  %v4723_v36 = vld [vmem:[#allocation7 + $0xc4] ss:$16 sps:$4 sm:$0xff]  }
  0x79   :  { %609 = vmatprep.subr.bf16.mxu0 %v4625_v38  ;;  %800 = vmatprep.subr.bf16.mxu1 %v4670_v5  ;;  %v4684_v38 = vld [vmem:[#allocation5 + $0x1e8] ss:$16 sps:$4 sm:$0xff]   ;;  %v4745_v5 = vld [vmem:[#allocation7 + $0x140] ss:$16 sps:$4 sm:$0xff]  }
  0x7c   :  { %610 = vmatpush1.bf16.msra.mxu0 %v4627_v40  ;;  %801 = vmatpush1.bf16.msra.mxu1 %v4672_v10  ;;  %v4690_v40 = vld [vmem:[#allocation7 + $0xc] ss:$16 sps:$4 sm:$0xff]   ;;  %v109_v10 = vld [vmem:[#allocation2 + $0xd0] sm:$0xff] }
  0x7d   :  { %611 = vmatprep.subr.bf16.mxu0 %v4628_v42  ;;  %802 = vmatprep.subr.bf16.mxu1 %v4673_v12  ;;  %v99_v42 = vld [vmem:[#allocation2 + $0x80] sm:$0xff]  ;;  %v4720_v12 = vld [vmem:[#allocation7 + $0xac] ss:$16 sps:$4 sm:$0xff]  }
  0x80   :  { %612 = vmatpush1.bf16.msra.mxu0 %v4630_v44  ;;  %803 = vmatpush1.bf16.msra.mxu1 %v4675_v18  ;;  %v4729_v44 = vld [vmem:[#allocation7 + $0xe4] ss:$16 sps:$4 sm:$0xff]   ;;  %v4757_v18 = vld [vmem:[#allocation7 + $0x180] ss:$16 sps:$4 sm:$0xff]  }
  0x81   :  { %613 = vmatprep.subr.bf16.mxu0 %v4631_v46  ;;  %804 = vmatprep.subr.bf16.mxu1 %v4676_v20  ;;  %v4688_v46 = vld [vmem:[#allocation7 + $0x8] ss:$16 sps:$4 sm:$0xff]   ;;  %v4765_v20 = vld [vmem:[#allocation7 + $0x1a4] ss:$16 sps:$4 sm:$0xff]  }
  0x84   :  { %614 = vmatpush1.bf16.msra.mxu0 %v4633_v48  ;;  %805 = vmatpush1.bf16.msra.mxu1 %v4678_v24  ;;  %v4696_v48 = vld [vmem:[#allocation7 + $0x2c] ss:$16 sps:$4 sm:$0xff]   ;;  %v113_v24 = vld [vmem:[#allocation2 + $0xf0] sm:$0xff] }
  0x85   :  { %615 = vmatprep.subr.bf16.mxu0 %v4634_v50  ;;  %806 = vmatprep.subr.bf16.mxu1 %v4679_v26  ;;  %v4735_v50 = vld [vmem:[#allocation7 + $0x104] ss:$16 sps:$4 sm:$0xff]   ;;  %v4732_v26 = vld [vmem:[#allocation7 + $0xec] ss:$16 sps:$4 sm:$0xff]  }
  0x88   :  { %616 = vmatpush1.bf16.msra.mxu0 %v4636_v51  ;;  %807 = vmatpush1.bf16.msra.mxu1 %v4681_v32  ;;  %v5302_v51 = vpack.c.bf16 %v101_v43, %v99_v42  ;;  %v4769_v32 = vld [vmem:[#allocation7 + $0x1c0] ss:$16 sps:$4 sm:$0xff]  }
  0x89   :  { %1953 = vmatprep.subr.bf16.mxu0 %v4687_v58  ;;  %808 = vmatprep.subr.bf16.mxu1 %v4682_v34  ;;  %v4741_v58 = vld [vmem:[#allocation7 + $0x124] ss:$16 sps:$4 sm:$0xff]   ;;  %v4736_v34 = vld [vmem:[#allocation7 + $0x108] ss:$16 sps:$4 sm:$0xff]  }
  0x8b   :  { %618 = vmatmul.mubr.bf16.vlgmr.msra.gmra.mrb[0].mxu0 %v5277_v59 }
  0x8c   :  { %627 = vmatprep.mubr.bf16.mxu0 %v5279_v61  ;;  %1954 = vmatpush1.bf16.msra.mxu0 %v4685_v63  ;;  %v4739_v63 = vld [vmem:[#allocation7 + $0x120] ss:$16 sps:$4 sm:$0xff]  }
  0x8d   :  { %1955 = vmatprep.subr.bf16.mxu0 %v4693_v1  ;;  %809 = vmatpush1.bf16.msra.mxu1 %v4684_v38  ;;  %v5310_v1 = vpack.c.bf16 %v105_v57, %v103_v56  ;;  %v4744_v38 = vld [vmem:[#allocation7 + $0x12c] ss:$16 sps:$4 sm:$0xff]   ;;  %v125_v56 = vld [vmem:[#allocation2 + $0x150] sm:$0xff] }
  0x8e   :  { %2339 = vmatprep.subr.bf16.mxu1 %v4690_v40  ;;  %v122_v40 = vld [vmem:[#allocation2 + $0x138] sm:$0xff] }
  0x8f   :  { %v4768_v57 = vld [vmem:[#allocation7 + $0x1ac] ss:$16 sps:$4 sm:$0xff]  }
  0x90   :  { %1956 = vmatpush1.bf16.msra.mxu0 %v4691_v7  ;;  %811 = vmatmul.mubr.bf16.vlgmr.msra.gmra.mrb[0].mxu1 %v5277_v59  ;;  %v108_v59 = vld [vmem:[#allocation2 + $0xc8] sm:$0xff]  ;;  %v4753_v7 = vld [vmem:[#allocation7 + $0x164] ss:$16 sps:$4 sm:$0xff]  }
  0x91   :  { %1957 = vmatprep.subr.bf16.mxu0 %v4699_v8  ;;  %2340 = vmatpush1.bf16.msra.mxu1 %v4688_v46  ;;  %v5313_v3 = vpack.c.bf16 %v110_v62, %v108_v59  ;;  %v107_v8 = vld [vmem:[#allocation2 + $0xc0] sm:$0xff]  ;;  %v121_v46 = vld [vmem:[#allocation2 + $0x130] sm:$0xff]  ;;  %v130_v59 = vld [vmem:[#allocation2 + $0x178] sm:$0xff] }
  0x92   :  { %820 = vmatprep.mubr.bf16.mxu1 %v5279_v61  ;;  %2341 = vmatprep.subr.bf16.mxu1 %v4696_v48  ;;  %v4708_v61 = vld [vmem:[#allocation7 + $0x6c] ss:$16 sps:$4 sm:$0xff]   ;;  %v5318_v17 = vpack.c.bf16 %v109_v10, %v107_v8  ;;  %v4777_v8 = vld [vmem:[#allocation7 + $0x1e4] ss:$16 sps:$4 sm:$0xff]  }
  0x93   :  { %628 = vmatmul.mubr.bf16.gmra.mrb[4].mxu0 %v5283_v9  ;;  %v124_v48 = vld [vmem:[#allocation2 + $0x148] sm:$0xff] }
  0x94   :  { %637 = vmatprep.mubr.bf16.mxu0 %v5285_v11  ;;  %1958 = vmatpush1.bf16.msra.mxu0 %v4697_v13  ;;  %v114_v13 = vld [vmem:[#allocation2 + $0xf8] sm:$0xff] }
  0x95   :  { %1959 = vmatprep.subr.bf16.mxu0 %v4705_v16  ;;  %2342 = vmatpush1.bf16.msra.mxu1 %v4694_v52  ;;  %v4726_v16 = vld [vmem:[#allocation7 + $0xcc] ss:$16 sps:$4 sm:$0xff]   ;;  %v165_v52 = vpack.c.bf16 %v121_v46, %v119_v45 }
  0x96   :  { %2343 = vmatprep.subr.bf16.mxu1 %v4702_v54  ;;  %v4760_v54 = vld [vmem:[#allocation7 + $0x188] ss:$16 sps:$4 sm:$0xff]   ;;  %v4774_v62 = vld [vmem:[#allocation7 + $0x1cc] ss:$16 sps:$4 sm:$0xff]  }
  0x97   :  { %v4780_v10 = vld [vmem:[#allocation7 + $0x1ec] ss:$16 sps:$4 sm:$0xff]  }
  0x98   :  { %1960 = vmatpush1.bf16.msra.mxu0 %v4703_v21  ;;  %821 = vmatmul.mubr.bf16.gmra.mrb[4].mxu1 %v5283_v9  ;;  %v112_v9 = vld [vmem:[#allocation2 + $0xe8] sm:$0xff] }
  0x99   :  { %1961 = vmatprep.subr.bf16.mxu0 %v4711_v22  ;;  %830 = vmatprep.mubr.bf16.mxu1 %v5285_v11  ;;  %v4751_v11 = vld [vmem:[#allocation7 + $0x160] ss:$16 sps:$4 sm:$0xff]   ;;  %v5321_v19 = vpack.c.bf16 %v114_v13, %v112_v9  ;;  %v4724_v21 = vld [vmem:[#allocation7 + $0xc8] ss:$16 sps:$4 sm:$0xff]  }
  0x9a   :  { %2344 = vmatpush1.bf16.msra.mxu1 %v4700_v60  ;;  %v111_v22 = vld [vmem:[#allocation2 + $0xe0] sm:$0xff]  ;;  %v4766_v60 = vld [vmem:[#allocation7 + $0x1a8] ss:$16 sps:$4 sm:$0xff]  }
  0x9b   :  { %638 = vmatmul.mubr.bf16.gmra.mrb[8].mxu0 %v5289_v23  ;;  %2345 = vmatprep.subr.bf16.mxu1 %v4708_v61  ;;  %v5326_v31 = vpack.c.bf16 %v113_v24, %v111_v22  ;;  %v4775_v9 = vld [vmem:[#allocation7 + $0x1e0] ss:$16 sps:$4 sm:$0xff]   ;;  %v4778_v13 = vld [vmem:[#allocation7 + $0x1e8] ss:$16 sps:$4 sm:$0xff]   ;;  %v4786_v22 = vld [vmem:[#allocation7 + $0x20c] ss:$16 sps:$4 sm:$0xff]  }
  0x9c   :  { %647 = vmatprep.mubr.bf16.mxu0 %v5291_v25  ;;  %1962 = vmatpush1.bf16.msra.mxu0 %v4709_v27  ;;  %v118_v27 = vld [vmem:[#allocation2 + $0x118] sm:$0xff] }
  0x9d   :  { %1963 = vmatprep.subr.bf16.mxu0 %v4717_v30  ;;  %v4738_v30 = vld [vmem:[#allocation7 + $0x10c] ss:$16 sps:$4 sm:$0xff]  }
  0x9e   :  { %2346 = vmatpush1.bf16.msra.mxu1 %v4706_v2  ;;  %v129_v2 = vld [vmem:[#allocation2 + $0x170] sm:$0xff] }
  0x9f   :  { %2347 = vmatprep.subr.bf16.mxu1 %v4714_v4  ;;  %v134_v4 = vld [vmem:[#allocation2 + $0x198] sm:$0xff] }
  0xa0   :  { %1964 = vmatpush1.bf16.msra.mxu0 %v4715_v35  ;;  %831 = vmatmul.mubr.bf16.gmra.mrb[8].mxu1 %v5289_v23  ;;  %v116_v23 = vld [vmem:[#allocation2 + $0x108] sm:$0xff]  ;;  %v115_v35 = vld [vmem:[#allocation2 + $0x100] sm:$0xff] }
  0xa1   :  { %1965 = vmatprep.subr.bf16.mxu0 %v4723_v36  ;;  %840 = vmatprep.mubr.bf16.mxu1 %v5291_v25  ;;  %v4771_v25 = vld [vmem:[#allocation7 + $0x1c4] ss:$16 sps:$4 sm:$0xff]   ;;  %v5329_v33 = vpack.c.bf16 %v118_v27, %v116_v23 }
  0xa2   :  { %2348 = vmatpush1.bf16.msra.mxu1 %v4712_v6  ;;  %v117_v36 = vld [vmem:[#allocation2 + $0x110] sm:$0xff]  ;;  %v139_v23 = vld [vmem:[#allocation2 + $0x1c0] sm:$0xff] }
  0xa3   :  { %648 = vmatmul.mubr.bf16.gmra.mrb[12].mxu0 %v5295_v37  ;;  %2349 = vmatprep.subr.bf16.mxu1 %v4720_v12  ;;  %v5334_v42 = vpack.c.bf16 %v117_v36, %v115_v35  ;;  %v133_v12 = vld [vmem:[#allocation2 + $0x190] sm:$0xff] }
  0xa4   :  { %657 = vmatprep.mubr.bf16.mxu0 %v5297_v39  ;;  %1966 = vmatpush1.bf16.msra.mxu0 %v4721_v41  ;;  %v4750_v41 = vld [vmem:[#allocation7 + $0x14c] ss:$16 sps:$4 sm:$0xff]   ;;  %v141_v27 = vld [vmem:[#allocation2 + $0x1d0] sm:$0xff] }
  0xa5   :  { %1967 = vmatprep.subr.bf16.mxu0 %v4729_v44  ;;  %v4748_v44 = vld [vmem:[#allocation7 + $0x148] ss:$16 sps:$4 sm:$0xff]  }
  0xa6   :  { %2350 = vmatpush1.bf16.msra.mxu1 %v4718_v15 }
  0xa7   :  { %2351 = vmatprep.subr.bf16.mxu1 %v4726_v16 }
  0xa8   :  { %1968 = vmatpush1.bf16.msra.mxu0 %v4727_v49  ;;  %841 = vmatmul.mubr.bf16.gmra.mrb[12].mxu1 %v5295_v37  ;;  %v120_v37 = vld [vmem:[#allocation2 + $0x128] sm:$0xff]  ;;  %v126_v49 = vld [vmem:[#allocation2 + $0x158] sm:$0xff] }
  0xa9   :  { %1969 = vmatprep.subr.bf16.mxu0 %v4735_v50  ;;  %850 = vmatprep.mubr.bf16.mxu1 %v5297_v39  ;;  %v4742_v39 = vld [vmem:[#allocation7 + $0x128] ss:$16 sps:$4 sm:$0xff]   ;;  %v5337_v43 = vpack.c.bf16 %v122_v40, %v120_v37 }
  0xaa   :  { %2352 = vmatpush1.bf16.msra.mxu1 %v4724_v21  ;;  %v4754_v50 = vld [vmem:[#allocation7 + $0x168] ss:$16 sps:$4 sm:$0xff]   ;;  %v4783_v21 = vld [vmem:[#allocation7 + $0x204] ss:$16 sps:$4 sm:$0xff]  }
  0xab   :  { %658 = vmatmul.mubr.bf16.gmra.mrb[16].mxu0 %v5302_v51  ;;  %2353 = vmatprep.subr.bf16.mxu1 %v4732_v26 }
  0xac   :  { %667 = vmatprep.mubr.bf16.mxu0 %v5305_v53  ;;  %1970 = vmatpush1.bf16.msra.mxu0 %v4733_v55  ;;  %v123_v55 = vld [vmem:[#allocation2 + $0x140] sm:$0xff] }
  0xad   :  { %1971 = vmatprep.subr.bf16.mxu0 %v4741_v58  ;;  %v128_v58 = vld [vmem:[#allocation2 + $0x168] sm:$0xff]  ;;  %v167_v61 = vpack.c.bf16 %v125_v56, %v123_v55  ;;  %v4781_v56 = vld [vmem:[#allocation7 + $0x200] ss:$16 sps:$4 sm:$0xff]  }
  0xae   :  { %2354 = vmatpush1.bf16.msra.mxu1 %v4730_v29  ;;  %v175_v29 = vpack.c.bf16 %v141_v27, %v139_v23  ;;  %v4802_v27 = vld [vmem:[#allocation7 + $0x268] ss:$16 sps:$4 sm:$0xff]  }
  0xaf   :  { %2355 = vmatprep.subr.bf16.mxu1 %v4738_v30 }
  0xb0   :  { %1972 = vmatpush1.bf16.msra.mxu0 %v4739_v63  ;;  %851 = vmatmul.mubr.bf16.gmra.mrb[16].mxu1 %v5302_v51  ;;  %v4762_v51 = vld [vmem:[#allocation7 + $0x18c] ss:$16 sps:$4 sm:$0xff]   ;;  %v170_v63 = vpack.c.bf16 %v130_v59, %v128_v58 }
  0xb1   :  { %1973 = vmatprep.subr.bf16.mxu0 %v4747_v0  ;;  %860 = vmatprep.mubr.bf16.mxu1 %v5305_v53  ;;  %v168_v53 = vpack.c.bf16 %v126_v49, %v124_v48  ;;  %v4772_v0 = vld [vmem:[#allocation7 + $0x1c8] ss:$16 sps:$4 sm:$0xff]  }
  0xb2   :  { %2356 = vmatpush1.bf16.msra.mxu1 %v4736_v34  ;;  %v245_v34 = vlaneseq }
  0xb3   :  { %668 = vmatmul.mubr.bf16.gmra.mrb[20].mxu0 %v5310_v1  ;;  %2357 = vmatprep.subr.bf16.mxu1 %v4744_v38  ;;  %v5355_v38 = vld [vmem:[%s6090_s2] sm:$0xf] }
  0xb4   :  { %677 = vmatprep.mubr.bf16.mxu0 %v5313_v3  ;;  %1974 = vmatpush1.bf16.msra.mxu0 %v4745_v5  ;;  %v5349_v35 = vshrl.u32 %v245_v34, 7 }
  0xb5   :  { %1975 = vmatprep.subr.bf16.mxu0 %v4753_v7  ;;  %v131_v7 = vld [vmem:[#allocation2 + $0x180] sm:$0xff] }
  0xb6   :  { %2358 = vmatpush1.bf16.msra.mxu1 %v4742_v39  ;;  %v171_v15 = vpack.c.bf16 %v133_v12, %v131_v7  ;;  %v247_v36 = vsub.s32 0, %v5349_v35  ;;  %v251_v37 = vsub.s32 1, %v5349_v35  ;;  %v4795_v7 = vld [vmem:[#allocation7 + $0x244] ss:$16 sps:$4 sm:$0xff]  }
  0xb7   :  { %2359 = vmatprep.subr.bf16.mxu1 %v4750_v41 }
  0xb8   :  { %1976 = vmatpush1.bf16.msra.mxu0 %v4751_v11  ;;  %861 = vmatmul.mubr.bf16.gmra.mrb[20].mxu1 %v5310_v1  ;;  %v127_v1 = vld [vmem:[#allocation2 + $0x160] sm:$0xff]  ;;  %v136_v11 = vld [vmem:[#allocation2 + $0x1a8] sm:$0xff]  ;;  %v5361_v40 = vrot.slane %v5355_v38, %v247_v36  ;;  %v5366_v39 = vrot.slane %v5355_v38, %v251_v37 }
  0xb9   :  { %1977 = vmatprep.subr.bf16.mxu0 %v4759_v14  ;;  %870 = vmatprep.mubr.bf16.mxu1 %v5313_v3  ;;  %v132_v3 = vld [vmem:[#allocation2 + $0x188] sm:$0xff]  ;;  %v169_v5 = vpack.c.bf16 %v129_v2, %v127_v1  ;;  %v138_v14 = vld [vmem:[#allocation2 + $0x1b8] sm:$0xff] }
  0xba   :  { %2360 = vmatpush1.bf16.msra.mxu1 %v4748_v44  ;;  %v172_v6 = vpack.c.bf16 %v134_v4, %v132_v3  ;;  %v174_v16 = vpack.c.bf16 %v138_v14, %v136_v11  ;;  %v4787_v3 = vld [vmem:[#allocation7 + $0x220] ss:$16 sps:$4 sm:$0xff]   ;;  %v4790_v4 = vld [vmem:[#allocation7 + $0x228] ss:$16 sps:$4 sm:$0xff]  }
  0xbb   :  { %678 = vmatmul.mubr.bf16.gmra.mrb[24].mxu0 %v5318_v17  ;;  %2361 = vmatprep.subr.bf16.mxu1 %v4756_v47  ;;  %v4793_v14 = vld [vmem:[#allocation7 + $0x240] ss:$16 sps:$4 sm:$0xff]  }
  0xbc   :  { %687 = vmatprep.mubr.bf16.mxu0 %v5321_v19  ;;  %1978 = vmatpush1.bf16.msra.mxu0 %v4757_v18  ;;  %v137_v18 = vld [vmem:[#allocation2 + $0x1b0] sm:$0xff] }
  0xbd   :  { %1979 = vmatprep.subr.bf16.mxu0 %v4765_v20  ;;  %v142_v20 = vld [vmem:[#allocation2 + $0x1d8] sm:$0xff] }
  0xbe   :  { %2362 = vmatpush1.bf16.msra.mxu1 %v4754_v50 }
  0xbf   :  { %2363 = vmatprep.subr.bf16.mxu1 %v4762_v51 }
  0xc0   :  { %1980 = vmatpush1.bf16.msra.mxu0 %v4763_v28  ;;  %871 = vmatmul.mubr.bf16.gmra.mrb[24].mxu1 %v5318_v17  ;;  %v135_v17 = vld [vmem:[#allocation2 + $0x1a0] sm:$0xff]  ;;  %v144_v28 = vld [vmem:[#allocation2 + $0x1e8] sm:$0xff] }
  0xc1   :  { %1981 = vmatprep.subr.bf16.mxu0 %v4771_v25  ;;  %880 = vmatprep.mubr.bf16.mxu1 %v5321_v19  ;;  %v140_v19 = vld [vmem:[#allocation2 + $0x1c8] sm:$0xff]  ;;  %v173_v24 = vpack.c.bf16 %v137_v18, %v135_v17  ;;  %v146_v25 = vld [vmem:[#allocation2 + $0x1f8] sm:$0xff]  ;;  %v4801_v18 = vld [vmem:[#allocation7 + $0x264] ss:$16 sps:$4 sm:$0xff]  }
  0xc2   :  { %2364 = vmatpush1.bf16.msra.mxu1 %v4760_v54  ;;  %v176_v26 = vpack.c.bf16 %v142_v20, %v140_v19  ;;  %v178_v30 = vpack.c.bf16 %v146_v25, %v144_v28  ;;  %v4804_v19 = vld [vmem:[#allocation7 + $0x26c] ss:$16 sps:$4 sm:$0xff]   ;;  %v4807_v28 = vld [vmem:[#allocation7 + $0x284] ss:$16 sps:$4 sm:$0xff]   ;;  %v255_v25 = vsub.s32 2, %v5349_v35 }
  0xc3   :  { %688 = vmatmul.mubr.bf16.gmra.mrb[28].mxu0 %v5326_v31  ;;  %2365 = vmatprep.subr.bf16.mxu1 %v4768_v57  ;;  %v4784_v57 = vld [vmem:[#allocation7 + $0x208] ss:$16 sps:$4 sm:$0xff]  }
  0xc4   :  { %697 = vmatprep.mubr.bf16.mxu0 %v5329_v33  ;;  %1982 = vmatpush1.bf16.msra.mxu0 %v4769_v32  ;;  %v145_v32 = vld [vmem:[#allocation2 + $0x1f0] sm:$0xff] }
  0xc5   :  { %1983 = vmatprep.subr.bf16.mxu0 %v4777_v8  ;;  %v4798_v8 = vld [vmem:[#allocation7 + $0x24c] ss:$16 sps:$4 sm:$0xff]  }
  0xc6   :  { %2366 = vmatpush1.bf16.msra.mxu1 %v4766_v60  ;;  %v4789_v60 = vld [vmem:[#allocation7 + $0x224] ss:$16 sps:$4 sm:$0xff]  }
  0xc7   :  { %2367 = vmatprep.subr.bf16.mxu1 %v4774_v62  ;;  %v4792_v62 = vld [vmem:[#allocation7 + $0x22c] ss:$16 sps:$4 sm:$0xff]  }
  0xc8   :  { %881 = vmatmul.mubr.bf16.gmra.mrb[28].mxu1 %v5326_v31  ;;  %1984 = vmatpush1.bf16.msra.mxu0 %v4775_v9  ;;  %v143_v31 = vld [vmem:[#allocation2 + $0x1e0] sm:$0xff] }
  0xc9   :  { %890 = vmatprep.mubr.bf16.mxu1 %v5329_v33  ;;  %2146 = vmatprep.subr.bf16.mxu0 %v4783_v21  ;;  %v177_v33 = vpack.c.bf16 %v145_v32, %v143_v31  ;;  %v4810_v31 = vld [vmem:[#allocation7 + $0x28c] ss:$16 sps:$4 sm:$0xff]   ;;  %v259_v32 = vsub.s32 3, %v5349_v35 }
  0xca   :  { %2368 = vmatpush1.bf16.msra.mxu1 %v4772_v0 }
  0xcb   :  { %698 = vmatmul.mubr.bf16.gmra.mrb[32].mxu0 %v5334_v42  ;;  %2369 = vmatprep.subr.bf16.mxu1 %v4780_v10 }
  0xcc   :  { %707 = vmatprep.mubr.bf16.mxu0 %v5337_v43 }
  0xce   :  { %2370 = vmatpush1.bf16.msra.mxu1 %v4778_v13 }
  0xcf   :  { %2532 = vmatprep.subr.bf16.mxu1 %v4786_v22 }
  0xd0   :  { %891 = vmatmul.mubr.bf16.gmra.mrb[32].mxu1 %v5334_v42 }
  0xd1   :  { %900 = vmatprep.mubr.bf16.mxu1 %v5337_v43 }
  0xd3   :  { %708 = vmatmul.mubr.bf16.gmra.mrb[36].mxu0 %v165_v52 }
  0xd4   :  { %717 = vmatprep.mubr.bf16.mxu0 %v168_v53 }
  0xd8   :  { %901 = vmatmul.mubr.bf16.gmra.mrb[36].mxu1 %v165_v52 }
  0xd9   :  { %910 = vmatprep.mubr.bf16.mxu1 %v168_v53 }
  0xdb   :  { %718 = vmatmul.mubr.bf16.gmra.mrb[40].mxu0 %v167_v61 }
  0xdc   :  { %727 = vmatprep.mubr.bf16.mxu0 %v170_v63 }
  0xe0   :  { %911 = vmatmul.mubr.bf16.gmra.mrb[40].mxu1 %v167_v61 }
  0xe1   :  { %920 = vmatprep.mubr.bf16.mxu1 %v170_v63 }
  0xe3   :  { %728 = vmatmul.mubr.bf16.gmra.mrb[44].mxu0 %v169_v5 }
  0xe4   :  { %737 = vmatprep.mubr.bf16.mxu0 %v172_v6 }
  0xe8   :  { %921 = vmatmul.mubr.bf16.gmra.mrb[44].mxu1 %v169_v5 }
  0xe9   :  { %930 = vmatprep.mubr.bf16.mxu1 %v172_v6 }
  0xeb   :  { %738 = vmatmul.mubr.bf16.gmra.mrb[48].mxu0 %v171_v15 }
  0xec   :  { %747 = vmatprep.mubr.bf16.mxu0 %v174_v16 }
  0xf0   :  { %931 = vmatmul.mubr.bf16.gmra.mrb[48].mxu1 %v171_v15  ;;  %v4796_v15 = vld [vmem:[#allocation7 + $0x248] ss:$16 sps:$4 sm:$0xff]  }
  0xf1   :  { %940 = vmatprep.mubr.bf16.mxu1 %v174_v16 }
  0xf3   :  { %748 = vmatmul.mubr.bf16.gmra.mrb[52].mxu0 %v173_v24 }
  0xf4   :  { %757 = vmatprep.mubr.bf16.mxu0 %v176_v26 }
  0xf8   :  { %941 = vmatmul.mubr.bf16.gmra.mrb[52].mxu1 %v173_v24 }
  0xf9   :  { %950 = vmatprep.mubr.bf16.mxu1 %v176_v26  ;;  %v4799_v26 = vld [vmem:[#allocation7 + $0x260] ss:$16 sps:$4 sm:$0xff]  }
  0xfb   :  { %758 = vmatmul.mubr.bf16.gmra.mrb[56].mxu0 %v175_v29 }
  0xfc   :  { %767 = vmatprep.mubr.bf16.mxu0 %v178_v30 }
 0x100   :  { %951 = vmatmul.mubr.bf16.gmra.mrb[56].mxu1 %v175_v29 }
 0x101   :  { %960 = vmatprep.mubr.bf16.mxu1 %v178_v30 }
 0x103   :  { %768 = vmatmul.mubr.bf16.gmra.mrb[60].mxu0 %v177_v33 }
 0x108   :  { %961 = vmatmul.mubr.bf16.gmra.mrb[60].mxu1 %v177_v33 }
 0x15e   :  { %v619_v41 = vpop.f32.mrb[0].mxu0 }
 0x15f   :  { %v620_v42 = vadd.f32 %v619_v41, %v5361_v40  ;;  %v621_v43 = vpop.f32.mrb[1].mxu0 }
 0x160   :  { %v622_v44 = vadd.f32 %v621_v43, %v5366_v39  ;;  %v623_v45 = vpop.f32.mrb[2].mxu0 }
 0x161   :  { %v624_v46 = vadd.f32 %v623_v45, %v5361_v40  ;;  %v625_v47 = vpop.f32.mrb[3].mxu0  ;;  %v971_v49 = vmax.f32 %v620_v42, 0.0  ;;  %v4808_v45 = vld [vmem:[#allocation7 + $0x288] ss:$16 sps:$4 sm:$0xff]  }
 0x162   :  { %v626_v48 = vadd.f32 %v625_v47, %v5366_v39  ;;  %v972_v51 = vmax.f32 %v622_v44, 0.0  ;;  %v4805_v44 = vld [vmem:[#allocation7 + $0x280] ss:$16 sps:$4 sm:$0xff]  }
 0x163   :  { %v975_v50 = vmax.f32 %v624_v46, 0.0  ;;  %v5385_v46 = vrot.slane %v5355_v38, %v255_v25 }
 0x164   :  { %v976_v52 = vmax.f32 %v626_v48, 0.0 }
 0x165   :  { %v1099_v53 = vpack.c.bf16 %v975_v50, %v971_v49  ;;  %v4813_v49 = vld [vmem:[#allocation7 + $0x2a4] ss:$16 sps:$4 sm:$0xff]   ;;  %v4816_v50 = vld [vmem:[#allocation7 + $0x2ac] ss:$16 sps:$4 sm:$0xff]  }
 0x166   :  { %v1100_v54 = vpack.c.bf16 %v976_v52, %v972_v51  ;;  %v629_v55 = vpop.f32.mrb[4].mxu0  ;;  %v5391_v51 = vrot.slane %v5355_v38, %v259_v32 }
 0x167   :  { %v630_v58 = vadd.f32 %v629_v55, %v5361_v40  ;;  %v631_v59 = vpop.f32.mrb[5].mxu0 }
 0x168   :  { %v632_v61 = vadd.f32 %v631_v59, %v5366_v39  ;;  %v633_v63 = vpop.f32.mrb[6].mxu0  ;;  %1985 = vmatprep.mubr.bf16.mxu0 %v1100_v54  ;;  %2371 = vmatprep.mubr.bf16.mxu1 %v1100_v54  ;;  %v4814_v59 = vld [vmem:[#allocation7 + $0x2a8] ss:$16 sps:$4 sm:$0xff]  }
 0x169   :  { %v634_v0 = vadd.f32 %v633_v63, %v5361_v40  ;;  %v635_v1 = vpop.f32.mrb[7].mxu0  ;;  %1986 = vmatmul.mubr.bf16.vlgmr.msra.gmra.mrb[64].mxu0 %v1099_v53  ;;  %2372 = vmatmul.mubr.bf16.vlgmr.msra.gmra.mrb[64].mxu1 %v1099_v53  ;;  %v979_v5 = vmax.f32 %v630_v58, 0.0 }
 0x16a   :  { %v636_v2 = vadd.f32 %v635_v1, %v5366_v39  ;;  %2147 = vmatpush1.bf16.msra.mxu0 %v4781_v56  ;;  %2533 = vmatpush1.bf16.msra.mxu1 %v4784_v57  ;;  %v980_v10 = vmax.f32 %v632_v61, 0.0  ;;  %v4811_v56 = vld [vmem:[#allocation7 + $0x2a0] ss:$16 sps:$4 sm:$0xff]   ;;  %v812_v57 = vpop.f32.mrb[0].mxu1 }
 0x16b   :  { %v983_v6 = vmax.f32 %v634_v0, 0.0  ;;  %2148 = vmatprep.subr.bf16.mxu0 %v4789_v60  ;;  %2534 = vmatprep.subr.bf16.mxu1 %v4792_v62  ;;  %v4819_v60 = vld [vmem:[#allocation7 + $0x2c4] ss:$16 sps:$4 sm:$0xff]   ;;  %v813_v38 = vadd.f32 %v812_v57, %v5385_v46  ;;  %v814_v62 = vpop.f32.mrb[1].mxu1  ;;  %v4822_v0 = vld [vmem:[#allocation7 + $0x2cc] ss:$16 sps:$4 sm:$0xff]  }
 0x16c   :  { %v984_v12 = vmax.f32 %v636_v2, 0.0  ;;  %v815_v1 = vadd.f32 %v814_v62, %v5391_v51  ;;  %v816_v2 = vpop.f32.mrb[2].mxu1 }
 0x16d   :  { %v1103_v9 = vpack.c.bf16 %v983_v6, %v979_v5  ;;  %v973_v5 = vmax.f32 %v813_v38, 0.0  ;;  %v817_v6 = vadd.f32 %v816_v2, %v5385_v46 }
 0x16e   :  { %v1104_v13 = vpack.c.bf16 %v984_v12, %v980_v10  ;;  %v639_v11 = vpop.f32.mrb[8].mxu0  ;;  %2149 = vmatpush1.bf16.msra.mxu0 %v4787_v3  ;;  %2535 = vmatpush1.bf16.msra.mxu1 %v4790_v4  ;;  %v974_v10 = vmax.f32 %v815_v1, 0.0 }
 0x16f   :  { %v640_v16 = vadd.f32 %v639_v11, %v5361_v40  ;;  %v641_v17 = vpop.f32.mrb[9].mxu0  ;;  %2150 = vmatprep.subr.bf16.mxu0 %v4795_v7  ;;  %2536 = vmatprep.subr.bf16.mxu1 %v4798_v8  ;;  %v818_v7 = vpop.f32.mrb[3].mxu1  ;;  %v4817_v11 = vld [vmem:[#allocation7 + $0x2c0] ss:$16 sps:$4 sm:$0xff]  }
 0x170   :  { %v642_v20 = vadd.f32 %v641_v17, %v5366_v39  ;;  %v643_v21 = vpop.f32.mrb[10].mxu0  ;;  %1995 = vmatprep.mubr.bf16.mxu0 %v1104_v13  ;;  %2381 = vmatprep.mubr.bf16.mxu1 %v1104_v13  ;;  %v819_v12 = vadd.f32 %v818_v7, %v5391_v51  ;;  %v4835_v7 = vld [vmem:[#allocation7 + $0x320] ss:$16 sps:$4 sm:$0xff]  }
 0x171   :  { %v644_v22 = vadd.f32 %v643_v21, %v5361_v40  ;;  %v645_v24 = vpop.f32.mrb[11].mxu0  ;;  %1996 = vmatmul.mubr.bf16.gmra.mrb[68].mxu0 %v1103_v9  ;;  %2382 = vmatmul.mubr.bf16.gmra.mrb[68].mxu1 %v1103_v9  ;;  %v987_v29 = vmax.f32 %v640_v16, 0.0 }
 0x172   :  { %v646_v23 = vadd.f32 %v645_v24, %v5366_v39  ;;  %2151 = vmatpush1.bf16.msra.mxu0 %v4793_v14  ;;  %2537 = vmatpush1.bf16.msra.mxu1 %v4796_v15  ;;  %v988_v33 = vmax.f32 %v642_v20, 0.0  ;;  %v4820_v14 = vld [vmem:[#allocation7 + $0x2c8] ss:$16 sps:$4 sm:$0xff]   ;;  %v977_v15 = vmax.f32 %v817_v6, 0.0  ;;  %v978_v20 = vmax.f32 %v819_v12, 0.0 }
 0x173   :  { %v991_v30 = vmax.f32 %v644_v22, 0.0  ;;  %2152 = vmatprep.subr.bf16.mxu0 %v4801_v18  ;;  %2538 = vmatprep.subr.bf16.mxu1 %v4804_v19  ;;  %v4825_v18 = vld [vmem:[#allocation7 + $0x2e4] ss:$16 sps:$4 sm:$0xff]   ;;  %v4828_v19 = vld [vmem:[#allocation7 + $0x2ec] ss:$16 sps:$4 sm:$0xff]  }
 0x174   :  { %v992_v34 = vmax.f32 %v646_v23, 0.0  ;;  %v5402_v24 = vpack.c.bf16 %v977_v15, %v973_v5 }
 0x175   :  { %v1107_v41 = vpack.c.bf16 %v991_v30, %v987_v29  ;;  %v822_v29 = vpop.f32.mrb[4].mxu1 }
 0x176   :  { %v1108_v42 = vpack.c.bf16 %v992_v34, %v988_v33  ;;  %v649_v43 = vpop.f32.mrb[12].mxu0  ;;  %2153 = vmatpush1.bf16.msra.mxu0 %v4799_v26  ;;  %2539 = vmatpush1.bf16.msra.mxu1 %v4802_v27  ;;  %v4823_v27 = vld [vmem:[#allocation7 + $0x2e0] ss:$16 sps:$4 sm:$0xff]   ;;  %v4831_v33 = vld [vmem:[#allocation7 + $0x304] ss:$16 sps:$4 sm:$0xff]   ;;  %v823_v34 = vadd.f32 %v822_v29, %v5385_v46 }
 0x177   :  { %v650_v47 = vadd.f32 %v649_v43, %v5361_v40  ;;  %v651_v48 = vpop.f32.mrb[13].mxu0  ;;  %2154 = vmatprep.subr.bf16.mxu0 %v4807_v28  ;;  %2540 = vmatprep.subr.bf16.mxu1 %v4810_v31  ;;  %v5405_v28 = vpack.c.bf16 %v978_v20, %v974_v10  ;;  %v4826_v31 = vld [vmem:[#allocation7 + $0x2e8] ss:$16 sps:$4 sm:$0xff]  }
 0x178   :  { %v652_v52 = vadd.f32 %v651_v48, %v5366_v39  ;;  %v653_v53 = vpop.f32.mrb[14].mxu0  ;;  %2005 = vmatprep.mubr.bf16.mxu0 %v1108_v42  ;;  %2391 = vmatprep.mubr.bf16.mxu1 %v1108_v42 }
 0x179   :  { %v654_v54 = vadd.f32 %v653_v53, %v5361_v40  ;;  %v655_v55 = vpop.f32.mrb[15].mxu0  ;;  %2006 = vmatmul.mubr.bf16.gmra.mrb[72].mxu0 %v1107_v41  ;;  %2392 = vmatmul.mubr.bf16.gmra.mrb[72].mxu1 %v1107_v41  ;;  %v995_v61 = vmax.f32 %v650_v47, 0.0  ;;  %v824_v41 = vpop.f32.mrb[5].mxu1 }
 0x17a   :  { %v656_v58 = vadd.f32 %v655_v55, %v5366_v39  ;;  %2155 = vmatpush1.bf16.msra.mxu0 %v4805_v44  ;;  %2541 = vmatpush1.bf16.msra.mxu1 %v4808_v45  ;;  %v996_v3 = vmax.f32 %v652_v52, 0.0  ;;  %v4834_v44 = vld [vmem:[#allocation7 + $0x30c] ss:$16 sps:$4 sm:$0xff]   ;;  %v825_v45 = vadd.f32 %v824_v41, %v5391_v51  ;;  %v826_v47 = vpop.f32.mrb[6].mxu1  ;;  %v4844_v41 = vld [vmem:[#allocation7 + $0x348] ss:$16 sps:$4 sm:$0xff]  }
 0x17b   :  { %v999_v63 = vmax.f32 %v654_v54, 0.0  ;;  %2156 = vmatprep.subr.bf16.mxu0 %v4813_v49  ;;  %2542 = vmatprep.subr.bf16.mxu1 %v4816_v50  ;;  %v981_v50 = vmax.f32 %v823_v34, 0.0  ;;  %v827_v52 = vadd.f32 %v826_v47, %v5385_v46  ;;  %v828_v53 = vpop.f32.mrb[7].mxu1  ;;  %v4841_v34 = vld [vmem:[#allocation7 + $0x340] ss:$16 sps:$4 sm:$0xff]  }
 0x17c   :  { %v1000_v4 = vmax.f32 %v656_v58, 0.0  ;;  %v982_v55 = vmax.f32 %v825_v45, 0.0  ;;  %v832_v10 = vpop.f32.mrb[8].mxu1  ;;  %v4849_v45 = vld [vmem:[#allocation7 + $0x364] ss:$16 sps:$4 sm:$0xff]  }
 0x17d   :  { %v1111_v8 = vpack.c.bf16 %v999_v63, %v995_v61  ;;  %v985_v38 = vmax.f32 %v827_v52, 0.0  ;;  %v4837_v63 = vld [vmem:[#allocation7 + $0x324] ss:$16 sps:$4 sm:$0xff]   ;;  %v4852_v47 = vld [vmem:[#allocation7 + $0x36c] ss:$16 sps:$4 sm:$0xff]  }
 0x17e   :  { %v1112_v9 = vpack.c.bf16 %v1000_v4, %v996_v3  ;;  %v659_v13 = vpop.f32.mrb[16].mxu0  ;;  %2157 = vmatpush1.bf16.msra.mxu0 %v4811_v56  ;;  %2543 = vmatpush1.bf16.msra.mxu1 %v4814_v59  ;;  %v829_v56 = vadd.f32 %v828_v53, %v5391_v51  ;;  %v4829_v59 = vld [vmem:[#allocation7 + $0x300] ss:$16 sps:$4 sm:$0xff]  }
 0x17f   :  { %v660_v16 = vadd.f32 %v659_v13, %v5361_v40  ;;  %v661_v17 = vpop.f32.mrb[17].mxu0  ;;  %2158 = vmatprep.subr.bf16.mxu0 %v4819_v60  ;;  %2544 = vmatprep.subr.bf16.mxu1 %v4822_v0  ;;  %v4832_v60 = vld [vmem:[#allocation7 + $0x308] ss:$16 sps:$4 sm:$0xff]   ;;  %v4840_v0 = vld [vmem:[#allocation7 + $0x32c] ss:$16 sps:$4 sm:$0xff]   ;;  %v5414_v4 = vpack.c.bf16 %v985_v38, %v981_v50 }
 0x180   :  { %v662_v21 = vadd.f32 %v661_v17, %v5366_v39  ;;  %v663_v22 = vpop.f32.mrb[18].mxu0  ;;  %2015 = vmatprep.mubr.bf16.mxu0 %v1112_v9  ;;  %2401 = vmatprep.mubr.bf16.mxu1 %v1112_v9  ;;  %v986_v1 = vmax.f32 %v829_v56, 0.0  ;;  %v4838_v9 = vld [vmem:[#allocation7 + $0x328] ss:$16 sps:$4 sm:$0xff]   ;;  %v4843_v13 = vld [vmem:[#allocation7 + $0x344] ss:$16 sps:$4 sm:$0xff]  }
 0x181   :  { %v664_v26 = vadd.f32 %v663_v22, %v5361_v40  ;;  %v665_v23 = vpop.f32.mrb[19].mxu0  ;;  %2016 = vmatmul.mubr.bf16.gmra.mrb[76].mxu0 %v1111_v8  ;;  %2402 = vmatmul.mubr.bf16.gmra.mrb[76].mxu1 %v1111_v8  ;;  %v1003_v42 = vmax.f32 %v660_v16, 0.0  ;;  %v4846_v17 = vld [vmem:[#allocation7 + $0x34c] ss:$16 sps:$4 sm:$0xff]  }
 0x182   :  { %v666_v30 = vadd.f32 %v665_v23, %v5366_v39  ;;  %2159 = vmatpush1.bf16.msra.mxu0 %v4817_v11  ;;  %2545 = vmatpush1.bf16.msra.mxu1 %v4820_v14  ;;  %v1004_v48 = vmax.f32 %v662_v21, 0.0  ;;  %v5417_v8 = vpack.c.bf16 %v986_v1, %v982_v55  ;;  %v833_v11 = vadd.f32 %v832_v10, %v5385_v46  ;;  %v834_v14 = vpop.f32.mrb[9].mxu1  ;;  %v4847_v55 = vld [vmem:[#allocation7 + $0x360] ss:$16 sps:$4 sm:$0xff]  }
 0x183   :  { %v1007_v43 = vmax.f32 %v664_v26, 0.0  ;;  %2160 = vmatprep.subr.bf16.mxu0 %v4825_v18  ;;  %2546 = vmatprep.subr.bf16.mxu1 %v4828_v19  ;;  %v835_v18 = vadd.f32 %v834_v14, %v5391_v51  ;;  %v836_v19 = vpop.f32.mrb[10].mxu1 }
 0x184   :  { %v1008_v49 = vmax.f32 %v666_v30, 0.0  ;;  %v989_v22 = vmax.f32 %v833_v11, 0.0  ;;  %v837_v26 = vadd.f32 %v836_v19, %v5385_v46  ;;  %v838_v23 = vpop.f32.mrb[11].mxu1 }
 0x185   :  { %v1115_v54 = vpack.c.bf16 %v1007_v43, %v1003_v42  ;;  %v990_v29 = vmax.f32 %v835_v18, 0.0  ;;  %v839_v30 = vadd.f32 %v838_v23, %v5391_v51 }
 0x186   :  { %v1116_v57 = vpack.c.bf16 %v1008_v49, %v1004_v48  ;;  %v669_v58 = vpop.f32.mrb[20].mxu0  ;;  %2161 = vmatpush1.bf16.msra.mxu0 %v4823_v27  ;;  %2547 = vmatpush1.bf16.msra.mxu1 %v4826_v31  ;;  %v993_v42 = vmax.f32 %v837_v26, 0.0 }
 0x187   :  { %v670_v62 = vadd.f32 %v669_v58, %v5361_v40  ;;  %v671_v61 = vpop.f32.mrb[21].mxu0  ;;  %2162 = vmatprep.subr.bf16.mxu0 %v4831_v33  ;;  %2548 = vmatprep.subr.bf16.mxu1 %v4834_v44  ;;  %v994_v48 = vmax.f32 %v839_v30, 0.0 }
 0x188   :  { %v672_v2 = vadd.f32 %v671_v61, %v5366_v39  ;;  %v673_v3 = vpop.f32.mrb[22].mxu0  ;;  %2025 = vmatprep.mubr.bf16.mxu0 %v1116_v57  ;;  %2411 = vmatprep.mubr.bf16.mxu1 %v1116_v57  ;;  %v5426_v52 = vpack.c.bf16 %v993_v42, %v989_v22  ;;  %v842_v57 = vpop.f32.mrb[12].mxu1  ;;  %v4862_v42 = vld [vmem:[#allocation7 + $0x3a8] ss:$16 sps:$4 sm:$0xff]  }
 0x189   :  { %v674_v5 = vadd.f32 %v673_v3, %v5361_v40  ;;  %v675_v6 = vpop.f32.mrb[23].mxu0  ;;  %2026 = vmatmul.mubr.bf16.gmra.mrb[80].mxu0 %v1115_v54  ;;  %2412 = vmatmul.mubr.bf16.gmra.mrb[80].mxu1 %v1115_v54  ;;  %v1011_v15 = vmax.f32 %v670_v62, 0.0  ;;  %v5429_v56 = vpack.c.bf16 %v994_v48, %v990_v29  ;;  %v843_v38 = vadd.f32 %v842_v57, %v5385_v46  ;;  %v844_v62 = vpop.f32.mrb[13].mxu1 }
 0x18a   :  { %v676_v12 = vadd.f32 %v675_v6, %v5366_v39  ;;  %2163 = vmatpush1.bf16.msra.mxu0 %v4829_v59  ;;  %2549 = vmatpush1.bf16.msra.mxu1 %v4832_v60  ;;  %v1012_v20 = vmax.f32 %v672_v2, 0.0  ;;  %v4850_v59 = vld [vmem:[#allocation7 + $0x368] ss:$16 sps:$4 sm:$0xff]   ;;  %v4855_v60 = vld [vmem:[#allocation7 + $0x384] ss:$16 sps:$4 sm:$0xff]   ;;  %v845_v1 = vadd.f32 %v844_v62, %v5391_v51  ;;  %v846_v2 = vpop.f32.mrb[14].mxu1 }
 0x18b   :  { %v1015_v16 = vmax.f32 %v674_v5, 0.0  ;;  %2164 = vmatprep.subr.bf16.mxu0 %v4837_v63  ;;  %2550 = vmatprep.subr.bf16.mxu1 %v4840_v0  ;;  %v4858_v0 = vld [vmem:[#allocation7 + $0x38c] ss:$16 sps:$4 sm:$0xff]   ;;  %v997_v6 = vmax.f32 %v843_v38, 0.0  ;;  %v848_v10 = vpop.f32.mrb[15].mxu1 }
 0x18c   :  { %v1016_v21 = vmax.f32 %v676_v12, 0.0 }
 0x18d   :  { %v1119_v27 = vpack.c.bf16 %v1015_v16, %v1011_v15  ;;  %v4853_v15 = vld [vmem:[#allocation7 + $0x380] ss:$16 sps:$4 sm:$0xff]   ;;  %v4856_v16 = vld [vmem:[#allocation7 + $0x388] ss:$16 sps:$4 sm:$0xff]  }
 0x18e   :  { %v1120_v31 = vpack.c.bf16 %v1016_v21, %v1012_v20  ;;  %v679_v33 = vpop.f32.mrb[24].mxu0  ;;  %2165 = vmatpush1.bf16.msra.mxu0 %v4835_v7  ;;  %2551 = vmatpush1.bf16.msra.mxu1 %v4838_v9  ;;  %v847_v7 = vadd.f32 %v846_v2, %v5385_v46  ;;  %v998_v9 = vmax.f32 %v845_v1, 0.0  ;;  %v4861_v20 = vld [vmem:[#allocation7 + $0x3a4] ss:$16 sps:$4 sm:$0xff]   ;;  %v4864_v21 = vld [vmem:[#allocation7 + $0x3ac] ss:$16 sps:$4 sm:$0xff]  }
 0x18f   :  { %v680_v43 = vadd.f32 %v679_v33, %v5361_v40  ;;  %v681_v44 = vpop.f32.mrb[25].mxu0  ;;  %2166 = vmatprep.subr.bf16.mxu0 %v4843_v13  ;;  %2552 = vmatprep.subr.bf16.mxu1 %v4846_v17  ;;  %v849_v13 = vadd.f32 %v848_v10, %v5391_v51  ;;  %v4868_v1 = vld [vmem:[#allocation7 + $0x3c8] ss:$16 sps:$4 sm:$0xff]   ;;  %v4876_v10 = vld [vmem:[#allocation7 + $0x3ec] ss:$16 sps:$4 sm:$0xff]  }
 0x190   :  { %v682_v49 = vadd.f32 %v681_v44, %v5366_v39  ;;  %v683_v50 = vpop.f32.mrb[26].mxu0  ;;  %2035 = vmatprep.mubr.bf16.mxu0 %v1120_v31  ;;  %2421 = vmatprep.mubr.bf16.mxu1 %v1120_v31  ;;  %v1001_v17 = vmax.f32 %v847_v7, 0.0  ;;  %v4859_v31 = vld [vmem:[#allocation7 + $0x3a0] ss:$16 sps:$4 sm:$0xff]   ;;  %v4873_v7 = vld [vmem:[#allocation7 + $0x3e4] ss:$16 sps:$4 sm:$0xff]  }
 0x191   :  { %v684_v53 = vadd.f32 %v683_v50, %v5361_v40  ;;  %v685_v54 = vpop.f32.mrb[27].mxu0  ;;  %2036 = vmatmul.mubr.bf16.gmra.mrb[84].mxu0 %v1119_v27  ;;  %2422 = vmatmul.mubr.bf16.gmra.mrb[84].mxu1 %v1119_v27  ;;  %v1019_v61 = vmax.f32 %v680_v43, 0.0  ;;  %v1002_v22 = vmax.f32 %v849_v13, 0.0  ;;  %v4867_v43 = vld [vmem:[#allocation7 + $0x3c4] ss:$16 sps:$4 sm:$0xff]  }
 0x192   :  { %v686_v58 = vadd.f32 %v685_v54, %v5366_v39  ;;  %2167 = vmatpush1.bf16.msra.mxu0 %v4841_v34  ;;  %2553 = vmatpush1.bf16.msra.mxu1 %v4844_v41  ;;  %v1020_v3 = vmax.f32 %v682_v49, 0.0  ;;  %v5438_v27 = vpack.c.bf16 %v1001_v17, %v997_v6  ;;  %v852_v34 = vpop.f32.mrb[16].mxu1  ;;  %v4870_v49 = vld [vmem:[#allocation7 + $0x3cc] ss:$16 sps:$4 sm:$0xff]  }
 0x193   :  { %v1023_v63 = vmax.f32 %v684_v53, 0.0  ;;  %2168 = vmatprep.subr.bf16.mxu0 %v4849_v45  ;;  %2554 = vmatprep.subr.bf16.mxu1 %v4852_v47  ;;  %v5441_v33 = vpack.c.bf16 %v1002_v22, %v998_v9  ;;  %v853_v44 = vadd.f32 %v852_v34, %v5385_v46  ;;  %v854_v45 = vpop.f32.mrb[17].mxu1 }
 0x194   :  { %v1024_v5 = vmax.f32 %v686_v58, 0.0  ;;  %v855_v50 = vadd.f32 %v854_v45, %v5391_v51  ;;  %v856_v53 = vpop.f32.mrb[18].mxu1 }
 0x195   :  { %v1123_v12 = vpack.c.bf16 %v1023_v63, %v1019_v61  ;;  %v1005_v57 = vmax.f32 %v853_v44, 0.0  ;;  %v857_v58 = vadd.f32 %v856_v53, %v5385_v46 }
 0x196   :  { %v1124_v11 = vpack.c.bf16 %v1024_v5, %v1020_v3  ;;  %v689_v14 = vpop.f32.mrb[28].mxu0  ;;  %2169 = vmatpush1.bf16.msra.mxu0 %v4847_v55  ;;  %2555 = vmatpush1.bf16.msra.mxu1 %v4850_v59  ;;  %v858_v59 = vpop.f32.mrb[19].mxu1  ;;  %v1006_v38 = vmax.f32 %v855_v50, 0.0 }
 0x197   :  { %v690_v18 = vadd.f32 %v689_v14, %v5361_v40  ;;  %v691_v19 = vpop.f32.mrb[29].mxu0  ;;  %2170 = vmatprep.subr.bf16.mxu0 %v4855_v60  ;;  %2556 = vmatprep.subr.bf16.mxu1 %v4858_v0  ;;  %v859_v62 = vadd.f32 %v858_v59, %v5391_v51  ;;  %v4865_v0 = vld [vmem:[#allocation7 + $0x3c0] ss:$16 sps:$4 sm:$0xff]   ;;  %v1009_v2 = vmax.f32 %v857_v58, 0.0 }
 0x198   :  { %v692_v26 = vadd.f32 %v691_v19, %v5366_v39  ;;  %v693_v23 = vpop.f32.mrb[30].mxu0  ;;  %2045 = vmatprep.mubr.bf16.mxu0 %v1124_v11  ;;  %2431 = vmatprep.mubr.bf16.mxu1 %v1124_v11  ;;  %v4874_v19 = vld [vmem:[#allocation7 + $0x3e8] ss:$16 sps:$4 sm:$0xff]  }
 0x199   :  { %v694_v29 = vadd.f32 %v693_v23, %v5361_v40  ;;  %v695_v30 = vpop.f32.mrb[31].mxu0  ;;  %2046 = vmatmul.mubr.bf16.gmra.mrb[88].mxu0 %v1123_v12  ;;  %2432 = vmatmul.mubr.bf16.gmra.mrb[88].mxu1 %v1123_v12  ;;  %v1027_v47 = vmax.f32 %v690_v18, 0.0  ;;  %v1010_v6 = vmax.f32 %v859_v62, 0.0  ;;  %v5450_v13 = vpack.c.bf16 %v1009_v2, %v1005_v57  ;;  %v4871_v18 = vld [vmem:[#allocation7 + $0x3e0] ss:$16 sps:$4 sm:$0xff]  }
 0x19a   :  { %v696_v41 = vadd.f32 %v695_v30, %v5366_v39  ;;  %2171 = vmatpush1.bf16.msra.mxu0 %v4853_v15  ;;  %2557 = vmatpush1.bf16.msra.mxu1 %v4856_v16  ;;  %v1028_v54 = vmax.f32 %v692_v26, 0.0  ;;  %v862_v16 = vpop.f32.mrb[20].mxu1 }
 0x19b   :  { %v1031_v48 = vmax.f32 %v694_v29, 0.0  ;;  %2172 = vmatprep.subr.bf16.mxu0 %v4861_v20  ;;  %2558 = vmatprep.subr.bf16.mxu1 %v4864_v21  ;;  %v5453_v15 = vpack.c.bf16 %v1010_v6, %v1006_v38  ;;  %v863_v20 = vadd.f32 %v862_v16, %v5385_v46  ;;  %v864_v21 = vpop.f32.mrb[21].mxu1 }
 0x19c   :  { %v1032_v55 = vmax.f32 %v696_v41, 0.0  ;;  %v865_v23 = vadd.f32 %v864_v21, %v5391_v51  ;;  %v866_v29 = vpop.f32.mrb[22].mxu1 }
 0x19d   :  { %v1127_v60 = vpack.c.bf16 %v1031_v48, %v1027_v47  ;;  %v1013_v34 = vmax.f32 %v863_v20, 0.0  ;;  %v867_v41 = vadd.f32 %v866_v29, %v5385_v46 }
 0x19e   :  { %v1128_v61 = vpack.c.bf16 %v1032_v55, %v1028_v54  ;;  %v699_v63 = vpop.f32.mrb[32].mxu0  ;;  %2173 = vmatpush1.bf16.msra.mxu0 %v4859_v31  ;;  %2559 = vmatpush1.bf16.msra.mxu1 %v4862_v42  ;;  %v868_v42 = vpop.f32.mrb[23].mxu1  ;;  %v1014_v44 = vmax.f32 %v865_v23, 0.0 }
 0x19f   :  { %v700_v3 = vadd.f32 %v699_v63, %v5361_v40  ;;  %v701_v5 = vpop.f32.mrb[33].mxu0  ;;  %2174 = vmatprep.subr.bf16.mxu0 %v4867_v43  ;;  %2560 = vmatprep.subr.bf16.mxu1 %v4870_v49  ;;  %v869_v45 = vadd.f32 %v868_v42, %v5391_v51  ;;  %v1017_v49 = vmax.f32 %v867_v41, 0.0  ;;  %v872_v62 = vpop.f32.mrb[24].mxu1 }
 0x1a0   :  { %v702_v12 = vadd.f32 %v701_v5, %v5366_v39  ;;  %v703_v9 = vpop.f32.mrb[34].mxu0  ;;  %2055 = vmatprep.mubr.bf16.mxu0 %v1128_v61  ;;  %2441 = vmatprep.mubr.bf16.mxu1 %v1128_v61  ;;  %v873_v63 = vadd.f32 %v872_v62, %v5385_v46 }
 0x1a1   :  { %v704_v11 = vadd.f32 %v703_v9, %v5361_v40  ;;  %v705_v14 = vpop.f32.mrb[35].mxu0  ;;  %2056 = vmatmul.mubr.bf16.gmra.mrb[92].mxu0 %v1127_v60  ;;  %2442 = vmatmul.mubr.bf16.gmra.mrb[92].mxu1 %v1127_v60  ;;  %v1035_v22 = vmax.f32 %v700_v3, 0.0  ;;  %v1018_v54 = vmax.f32 %v869_v45, 0.0  ;;  %v5462_v58 = vpack.c.bf16 %v1017_v49, %v1013_v34 }
 0x1a2   :  { %v706_v17 = vadd.f32 %v705_v14, %v5366_v39  ;;  %2175 = vmatpush1.bf16.msra.mxu0 %v4865_v0  ;;  %2561 = vmatpush1.bf16.msra.mxu1 %v4868_v1  ;;  %v1036_v30 = vmax.f32 %v702_v12, 0.0  ;;  %v874_v0 = vpop.f32.mrb[25].mxu1 }
 0x1a3   :  { %v1039_v26 = vmax.f32 %v704_v11, 0.0  ;;  %2176 = vmatprep.subr.bf16.mxu0 %v4873_v7  ;;  %2562 = vmatprep.subr.bf16.mxu1 %v4876_v10  ;;  %v5465_v38 = vpack.c.bf16 %v1018_v54, %v1014_v44  ;;  %v875_v3 = vadd.f32 %v874_v0, %v5391_v51  ;;  %v876_v5 = vpop.f32.mrb[26].mxu1  ;;  %v1021_v10 = vmax.f32 %v873_v63, 0.0 }
 0x1a4   :  { %v1040_v31 = vmax.f32 %v706_v17, 0.0  ;;  %v877_v12 = vadd.f32 %v876_v5, %v5385_v46  ;;  %v878_v9 = vpop.f32.mrb[27].mxu1 }
 0x1a5   :  { %v1131_v43 = vpack.c.bf16 %v1039_v26, %v1035_v22  ;;  %v1022_v14 = vmax.f32 %v875_v3, 0.0  ;;  %v879_v16 = vadd.f32 %v878_v9, %v5391_v51  ;;  %v882_v41 = vpop.f32.mrb[28].mxu1 }
 0x1a6   :  { %v1132_v47 = vpack.c.bf16 %v1040_v31, %v1036_v30  ;;  %v709_v48 = vpop.f32.mrb[36].mxu0  ;;  %2177 = vmatpush1.bf16.msra.mxu0 %v4871_v18  ;;  %2563 = vmatpush1.bf16.msra.mxu1 %v4874_v19  ;;  %v1025_v19 = vmax.f32 %v877_v12, 0.0  ;;  %v884_v44 = vpop.f32.mrb[29].mxu1 }
 0x1a7   :  { %v710_v50 = vadd.f32 %v709_v48, %v5361_v40  ;;  %v711_v53 = vpop.f32.mrb[37].mxu0  ;;  %v1026_v22 = vmax.f32 %v879_v16, 0.0  ;;  %v885_v48 = vadd.f32 %v884_v44, %v5391_v51  ;;  %v886_v49 = vpop.f32.mrb[30].mxu1 }
 0x1a8   :  { %v712_v55 = vadd.f32 %v711_v53, %v5366_v39  ;;  %v713_v57 = vpop.f32.mrb[38].mxu0  ;;  %2065 = vmatprep.mubr.bf16.mxu0 %v1132_v47  ;;  %2451 = vmatprep.mubr.bf16.mxu1 %v1132_v47  ;;  %v5474_v29 = vpack.c.bf16 %v1025_v19, %v1021_v10 }
 0x1a9   :  { %v714_v59 = vadd.f32 %v713_v57, %v5361_v40  ;;  %v715_v60 = vpop.f32.mrb[39].mxu0  ;;  %2066 = vmatmul.mubr.bf16.gmra.mrb[96].mxu0 %v1131_v43  ;;  %2452 = vmatmul.mubr.bf16.gmra.mrb[96].mxu1 %v1131_v43  ;;  %v1043_v1 = vmax.f32 %v710_v50, 0.0  ;;  %v5477_v34 = vpack.c.bf16 %v1026_v22, %v1022_v14  ;;  %v883_v43 = vadd.f32 %v882_v41, %v5385_v46  ;;  %v888_v57 = vpop.f32.mrb[31].mxu1 }
 0x1aa   :  { %v716_v61 = vadd.f32 %v715_v60, %v5366_v39  ;;  %v1044_v6 = vmax.f32 %v712_v55, 0.0  ;;  %v887_v55 = vadd.f32 %v886_v49, %v5385_v46  ;;  %v1030_v60 = vmax.f32 %v885_v48, 0.0 }
 0x1ab   :  { %v1047_v2 = vmax.f32 %v714_v59, 0.0  ;;  %v1029_v54 = vmax.f32 %v883_v43, 0.0  ;;  %v889_v62 = vadd.f32 %v888_v57, %v5391_v51 }
 0x1ac   :  { %v1048_v7 = vmax.f32 %v716_v61, 0.0  ;;  %v1033_v0 = vmax.f32 %v887_v55, 0.0 }
 0x1ad   :  { %v1135_v11 = vpack.c.bf16 %v1047_v2, %v1043_v1  ;;  %v1034_v3 = vmax.f32 %v889_v62, 0.0 }
 0x1ae   :  { %v1136_v17 = vpack.c.bf16 %v1048_v7, %v1044_v6  ;;  %v719_v18 = vpop.f32.mrb[40].mxu0  ;;  %v5486_v7 = vpack.c.bf16 %v1033_v0, %v1029_v54 }
 0x1af   :  { %v720_v20 = vadd.f32 %v719_v18, %v5361_v40  ;;  %v721_v21 = vpop.f32.mrb[41].mxu0  ;;  %v5489_v9 = vpack.c.bf16 %v1034_v3, %v1030_v60 }
 0x1b0   :  { %v722_v26 = vadd.f32 %v721_v21, %v5366_v39  ;;  %v723_v23 = vpop.f32.mrb[42].mxu0  ;;  %2075 = vmatprep.mubr.bf16.mxu0 %v1136_v17  ;;  %2461 = vmatprep.mubr.bf16.mxu1 %v1136_v17 }
 0x1b1   :  { %v724_v30 = vadd.f32 %v723_v23, %v5361_v40  ;;  %v725_v31 = vpop.f32.mrb[43].mxu0  ;;  %2076 = vmatmul.mubr.bf16.gmra.mrb[100].mxu0 %v1135_v11  ;;  %2462 = vmatmul.mubr.bf16.gmra.mrb[100].mxu1 %v1135_v11  ;;  %v1051_v45 = vmax.f32 %v720_v20, 0.0  ;;  %v892_v11 = vpop.f32.mrb[32].mxu1 }
 0x1b2   :  { %v726_v42 = vadd.f32 %v725_v31, %v5366_v39  ;;  %v1052_v50 = vmax.f32 %v722_v26, 0.0  ;;  %v893_v16 = vadd.f32 %v892_v11, %v5385_v46  ;;  %v894_v17 = vpop.f32.mrb[33].mxu1 }
 0x1b3   :  { %v1055_v47 = vmax.f32 %v724_v30, 0.0  ;;  %v895_v20 = vadd.f32 %v894_v17, %v5391_v51  ;;  %v896_v21 = vpop.f32.mrb[34].mxu1 }
 0x1b4   :  { %v1056_v53 = vmax.f32 %v726_v42, 0.0  ;;  %v1037_v23 = vmax.f32 %v893_v16, 0.0  ;;  %v897_v30 = vadd.f32 %v896_v21, %v5385_v46  ;;  %v898_v31 = vpop.f32.mrb[35].mxu1 }
 0x1b5   :  { %v1139_v59 = vpack.c.bf16 %v1055_v47, %v1051_v45  ;;  %v1038_v42 = vmax.f32 %v895_v20, 0.0  ;;  %v899_v43 = vadd.f32 %v898_v31, %v5391_v51  ;;  %v902_v62 = vpop.f32.mrb[36].mxu1 }
 0x1b6   :  { %v1140_v61 = vpack.c.bf16 %v1056_v53, %v1052_v50  ;;  %v729_v63 = vpop.f32.mrb[44].mxu0  ;;  %v1041_v47 = vmax.f32 %v897_v30, 0.0  ;;  %v904_v0 = vpop.f32.mrb[37].mxu1 }
 0x1b7   :  { %v730_v1 = vadd.f32 %v729_v63, %v5361_v40  ;;  %v731_v2 = vpop.f32.mrb[45].mxu0  ;;  %v1042_v50 = vmax.f32 %v899_v43, 0.0  ;;  %v903_v63 = vadd.f32 %v902_v62, %v5385_v46 }
 0x1b8   :  { %v732_v5 = vadd.f32 %v731_v2, %v5366_v39  ;;  %v733_v6 = vpop.f32.mrb[46].mxu0  ;;  %2085 = vmatprep.mubr.bf16.mxu0 %v1140_v61  ;;  %2471 = vmatprep.mubr.bf16.mxu1 %v1140_v61  ;;  %v5498_v55 = vpack.c.bf16 %v1041_v47, %v1037_v23  ;;  %v4879_v2 = vld [vmem:[#allocation8 + $0xc0] sm:$0xff]  }
 0x1b9   :  { %v734_v10 = vadd.f32 %v733_v6, %v5361_v40  ;;  %v735_v12 = vpop.f32.mrb[47].mxu0  ;;  %2086 = vmatmul.mubr.bf16.gmra.mrb[104].mxu0 %v1139_v59  ;;  %2472 = vmatmul.mubr.bf16.gmra.mrb[104].mxu1 %v1139_v59  ;;  %v1059_v18 = vmax.f32 %v730_v1, 0.0  ;;  %v5501_v60 = vpack.c.bf16 %v1042_v50, %v1038_v42  ;;  %v4877_v1 = vld [vmem:[#allocation8 + $0x40] sm:$0xff]   ;;  %v905_v6 = vadd.f32 %v904_v0, %v5391_v51 }
 0x1ba   :  { %v736_v14 = vadd.f32 %v735_v12, %v5366_v39  ;;  %v1060_v22 = vmax.f32 %v732_v5, 0.0  ;;  %4098 = vmatprep.subr.bf16.mxu0 %v4877_v1  ;;  %4210 = vmatprep.subr.bf16.mxu1 %v4879_v2 }
 0x1bb   :  { %v1063_v19 = vmax.f32 %v734_v10, 0.0  ;;  %v906_v10 = vpop.f32.mrb[38].mxu1 }
 0x1bc   :  { %v1064_v26 = vmax.f32 %v736_v14, 0.0  ;;  %v1045_v14 = vmax.f32 %v903_v63, 0.0  ;;  %v907_v16 = vadd.f32 %v906_v10, %v5385_v46  ;;  %v908_v17 = vpop.f32.mrb[39].mxu1 }
 0x1bd   :  { %v1143_v41 = vpack.c.bf16 %v1063_v19, %v1059_v18  ;;  %v1046_v19 = vmax.f32 %v905_v6, 0.0  ;;  %v909_v20 = vadd.f32 %v908_v17, %v5391_v51 }
 0x1be   :  { %v1144_v44 = vpack.c.bf16 %v1064_v26, %v1060_v22  ;;  %v739_v45 = vpop.f32.mrb[48].mxu0  ;;  %v1049_v26 = vmax.f32 %v907_v16, 0.0 }
 0x1bf   :  { %v740_v48 = vadd.f32 %v739_v45, %v5361_v40  ;;  %v741_v49 = vpop.f32.mrb[49].mxu0  ;;  %v1050_v31 = vmax.f32 %v909_v20, 0.0 }
 0x1c0   :  { %v742_v53 = vadd.f32 %v741_v49, %v5366_v39  ;;  %v743_v54 = vpop.f32.mrb[50].mxu0  ;;  %2095 = vmatprep.mubr.bf16.mxu0 %v1144_v44  ;;  %2481 = vmatprep.mubr.bf16.mxu1 %v1144_v44  ;;  %v5510_v43 = vpack.c.bf16 %v1049_v26, %v1045_v14 }
 0x1c1   :  { %v744_v57 = vadd.f32 %v743_v54, %v5361_v40  ;;  %v745_v59 = vpop.f32.mrb[51].mxu0  ;;  %2096 = vmatmul.mubr.bf16.gmra.mrb[108].mxu0 %v1143_v41  ;;  %2482 = vmatmul.mubr.bf16.gmra.mrb[108].mxu1 %v1143_v41  ;;  %v1067_v3 = vmax.f32 %v740_v48, 0.0  ;;  %v5513_v47 = vpack.c.bf16 %v1050_v31, %v1046_v19  ;;  %v912_v48 = vpop.f32.mrb[40].mxu1 }
 0x1c2   :  { %v746_v61 = vadd.f32 %v745_v59, %v5366_v39  ;;  %v1068_v12 = vmax.f32 %v742_v53, 0.0  ;;  %v913_v50 = vadd.f32 %v912_v48, %v5385_v46  ;;  %v914_v53 = vpop.f32.mrb[41].mxu1 }
 0x1c3   :  { %v1071_v5 = vmax.f32 %v744_v57, 0.0  ;;  %v915_v59 = vadd.f32 %v914_v53, %v5391_v51  ;;  %v916_v62 = vpop.f32.mrb[42].mxu1 }
 0x1c4   :  { %v1072_v11 = vmax.f32 %v746_v61, 0.0  ;;  %v1053_v0 = vmax.f32 %v913_v50, 0.0  ;;  %v917_v1 = vadd.f32 %v916_v62, %v5385_v46  ;;  %v918_v2 = vpop.f32.mrb[43].mxu1 }
 0x1c5   :  { %v1147_v18 = vpack.c.bf16 %v1071_v5, %v1067_v3  ;;  %v1054_v5 = vmax.f32 %v915_v59, 0.0  ;;  %v919_v6 = vadd.f32 %v918_v2, %v5391_v51 }
 0x1c6   :  { %v1148_v21 = vpack.c.bf16 %v1072_v11, %v1068_v12  ;;  %v749_v22 = vpop.f32.mrb[52].mxu0  ;;  %v1057_v11 = vmax.f32 %v917_v1, 0.0 }
 0x1c7   :  { %v750_v23 = vadd.f32 %v749_v22, %v5361_v40  ;;  %v751_v30 = vpop.f32.mrb[53].mxu0  ;;  %v1058_v17 = vmax.f32 %v919_v6, 0.0 }
 0x1c8   :  { %v752_v41 = vadd.f32 %v751_v30, %v5366_v39  ;;  %v753_v42 = vpop.f32.mrb[54].mxu0  ;;  %2105 = vmatprep.mubr.bf16.mxu0 %v1148_v21  ;;  %2491 = vmatprep.mubr.bf16.mxu1 %v1148_v21  ;;  %v5522_v20 = vpack.c.bf16 %v1057_v11, %v1053_v0 }
 0x1c9   :  { %v754_v44 = vadd.f32 %v753_v42, %v5361_v40  ;;  %v755_v45 = vpop.f32.mrb[55].mxu0  ;;  %2106 = vmatmul.mubr.bf16.gmra.mrb[112].mxu0 %v1147_v18  ;;  %2492 = vmatmul.mubr.bf16.gmra.mrb[112].mxu1 %v1147_v18  ;;  %v1075_v54 = vmax.f32 %v750_v23, 0.0  ;;  %v5525_v26 = vpack.c.bf16 %v1058_v17, %v1054_v5  ;;  %v922_v23 = vpop.f32.mrb[44].mxu1 }
 0x1ca   :  { %v756_v49 = vadd.f32 %v755_v45, %v5366_v39  ;;  %v1076_v61 = vmax.f32 %v752_v41, 0.0  ;;  %v923_v31 = vadd.f32 %v922_v23, %v5385_v46  ;;  %v924_v41 = vpop.f32.mrb[45].mxu1 }
 0x1cb   :  { %v1079_v57 = vmax.f32 %v754_v44, 0.0  ;;  %v925_v45 = vadd.f32 %v924_v41, %v5391_v51  ;;  %v926_v48 = vpop.f32.mrb[46].mxu1 }
 0x1cc   :  { %v1080_v63 = vmax.f32 %v756_v49, 0.0  ;;  %v1061_v53 = vmax.f32 %v923_v31, 0.0 }
 0x1cd   :  { %v1151_v3 = vpack.c.bf16 %v1079_v57, %v1075_v54  ;;  %v927_v54 = vadd.f32 %v926_v48, %v5385_v46  ;;  %v928_v57 = vpop.f32.mrb[47].mxu1  ;;  %v1062_v62 = vmax.f32 %v925_v45, 0.0 }
 0x1ce   :  { %v1152_v10 = vpack.c.bf16 %v1080_v63, %v1076_v61  ;;  %v759_v12 = vpop.f32.mrb[56].mxu0  ;;  %v929_v61 = vadd.f32 %v928_v57, %v5391_v51  ;;  %v932_v17 = vpop.f32.mrb[48].mxu1 }
 0x1cf   :  { %v760_v14 = vadd.f32 %v759_v12, %v5361_v40  ;;  %v761_v16 = vpop.f32.mrb[57].mxu0  ;;  %v1065_v1 = vmax.f32 %v927_v54, 0.0 }
 0x1d0   :  { %v762_v18 = vadd.f32 %v761_v16, %v5366_v39  ;;  %v763_v19 = vpop.f32.mrb[58].mxu0  ;;  %2115 = vmatprep.mubr.bf16.mxu0 %v1152_v10  ;;  %2501 = vmatprep.mubr.bf16.mxu1 %v1152_v10  ;;  %v1066_v5 = vmax.f32 %v929_v61, 0.0 }
 0x1d1   :  { %v764_v21 = vadd.f32 %v763_v19, %v5361_v40  ;;  %v765_v22 = vpop.f32.mrb[59].mxu0  ;;  %2116 = vmatmul.mubr.bf16.gmra.mrb[116].mxu0 %v1151_v3  ;;  %2502 = vmatmul.mubr.bf16.gmra.mrb[116].mxu1 %v1151_v3  ;;  %v1083_v42 = vmax.f32 %v760_v14, 0.0  ;;  %v5534_v12 = vpack.c.bf16 %v1065_v1, %v1061_v53  ;;  %v933_v19 = vadd.f32 %v932_v17, %v5385_v46  ;;  %v4878_v17 = vld [vmem:[#allocation8] sm:$0xff]  }
 0x1d2   :  { %v766_v30 = vadd.f32 %v765_v22, %v5366_v39  ;;  %v1084_v49 = vmax.f32 %v762_v18, 0.0  ;;  %v5537_v16 = vpack.c.bf16 %v1066_v5, %v1062_v62 }
 0x1d3   :  { %v1087_v44 = vmax.f32 %v764_v21, 0.0  ;;  %v934_v21 = vpop.f32.mrb[49].mxu1 }
 0x1d4   :  { %v1088_v50 = vmax.f32 %v766_v30, 0.0  ;;  %v935_v30 = vadd.f32 %v934_v21, %v5391_v51  ;;  %v936_v31 = vpop.f32.mrb[50].mxu1  ;;  %v4883_v21 = vld [vmem:[#allocation8 + $0xc8] sm:$0xff]  }
 0x1d5   :  { %v1155_v59 = vpack.c.bf16 %v1087_v44, %v1083_v42  ;;  %v1069_v44 = vmax.f32 %v933_v19, 0.0  ;;  %v938_v45 = vpop.f32.mrb[51].mxu1 }
 0x1d6   :  { %v1156_v63 = vpack.c.bf16 %v1088_v50, %v1084_v49  ;;  %v769_v0 = vpop.f32.mrb[60].mxu0  ;;  %v1070_v49 = vmax.f32 %v935_v30, 0.0  ;;  %v939_v50 = vadd.f32 %v938_v45, %v5391_v51  ;;  %v942_v62 = vpop.f32.mrb[52].mxu1 }
 0x1d7   :  { %v770_v2 = vadd.f32 %v769_v0, %v5361_v40  ;;  %v771_v3 = vpop.f32.mrb[61].mxu0  ;;  %v943_v61 = vadd.f32 %v942_v62, %v5385_v46  ;;  %v4886_v62 = vld [vmem:[#allocation8 + $0x10] sm:$0xff]  }
 0x1d8   :  { %v772_v6 = vadd.f32 %v771_v3, %v5366_v39  ;;  %v773_v10 = vpop.f32.mrb[62].mxu0  ;;  %2125 = vmatprep.mubr.bf16.mxu0 %v1156_v63  ;;  %2511 = vmatprep.mubr.bf16.mxu1 %v1156_v63  ;;  %v1074_v54 = vmax.f32 %v939_v50, 0.0  ;;  %v944_v63 = vpop.f32.mrb[53].mxu1  ;;  %v4887_v50 = vld [vmem:[#allocation8 + $0xd0] sm:$0xff]  }
 0x1d9   :  { %v774_v11 = vadd.f32 %v773_v10, %v5361_v40  ;;  %v775_v14 = vpop.f32.mrb[63].mxu0  ;;  %2126 = vmatmul.mubr.bf16.gmra.mrb[120].mxu0 %v1155_v59  ;;  %2512 = vmatmul.mubr.bf16.gmra.mrb[120].mxu1 %v1155_v59  ;;  %v1091_v22 = vmax.f32 %v770_v2, 0.0  ;;  %v937_v40 = vadd.f32 %v936_v31, %v5385_v46  ;;  %v945_v0 = vadd.f32 %v944_v63, %v5391_v51  ;;  %v946_v1 = vpop.f32.mrb[54].mxu1 }
 0x1da   :  { %v776_v18 = vadd.f32 %v775_v14, %v5366_v39  ;;  %v1092_v41 = vmax.f32 %v772_v6, 0.0  ;;  %v5546_v59 = vpack.c.bf16 %v1074_v54, %v1070_v49  ;;  %v1077_v2 = vmax.f32 %v943_v61, 0.0  ;;  %v948_v5 = vpop.f32.mrb[55].mxu1  ;;  %v4885_v49 = vld [vmem:[#allocation8 + $0x50] sm:$0xff]  }
 0x1db   :  { %v1095_v23 = vmax.f32 %v774_v11, 0.0  ;;  %v1073_v39 = vmax.f32 %v937_v40, 0.0  ;;  %v947_v3 = vadd.f32 %v946_v1, %v5385_v46  ;;  %v1078_v6 = vmax.f32 %v945_v0, 0.0  ;;  %v4884_v40 = vld [vmem:[#allocation8 + $0x88] sm:$0xff]   ;;  %v4888_v61 = vld [vmem:[#allocation8 + $0x90] sm:$0xff]   ;;  %v4889_v0 = vld [vmem:[#allocation8 + $0x58] sm:$0xff]  }
 0x1dc   :  { %v1096_v42 = vmax.f32 %v776_v18, 0.0  ;;  %v949_v10 = vadd.f32 %v948_v5, %v5391_v51  ;;  %v4880_v18 = vld [vmem:[#allocation8 + $0x80] sm:$0xff]   ;;  %v4891_v1 = vld [vmem:[#allocation8 + $0xd8] sm:$0xff]  }
 0x1dd   :  { %v1159_v48 = vpack.c.bf16 %v1095_v23, %v1091_v22  ;;  %v5544_v57 = vpack.c.bf16 %v1073_v39, %v1069_v44  ;;  %v1081_v11 = vmax.f32 %v947_v3, 0.0  ;;  %v952_v23 = vpop.f32.mrb[56].mxu1  ;;  %v4882_v44 = vld [vmem:[#allocation8 + $0x8] sm:$0xff]  }
 0x1de   :  { %v1160_v53 = vpack.c.bf16 %v1096_v42, %v1092_v41  ;;  %v1082_v14 = vmax.f32 %v949_v10, 0.0  ;;  %v953_v30 = vadd.f32 %v952_v23, %v5385_v46  ;;  %v954_v31 = vpop.f32.mrb[57].mxu1  ;;  %v4895_v23 = vld [vmem:[#allocation8 + $0xe0] sm:$0xff]  }
 0x1df   :  { %v5554_v19 = vpack.c.bf16 %v1081_v11, %v1077_v2  ;;  %v955_v41 = vadd.f32 %v954_v31, %v5391_v51  ;;  %v956_v42 = vpop.f32.mrb[58].mxu1 }
 0x1e0   :  { %2135 = vmatprep.mubr.bf16.mxu0 %v1160_v53  ;;  %2521 = vmatprep.mubr.bf16.mxu1 %v1160_v53  ;;  %v5558_v22 = vpack.c.bf16 %v1082_v14, %v1078_v6  ;;  %v1085_v45 = vmax.f32 %v953_v30, 0.0  ;;  %v4890_v14 = vld [vmem:[#allocation8 + $0x18] sm:$0xff]  }
 0x1e1   :  { %2136 = vmatmul.mubr.bf16.gmra.mrb[124].mxu0 %v1159_v48  ;;  %2522 = vmatmul.mubr.bf16.gmra.mrb[124].mxu1 %v1159_v48  ;;  %v958_v48 = vpop.f32.mrb[59].mxu1  ;;  %v1086_v53 = vmax.f32 %v955_v41, 0.0 }
 0x1e2   :  { %2178 = vmatprep.mubr.bf16.mxu0 %v5405_v28  ;;  %2564 = vmatprep.mubr.bf16.mxu1 %v5405_v28  ;;  %v4881_v28 = vld [vmem:[#allocation8 + $0x48] sm:$0xff]   ;;  %v962_v3 = vpop.f32.mrb[60].mxu1 }
 0x1e3   :  { %v963_v5 = vadd.f32 %v962_v3, %v5385_v46  ;;  %v964_v6 = vpop.f32.mrb[61].mxu1 }
 0x1e4   :  { %v965_v10 = vadd.f32 %v964_v6, %v5391_v51  ;;  %v966_v11 = vpop.f32.mrb[62].mxu1 }
 0x1e6   :  { %v1094_v30 = vmax.f32 %v965_v10, 0.0 }
 0x1e9   :  { %2179 = vmatmul.mubr.bf16.vlgmr.msra.gmra.mrb[64].mxu0 %v5402_v24  ;;  %2565 = vmatmul.mubr.bf16.vlgmr.msra.gmra.mrb[64].mxu1 %v5402_v24  ;;  %v957_v24 = vadd.f32 %v956_v42, %v5385_v46  ;;  %v4894_v42 = vld [vmem:[#allocation8 + $0x20] sm:$0xff]  }
 0x1ea   :  { %2188 = vmatprep.mubr.bf16.mxu0 %v5417_v8  ;;  %2574 = vmatprep.mubr.bf16.mxu1 %v5417_v8  ;;  %v959_v8 = vadd.f32 %v958_v48, %v5391_v51  ;;  %v4900_v48 = vld [vmem:[#allocation8 + $0xa8] sm:$0xff]  }
 0x1eb   :  { %4099 = vmatpush3.bf16.msra.mxu0 %v4878_v17  ;;  %4211 = vmatpush3.bf16.msra.mxu1 %v4880_v18  ;;  %v1089_v39 = vmax.f32 %v957_v24, 0.0  ;;  %v4892_v17 = vld [vmem:[#allocation8 + $0x98] sm:$0xff]   ;;  %v1093_v18 = vmax.f32 %v963_v5, 0.0 }
 0x1ec   :  { %4100 = vmatprep.subr.bf16.mxu0 %v4881_v28  ;;  %4212 = vmatprep.subr.bf16.mxu1 %v4883_v21  ;;  %v1090_v54 = vmax.f32 %v959_v8, 0.0  ;;  %v968_v28 = vpop.f32.mrb[63].mxu1  ;;  %v4893_v21 = vld [vmem:[#allocation8 + $0x60] sm:$0xff]   ;;  %v4904_v8 = vld [vmem:[#allocation8 + $0xb0] sm:$0xff]  }
 0x1ed   :  { %v5566_v63 = vpack.c.bf16 %v1089_v39, %v1085_v45  ;;  %v4897_v45 = vld [vmem:[#allocation8 + $0x68] sm:$0xff]   ;;  %v4907_v39 = vld [vmem:[#allocation8 + $0xf8] sm:$0xff]  }
 0x1ee   :  { %v5570_v2 = vpack.c.bf16 %v1090_v54, %v1086_v53  ;;  %v4902_v53 = vld [vmem:[#allocation8 + $0x30] sm:$0xff]   ;;  %v4908_v54 = vld [vmem:[#allocation8 + $0xb8] sm:$0xff]  }
 0x1ef   :  { %4101 = vmatpush3.bf16.msra.mxu0 %v4882_v44  ;;  %4213 = vmatpush3.bf16.msra.mxu1 %v4884_v40  ;;  %v4896_v44 = vld [vmem:[#allocation8 + $0xa0] sm:$0xff]  }
 0x1f0   :  { %4102 = vmatprep.subr.bf16.mxu0 %v4885_v49  ;;  %4214 = vmatprep.subr.bf16.mxu1 %v4887_v50  ;;  %v4901_v49 = vld [vmem:[#allocation8 + $0x70] sm:$0xff]  }
 0x1f1   :  { %2189 = vmatmul.mubr.bf16.gmra.mrb[68].mxu0 %v5414_v4  ;;  %2575 = vmatmul.mubr.bf16.gmra.mrb[68].mxu1 %v5414_v4  ;;  %v967_v4 = vadd.f32 %v966_v11, %v5385_v46  ;;  %v4899_v46 = vld [vmem:[#allocation8 + $0xe8] sm:$0xff]   ;;  %v4903_v50 = vld [vmem:[#allocation8 + $0xf0] sm:$0xff]  }
 0x1f2   :  { %2198 = vmatprep.mubr.bf16.mxu0 %v5429_v56  ;;  %2584 = vmatprep.mubr.bf16.mxu1 %v5429_v56  ;;  %v969_v56 = vadd.f32 %v968_v28, %v5391_v51  ;;  %v4898_v51 = vld [vmem:[#allocation8 + $0x28] sm:$0xff]  }
 0x1f3   :  { %4103 = vmatpush3.bf16.msra.mxu0 %v4886_v62  ;;  %4215 = vmatpush3.bf16.msra.mxu1 %v4888_v61  ;;  %v1097_v31 = vmax.f32 %v967_v4, 0.0 }
 0x1f4   :  { %4104 = vmatprep.subr.bf16.mxu0 %v4889_v0  ;;  %4216 = vmatprep.subr.bf16.mxu1 %v4891_v1  ;;  %v1098_v41 = vmax.f32 %v969_v56, 0.0 }
 0x1f5   :  { %v5578_v40 = vpack.c.bf16 %v1097_v31, %v1093_v18 }
 0x1f6   :  { %v5582_v24 = vpack.c.bf16 %v1098_v41, %v1094_v30 }
 0x1f7   :  { %4105 = vmatpush3.bf16.msra.mxu0 %v4890_v14  ;;  %4217 = vmatpush3.bf16.msra.mxu1 %v4892_v17 }
 0x1f8   :  { %4106 = vmatprep.subr.bf16.mxu0 %v4893_v21  ;;  %4218 = vmatprep.subr.bf16.mxu1 %v4895_v23 }
 0x1f9   :  { %2199 = vmatmul.mubr.bf16.gmra.mrb[72].mxu0 %v5426_v52  ;;  %2585 = vmatmul.mubr.bf16.gmra.mrb[72].mxu1 %v5426_v52  ;;  %v4905_v52 = vld [vmem:[#allocation8 + $0x78] sm:$0xff]  }
 0x1fa   :  { %2208 = vmatprep.mubr.bf16.mxu0 %v5441_v33  ;;  %2594 = vmatprep.mubr.bf16.mxu1 %v5441_v33  ;;  %v4906_v33 = vld [vmem:[#allocation8 + $0x38] sm:$0xff]  }
 0x1fb   :  { %4107 = vmatpush3.bf16.msra.mxu0 %v4894_v42  ;;  %4219 = vmatpush3.bf16.msra.mxu1 %v4896_v44 }
 0x1fc   :  { %4108 = vmatprep.subr.bf16.mxu0 %v4897_v45  ;;  %4220 = vmatprep.subr.bf16.mxu1 %v4899_v46 }
 0x1ff   :  { %4109 = vmatpush3.bf16.msra.mxu0 %v4898_v51  ;;  %4221 = vmatpush3.bf16.msra.mxu1 %v4900_v48 }
 0x200   :  { %4110 = vmatprep.subr.bf16.mxu0 %v4901_v49  ;;  %4222 = vmatprep.subr.bf16.mxu1 %v4903_v50 }
 0x201   :  { %2209 = vmatmul.mubr.bf16.gmra.mrb[76].mxu0 %v5438_v27  ;;  %2595 = vmatmul.mubr.bf16.gmra.mrb[76].mxu1 %v5438_v27  ;;  %v1291_v27 = vld [vmem:[%s6092_s4] sm:$0xf] }
 0x202   :  { %2218 = vmatprep.mubr.bf16.mxu0 %v5453_v15  ;;  %2604 = vmatprep.mubr.bf16.mxu1 %v5453_v15  ;;  %v5645_v15 = vrot.slane %v1291_v27, %v255_v25 }
 0x203   :  { %4111 = vmatpush3.bf16.msra.mxu0 %v4902_v53  ;;  %4223 = vmatpush3.bf16.msra.mxu1 %v4904_v8 }
 0x204   :  { %4112 = vmatprep.subr.bf16.mxu0 %v4905_v52  ;;  %4224 = vmatprep.subr.bf16.mxu1 %v4907_v39 }
 0x207   :  { %4113 = vmatpush3.bf16.msra.mxu0 %v4906_v33  ;;  %4225 = vmatpush3.bf16.msra.mxu1 %v4908_v54 }
 0x209   :  { %2219 = vmatmul.mubr.bf16.gmra.mrb[80].mxu0 %v5450_v13  ;;  %2605 = vmatmul.mubr.bf16.gmra.mrb[80].mxu1 %v5450_v13  ;;  %v5641_v13 = vrot.slane %v1291_v27, %v247_v36 }
 0x20a   :  { %2228 = vmatprep.mubr.bf16.mxu0 %v5465_v38  ;;  %2614 = vmatprep.mubr.bf16.mxu1 %v5465_v38  ;;  %v5653_v38 = vrot.slane %v1291_v27, %v259_v32 }
 0x211   :  { %2229 = vmatmul.mubr.bf16.gmra.mrb[84].mxu0 %v5462_v58  ;;  %2615 = vmatmul.mubr.bf16.gmra.mrb[84].mxu1 %v5462_v58  ;;  %v5649_v58 = vrot.slane %v1291_v27, %v251_v37 }
 0x212   :  { %2238 = vmatprep.mubr.bf16.mxu0 %v5477_v34  ;;  %2624 = vmatprep.mubr.bf16.mxu1 %v5477_v34 }
 0x219   :  { %2239 = vmatmul.mubr.bf16.gmra.mrb[88].mxu0 %v5474_v29  ;;  %2625 = vmatmul.mubr.bf16.gmra.mrb[88].mxu1 %v5474_v29 }
 0x21a   :  { %2248 = vmatprep.mubr.bf16.mxu0 %v5489_v9  ;;  %2634 = vmatprep.mubr.bf16.mxu1 %v5489_v9 }
 0x221   :  { %2249 = vmatmul.mubr.bf16.gmra.mrb[92].mxu0 %v5486_v7  ;;  %2635 = vmatmul.mubr.bf16.gmra.mrb[92].mxu1 %v5486_v7 }
 0x222   :  { %2258 = vmatprep.mubr.bf16.mxu0 %v5501_v60  ;;  %2644 = vmatprep.mubr.bf16.mxu1 %v5501_v60 }
 0x229   :  { %2259 = vmatmul.mubr.bf16.gmra.mrb[96].mxu0 %v5498_v55  ;;  %2645 = vmatmul.mubr.bf16.gmra.mrb[96].mxu1 %v5498_v55 }
 0x22a   :  { %2268 = vmatprep.mubr.bf16.mxu0 %v5513_v47  ;;  %2654 = vmatprep.mubr.bf16.mxu1 %v5513_v47 }
 0x231   :  { %2269 = vmatmul.mubr.bf16.gmra.mrb[100].mxu0 %v5510_v43  ;;  %2655 = vmatmul.mubr.bf16.gmra.mrb[100].mxu1 %v5510_v43 }
 0x232   :  { %2278 = vmatprep.mubr.bf16.mxu0 %v5525_v26  ;;  %2664 = vmatprep.mubr.bf16.mxu1 %v5525_v26 }
 0x239   :  { %2279 = vmatmul.mubr.bf16.gmra.mrb[104].mxu0 %v5522_v20  ;;  %2665 = vmatmul.mubr.bf16.gmra.mrb[104].mxu1 %v5522_v20 }
 0x23a   :  { %2288 = vmatprep.mubr.bf16.mxu0 %v5537_v16  ;;  %2674 = vmatprep.mubr.bf16.mxu1 %v5537_v16 }
 0x241   :  { %2289 = vmatmul.mubr.bf16.gmra.mrb[108].mxu0 %v5534_v12  ;;  %2675 = vmatmul.mubr.bf16.gmra.mrb[108].mxu1 %v5534_v12 }
 0x242   :  { %2298 = vmatprep.mubr.bf16.mxu0 %v5546_v59  ;;  %2684 = vmatprep.mubr.bf16.mxu1 %v5546_v59 }
 0x249   :  { %2299 = vmatmul.mubr.bf16.gmra.mrb[112].mxu0 %v5544_v57  ;;  %2685 = vmatmul.mubr.bf16.gmra.mrb[112].mxu1 %v5544_v57 }
 0x24a   :  { %2308 = vmatprep.mubr.bf16.mxu0 %v5558_v22  ;;  %2694 = vmatprep.mubr.bf16.mxu1 %v5558_v22 }
 0x251   :  { %2309 = vmatmul.mubr.bf16.gmra.mrb[116].mxu0 %v5554_v19  ;;  %2695 = vmatmul.mubr.bf16.gmra.mrb[116].mxu1 %v5554_v19 }
 0x252   :  { %2318 = vmatprep.mubr.bf16.mxu0 %v5570_v2  ;;  %2704 = vmatprep.mubr.bf16.mxu1 %v5570_v2 }
 0x259   :  { %2319 = vmatmul.mubr.bf16.gmra.mrb[120].mxu0 %v5566_v63  ;;  %2705 = vmatmul.mubr.bf16.gmra.mrb[120].mxu1 %v5566_v63 }
 0x25a   :  { %2328 = vmatprep.mubr.bf16.mxu0 %v5582_v24  ;;  %2714 = vmatprep.mubr.bf16.mxu1 %v5582_v24 }
 0x261   :  { %2329 = vmatmul.mubr.bf16.gmra.mrb[124].mxu0 %v5578_v40  ;;  %2715 = vmatmul.mubr.bf16.gmra.mrb[124].mxu1 %v5578_v40 }
 0x2bc   :  { %v2180_v29 = vpop.f32.mrb[64].mxu0  ;;  %v2566_v34 = vpop.f32.mrb[64].mxu1 }
 0x2bd   :  { %v4322_v7 = vadd.f32 %v2180_v29, %v5641_v13  ;;  %v4386_v9 = vadd.f32 %v2566_v34, %v5645_v15  ;;  %v2182_v36 = vpop.f32.mrb[65].mxu0  ;;  %v2568_v55 = vpop.f32.mrb[65].mxu1 }
 0x2be   :  { %v4323_v60 = vadd.f32 %v2182_v36, %v5649_v58  ;;  %v4387_v25 = vadd.f32 %v2568_v55, %v5653_v38  ;;  %v2184_v43 = vpop.f32.mrb[66].mxu0  ;;  %v2570_v47 = vpop.f32.mrb[66].mxu1 }
 0x2bf   :  { %v4324_v37 = vadd.f32 %v2184_v43, %v5641_v13  ;;  %v4388_v35 = vadd.f32 %v2570_v47, %v5645_v15  ;;  %v2186_v32 = vpop.f32.mrb[67].mxu0  ;;  %v2572_v20 = vpop.f32.mrb[67].mxu1  ;;  %v2725_v16 = vmax.f32 %v4322_v7, 0.0  ;;  %v2727_v57 = vmax.f32 %v4386_v9, 0.0 }
 0x2c0   :  { %v4325_v26 = vadd.f32 %v2186_v32, %v5649_v58  ;;  %v4389_v12 = vadd.f32 %v2572_v20, %v5653_v38  ;;  %v2726_v22 = vmax.f32 %v4323_v60, 0.0  ;;  %v2728_v62 = vmax.f32 %v4387_v25, 0.0 }
 0x2c1   :  { %v2729_v59 = vmax.f32 %v4324_v37, 0.0  ;;  %v2731_v19 = vmax.f32 %v4388_v35, 0.0 }
 0x2c2   :  { %v2730_v61 = vmax.f32 %v4325_v26, 0.0  ;;  %v2732_v63 = vmax.f32 %v4389_v12, 0.0 }
 0x2c3   :  { %v2853_v0 = vpack.c.bf16 %v2729_v59, %v2725_v16  ;;  %v2855_v1 = vpack.c.bf16 %v2731_v19, %v2727_v57 }
 0x2c4   :  { %v2854_v2 = vpack.c.bf16 %v2730_v61, %v2726_v22  ;;  %v2856_v3 = vpack.c.bf16 %v2732_v63, %v2728_v62  ;;  %v2190_v5 = vpop.f32.mrb[68].mxu0  ;;  %v2576_v6 = vpop.f32.mrb[68].mxu1 }
 0x2c5   :  { %v4326_v10 = vadd.f32 %v2190_v5, %v5641_v13  ;;  %v4390_v11 = vadd.f32 %v2576_v6, %v5645_v15  ;;  %v2192_v14 = vpop.f32.mrb[69].mxu0  ;;  %v2578_v17 = vpop.f32.mrb[69].mxu1 }
 0x2c6   :  { %v4327_v18 = vadd.f32 %v2192_v14, %v5649_v58  ;;  %v4391_v4 = vadd.f32 %v2578_v17, %v5653_v38  ;;  %v2194_v28 = vpop.f32.mrb[70].mxu0  ;;  %v2580_v21 = vpop.f32.mrb[70].mxu1  ;;  %3212 = vmatprep.mubr.bf16.mxu0 %v2854_v2  ;;  %3373 = vmatprep.mubr.bf16.mxu1 %v2856_v3 }
 0x2c7   :  { %v4328_v23 = vadd.f32 %v2194_v28, %v5641_v13  ;;  %v4392_v30 = vadd.f32 %v2580_v21, %v5645_v15  ;;  %v2196_v56 = vpop.f32.mrb[71].mxu0  ;;  %v2582_v31 = vpop.f32.mrb[71].mxu1  ;;  %3213 = vmatmul.mubr.bf16.vlgmr.msra.gmra.mrb[128].mxu0 %v2853_v0  ;;  %3374 = vmatmul.mubr.bf16.vlgmr.msra.gmra.mrb[128].mxu1 %v2855_v1  ;;  %v2733_v44 = vmax.f32 %v4326_v10, 0.0  ;;  %v2735_v40 = vmax.f32 %v4390_v11, 0.0 }
 0x2c8   :  { %v4329_v41 = vadd.f32 %v2196_v56, %v5649_v58  ;;  %v4393_v42 = vadd.f32 %v2582_v31, %v5653_v38  ;;  %v2734_v24 = vmax.f32 %v4327_v18, 0.0  ;;  %v2736_v51 = vmax.f32 %v4391_v4, 0.0 }
 0x2c9   :  { %v2737_v45 = vmax.f32 %v4328_v23, 0.0  ;;  %v2739_v46 = vmax.f32 %v4392_v30, 0.0 }
 0x2ca   :  { %v2738_v48 = vmax.f32 %v4329_v41, 0.0  ;;  %v2740_v49 = vmax.f32 %v4393_v42, 0.0 }
 0x2cb   :  { %v2857_v50 = vpack.c.bf16 %v2737_v45, %v2733_v44  ;;  %v2859_v53 = vpack.c.bf16 %v2739_v46, %v2735_v40 }
 0x2cc   :  { %v2858_v8 = vpack.c.bf16 %v2738_v48, %v2734_v24  ;;  %v2860_v52 = vpack.c.bf16 %v2740_v49, %v2736_v51  ;;  %v2200_v39 = vpop.f32.mrb[72].mxu0  ;;  %v2586_v33 = vpop.f32.mrb[72].mxu1 }
 0x2cd   :  { %v4330_v54 = vadd.f32 %v2200_v39, %v5641_v13  ;;  %v4394_v27 = vadd.f32 %v2586_v33, %v5645_v15  ;;  %v2202_v29 = vpop.f32.mrb[73].mxu0  ;;  %v2588_v34 = vpop.f32.mrb[73].mxu1 }
 0x2ce   :  { %v4331_v7 = vadd.f32 %v2202_v29, %v5649_v58  ;;  %v4395_v9 = vadd.f32 %v2588_v34, %v5653_v38  ;;  %v2204_v36 = vpop.f32.mrb[74].mxu0  ;;  %v2590_v55 = vpop.f32.mrb[74].mxu1  ;;  %3220 = vmatprep.mubr.bf16.mxu0 %v2858_v8  ;;  %3381 = vmatprep.mubr.bf16.mxu1 %v2860_v52 }
 0x2cf   :  { %v4332_v60 = vadd.f32 %v2204_v36, %v5641_v13  ;;  %v4396_v25 = vadd.f32 %v2590_v55, %v5645_v15  ;;  %v2206_v43 = vpop.f32.mrb[75].mxu0  ;;  %v2592_v47 = vpop.f32.mrb[75].mxu1  ;;  %3221 = vmatmul.mubr.bf16.gmra.mrb[132].mxu0 %v2857_v50  ;;  %3382 = vmatmul.mubr.bf16.gmra.mrb[132].mxu1 %v2859_v53  ;;  %v2741_v32 = vmax.f32 %v4330_v54, 0.0  ;;  %v2743_v20 = vmax.f32 %v4394_v27, 0.0 }
 0x2d0   :  { %v4333_v37 = vadd.f32 %v2206_v43, %v5649_v58  ;;  %v4397_v35 = vadd.f32 %v2592_v47, %v5653_v38  ;;  %v2742_v16 = vmax.f32 %v4331_v7, 0.0  ;;  %v2744_v57 = vmax.f32 %v4395_v9, 0.0 }
 0x2d1   :  { %v2745_v26 = vmax.f32 %v4332_v60, 0.0  ;;  %v2747_v12 = vmax.f32 %v4396_v25, 0.0 }
 0x2d2   :  { %v2746_v59 = vmax.f32 %v4333_v37, 0.0  ;;  %v2748_v19 = vmax.f32 %v4397_v35, 0.0 }
 0x2d3   :  { %v2861_v22 = vpack.c.bf16 %v2745_v26, %v2741_v32  ;;  %v2863_v62 = vpack.c.bf16 %v2747_v12, %v2743_v20 }
 0x2d4   :  { %v2862_v61 = vpack.c.bf16 %v2746_v59, %v2742_v16  ;;  %v2864_v63 = vpack.c.bf16 %v2748_v19, %v2744_v57  ;;  %v2210_v0 = vpop.f32.mrb[76].mxu0  ;;  %v2596_v1 = vpop.f32.mrb[76].mxu1 }
 0x2d5   :  { %v4334_v2 = vadd.f32 %v2210_v0, %v5641_v13  ;;  %v4398_v3 = vadd.f32 %v2596_v1, %v5645_v15  ;;  %v2212_v5 = vpop.f32.mrb[77].mxu0  ;;  %v2598_v6 = vpop.f32.mrb[77].mxu1 }
 0x2d6   :  { %v4335_v10 = vadd.f32 %v2212_v5, %v5649_v58  ;;  %v4399_v11 = vadd.f32 %v2598_v6, %v5653_v38  ;;  %v2214_v14 = vpop.f32.mrb[78].mxu0  ;;  %v2600_v17 = vpop.f32.mrb[78].mxu1  ;;  %3228 = vmatprep.mubr.bf16.mxu0 %v2862_v61  ;;  %3389 = vmatprep.mubr.bf16.mxu1 %v2864_v63 }
 0x2d7   :  { %v4336_v18 = vadd.f32 %v2214_v14, %v5641_v13  ;;  %v4400_v4 = vadd.f32 %v2600_v17, %v5645_v15  ;;  %v2216_v28 = vpop.f32.mrb[79].mxu0  ;;  %v2602_v21 = vpop.f32.mrb[79].mxu1  ;;  %3229 = vmatmul.mubr.bf16.gmra.mrb[136].mxu0 %v2861_v22  ;;  %3390 = vmatmul.mubr.bf16.gmra.mrb[136].mxu1 %v2863_v62  ;;  %v2749_v56 = vmax.f32 %v4334_v2, 0.0  ;;  %v2751_v31 = vmax.f32 %v4398_v3, 0.0 }
 0x2d8   :  { %v4337_v23 = vadd.f32 %v2216_v28, %v5649_v58  ;;  %v4401_v30 = vadd.f32 %v2602_v21, %v5653_v38  ;;  %v2750_v44 = vmax.f32 %v4335_v10, 0.0  ;;  %v2752_v40 = vmax.f32 %v4399_v11, 0.0 }
 0x2d9   :  { %v2753_v41 = vmax.f32 %v4336_v18, 0.0  ;;  %v2755_v42 = vmax.f32 %v4400_v4, 0.0 }
 0x2da   :  { %v2754_v45 = vmax.f32 %v4337_v23, 0.0  ;;  %v2756_v46 = vmax.f32 %v4401_v30, 0.0 }
 0x2db   :  { %v2865_v24 = vpack.c.bf16 %v2753_v41, %v2749_v56  ;;  %v2867_v51 = vpack.c.bf16 %v2755_v42, %v2751_v31 }
 0x2dc   :  { %v2866_v48 = vpack.c.bf16 %v2754_v45, %v2750_v44  ;;  %v2868_v49 = vpack.c.bf16 %v2756_v46, %v2752_v40  ;;  %v2220_v50 = vpop.f32.mrb[80].mxu0  ;;  %v2606_v53 = vpop.f32.mrb[80].mxu1 }
 0x2dd   :  { %v4338_v8 = vadd.f32 %v2220_v50, %v5641_v13  ;;  %v4402_v52 = vadd.f32 %v2606_v53, %v5645_v15  ;;  %v2222_v39 = vpop.f32.mrb[81].mxu0  ;;  %v2608_v33 = vpop.f32.mrb[81].mxu1 }
 0x2de   :  { %v4339_v54 = vadd.f32 %v2222_v39, %v5649_v58  ;;  %v4403_v27 = vadd.f32 %v2608_v33, %v5653_v38  ;;  %v2224_v29 = vpop.f32.mrb[82].mxu0  ;;  %v2610_v34 = vpop.f32.mrb[82].mxu1  ;;  %3236 = vmatprep.mubr.bf16.mxu0 %v2866_v48  ;;  %3397 = vmatprep.mubr.bf16.mxu1 %v2868_v49 }
 0x2df   :  { %v4340_v7 = vadd.f32 %v2224_v29, %v5641_v13  ;;  %v4404_v9 = vadd.f32 %v2610_v34, %v5645_v15  ;;  %v2226_v36 = vpop.f32.mrb[83].mxu0  ;;  %v2612_v55 = vpop.f32.mrb[83].mxu1  ;;  %3237 = vmatmul.mubr.bf16.gmra.mrb[140].mxu0 %v2865_v24  ;;  %3398 = vmatmul.mubr.bf16.gmra.mrb[140].mxu1 %v2867_v51  ;;  %v2757_v43 = vmax.f32 %v4338_v8, 0.0  ;;  %v2759_v47 = vmax.f32 %v4402_v52, 0.0 }
 0x2e0   :  { %v4341_v60 = vadd.f32 %v2226_v36, %v5649_v58  ;;  %v4405_v25 = vadd.f32 %v2612_v55, %v5653_v38  ;;  %v2758_v32 = vmax.f32 %v4339_v54, 0.0  ;;  %v2760_v20 = vmax.f32 %v4403_v27, 0.0 }
 0x2e1   :  { %v2761_v37 = vmax.f32 %v4340_v7, 0.0  ;;  %v2763_v35 = vmax.f32 %v4404_v9, 0.0 }
 0x2e2   :  { %v2762_v26 = vmax.f32 %v4341_v60, 0.0  ;;  %v2764_v12 = vmax.f32 %v4405_v25, 0.0 }
 0x2e3   :  { %v2869_v16 = vpack.c.bf16 %v2761_v37, %v2757_v43  ;;  %v2871_v57 = vpack.c.bf16 %v2763_v35, %v2759_v47 }
 0x2e4   :  { %v2870_v59 = vpack.c.bf16 %v2762_v26, %v2758_v32  ;;  %v2872_v19 = vpack.c.bf16 %v2764_v12, %v2760_v20  ;;  %v2230_v22 = vpop.f32.mrb[84].mxu0  ;;  %v2616_v62 = vpop.f32.mrb[84].mxu1 }
 0x2e5   :  { %v4342_v61 = vadd.f32 %v2230_v22, %v5641_v13  ;;  %v4406_v63 = vadd.f32 %v2616_v62, %v5645_v15  ;;  %v2232_v0 = vpop.f32.mrb[85].mxu0  ;;  %v2618_v1 = vpop.f32.mrb[85].mxu1 }
 0x2e6   :  { %v4343_v2 = vadd.f32 %v2232_v0, %v5649_v58  ;;  %v4407_v3 = vadd.f32 %v2618_v1, %v5653_v38  ;;  %v2234_v5 = vpop.f32.mrb[86].mxu0  ;;  %v2620_v6 = vpop.f32.mrb[86].mxu1  ;;  %3244 = vmatprep.mubr.bf16.mxu0 %v2870_v59  ;;  %3405 = vmatprep.mubr.bf16.mxu1 %v2872_v19 }
 0x2e7   :  { %v4344_v10 = vadd.f32 %v2234_v5, %v5641_v13  ;;  %v4408_v11 = vadd.f32 %v2620_v6, %v5645_v15  ;;  %v2236_v14 = vpop.f32.mrb[87].mxu0  ;;  %v2622_v17 = vpop.f32.mrb[87].mxu1  ;;  %3245 = vmatmul.mubr.bf16.gmra.mrb[144].mxu0 %v2869_v16  ;;  %3406 = vmatmul.mubr.bf16.gmra.mrb[144].mxu1 %v2871_v57  ;;  %v2765_v28 = vmax.f32 %v4342_v61, 0.0  ;;  %v2767_v21 = vmax.f32 %v4406_v63, 0.0 }
 0x2e8   :  { %v4345_v18 = vadd.f32 %v2236_v14, %v5649_v58  ;;  %v4409_v4 = vadd.f32 %v2622_v17, %v5653_v38  ;;  %v2766_v56 = vmax.f32 %v4343_v2, 0.0  ;;  %v2768_v31 = vmax.f32 %v4407_v3, 0.0 }
 0x2e9   :  { %v2769_v23 = vmax.f32 %v4344_v10, 0.0  ;;  %v2771_v30 = vmax.f32 %v4408_v11, 0.0 }
 0x2ea   :  { %v2770_v41 = vmax.f32 %v4345_v18, 0.0  ;;  %v2772_v42 = vmax.f32 %v4409_v4, 0.0 }
 0x2eb   :  { %v2873_v44 = vpack.c.bf16 %v2769_v23, %v2765_v28  ;;  %v2875_v40 = vpack.c.bf16 %v2771_v30, %v2767_v21 }
 0x2ec   :  { %v2874_v45 = vpack.c.bf16 %v2770_v41, %v2766_v56  ;;  %v2876_v46 = vpack.c.bf16 %v2772_v42, %v2768_v31  ;;  %v2240_v24 = vpop.f32.mrb[88].mxu0  ;;  %v2626_v51 = vpop.f32.mrb[88].mxu1 }
 0x2ed   :  { %v4346_v48 = vadd.f32 %v2240_v24, %v5641_v13  ;;  %v4410_v49 = vadd.f32 %v2626_v51, %v5645_v15  ;;  %v2242_v50 = vpop.f32.mrb[89].mxu0  ;;  %v2628_v53 = vpop.f32.mrb[89].mxu1 }
 0x2ee   :  { %v4347_v8 = vadd.f32 %v2242_v50, %v5649_v58  ;;  %v4411_v52 = vadd.f32 %v2628_v53, %v5653_v38  ;;  %v2244_v39 = vpop.f32.mrb[90].mxu0  ;;  %v2630_v33 = vpop.f32.mrb[90].mxu1  ;;  %3252 = vmatprep.mubr.bf16.mxu0 %v2874_v45  ;;  %3413 = vmatprep.mubr.bf16.mxu1 %v2876_v46 }
 0x2ef   :  { %v4348_v54 = vadd.f32 %v2244_v39, %v5641_v13  ;;  %v4412_v27 = vadd.f32 %v2630_v33, %v5645_v15  ;;  %v2246_v29 = vpop.f32.mrb[91].mxu0  ;;  %v2632_v34 = vpop.f32.mrb[91].mxu1  ;;  %3253 = vmatmul.mubr.bf16.gmra.mrb[148].mxu0 %v2873_v44  ;;  %3414 = vmatmul.mubr.bf16.gmra.mrb[148].mxu1 %v2875_v40  ;;  %v2773_v36 = vmax.f32 %v4346_v48, 0.0  ;;  %v2775_v55 = vmax.f32 %v4410_v49, 0.0 }
 0x2f0   :  { %v4349_v7 = vadd.f32 %v2246_v29, %v5649_v58  ;;  %v4413_v9 = vadd.f32 %v2632_v34, %v5653_v38  ;;  %v2774_v43 = vmax.f32 %v4347_v8, 0.0  ;;  %v2776_v47 = vmax.f32 %v4411_v52, 0.0 }
 0x2f1   :  { %v2777_v60 = vmax.f32 %v4348_v54, 0.0  ;;  %v2779_v25 = vmax.f32 %v4412_v27, 0.0 }
 0x2f2   :  { %v2778_v37 = vmax.f32 %v4349_v7, 0.0  ;;  %v2780_v35 = vmax.f32 %v4413_v9, 0.0 }
 0x2f3   :  { %v2877_v32 = vpack.c.bf16 %v2777_v60, %v2773_v36  ;;  %v2879_v20 = vpack.c.bf16 %v2779_v25, %v2775_v55 }
 0x2f4   :  { %v2878_v26 = vpack.c.bf16 %v2778_v37, %v2774_v43  ;;  %v2880_v12 = vpack.c.bf16 %v2780_v35, %v2776_v47  ;;  %v2250_v16 = vpop.f32.mrb[92].mxu0  ;;  %v2636_v57 = vpop.f32.mrb[92].mxu1 }
 0x2f5   :  { %v4350_v59 = vadd.f32 %v2250_v16, %v5641_v13  ;;  %v4414_v19 = vadd.f32 %v2636_v57, %v5645_v15  ;;  %v2252_v22 = vpop.f32.mrb[93].mxu0  ;;  %v2638_v62 = vpop.f32.mrb[93].mxu1 }
 0x2f6   :  { %v4351_v61 = vadd.f32 %v2252_v22, %v5649_v58  ;;  %v4415_v63 = vadd.f32 %v2638_v62, %v5653_v38  ;;  %v2254_v0 = vpop.f32.mrb[94].mxu0  ;;  %v2640_v1 = vpop.f32.mrb[94].mxu1  ;;  %3260 = vmatprep.mubr.bf16.mxu0 %v2878_v26  ;;  %3421 = vmatprep.mubr.bf16.mxu1 %v2880_v12 }
 0x2f7   :  { %v4352_v2 = vadd.f32 %v2254_v0, %v5641_v13  ;;  %v4416_v3 = vadd.f32 %v2640_v1, %v5645_v15  ;;  %v2256_v5 = vpop.f32.mrb[95].mxu0  ;;  %v2642_v6 = vpop.f32.mrb[95].mxu1  ;;  %3261 = vmatmul.mubr.bf16.gmra.mrb[152].mxu0 %v2877_v32  ;;  %3422 = vmatmul.mubr.bf16.gmra.mrb[152].mxu1 %v2879_v20  ;;  %v2781_v14 = vmax.f32 %v4350_v59, 0.0  ;;  %v2783_v17 = vmax.f32 %v4414_v19, 0.0 }
 0x2f8   :  { %v4353_v10 = vadd.f32 %v2256_v5, %v5649_v58  ;;  %v4417_v11 = vadd.f32 %v2642_v6, %v5653_v38  ;;  %v2782_v28 = vmax.f32 %v4351_v61, 0.0  ;;  %v2784_v21 = vmax.f32 %v4415_v63, 0.0 }
 0x2f9   :  { %v2785_v18 = vmax.f32 %v4352_v2, 0.0  ;;  %v2787_v4 = vmax.f32 %v4416_v3, 0.0 }
 0x2fa   :  { %v2786_v23 = vmax.f32 %v4353_v10, 0.0  ;;  %v2788_v30 = vmax.f32 %v4417_v11, 0.0 }
 0x2fb   :  { %v2881_v56 = vpack.c.bf16 %v2785_v18, %v2781_v14  ;;  %v2883_v31 = vpack.c.bf16 %v2787_v4, %v2783_v17 }
 0x2fc   :  { %v2882_v41 = vpack.c.bf16 %v2786_v23, %v2782_v28  ;;  %v2884_v42 = vpack.c.bf16 %v2788_v30, %v2784_v21  ;;  %v2260_v44 = vpop.f32.mrb[96].mxu0  ;;  %v2646_v40 = vpop.f32.mrb[96].mxu1 }
 0x2fd   :  { %v4354_v45 = vadd.f32 %v2260_v44, %v5641_v13  ;;  %v4418_v46 = vadd.f32 %v2646_v40, %v5645_v15  ;;  %v2262_v24 = vpop.f32.mrb[97].mxu0  ;;  %v2648_v51 = vpop.f32.mrb[97].mxu1 }
 0x2fe   :  { %v4355_v48 = vadd.f32 %v2262_v24, %v5649_v58  ;;  %v4419_v49 = vadd.f32 %v2648_v51, %v5653_v38  ;;  %v2264_v50 = vpop.f32.mrb[98].mxu0  ;;  %v2650_v53 = vpop.f32.mrb[98].mxu1  ;;  %3268 = vmatprep.mubr.bf16.mxu0 %v2882_v41  ;;  %3429 = vmatprep.mubr.bf16.mxu1 %v2884_v42 }
 0x2ff   :  { %v4356_v8 = vadd.f32 %v2264_v50, %v5641_v13  ;;  %v4420_v52 = vadd.f32 %v2650_v53, %v5645_v15  ;;  %v2266_v39 = vpop.f32.mrb[99].mxu0  ;;  %v2652_v33 = vpop.f32.mrb[99].mxu1  ;;  %3269 = vmatmul.mubr.bf16.gmra.mrb[156].mxu0 %v2881_v56  ;;  %3430 = vmatmul.mubr.bf16.gmra.mrb[156].mxu1 %v2883_v31  ;;  %v2789_v29 = vmax.f32 %v4354_v45, 0.0  ;;  %v2791_v34 = vmax.f32 %v4418_v46, 0.0 }
 0x300   :  { %v4357_v54 = vadd.f32 %v2266_v39, %v5649_v58  ;;  %v4421_v27 = vadd.f32 %v2652_v33, %v5653_v38  ;;  %v2790_v36 = vmax.f32 %v4355_v48, 0.0  ;;  %v2792_v55 = vmax.f32 %v4419_v49, 0.0 }
 0x301   :  { %v2793_v7 = vmax.f32 %v4356_v8, 0.0  ;;  %v2795_v9 = vmax.f32 %v4420_v52, 0.0 }
 0x302   :  { %v2794_v60 = vmax.f32 %v4357_v54, 0.0  ;;  %v2796_v25 = vmax.f32 %v4421_v27, 0.0 }
 0x303   :  { %v2885_v43 = vpack.c.bf16 %v2793_v7, %v2789_v29  ;;  %v2887_v47 = vpack.c.bf16 %v2795_v9, %v2791_v34 }
 0x304   :  { %v2886_v37 = vpack.c.bf16 %v2794_v60, %v2790_v36  ;;  %v2888_v35 = vpack.c.bf16 %v2796_v25, %v2792_v55  ;;  %v2270_v32 = vpop.f32.mrb[100].mxu0  ;;  %v2656_v20 = vpop.f32.mrb[100].mxu1 }
 0x305   :  { %v4358_v26 = vadd.f32 %v2270_v32, %v5641_v13  ;;  %v4422_v12 = vadd.f32 %v2656_v20, %v5645_v15  ;;  %v2272_v16 = vpop.f32.mrb[101].mxu0  ;;  %v2658_v57 = vpop.f32.mrb[101].mxu1 }
 0x306   :  { %v4359_v59 = vadd.f32 %v2272_v16, %v5649_v58  ;;  %v4423_v19 = vadd.f32 %v2658_v57, %v5653_v38  ;;  %v2274_v22 = vpop.f32.mrb[102].mxu0  ;;  %v2660_v62 = vpop.f32.mrb[102].mxu1  ;;  %3276 = vmatprep.mubr.bf16.mxu0 %v2886_v37  ;;  %3437 = vmatprep.mubr.bf16.mxu1 %v2888_v35 }
 0x307   :  { %v4360_v61 = vadd.f32 %v2274_v22, %v5641_v13  ;;  %v4424_v63 = vadd.f32 %v2660_v62, %v5645_v15  ;;  %v2276_v0 = vpop.f32.mrb[103].mxu0  ;;  %v2662_v1 = vpop.f32.mrb[103].mxu1  ;;  %3277 = vmatmul.mubr.bf16.gmra.mrb[160].mxu0 %v2885_v43  ;;  %3438 = vmatmul.mubr.bf16.gmra.mrb[160].mxu1 %v2887_v47  ;;  %v2797_v5 = vmax.f32 %v4358_v26, 0.0  ;;  %v2799_v6 = vmax.f32 %v4422_v12, 0.0 }
 0x308   :  { %v4361_v2 = vadd.f32 %v2276_v0, %v5649_v58  ;;  %v4425_v3 = vadd.f32 %v2662_v1, %v5653_v38  ;;  %v2798_v14 = vmax.f32 %v4359_v59, 0.0  ;;  %v2800_v17 = vmax.f32 %v4423_v19, 0.0 }
 0x309   :  { %v2801_v10 = vmax.f32 %v4360_v61, 0.0  ;;  %v2803_v11 = vmax.f32 %v4424_v63, 0.0 }
 0x30a   :  { %v2802_v18 = vmax.f32 %v4361_v2, 0.0  ;;  %v2804_v4 = vmax.f32 %v4425_v3, 0.0 }
 0x30b   :  { %v2889_v28 = vpack.c.bf16 %v2801_v10, %v2797_v5  ;;  %v2891_v21 = vpack.c.bf16 %v2803_v11, %v2799_v6 }
 0x30c   :  { %v2890_v23 = vpack.c.bf16 %v2802_v18, %v2798_v14  ;;  %v2892_v30 = vpack.c.bf16 %v2804_v4, %v2800_v17  ;;  %v2280_v56 = vpop.f32.mrb[104].mxu0  ;;  %v2666_v31 = vpop.f32.mrb[104].mxu1 }
 0x30d   :  { %v4362_v41 = vadd.f32 %v2280_v56, %v5641_v13  ;;  %v4426_v42 = vadd.f32 %v2666_v31, %v5645_v15  ;;  %v2282_v44 = vpop.f32.mrb[105].mxu0  ;;  %v2668_v40 = vpop.f32.mrb[105].mxu1 }
 0x30e   :  { %v4363_v45 = vadd.f32 %v2282_v44, %v5649_v58  ;;  %v4427_v46 = vadd.f32 %v2668_v40, %v5653_v38  ;;  %v2284_v24 = vpop.f32.mrb[106].mxu0  ;;  %v2670_v51 = vpop.f32.mrb[106].mxu1  ;;  %3284 = vmatprep.mubr.bf16.mxu0 %v2890_v23  ;;  %3445 = vmatprep.mubr.bf16.mxu1 %v2892_v30 }
 0x30f   :  { %v4364_v48 = vadd.f32 %v2284_v24, %v5641_v13  ;;  %v4428_v49 = vadd.f32 %v2670_v51, %v5645_v15  ;;  %v2286_v50 = vpop.f32.mrb[107].mxu0  ;;  %v2672_v53 = vpop.f32.mrb[107].mxu1  ;;  %3285 = vmatmul.mubr.bf16.gmra.mrb[164].mxu0 %v2889_v28  ;;  %3446 = vmatmul.mubr.bf16.gmra.mrb[164].mxu1 %v2891_v21  ;;  %v2805_v39 = vmax.f32 %v4362_v41, 0.0  ;;  %v2807_v33 = vmax.f32 %v4426_v42, 0.0 }
 0x310   :  { %v4365_v8 = vadd.f32 %v2286_v50, %v5649_v58  ;;  %v4429_v52 = vadd.f32 %v2672_v53, %v5653_v38  ;;  %v2806_v29 = vmax.f32 %v4363_v45, 0.0  ;;  %v2808_v34 = vmax.f32 %v4427_v46, 0.0 }
 0x311   :  { %v2809_v54 = vmax.f32 %v4364_v48, 0.0  ;;  %v2811_v27 = vmax.f32 %v4428_v49, 0.0 }
 0x312   :  { %v2810_v7 = vmax.f32 %v4365_v8, 0.0  ;;  %v2812_v9 = vmax.f32 %v4429_v52, 0.0 }
 0x313   :  { %v2893_v36 = vpack.c.bf16 %v2809_v54, %v2805_v39  ;;  %v2895_v55 = vpack.c.bf16 %v2811_v27, %v2807_v33 }
 0x314   :  { %v2894_v60 = vpack.c.bf16 %v2810_v7, %v2806_v29  ;;  %v2896_v25 = vpack.c.bf16 %v2812_v9, %v2808_v34  ;;  %v2290_v43 = vpop.f32.mrb[108].mxu0  ;;  %v2676_v47 = vpop.f32.mrb[108].mxu1 }
 0x315   :  { %v4366_v37 = vadd.f32 %v2290_v43, %v5641_v13  ;;  %v4430_v35 = vadd.f32 %v2676_v47, %v5645_v15  ;;  %v2292_v32 = vpop.f32.mrb[109].mxu0  ;;  %v2678_v20 = vpop.f32.mrb[109].mxu1 }
 0x316   :  { %v4367_v26 = vadd.f32 %v2292_v32, %v5649_v58  ;;  %v4431_v12 = vadd.f32 %v2678_v20, %v5653_v38  ;;  %v2294_v16 = vpop.f32.mrb[110].mxu0  ;;  %v2680_v57 = vpop.f32.mrb[110].mxu1  ;;  %3292 = vmatprep.mubr.bf16.mxu0 %v2894_v60  ;;  %3453 = vmatprep.mubr.bf16.mxu1 %v2896_v25 }
 0x317   :  { %v4368_v59 = vadd.f32 %v2294_v16, %v5641_v13  ;;  %v4432_v19 = vadd.f32 %v2680_v57, %v5645_v15  ;;  %v2296_v22 = vpop.f32.mrb[111].mxu0  ;;  %v2682_v62 = vpop.f32.mrb[111].mxu1  ;;  %3293 = vmatmul.mubr.bf16.gmra.mrb[168].mxu0 %v2893_v36  ;;  %3454 = vmatmul.mubr.bf16.gmra.mrb[168].mxu1 %v2895_v55  ;;  %v2813_v0 = vmax.f32 %v4366_v37, 0.0  ;;  %v2815_v1 = vmax.f32 %v4430_v35, 0.0 }
 0x318   :  { %v4369_v61 = vadd.f32 %v2296_v22, %v5649_v58  ;;  %v4433_v63 = vadd.f32 %v2682_v62, %v5653_v38  ;;  %v2814_v5 = vmax.f32 %v4367_v26, 0.0  ;;  %v2816_v6 = vmax.f32 %v4431_v12, 0.0 }
 0x319   :  { %v2817_v2 = vmax.f32 %v4368_v59, 0.0  ;;  %v2819_v3 = vmax.f32 %v4432_v19, 0.0 }
 0x31a   :  { %v2818_v10 = vmax.f32 %v4369_v61, 0.0  ;;  %v2820_v11 = vmax.f32 %v4433_v63, 0.0 }
 0x31b   :  { %v2897_v14 = vpack.c.bf16 %v2817_v2, %v2813_v0  ;;  %v2899_v17 = vpack.c.bf16 %v2819_v3, %v2815_v1 }
 0x31c   :  { %v2898_v18 = vpack.c.bf16 %v2818_v10, %v2814_v5  ;;  %v2900_v4 = vpack.c.bf16 %v2820_v11, %v2816_v6  ;;  %v2300_v28 = vpop.f32.mrb[112].mxu0  ;;  %v2686_v21 = vpop.f32.mrb[112].mxu1 }
 0x31d   :  { %v4370_v23 = vadd.f32 %v2300_v28, %v5641_v13  ;;  %v4434_v30 = vadd.f32 %v2686_v21, %v5645_v15  ;;  %v2302_v56 = vpop.f32.mrb[113].mxu0  ;;  %v2688_v31 = vpop.f32.mrb[113].mxu1 }
 0x31e   :  { %v4371_v41 = vadd.f32 %v2302_v56, %v5649_v58  ;;  %v4435_v42 = vadd.f32 %v2688_v31, %v5653_v38  ;;  %v2304_v44 = vpop.f32.mrb[114].mxu0  ;;  %v2690_v40 = vpop.f32.mrb[114].mxu1  ;;  %3300 = vmatprep.mubr.bf16.mxu0 %v2898_v18  ;;  %3461 = vmatprep.mubr.bf16.mxu1 %v2900_v4 }
 0x31f   :  { %v4372_v45 = vadd.f32 %v2304_v44, %v5641_v13  ;;  %v4436_v46 = vadd.f32 %v2690_v40, %v5645_v15  ;;  %v2306_v24 = vpop.f32.mrb[115].mxu0  ;;  %v2692_v51 = vpop.f32.mrb[115].mxu1  ;;  %3301 = vmatmul.mubr.bf16.gmra.mrb[172].mxu0 %v2897_v14  ;;  %3462 = vmatmul.mubr.bf16.gmra.mrb[172].mxu1 %v2899_v17  ;;  %v2821_v50 = vmax.f32 %v4370_v23, 0.0  ;;  %v2823_v53 = vmax.f32 %v4434_v30, 0.0 }
 0x320   :  { %v4373_v48 = vadd.f32 %v2306_v24, %v5649_v58  ;;  %v4437_v49 = vadd.f32 %v2692_v51, %v5653_v38  ;;  %v2822_v39 = vmax.f32 %v4371_v41, 0.0  ;;  %v2824_v33 = vmax.f32 %v4435_v42, 0.0 }
 0x321   :  { %v2825_v8 = vmax.f32 %v4372_v45, 0.0  ;;  %v2827_v52 = vmax.f32 %v4436_v46, 0.0 }
 0x322   :  { %v2826_v54 = vmax.f32 %v4373_v48, 0.0  ;;  %v2828_v27 = vmax.f32 %v4437_v49, 0.0 }
 0x323   :  { %v2901_v29 = vpack.c.bf16 %v2825_v8, %v2821_v50  ;;  %v2903_v34 = vpack.c.bf16 %v2827_v52, %v2823_v53 }
 0x324   :  { %v2902_v7 = vpack.c.bf16 %v2826_v54, %v2822_v39  ;;  %v2904_v9 = vpack.c.bf16 %v2828_v27, %v2824_v33  ;;  %v2310_v36 = vpop.f32.mrb[116].mxu0  ;;  %v2696_v55 = vpop.f32.mrb[116].mxu1 }
 0x325   :  { %v4374_v60 = vadd.f32 %v2310_v36, %v5641_v13  ;;  %v4438_v25 = vadd.f32 %v2696_v55, %v5645_v15  ;;  %v2312_v43 = vpop.f32.mrb[117].mxu0  ;;  %v2698_v47 = vpop.f32.mrb[117].mxu1 }
 0x326   :  { %v4375_v37 = vadd.f32 %v2312_v43, %v5649_v58  ;;  %v4439_v35 = vadd.f32 %v2698_v47, %v5653_v38  ;;  %v2314_v32 = vpop.f32.mrb[118].mxu0  ;;  %v2700_v20 = vpop.f32.mrb[118].mxu1  ;;  %3308 = vmatprep.mubr.bf16.mxu0 %v2902_v7  ;;  %3469 = vmatprep.mubr.bf16.mxu1 %v2904_v9 }
 0x327   :  { %v4376_v26 = vadd.f32 %v2314_v32, %v5641_v13  ;;  %v4440_v12 = vadd.f32 %v2700_v20, %v5645_v15  ;;  %v2316_v16 = vpop.f32.mrb[119].mxu0  ;;  %v2702_v57 = vpop.f32.mrb[119].mxu1  ;;  %3309 = vmatmul.mubr.bf16.gmra.mrb[176].mxu0 %v2901_v29  ;;  %3470 = vmatmul.mubr.bf16.gmra.mrb[176].mxu1 %v2903_v34  ;;  %v2829_v22 = vmax.f32 %v4374_v60, 0.0  ;;  %v2831_v62 = vmax.f32 %v4438_v25, 0.0 }
 0x328   :  { %v4377_v59 = vadd.f32 %v2316_v16, %v5649_v58  ;;  %v4441_v19 = vadd.f32 %v2702_v57, %v5653_v38  ;;  %v2830_v0 = vmax.f32 %v4375_v37, 0.0  ;;  %v2832_v1 = vmax.f32 %v4439_v35, 0.0 }
 0x329   :  { %v2833_v61 = vmax.f32 %v4376_v26, 0.0  ;;  %v2835_v63 = vmax.f32 %v4440_v12, 0.0 }
 0x32a   :  { %v2834_v2 = vmax.f32 %v4377_v59, 0.0  ;;  %v2836_v3 = vmax.f32 %v4441_v19, 0.0 }
 0x32b   :  { %v2905_v5 = vpack.c.bf16 %v2833_v61, %v2829_v22  ;;  %v2907_v6 = vpack.c.bf16 %v2835_v63, %v2831_v62 }
 0x32c   :  { %v2906_v10 = vpack.c.bf16 %v2834_v2, %v2830_v0  ;;  %v2908_v11 = vpack.c.bf16 %v2836_v3, %v2832_v1  ;;  %v2320_v14 = vpop.f32.mrb[120].mxu0  ;;  %v2706_v17 = vpop.f32.mrb[120].mxu1 }
 0x32d   :  { %v4378_v18 = vadd.f32 %v2320_v14, %v5641_v13  ;;  %v4442_v4 = vadd.f32 %v2706_v17, %v5645_v15  ;;  %v2322_v28 = vpop.f32.mrb[121].mxu0  ;;  %v2708_v21 = vpop.f32.mrb[121].mxu1 }
 0x32e   :  { %v4379_v23 = vadd.f32 %v2322_v28, %v5649_v58  ;;  %v4443_v30 = vadd.f32 %v2708_v21, %v5653_v38  ;;  %v2324_v56 = vpop.f32.mrb[122].mxu0  ;;  %v2710_v31 = vpop.f32.mrb[122].mxu1  ;;  %3316 = vmatprep.mubr.bf16.mxu0 %v2906_v10  ;;  %3477 = vmatprep.mubr.bf16.mxu1 %v2908_v11 }
 0x32f   :  { %v4380_v41 = vadd.f32 %v2324_v56, %v5641_v13  ;;  %v4444_v42 = vadd.f32 %v2710_v31, %v5645_v15  ;;  %v2326_v44 = vpop.f32.mrb[123].mxu0  ;;  %v2712_v40 = vpop.f32.mrb[123].mxu1  ;;  %3317 = vmatmul.mubr.bf16.gmra.mrb[180].mxu0 %v2905_v5  ;;  %3478 = vmatmul.mubr.bf16.gmra.mrb[180].mxu1 %v2907_v6  ;;  %v2837_v24 = vmax.f32 %v4378_v18, 0.0  ;;  %v2839_v51 = vmax.f32 %v4442_v4, 0.0 }
 0x330   :  { %v4381_v45 = vadd.f32 %v2326_v44, %v5649_v58  ;;  %v4445_v46 = vadd.f32 %v2712_v40, %v5653_v38  ;;  %v2838_v50 = vmax.f32 %v4379_v23, 0.0  ;;  %v2840_v53 = vmax.f32 %v4443_v30, 0.0 }
 0x331   :  { %v2841_v48 = vmax.f32 %v4380_v41, 0.0  ;;  %v2843_v49 = vmax.f32 %v4444_v42, 0.0 }
 0x332   :  { %v2842_v8 = vmax.f32 %v4381_v45, 0.0  ;;  %v2844_v52 = vmax.f32 %v4445_v46, 0.0 }
 0x333   :  { %v2909_v39 = vpack.c.bf16 %v2841_v48, %v2837_v24  ;;  %v2911_v33 = vpack.c.bf16 %v2843_v49, %v2839_v51 }
 0x334   :  { %v2910_v54 = vpack.c.bf16 %v2842_v8, %v2838_v50  ;;  %v2912_v27 = vpack.c.bf16 %v2844_v52, %v2840_v53  ;;  %v2330_v29 = vpop.f32.mrb[124].mxu0  ;;  %v2716_v34 = vpop.f32.mrb[124].mxu1 }
 0x335   :  { %v4382_v7 = vadd.f32 %v2330_v29, %v5641_v13  ;;  %v4446_v9 = vadd.f32 %v2716_v34, %v5645_v15  ;;  %v2332_v36 = vpop.f32.mrb[125].mxu0  ;;  %v2718_v55 = vpop.f32.mrb[125].mxu1 }
 0x336   :  { %v4383_v60 = vadd.f32 %v2332_v36, %v5649_v58  ;;  %v4447_v25 = vadd.f32 %v2718_v55, %v5653_v38  ;;  %v2334_v43 = vpop.f32.mrb[126].mxu0  ;;  %v2720_v47 = vpop.f32.mrb[126].mxu1  ;;  %3324 = vmatprep.mubr.bf16.mxu0 %v2910_v54  ;;  %3485 = vmatprep.mubr.bf16.mxu1 %v2912_v27 }
 0x337   :  { %v4384_v37 = vadd.f32 %v2334_v43, %v5641_v13  ;;  %v4448_v35 = vadd.f32 %v2720_v47, %v5645_v15  ;;  %v2336_v32 = vpop.f32.mrb[127].mxu0  ;;  %v2722_v20 = vpop.f32.mrb[127].mxu1  ;;  %3325 = vmatmul.mubr.bf16.gmra.mrb[184].mxu0 %v2909_v39  ;;  %3486 = vmatmul.mubr.bf16.gmra.mrb[184].mxu1 %v2911_v33  ;;  %v2845_v16 = vmax.f32 %v4382_v7, 0.0  ;;  %v2847_v57 = vmax.f32 %v4446_v9, 0.0 }
 0x338   :  { %v4385_v26 = vadd.f32 %v2336_v32, %v5649_v58  ;;  %v4449_v12 = vadd.f32 %v2722_v20, %v5653_v38  ;;  %v2846_v22 = vmax.f32 %v4383_v60, 0.0  ;;  %v2848_v62 = vmax.f32 %v4447_v25, 0.0  ;;  %v5786_v38 = vld [vmem:[%s6094_s6] ss:$0 sm:$0xff]  ;;  %s5163_s6 = smov [#allocation10]  }
 0x339   :  { %v2849_v59 = vmax.f32 %v4384_v37, 0.0  ;;  %v2851_v19 = vmax.f32 %v4448_v35, 0.0  ;;  %s3859_s30 = sshll.u32 %s5163_s6, 4  ;;  %s3860_s30 = int_to_ptr.vmem [resolvable:$true] %s3859_s30 }
 0x33a   :  { %v2850_v61 = vmax.f32 %v4385_v26, 0.0  ;;  %v2852_v63 = vmax.f32 %v4449_v12, 0.0  ;;  %s5125_s8 = scalar_lea.vmem %s3860_s30, 4096  ;;  %p5130_p5 = scmp.lt.s32.totalorder %s3860_s30, %s3860_s30 }
 0x33b   :  { %v2913_v0 = vpack.c.bf16 %v2849_v59, %v2845_v16  ;;  %v2915_v13 = vpack.c.bf16 %v2851_v19, %v2847_v57  ;;  %p5126_p4 = scmp.ne.s32.totalorder %s3860_s30, %s5125_s8  ;;  %p5131_p6 = scmp.lt.s32.totalorder %s5125_s8, %s5125_s8 }
 0x33c   :  { %v2914_v1 = vpack.c.bf16 %v2850_v61, %v2846_v22  ;;  %v2916_v15 = vpack.c.bf16 %v2852_v63, %v2848_v62 }
 0x33d   :  { %p5132_p7 = por %p5131_p6, %p5130_p5 }
 0x33e   :  { %3332 = vmatprep.mubr.bf16.mxu0 %v2914_v1  ;;  %3493 = vmatprep.mubr.bf16.mxu1 %v2916_v15 }
 0x33f   :  { %3333 = vmatmul.mubr.bf16.gmra.mrb[188].mxu0 %v2913_v0  ;;  %3494 = vmatmul.mubr.bf16.gmra.mrb[188].mxu1 %v2915_v13  ;;  %p5133_p8 = pnand %p5132_p7, %p5126_p4 }
 0x39a   :  { %v4114_v2 = vpop.f32.mrb[128].mxu0  ;;  %v4226_v58 = vpop.f32.mrb[128].mxu1 }
 0x39b   :  { %v4115_v3 = vpop.f32.mrb[129].mxu0  ;;  %v4227_v5 = vpop.f32.mrb[129].mxu1 }
 0x39c   :  { %v4116_v6 = vadd.f32 %v4115_v3, %v4114_v2  ;;  %v4228_v10 = vadd.f32 %v4227_v5, %v4226_v58  ;;  %v4117_v11 = vpop.f32.mrb[130].mxu0  ;;  %v4229_v14 = vpop.f32.mrb[130].mxu1 }
 0x39d   :  { %v4118_v17 = vpop.f32.mrb[131].mxu0  ;;  %v4230_v18 = vpop.f32.mrb[131].mxu1 }
 0x39e   :  { %v3215_v4 = vadd.f32 %v4116_v6, %v5786_v38  ;;  %v4119_v28 = vadd.f32 %v4118_v17, %v4117_v11  ;;  %v4231_v21 = vadd.f32 %v4230_v18, %v4229_v14 }
 0x3a0   :  { %v3218_v23 = vadd.f32 %v4119_v28, %v5786_v38  ;;  %v5790_v30 = vadd.f32 %v4228_v10, %v3215_v4 }
 0x3a2   :  { %v4120_v56 = vpop.f32.mrb[132].mxu0  ;;  %v4232_v31 = vpop.f32.mrb[132].mxu1  ;;  %3502 = vmax.xlane.f32.xlu0 %v5790_v30  ;;  %v5793_v41 = vadd.f32 %v4231_v21, %v3218_v23 }
 0x3a3   :  { %v4121_v42 = vpop.f32.mrb[133].mxu0  ;;  %v4233_v44 = vpop.f32.mrb[133].mxu1 }
 0x3a4   :  { %v4122_v40 = vadd.f32 %v4121_v42, %v4120_v56  ;;  %v4234_v45 = vadd.f32 %v4233_v44, %v4232_v31  ;;  %v4123_v46 = vpop.f32.mrb[134].mxu0  ;;  %v4235_v24 = vpop.f32.mrb[134].mxu1 }
 0x3a5   :  { %v4124_v51 = vpop.f32.mrb[135].mxu0  ;;  %v4236_v48 = vpop.f32.mrb[135].mxu1 }
 0x3a6   :  { %v3223_v49 = vadd.f32 %v4122_v40, %v5786_v38  ;;  %v4125_v50 = vadd.f32 %v4124_v51, %v4123_v46  ;;  %v4237_v53 = vadd.f32 %v4236_v48, %v4235_v24  ;;  %3504 = vmax.xlane.f32.xlu0 %v5793_v41 }
 0x3a8   :  { %v3226_v8 = vadd.f32 %v4125_v50, %v5786_v38  ;;  %v5798_v52 = vadd.f32 %v4234_v45, %v3223_v49 }
 0x3aa   :  { %v4126_v39 = vpop.f32.mrb[136].mxu0  ;;  %v4238_v33 = vpop.f32.mrb[136].mxu1  ;;  %3506 = vmax.xlane.f32.xlu1 %v5798_v52  ;;  %v5801_v54 = vadd.f32 %v4237_v53, %v3226_v8 }
 0x3ab   :  { %v4127_v27 = vpop.f32.mrb[137].mxu0  ;;  %v4239_v29 = vpop.f32.mrb[137].mxu1 }
 0x3ac   :  { %v4128_v34 = vadd.f32 %v4127_v27, %v4126_v39  ;;  %v4240_v7 = vadd.f32 %v4239_v29, %v4238_v33  ;;  %v4129_v9 = vpop.f32.mrb[138].mxu0  ;;  %v4241_v36 = vpop.f32.mrb[138].mxu1 }
 0x3ad   :  { %v4130_v55 = vpop.f32.mrb[139].mxu0  ;;  %v4242_v60 = vpop.f32.mrb[139].mxu1 }
 0x3ae   :  { %v3231_v25 = vadd.f32 %v4128_v34, %v5786_v38  ;;  %v4131_v43 = vadd.f32 %v4130_v55, %v4129_v9  ;;  %v4243_v47 = vadd.f32 %v4242_v60, %v4241_v36  ;;  %3508 = vmax.xlane.f32.xlu1 %v5801_v54 }
 0x3b0   :  { %v3234_v37 = vadd.f32 %v4131_v43, %v5786_v38  ;;  %v5806_v35 = vadd.f32 %v4240_v7, %v3231_v25 }
 0x3b2   :  { %v4132_v32 = vpop.f32.mrb[140].mxu0  ;;  %v4244_v20 = vpop.f32.mrb[140].mxu1  ;;  %3510 = vmax.xlane.f32.xlu0 %v5806_v35  ;;  %v5809_v26 = vadd.f32 %v4243_v47, %v3234_v37 }
 0x3b3   :  { %v4133_v12 = vpop.f32.mrb[141].mxu0  ;;  %v4245_v16 = vpop.f32.mrb[141].mxu1 }
 0x3b4   :  { %v4134_v57 = vadd.f32 %v4133_v12, %v4132_v32  ;;  %v4246_v59 = vadd.f32 %v4245_v16, %v4244_v20  ;;  %v4135_v19 = vpop.f32.mrb[142].mxu0  ;;  %v4247_v22 = vpop.f32.mrb[142].mxu1  ;;  %3512 = vmax.xlane.f32.xlu1 %v5809_v26 }
 0x3b5   :  { %v4136_v62 = vpop.f32.mrb[143].mxu0  ;;  %v4248_v61 = vpop.f32.mrb[143].mxu1 }
 0x3b6   :  { %v3239_v63 = vadd.f32 %v4134_v57, %v5786_v38  ;;  %v4137_v0 = vadd.f32 %v4136_v62, %v4135_v19  ;;  %v4249_v13 = vadd.f32 %v4248_v61, %v4247_v22 }
 0x3b8   :  { %v3242_v1 = vadd.f32 %v4137_v0, %v5786_v38  ;;  %v5814_v15 = vadd.f32 %v4246_v59, %v3239_v63 }
 0x3ba   :  { %v4138_v2 = vpop.f32.mrb[144].mxu0  ;;  %v4250_v58 = vpop.f32.mrb[144].mxu1  ;;  %3514 = vmax.xlane.f32.xlu0 %v5814_v15  ;;  %v5817_v3 = vadd.f32 %v4249_v13, %v3242_v1 }
 0x3bb   :  { %v4139_v5 = vpop.f32.mrb[145].mxu0  ;;  %v4251_v6 = vpop.f32.mrb[145].mxu1 }
 0x3bc   :  { %v4140_v10 = vadd.f32 %v4139_v5, %v4138_v2  ;;  %v4252_v11 = vadd.f32 %v4251_v6, %v4250_v58  ;;  %v4141_v14 = vpop.f32.mrb[146].mxu0  ;;  %v4253_v17 = vpop.f32.mrb[146].mxu1  ;;  %3516 = vmax.xlane.f32.xlu1 %v5817_v3 }
 0x3bd   :  { %v4142_v18 = vpop.f32.mrb[147].mxu0  ;;  %v4254_v4 = vpop.f32.mrb[147].mxu1 }
 0x3be   :  { %v3247_v28 = vadd.f32 %v4140_v10, %v5786_v38  ;;  %v4143_v21 = vadd.f32 %v4142_v18, %v4141_v14  ;;  %v4255_v23 = vadd.f32 %v4254_v4, %v4253_v17 }
 0x3c0   :  { %v3250_v56 = vadd.f32 %v4143_v21, %v5786_v38  ;;  %v5822_v31 = vadd.f32 %v4252_v11, %v3247_v28 }
 0x3c2   :  { %v4144_v42 = vpop.f32.mrb[148].mxu0  ;;  %v4256_v44 = vpop.f32.mrb[148].mxu1  ;;  %3518 = vmax.xlane.f32.xlu0 %v5822_v31  ;;  %v5825_v40 = vadd.f32 %v4255_v23, %v3250_v56 }
 0x3c3   :  { %v4145_v45 = vpop.f32.mrb[149].mxu0  ;;  %v4257_v46 = vpop.f32.mrb[149].mxu1 }
 0x3c4   :  { %v4146_v24 = vadd.f32 %v4145_v45, %v4144_v42  ;;  %v4258_v51 = vadd.f32 %v4257_v46, %v4256_v44  ;;  %v4147_v48 = vpop.f32.mrb[150].mxu0  ;;  %v4259_v49 = vpop.f32.mrb[150].mxu1  ;;  %3520 = vmax.xlane.f32.xlu1 %v5825_v40 }
 0x3c5   :  { %v4148_v50 = vpop.f32.mrb[151].mxu0  ;;  %v4260_v53 = vpop.f32.mrb[151].mxu1 }
 0x3c6   :  { %v3255_v8 = vadd.f32 %v4146_v24, %v5786_v38  ;;  %v4149_v39 = vadd.f32 %v4148_v50, %v4147_v48  ;;  %v4261_v33 = vadd.f32 %v4260_v53, %v4259_v49 }
 0x3c8   :  { %v3258_v27 = vadd.f32 %v4149_v39, %v5786_v38  ;;  %v5830_v29 = vadd.f32 %v4258_v51, %v3255_v8 }
 0x3ca   :  { %v4150_v34 = vpop.f32.mrb[152].mxu0  ;;  %v4262_v7 = vpop.f32.mrb[152].mxu1  ;;  %3522 = vmax.xlane.f32.xlu0 %v5830_v29  ;;  %v5833_v9 = vadd.f32 %v4261_v33, %v3258_v27 }
 0x3cb   :  { %v4151_v36 = vpop.f32.mrb[153].mxu0  ;;  %v4263_v55 = vpop.f32.mrb[153].mxu1 }
 0x3cc   :  { %v4152_v60 = vadd.f32 %v4151_v36, %v4150_v34  ;;  %v4264_v25 = vadd.f32 %v4263_v55, %v4262_v7  ;;  %v4153_v43 = vpop.f32.mrb[154].mxu0  ;;  %v4265_v47 = vpop.f32.mrb[154].mxu1  ;;  %3524 = vmax.xlane.f32.xlu1 %v5833_v9 }
 0x3cd   :  { %v4154_v37 = vpop.f32.mrb[155].mxu0  ;;  %v4266_v32 = vpop.f32.mrb[155].mxu1 }
 0x3ce   :  { %v3263_v20 = vadd.f32 %v4152_v60, %v5786_v38  ;;  %v4155_v12 = vadd.f32 %v4154_v37, %v4153_v43  ;;  %v4267_v16 = vadd.f32 %v4266_v32, %v4265_v47 }
 0x3d0   :  { %v3266_v57 = vadd.f32 %v4155_v12, %v5786_v38  ;;  %v5838_v59 = vadd.f32 %v4264_v25, %v3263_v20 }
 0x3d2   :  { %v4156_v19 = vpop.f32.mrb[156].mxu0  ;;  %v4268_v22 = vpop.f32.mrb[156].mxu1  ;;  %3526 = vmax.xlane.f32.xlu0 %v5838_v59  ;;  %v5841_v62 = vadd.f32 %v4267_v16, %v3266_v57 }
 0x3d3   :  { %v4157_v61 = vpop.f32.mrb[157].mxu0  ;;  %v4269_v63 = vpop.f32.mrb[157].mxu1 }
 0x3d4   :  { %v4158_v0 = vadd.f32 %v4157_v61, %v4156_v19  ;;  %v4270_v13 = vadd.f32 %v4269_v63, %v4268_v22  ;;  %v4159_v1 = vpop.f32.mrb[158].mxu0  ;;  %v4271_v2 = vpop.f32.mrb[158].mxu1  ;;  %3528 = vmax.xlane.f32.xlu1 %v5841_v62 }
 0x3d5   :  { %v4160_v58 = vpop.f32.mrb[159].mxu0  ;;  %v4272_v5 = vpop.f32.mrb[159].mxu1 }
 0x3d6   :  { %v3271_v6 = vadd.f32 %v4158_v0, %v5786_v38  ;;  %v4161_v10 = vadd.f32 %v4160_v58, %v4159_v1  ;;  %v4273_v11 = vadd.f32 %v4272_v5, %v4271_v2 }
 0x3d8   :  { %v3274_v14 = vadd.f32 %v4161_v10, %v5786_v38  ;;  %v5846_v17 = vadd.f32 %v4270_v13, %v3271_v6 }
 0x3da   :  { %v4162_v18 = vpop.f32.mrb[160].mxu0  ;;  %v4274_v4 = vpop.f32.mrb[160].mxu1  ;;  %3530 = vmax.xlane.f32.xlu0 %v5846_v17  ;;  %v5849_v28 = vadd.f32 %v4273_v11, %v3274_v14 }
 0x3db   :  { %v4163_v21 = vpop.f32.mrb[161].mxu0  ;;  %v4275_v23 = vpop.f32.mrb[161].mxu1 }
 0x3dc   :  { %v4164_v56 = vadd.f32 %v4163_v21, %v4162_v18  ;;  %v4276_v42 = vadd.f32 %v4275_v23, %v4274_v4  ;;  %v4165_v44 = vpop.f32.mrb[162].mxu0  ;;  %v4277_v45 = vpop.f32.mrb[162].mxu1  ;;  %3532 = vmax.xlane.f32.xlu1 %v5849_v28 }
 0x3dd   :  { %v4166_v46 = vpop.f32.mrb[163].mxu0  ;;  %v4278_v24 = vpop.f32.mrb[163].mxu1 }
 0x3de   :  { %v3279_v51 = vadd.f32 %v4164_v56, %v5786_v38  ;;  %v4167_v48 = vadd.f32 %v4166_v46, %v4165_v44  ;;  %v4279_v49 = vadd.f32 %v4278_v24, %v4277_v45 }
 0x3e0   :  { %v3282_v50 = vadd.f32 %v4167_v48, %v5786_v38  ;;  %v5854_v53 = vadd.f32 %v4276_v42, %v3279_v51 }
 0x3e2   :  { %v4168_v8 = vpop.f32.mrb[164].mxu0  ;;  %v4280_v39 = vpop.f32.mrb[164].mxu1  ;;  %3534 = vmax.xlane.f32.xlu0 %v5854_v53  ;;  %v5857_v33 = vadd.f32 %v4279_v49, %v3282_v50 }
 0x3e3   :  { %v4169_v27 = vpop.f32.mrb[165].mxu0  ;;  %v4281_v34 = vpop.f32.mrb[165].mxu1 }
 0x3e4   :  { %v4170_v7 = vadd.f32 %v4169_v27, %v4168_v8  ;;  %v4282_v36 = vadd.f32 %v4281_v34, %v4280_v39  ;;  %v4171_v55 = vpop.f32.mrb[166].mxu0  ;;  %v4283_v60 = vpop.f32.mrb[166].mxu1  ;;  %3536 = vmax.xlane.f32.xlu1 %v5857_v33 }
 0x3e5   :  { %v4172_v25 = vpop.f32.mrb[167].mxu0  ;;  %v4284_v43 = vpop.f32.mrb[167].mxu1 }
 0x3e6   :  { %v3287_v47 = vadd.f32 %v4170_v7, %v5786_v38  ;;  %v4173_v37 = vadd.f32 %v4172_v25, %v4171_v55  ;;  %v4285_v32 = vadd.f32 %v4284_v43, %v4283_v60 }
 0x3e8   :  { %v3290_v20 = vadd.f32 %v4173_v37, %v5786_v38  ;;  %v5862_v12 = vadd.f32 %v4282_v36, %v3287_v47 }
 0x3ea   :  { %v4174_v16 = vpop.f32.mrb[168].mxu0  ;;  %v4286_v57 = vpop.f32.mrb[168].mxu1  ;;  %3538 = vmax.xlane.f32.xlu0 %v5862_v12  ;;  %v5865_v19 = vadd.f32 %v4285_v32, %v3290_v20 }
 0x3eb   :  { %v4175_v22 = vpop.f32.mrb[169].mxu0  ;;  %v4287_v61 = vpop.f32.mrb[169].mxu1 }
 0x3ec   :  { %v4176_v63 = vadd.f32 %v4175_v22, %v4174_v16  ;;  %v4288_v0 = vadd.f32 %v4287_v61, %v4286_v57  ;;  %v4177_v13 = vpop.f32.mrb[170].mxu0  ;;  %v4289_v1 = vpop.f32.mrb[170].mxu1  ;;  %3540 = vmax.xlane.f32.xlu1 %v5865_v19 }
 0x3ed   :  { %v4178_v2 = vpop.f32.mrb[171].mxu0  ;;  %v4290_v58 = vpop.f32.mrb[171].mxu1 }
 0x3ee   :  { %v3295_v5 = vadd.f32 %v4176_v63, %v5786_v38  ;;  %v4179_v6 = vadd.f32 %v4178_v2, %v4177_v13  ;;  %v4291_v10 = vadd.f32 %v4290_v58, %v4289_v1 }
 0x3f0   :  { %v3298_v11 = vadd.f32 %v4179_v6, %v5786_v38  ;;  %v5870_v14 = vadd.f32 %v4288_v0, %v3295_v5 }
 0x3f2   :  { %v4180_v18 = vpop.f32.mrb[172].mxu0  ;;  %v4292_v4 = vpop.f32.mrb[172].mxu1  ;;  %3542 = vmax.xlane.f32.xlu0 %v5870_v14  ;;  %v5873_v21 = vadd.f32 %v4291_v10, %v3298_v11 }
 0x3f3   :  { %v4181_v23 = vpop.f32.mrb[173].mxu0  ;;  %v4293_v56 = vpop.f32.mrb[173].mxu1 }
 0x3f4   :  { %v4182_v42 = vadd.f32 %v4181_v23, %v4180_v18  ;;  %v4294_v44 = vadd.f32 %v4293_v56, %v4292_v4  ;;  %v4183_v45 = vpop.f32.mrb[174].mxu0  ;;  %v4295_v46 = vpop.f32.mrb[174].mxu1  ;;  %3544 = vmax.xlane.f32.xlu1 %v5873_v21 }
 0x3f5   :  { %v4184_v24 = vpop.f32.mrb[175].mxu0  ;;  %v4296_v51 = vpop.f32.mrb[175].mxu1 }
 0x3f6   :  { %v3303_v48 = vadd.f32 %v4182_v42, %v5786_v38  ;;  %v4185_v49 = vadd.f32 %v4184_v24, %v4183_v45  ;;  %v4297_v50 = vadd.f32 %v4296_v51, %v4295_v46 }
 0x3f8   :  { %v3306_v8 = vadd.f32 %v4185_v49, %v5786_v38  ;;  %v5878_v39 = vadd.f32 %v4294_v44, %v3303_v48 }
 0x3fa   :  { %v4186_v27 = vpop.f32.mrb[176].mxu0  ;;  %v4298_v34 = vpop.f32.mrb[176].mxu1  ;;  %3546 = vmax.xlane.f32.xlu0 %v5878_v39  ;;  %v5881_v7 = vadd.f32 %v4297_v50, %v3306_v8 }
 0x3fb   :  { %v4187_v36 = vpop.f32.mrb[177].mxu0  ;;  %v4299_v55 = vpop.f32.mrb[177].mxu1 }
 0x3fc   :  { %v4188_v60 = vadd.f32 %v4187_v36, %v4186_v27  ;;  %v4300_v25 = vadd.f32 %v4299_v55, %v4298_v34  ;;  %v4189_v43 = vpop.f32.mrb[178].mxu0  ;;  %v4301_v47 = vpop.f32.mrb[178].mxu1  ;;  %3548 = vmax.xlane.f32.xlu1 %v5881_v7 }
 0x3fd   :  { %v4190_v37 = vpop.f32.mrb[179].mxu0  ;;  %v4302_v32 = vpop.f32.mrb[179].mxu1 }
 0x3fe   :  { %v3311_v20 = vadd.f32 %v4188_v60, %v5786_v38  ;;  %v4191_v16 = vadd.f32 %v4190_v37, %v4189_v43  ;;  %v4303_v57 = vadd.f32 %v4302_v32, %v4301_v47 }
 0x400   :  { %v3314_v22 = vadd.f32 %v4191_v16, %v5786_v38  ;;  %v5886_v61 = vadd.f32 %v4300_v25, %v3311_v20 }
 0x402   :  { %v4192_v63 = vpop.f32.mrb[180].mxu0  ;;  %v4304_v0 = vpop.f32.mrb[180].mxu1  ;;  %3550 = vmax.xlane.f32.xlu0 %v5886_v61  ;;  %v5889_v13 = vadd.f32 %v4303_v57, %v3314_v22 }
 0x403   :  { %v4193_v1 = vpop.f32.mrb[181].mxu0  ;;  %v4305_v2 = vpop.f32.mrb[181].mxu1 }
 0x404   :  { %v4194_v58 = vadd.f32 %v4193_v1, %v4192_v63  ;;  %v4306_v5 = vadd.f32 %v4305_v2, %v4304_v0  ;;  %v4195_v6 = vpop.f32.mrb[182].mxu0  ;;  %v4307_v10 = vpop.f32.mrb[182].mxu1  ;;  %3552 = vmax.xlane.f32.xlu1 %v5889_v13 }
 0x405   :  { %v4196_v11 = vpop.f32.mrb[183].mxu0  ;;  %v4308_v18 = vpop.f32.mrb[183].mxu1 }
 0x406   :  { %v3319_v4 = vadd.f32 %v4194_v58, %v5786_v38  ;;  %v4197_v23 = vadd.f32 %v4196_v11, %v4195_v6  ;;  %v4309_v56 = vadd.f32 %v4308_v18, %v4307_v10 }
 0x408   :  { %v3322_v42 = vadd.f32 %v4197_v23, %v5786_v38  ;;  %v5894_v44 = vadd.f32 %v4306_v5, %v3319_v4 }
 0x40a   :  { %v4198_v45 = vpop.f32.mrb[184].mxu0  ;;  %v4310_v46 = vpop.f32.mrb[184].mxu1  ;;  %3554 = vmax.xlane.f32.xlu0 %v5894_v44  ;;  %v5897_v24 = vadd.f32 %v4309_v56, %v3322_v42 }
 0x40b   :  { %v4199_v51 = vpop.f32.mrb[185].mxu0  ;;  %v4311_v48 = vpop.f32.mrb[185].mxu1 }
 0x40c   :  { %v4200_v49 = vadd.f32 %v4199_v51, %v4198_v45  ;;  %v4312_v50 = vadd.f32 %v4311_v48, %v4310_v46  ;;  %v4201_v8 = vpop.f32.mrb[186].mxu0  ;;  %v4313_v27 = vpop.f32.mrb[186].mxu1  ;;  %3556 = vmax.xlane.f32.xlu1 %v5897_v24 }
 0x40d   :  { %v4202_v34 = vpop.f32.mrb[187].mxu0  ;;  %v4314_v36 = vpop.f32.mrb[187].mxu1 }
 0x40e   :  { %v3327_v55 = vadd.f32 %v4200_v49, %v5786_v38  ;;  %v4203_v60 = vadd.f32 %v4202_v34, %v4201_v8  ;;  %v4315_v25 = vadd.f32 %v4314_v36, %v4313_v27 }
 0x410   :  { %v3330_v43 = vadd.f32 %v4203_v60, %v5786_v38  ;;  %v5902_v47 = vadd.f32 %v4312_v50, %v3327_v55 }
 0x412   :  { %v4204_v37 = vpop.f32.mrb[188].mxu0  ;;  %v4316_v32 = vpop.f32.mrb[188].mxu1  ;;  %3558 = vmax.xlane.f32.xlu0 %v5902_v47  ;;  %v5905_v20 = vadd.f32 %v4315_v25, %v3330_v43 }
 0x413   :  { %v4205_v16 = vpop.f32.mrb[189].mxu0  ;;  %v4317_v57 = vpop.f32.mrb[189].mxu1 }
 0x414   :  { %v4206_v22 = vadd.f32 %v4205_v16, %v4204_v37  ;;  %v4318_v63 = vadd.f32 %v4317_v57, %v4316_v32  ;;  %v4207_v0 = vpop.f32.mrb[190].mxu0  ;;  %v4319_v1 = vpop.f32.mrb[190].mxu1  ;;  %3560 = vmax.xlane.f32.xlu1 %v5905_v20 }
 0x415   :  { %v4208_v2 = vpop.f32.mrb[191].mxu0  ;;  %v4320_v58 = vpop.f32.mrb[191].mxu1 }
 0x416   :  { %v3335_v5 = vadd.f32 %v4206_v22, %v5786_v38  ;;  %v4209_v6 = vadd.f32 %v4208_v2, %v4207_v0  ;;  %v4321_v10 = vadd.f32 %v4320_v58, %v4319_v1 }
 0x418   :  { %v3338_v11 = vadd.f32 %v4209_v6, %v5786_v38  ;;  %v5910_v18 = vadd.f32 %v4318_v63, %v3335_v5 }
 0x41a   :  { %3562 = vmax.xlane.f32.xlu0 %v5910_v18  ;;  %v5913_v4 = vadd.f32 %v4321_v10, %v3338_v11 }
 0x41c   :  { %3564 = vmax.xlane.f32.xlu1 %v5913_v4 }
 0x42f   :  { %v3503_v23 = vpop.xlane.xlu0 %3502 }
 0x430   :  { %v5917_v56 = vsub.f32 %v5790_v30, %v3503_v23 }
 0x432   :  { %v3598_v42 = vmul.f32 1.442695, %v5917_v56 }
 0x433   :  { %v3505_v45 = vpop.xlane.xlu0 %3504 }
 0x434   :  { %4909 = vpow2.f32 %v3598_v42  ;;  %v5921_v46 = vsub.f32 %v5793_v41, %v3505_v45 }
 0x436   :  { %v3600_v38 = vmul.f32 1.442695, %v5921_v46 }
 0x437   :  { %v3507_v51 = vpop.xlane.xlu1 %3506 }
 0x438   :  { %4911 = vpow2.f32 %v3600_v38  ;;  %v5925_v48 = vsub.f32 %v5798_v52, %v3507_v51 }
 0x43a   :  { %v3602_v49 = vmul.f32 1.442695, %v5925_v48 }
 0x43b   :  { %v3509_v50 = vpop.xlane.xlu1 %3508 }
 0x43c   :  { %4913 = vpow2.f32 %v3602_v49  ;;  %v5929_v30 = vsub.f32 %v5801_v54, %v3509_v50 }
 0x43e   :  { %v4910_v8 = vpop.eup %4909  ;;  %v3604_v27 = vmul.f32 1.442695, %v5929_v30 }
 0x43f   :  { %3662 = vadd.xlane.f32.xlu0 %v4910_v8  ;;  %v3511_v41 = vpop.xlane.xlu0 %3510 }
 0x440   :  { %4915 = vpow2.f32 %v3604_v27  ;;  %v5933_v34 = vsub.f32 %v5806_v35, %v3511_v41 }
 0x441   :  { %v3513_v36 = vpop.xlane.xlu1 %3512 }
 0x442   :  { %v4912_v55 = vpop.eup %4911  ;;  %v3606_v52 = vmul.f32 1.442695, %v5933_v34  ;;  %v5937_v60 = vsub.f32 %v5809_v26, %v3513_v36 }
 0x443   :  { %3664 = vadd.xlane.f32.xlu1 %v4912_v55 }
 0x444   :  { %4917 = vpow2.f32 %v3606_v52  ;;  %v3608_v54 = vmul.f32 1.442695, %v5937_v60 }
 0x446   :  { %v4914_v25 = vpop.eup %4913  ;;  %4919 = vpow2.f32 %v3608_v54 }
 0x447   :  { %3666 = vadd.xlane.f32.xlu0 %v4914_v25  ;;  %v3515_v43 = vpop.xlane.xlu0 %3514 }
 0x448   :  { %v5941_v37 = vsub.f32 %v5814_v15, %v3515_v43 }
 0x449   :  { %v3517_v35 = vpop.xlane.xlu1 %3516 }
 0x44a   :  { %v4916_v32 = vpop.eup %4915  ;;  %v3610_v16 = vmul.f32 1.442695, %v5941_v37  ;;  %v5945_v57 = vsub.f32 %v5817_v3, %v3517_v35 }
 0x44b   :  { %3668 = vadd.xlane.f32.xlu1 %v4916_v32 }
 0x44c   :  { %4921 = vpow2.f32 %v3610_v16  ;;  %v3612_v26 = vmul.f32 1.442695, %v5945_v57 }
 0x44e   :  { %v4918_v22 = vpop.eup %4917  ;;  %4923 = vpow2.f32 %v3612_v26 }
 0x44f   :  { %3670 = vadd.xlane.f32.xlu0 %v4918_v22  ;;  %v3519_v63 = vpop.xlane.xlu0 %3518 }
 0x450   :  { %v4920_v0 = vpop.eup %4919  ;;  %v5949_v1 = vsub.f32 %v5822_v31, %v3519_v63 }
 0x451   :  { %v3521_v15 = vpop.xlane.xlu1 %3520  ;;  %3672 = vadd.xlane.f32.xlu1 %v4920_v0 }
 0x452   :  { %v3614_v2 = vmul.f32 1.442695, %v5949_v1  ;;  %v5953_v58 = vsub.f32 %v5825_v40, %v3521_v15 }
 0x454   :  { %4925 = vpow2.f32 %v3614_v2  ;;  %v3616_v3 = vmul.f32 1.442695, %v5953_v58 }
 0x456   :  { %v4922_v5 = vpop.eup %4921  ;;  %4927 = vpow2.f32 %v3616_v3 }
 0x457   :  { %3674 = vadd.xlane.f32.xlu0 %v4922_v5  ;;  %v3523_v6 = vpop.xlane.xlu0 %3522 }
 0x458   :  { %v4924_v10 = vpop.eup %4923  ;;  %v5957_v11 = vsub.f32 %v5830_v29, %v3523_v6 }
 0x459   :  { %v3525_v31 = vpop.xlane.xlu1 %3524  ;;  %3676 = vadd.xlane.f32.xlu1 %v4924_v10 }
 0x45a   :  { %v3618_v23 = vmul.f32 1.442695, %v5957_v11  ;;  %v5961_v42 = vsub.f32 %v5833_v9, %v3525_v31 }
 0x45c   :  { %4929 = vpow2.f32 %v3618_v23  ;;  %v3620_v40 = vmul.f32 1.442695, %v5961_v42 }
 0x45e   :  { %v4926_v45 = vpop.eup %4925  ;;  %4931 = vpow2.f32 %v3620_v40 }
 0x45f   :  { %3678 = vadd.xlane.f32.xlu0 %v4926_v45  ;;  %v3527_v38 = vpop.xlane.xlu0 %3526 }
 0x460   :  { %v4928_v51 = vpop.eup %4927  ;;  %v5965_v49 = vsub.f32 %v5838_v59, %v3527_v38 }
 0x461   :  { %v3529_v29 = vpop.xlane.xlu1 %3528  ;;  %3680 = vadd.xlane.f32.xlu1 %v4928_v51 }
 0x462   :  { %v3622_v50 = vmul.f32 1.442695, %v5965_v49  ;;  %v5969_v8 = vsub.f32 %v5841_v62, %v3529_v29 }
 0x464   :  { %4933 = vpow2.f32 %v3622_v50  ;;  %v3624_v9 = vmul.f32 1.442695, %v5969_v8 }
 0x466   :  { %v4930_v27 = vpop.eup %4929  ;;  %4935 = vpow2.f32 %v3624_v9 }
 0x467   :  { %3682 = vadd.xlane.f32.xlu0 %v4930_v27  ;;  %v3531_v41 = vpop.xlane.xlu0 %3530 }
 0x468   :  { %v4932_v36 = vpop.eup %4931  ;;  %v5973_v55 = vsub.f32 %v5846_v17, %v3531_v41 }
 0x469   :  { %v3533_v59 = vpop.xlane.xlu1 %3532  ;;  %3684 = vadd.xlane.f32.xlu1 %v4932_v36 }
 0x46a   :  { %v3626_v52 = vmul.f32 1.442695, %v5973_v55  ;;  %v5977_v54 = vsub.f32 %v5849_v28, %v3533_v59 }
 0x46c   :  { %4937 = vpow2.f32 %v3626_v52  ;;  %v3628_v62 = vmul.f32 1.442695, %v5977_v54 }
 0x46e   :  { %v4934_v25 = vpop.eup %4933  ;;  %4939 = vpow2.f32 %v3628_v62 }
 0x46f   :  { %3686 = vadd.xlane.f32.xlu0 %v4934_v25  ;;  %v3535_v43 = vpop.xlane.xlu0 %3534 }
 0x470   :  { %v4936_v35 = vpop.eup %4935  ;;  %v5981_v32 = vsub.f32 %v5854_v53, %v3535_v43 }
 0x471   :  { %v3537_v17 = vpop.xlane.xlu1 %3536  ;;  %3688 = vadd.xlane.f32.xlu1 %v4936_v35 }
 0x472   :  { %v3630_v16 = vmul.f32 1.442695, %v5981_v32  ;;  %v5985_v26 = vsub.f32 %v5857_v33, %v3537_v17 }
 0x474   :  { %4941 = vpow2.f32 %v3630_v16  ;;  %v3632_v28 = vmul.f32 1.442695, %v5985_v26 }
 0x476   :  { %v4938_v22 = vpop.eup %4937  ;;  %4943 = vpow2.f32 %v3632_v28 }
 0x477   :  { %3690 = vadd.xlane.f32.xlu0 %v4938_v22  ;;  %v3539_v63 = vpop.xlane.xlu0 %3538 }
 0x478   :  { %v4940_v0 = vpop.eup %4939  ;;  %v5989_v15 = vsub.f32 %v5862_v12, %v3539_v63 }
 0x479   :  { %v3541_v53 = vpop.xlane.xlu1 %3540  ;;  %3692 = vadd.xlane.f32.xlu1 %v4940_v0 }
 0x47a   :  { %v3634_v2 = vmul.f32 1.442695, %v5989_v15  ;;  %v5993_v3 = vsub.f32 %v5865_v19, %v3541_v53 }
 0x47c   :  { %4945 = vpow2.f32 %v3634_v2  ;;  %v3636_v33 = vmul.f32 1.442695, %v5993_v3 }
 0x47e   :  { %v4942_v5 = vpop.eup %4941  ;;  %4947 = vpow2.f32 %v3636_v33 }
 0x47f   :  { %3694 = vadd.xlane.f32.xlu0 %v4942_v5  ;;  %v3543_v6 = vpop.xlane.xlu0 %3542 }
 0x480   :  { %v4944_v10 = vpop.eup %4943  ;;  %v5997_v31 = vsub.f32 %v5870_v14, %v3543_v6 }
 0x481   :  { %v3545_v12 = vpop.xlane.xlu1 %3544  ;;  %3696 = vadd.xlane.f32.xlu1 %v4944_v10 }
 0x482   :  { %v3638_v23 = vmul.f32 1.442695, %v5997_v31  ;;  %v6001_v40 = vsub.f32 %v5873_v21, %v3545_v12 }
 0x484   :  { %4949 = vpow2.f32 %v3638_v23  ;;  %v3640_v19 = vmul.f32 1.442695, %v6001_v40 }
 0x486   :  { %v4946_v45 = vpop.eup %4945  ;;  %4951 = vpow2.f32 %v3640_v19 }
 0x487   :  { %3698 = vadd.xlane.f32.xlu0 %v4946_v45  ;;  %v3547_v38 = vpop.xlane.xlu0 %3546 }
 0x488   :  { %v4948_v51 = vpop.eup %4947  ;;  %v6005_v29 = vsub.f32 %v5878_v39, %v3547_v38 }
 0x489   :  { %v3549_v14 = vpop.xlane.xlu1 %3548  ;;  %3700 = vadd.xlane.f32.xlu1 %v4948_v51 }
 0x48a   :  { %v3642_v50 = vmul.f32 1.442695, %v6005_v29  ;;  %v6009_v9 = vsub.f32 %v5881_v7, %v3549_v14 }
 0x48c   :  { %4953 = vpow2.f32 %v3642_v50  ;;  %v3644_v21 = vmul.f32 1.442695, %v6009_v9 }
 0x48e   :  { %v4950_v27 = vpop.eup %4949  ;;  %4955 = vpow2.f32 %v3644_v21 }
 0x48f   :  { %3702 = vadd.xlane.f32.xlu0 %v4950_v27  ;;  %v3551_v41 = vpop.xlane.xlu0 %3550 }
 0x490   :  { %v4952_v36 = vpop.eup %4951  ;;  %v6013_v59 = vsub.f32 %v5886_v61, %v3551_v41 }
 0x491   :  { %v3553_v39 = vpop.xlane.xlu1 %3552  ;;  %3704 = vadd.xlane.f32.xlu1 %v4952_v36 }
 0x492   :  { %v3646_v52 = vmul.f32 1.442695, %v6013_v59  ;;  %v6017_v62 = vsub.f32 %v5889_v13, %v3553_v39 }
 0x494   :  { %4957 = vpow2.f32 %v3646_v52  ;;  %v3648_v7 = vmul.f32 1.442695, %v6017_v62 }
 0x496   :  { %v4954_v25 = vpop.eup %4953  ;;  %4959 = vpow2.f32 %v3648_v7 }
 0x497   :  { %3706 = vadd.xlane.f32.xlu0 %v4954_v25  ;;  %v3555_v43 = vpop.xlane.xlu0 %3554 }
 0x498   :  { %v4956_v35 = vpop.eup %4955  ;;  %v6021_v17 = vsub.f32 %v5894_v44, %v3555_v43 }
 0x499   :  { %v3557_v61 = vpop.xlane.xlu1 %3556  ;;  %3708 = vadd.xlane.f32.xlu1 %v4956_v35 }
 0x49a   :  { %v3650_v16 = vmul.f32 1.442695, %v6021_v17  ;;  %v6025_v28 = vsub.f32 %v5897_v24, %v3557_v61 }
 0x49c   :  { %4961 = vpow2.f32 %v3650_v16  ;;  %v3652_v13 = vmul.f32 1.442695, %v6025_v28 }
 0x49e   :  { %v4958_v22 = vpop.eup %4957  ;;  %4963 = vpow2.f32 %v3652_v13 }
 0x49f   :  { %3710 = vadd.xlane.f32.xlu0 %v4958_v22  ;;  %v3559_v63 = vpop.xlane.xlu0 %3558 }
 0x4a0   :  { %v4960_v0 = vpop.eup %4959  ;;  %v6029_v53 = vsub.f32 %v5902_v47, %v3559_v63 }
 0x4a1   :  { %v3561_v44 = vpop.xlane.xlu1 %3560  ;;  %3712 = vadd.xlane.f32.xlu1 %v4960_v0 }
 0x4a2   :  { %v3654_v2 = vmul.f32 1.442695, %v6029_v53  ;;  %v6033_v33 = vsub.f32 %v5905_v20, %v3561_v44 }
 0x4a4   :  { %4965 = vpow2.f32 %v3654_v2  ;;  %v3656_v24 = vmul.f32 1.442695, %v6033_v33 }
 0x4a6   :  { %v4962_v5 = vpop.eup %4961  ;;  %4967 = vpow2.f32 %v3656_v24 }
 0x4a7   :  { %3714 = vadd.xlane.f32.xlu0 %v4962_v5  ;;  %v3563_v6 = vpop.xlane.xlu0 %3562 }
 0x4a8   :  { %v4964_v10 = vpop.eup %4963  ;;  %v6037_v12 = vsub.f32 %v5910_v18, %v3563_v6 }
 0x4a9   :  { %v3565_v47 = vpop.xlane.xlu1 %3564  ;;  %3716 = vadd.xlane.f32.xlu1 %v4964_v10 }
 0x4aa   :  { %v3658_v23 = vmul.f32 1.442695, %v6037_v12  ;;  %v6041_v19 = vsub.f32 %v5913_v4, %v3565_v47 }
 0x4ac   :  { %4969 = vpow2.f32 %v3658_v23  ;;  %v3660_v20 = vmul.f32 1.442695, %v6041_v19 }
 0x4ae   :  { %v4966_v45 = vpop.eup %4965  ;;  %4971 = vpow2.f32 %v3660_v20 }
 0x4af   :  { %3718 = vadd.xlane.f32.xlu0 %v4966_v45 }
 0x4b0   :  { %v4968_v38 = vpop.eup %4967 }
 0x4b1   :  { %3720 = vadd.xlane.f32.xlu1 %v4968_v38 }
 0x4b6   :  { %v4970_v51 = vpop.eup %4969 }
 0x4b7   :  { %3722 = vadd.xlane.f32.xlu0 %v4970_v51 }
 0x4b8   :  { %v4972_v14 = vpop.eup %4971 }
 0x4b9   :  { %3724 = vadd.xlane.f32.xlu1 %v4972_v14 }
 0x4cc   :  { %v3663_v18 = vpop.xlane.xlu0 %3662 }
 0x4cd   :  { %4973 = vlog2.f32 %v3663_v18 }
 0x4d0   :  { %v3665_v50 = vpop.xlane.xlu1 %3664 }
 0x4d1   :  { %4975 = vlog2.f32 %v3665_v50 }
 0x4d4   :  { %v3667_v21 = vpop.xlane.xlu0 %3666 }
 0x4d5   :  { %4977 = vlog2.f32 %v3667_v21 }
 0x4d7   :  { %v4974_v4 = vpop.eup %4973 }
 0x4d8   :  { %v3727_v27 = vmul.f32 0.6931472, %v4974_v4  ;;  %v3669_v41 = vpop.xlane.xlu1 %3668 }
 0x4d9   :  { %4979 = vlog2.f32 %v3669_v41 }
 0x4da   :  { %v3790_v36 = vsub.f32 %v5917_v56, %v3727_v27 }
 0x4db   :  { %v4976_v39 = vpop.eup %4975 }
 0x4dc   :  { %3822 = vst [vmem:[#allocation10] sm:$0xff] %v3790_v36  ;;  %v3729_v52 = vmul.f32 0.6931472, %v4976_v39  ;;  %v3671_v7 = vpop.xlane.xlu0 %3670 }
 0x4dd   :  { %4981 = vlog2.f32 %v3671_v7 }
 0x4de   :  { %v3791_v25 = vsub.f32 %v5921_v46, %v3729_v52  ;;  %v3673_v43 = vpop.xlane.xlu1 %3672 }
 0x4df   :  { %v4978_v35 = vpop.eup %4977  ;;  %4983 = vlog2.f32 %v3673_v43 }
 0x4e0   :  { %3823 = vst [vmem:[#allocation10 + $0x8] sm:$0xff] %v3791_v25  ;;  %v3731_v61 = vmul.f32 0.6931472, %v4978_v35 }
 0x4e2   :  { %v3792_v16 = vsub.f32 %v5925_v48, %v3731_v61 }
 0x4e3   :  { %v4980_v13 = vpop.eup %4979 }
 0x4e4   :  { %3824 = vst [vmem:[#allocation10 + $0x10] sm:$0xff] %v3792_v16  ;;  %v3733_v22 = vmul.f32 0.6931472, %v4980_v13  ;;  %v3675_v63 = vpop.xlane.xlu0 %3674 }
 0x4e5   :  { %4985 = vlog2.f32 %v3675_v63 }
 0x4e6   :  { %v3793_v56 = vsub.f32 %v5929_v30, %v3733_v22  ;;  %v3677_v0 = vpop.xlane.xlu1 %3676 }
 0x4e7   :  { %v4982_v44 = vpop.eup %4981  ;;  %4987 = vlog2.f32 %v3677_v0 }
 0x4e8   :  { %3825 = vst [vmem:[#allocation10 + $0x18] sm:$0xff] %v3793_v56  ;;  %v3735_v2 = vmul.f32 0.6931472, %v4982_v44 }
 0x4e9   :  { %v4984_v46 = vpop.eup %4983 }
 0x4ea   :  { %v3794_v24 = vsub.f32 %v5933_v34, %v3735_v2  ;;  %v3737_v5 = vmul.f32 0.6931472, %v4984_v46 }
 0x4ec   :  { %3826 = vst [vmem:[#allocation10 + $0x20] sm:$0xff] %v3794_v24  ;;  %v3795_v6 = vsub.f32 %v5937_v60, %v3737_v5  ;;  %v3679_v48 = vpop.xlane.xlu0 %3678 }
 0x4ed   :  { %4989 = vlog2.f32 %v3679_v48 }
 0x4ee   :  { %3827 = vst [vmem:[#allocation10 + $0x28] sm:$0xff] %v3795_v6  ;;  %v3681_v10 = vpop.xlane.xlu1 %3680 }
 0x4ef   :  { %v4986_v47 = vpop.eup %4985  ;;  %4991 = vlog2.f32 %v3681_v10 }
 0x4f0   :  { %v3739_v23 = vmul.f32 0.6931472, %v4986_v47 }
 0x4f1   :  { %v4988_v30 = vpop.eup %4987 }
 0x4f2   :  { %v3796_v20 = vsub.f32 %v5941_v37, %v3739_v23  ;;  %v3741_v45 = vmul.f32 0.6931472, %v4988_v30 }
 0x4f4   :  { %3828 = vst [vmem:[#allocation10 + $0x30] sm:$0xff] %v3796_v20  ;;  %v3797_v38 = vsub.f32 %v5945_v57, %v3741_v45  ;;  %v3683_v51 = vpop.xlane.xlu0 %3682 }
 0x4f5   :  { %4993 = vlog2.f32 %v3683_v51 }
 0x4f6   :  { %3829 = vst [vmem:[#allocation10 + $0x38] sm:$0xff] %v3797_v38  ;;  %v3685_v34 = vpop.xlane.xlu1 %3684 }
 0x4f7   :  { %v4990_v14 = vpop.eup %4989  ;;  %4995 = vlog2.f32 %v3685_v34 }
 0x4f8   :  { %v3743_v60 = vmul.f32 0.6931472, %v4990_v14 }
 0x4f9   :  { %v4992_v18 = vpop.eup %4991 }
 0x4fa   :  { %v3798_v50 = vsub.f32 %v5949_v1, %v3743_v60  ;;  %v3745_v21 = vmul.f32 0.6931472, %v4992_v18 }
 0x4fc   :  { %3830 = vst [vmem:[#allocation10 + $0x40] sm:$0xff] %v3798_v50  ;;  %v3799_v4 = vsub.f32 %v5953_v58, %v3745_v21  ;;  %v3687_v27 = vpop.xlane.xlu0 %3686 }
 0x4fd   :  { %4997 = vlog2.f32 %v3687_v27 }
 0x4fe   :  { %3831 = vst [vmem:[#allocation10 + $0x48] sm:$0xff] %v3799_v4  ;;  %v3689_v37 = vpop.xlane.xlu1 %3688 }
 0x4ff   :  { %v4994_v41 = vpop.eup %4993  ;;  %4999 = vlog2.f32 %v3689_v37 }
 0x500   :  { %v3747_v57 = vmul.f32 0.6931472, %v4994_v41 }
 0x501   :  { %v4996_v36 = vpop.eup %4995 }
 0x502   :  { %v3800_v39 = vsub.f32 %v5957_v11, %v3747_v57  ;;  %v3749_v52 = vmul.f32 0.6931472, %v4996_v36 }
 0x504   :  { %3832 = vst [vmem:[#allocation10 + $0x50] sm:$0xff] %v3800_v39  ;;  %v3801_v7 = vsub.f32 %v5961_v42, %v3749_v52  ;;  %v3691_v25 = vpop.xlane.xlu0 %3690 }
 0x505   :  { %5001 = vlog2.f32 %v3691_v25 }
 0x506   :  { %3833 = vst [vmem:[#allocation10 + $0x58] sm:$0xff] %v3801_v7  ;;  %v3693_v1 = vpop.xlane.xlu1 %3692 }
 0x507   :  { %v4998_v43 = vpop.eup %4997  ;;  %5003 = vlog2.f32 %v3693_v1 }
 0x508   :  { %v3751_v58 = vmul.f32 0.6931472, %v4998_v43 }
 0x509   :  { %v5000_v35 = vpop.eup %4999 }
 0x50a   :  { %v3802_v61 = vsub.f32 %v5965_v49, %v3751_v58  ;;  %v3753_v16 = vmul.f32 0.6931472, %v5000_v35 }
 0x50c   :  { %3834 = vst [vmem:[#allocation10 + $0x60] sm:$0xff] %v3802_v61  ;;  %v3803_v13 = vsub.f32 %v5969_v8, %v3753_v16  ;;  %v3695_v22 = vpop.xlane.xlu0 %3694 }
 0x50d   :  { %5005 = vlog2.f32 %v3695_v22 }
 0x50e   :  { %3835 = vst [vmem:[#allocation10 + $0x68] sm:$0xff] %v3803_v13  ;;  %v3697_v11 = vpop.xlane.xlu1 %3696 }
 0x50f   :  { %v5002_v63 = vpop.eup %5001  ;;  %5007 = vlog2.f32 %v3697_v11 }
 0x510   :  { %v3755_v42 = vmul.f32 0.6931472, %v5002_v63 }
 0x511   :  { %v5004_v56 = vpop.eup %5003 }
 0x512   :  { %v3804_v0 = vsub.f32 %v5973_v55, %v3755_v42  ;;  %v3757_v44 = vmul.f32 0.6931472, %v5004_v56 }
 0x514   :  { %3836 = vst [vmem:[#allocation10 + $0x70] sm:$0xff] %v3804_v0  ;;  %v3805_v2 = vsub.f32 %v5977_v54, %v3757_v44  ;;  %v3699_v46 = vpop.xlane.xlu0 %3698 }
 0x515   :  { %5009 = vlog2.f32 %v3699_v46 }
 0x516   :  { %3837 = vst [vmem:[#allocation10 + $0x78] sm:$0xff] %v3805_v2  ;;  %v3701_v49 = vpop.xlane.xlu1 %3700 }
 0x517   :  { %v5006_v24 = vpop.eup %5005  ;;  %5011 = vlog2.f32 %v3701_v49 }
 0x518   :  { %v3759_v8 = vmul.f32 0.6931472, %v5006_v24 }
 0x519   :  { %v5008_v5 = vpop.eup %5007 }
 0x51a   :  { %v3806_v6 = vsub.f32 %v5981_v32, %v3759_v8  ;;  %v3761_v48 = vmul.f32 0.6931472, %v5008_v5 }
 0x51c   :  { %3838 = vst [vmem:[#allocation10 + $0x80] sm:$0xff] %v3806_v6  ;;  %v3807_v10 = vsub.f32 %v5985_v26, %v3761_v48  ;;  %v3703_v47 = vpop.xlane.xlu0 %3702 }
 0x51d   :  { %5013 = vlog2.f32 %v3703_v47 }
 0x51e   :  { %3839 = vst [vmem:[#allocation10 + $0x88] sm:$0xff] %v3807_v10  ;;  %v3705_v55 = vpop.xlane.xlu1 %3704 }
 0x51f   :  { %v5010_v23 = vpop.eup %5009  ;;  %5015 = vlog2.f32 %v3705_v55 }
 0x520   :  { %v3763_v54 = vmul.f32 0.6931472, %v5010_v23 }
 0x521   :  { %v5012_v30 = vpop.eup %5011 }
 0x522   :  { %v3808_v20 = vsub.f32 %v5989_v15, %v3763_v54  ;;  %v3765_v45 = vmul.f32 0.6931472, %v5012_v30 }
 0x524   :  { %3840 = vst [vmem:[#allocation10 + $0x90] sm:$0xff] %v3808_v20  ;;  %v3809_v38 = vsub.f32 %v5993_v3, %v3765_v45  ;;  %v3707_v51 = vpop.xlane.xlu0 %3706 }
 0x525   :  { %5017 = vlog2.f32 %v3707_v51 }
 0x526   :  { %3841 = vst [vmem:[#allocation10 + $0x98] sm:$0xff] %v3809_v38  ;;  %v3709_v32 = vpop.xlane.xlu1 %3708 }
 0x527   :  { %v5014_v34 = vpop.eup %5013  ;;  %5019 = vlog2.f32 %v3709_v32 }
 0x528   :  { %v3767_v26 = vmul.f32 0.6931472, %v5014_v34 }
 0x529   :  { %v5016_v14 = vpop.eup %5015 }
 0x52a   :  { %v3810_v60 = vsub.f32 %v5997_v31, %v3767_v26  ;;  %v3769_v18 = vmul.f32 0.6931472, %v5016_v14 }
 0x52c   :  { %3842 = vst [vmem:[#allocation10 + $0xa0] sm:$0xff] %v3810_v60  ;;  %v3811_v50 = vsub.f32 %v6001_v40, %v3769_v18  ;;  %v3711_v21 = vpop.xlane.xlu0 %3710 }
 0x52d   :  { %5021 = vlog2.f32 %v3711_v21 }
 0x52e   :  { %3843 = vst [vmem:[#allocation10 + $0xa8] sm:$0xff] %v3811_v50  ;;  %v3713_v15 = vpop.xlane.xlu1 %3712 }
 0x52f   :  { %v5018_v4 = vpop.eup %5017  ;;  %5023 = vlog2.f32 %v3713_v15 }
 0x530   :  { %v3771_v3 = vmul.f32 0.6931472, %v5018_v4 }
 0x531   :  { %v5020_v27 = vpop.eup %5019 }
 0x532   :  { %v3812_v37 = vsub.f32 %v6005_v29, %v3771_v3  ;;  %v3773_v41 = vmul.f32 0.6931472, %v5020_v27 }
 0x534   :  { %3844 = vst [vmem:[#allocation10 + $0xb0] sm:$0xff] %v3812_v37  ;;  %v3813_v57 = vsub.f32 %v6009_v9, %v3773_v41  ;;  %v3715_v36 = vpop.xlane.xlu0 %3714 }
 0x535   :  { %5025 = vlog2.f32 %v3715_v36 }
 0x536   :  { %3845 = vst [vmem:[#allocation10 + $0xb8] sm:$0xff] %v3813_v57  ;;  %v3717_v31 = vpop.xlane.xlu1 %3716 }
 0x537   :  { %v5022_v39 = vpop.eup %5021  ;;  %5027 = vlog2.f32 %v3717_v31 }
 0x538   :  { %v3775_v40 = vmul.f32 0.6931472, %v5022_v39 }
 0x539   :  { %v5024_v52 = vpop.eup %5023 }
 0x53a   :  { %v3814_v7 = vsub.f32 %v6013_v59, %v3775_v40  ;;  %v3777_v25 = vmul.f32 0.6931472, %v5024_v52 }
 0x53c   :  { %3846 = vst [vmem:[#allocation10 + $0xc0] sm:$0xff] %v3814_v7  ;;  %v3815_v1 = vsub.f32 %v6017_v62, %v3777_v25  ;;  %v3719_v43 = vpop.xlane.xlu0 %3718 }
 0x53d   :  { %5029 = vlog2.f32 %v3719_v43 }
 0x53e   :  { %3847 = vst [vmem:[#allocation10 + $0xc8] sm:$0xff] %v3815_v1  ;;  %v3721_v29 = vpop.xlane.xlu1 %3720 }
 0x53f   :  { %v5026_v58 = vpop.eup %5025  ;;  %5031 = vlog2.f32 %v3721_v29 }
 0x540   :  { %v3779_v9 = vmul.f32 0.6931472, %v5026_v58 }
 0x541   :  { %v5028_v35 = vpop.eup %5027 }
 0x542   :  { %v3816_v61 = vsub.f32 %v6021_v17, %v3779_v9  ;;  %v3781_v16 = vmul.f32 0.6931472, %v5028_v35 }
 0x544   :  { %3848 = vst [vmem:[#allocation10 + $0xd0] sm:$0xff] %v3816_v61  ;;  %v3817_v13 = vsub.f32 %v6025_v28, %v3781_v16  ;;  %v3723_v22 = vpop.xlane.xlu0 %3722 }
 0x545   :  { %5033 = vlog2.f32 %v3723_v22 }
 0x546   :  { %3849 = vst [vmem:[#allocation10 + $0xd8] sm:$0xff] %v3817_v13  ;;  %v3725_v59 = vpop.xlane.xlu1 %3724 }
 0x547   :  { %v5030_v11 = vpop.eup %5029  ;;  %5035 = vlog2.f32 %v3725_v59 }
 0x548   :  { %v3783_v62 = vmul.f32 0.6931472, %v5030_v11 }
 0x549   :  { %v5032_v63 = vpop.eup %5031 }
 0x54a   :  { %v3818_v42 = vsub.f32 %v6029_v53, %v3783_v62  ;;  %v3785_v56 = vmul.f32 0.6931472, %v5032_v63 }
 0x54c   :  { %3850 = vst [vmem:[#allocation10 + $0xe0] sm:$0xff] %v3818_v42  ;;  %v3819_v0 = vsub.f32 %v6033_v33, %v3785_v56 }
 0x54e   :  { %3851 = vst [vmem:[#allocation10 + $0xe8] sm:$0xff] %v3819_v0 }
 0x54f   :  { %v5034_v17 = vpop.eup %5033 }
 0x550   :  { %v3787_v44 = vmul.f32 0.6931472, %v5034_v17 }
 0x551   :  { %v5036_v28 = vpop.eup %5035 }
 0x552   :  { %v3820_v2 = vsub.f32 %v6037_v12, %v3787_v44  ;;  %v3789_v46 = vmul.f32 0.6931472, %v5036_v28 }
 0x554   :  { %3852 = vst [vmem:[#allocation10 + $0xf0] sm:$0xff] %v3820_v2  ;;  %v3821_v49 = vsub.f32 %v6041_v19, %v3789_v46 }
 0x556   :  { %3853 = vst [vmem:[#allocation10 + $0xf8] sm:$0xff] %v3821_v49 }
 0x557   :  { %5136 = shalt.err (!%p5133_p8)
}
 0x558   :  { %s5137_s11 = scalar_lea.hbm %s6095_s7, 4096 }
 0x559   :  { %p5138_p9 = scmp.ne.s32.totalorder %s6095_s7, %s5137_s11  ;;  %p5141_p10 = scmp.lt.u32.totalorder %s5137_s11, %s6095_s7 }
 0x55b   :  { %p5143_p11 = pnand %p5141_p10, %p5138_p9 }
 0x55d   :  { %5146 = shalt.err (!%p5143_p11)
}
 0x55e   :  { %s5164_s27 = smov 128   ;;  %s5165_s17 = smov 8  }
 0x55f   :  { %3865 = dma.vmem_to_hbm [thread:$0]  %s3860_s30, 4096, %s6095_s7, [#allocation4], %s5164_s27, %s5164_s27, %s5165_s17  }
 0x560   :  { %5153 = dma.done.wait [#allocation4], 4096  }
 0x561   :  { %5154 = vsyncadd [#allocation4], 4294963200 }
 0x562   :  { %3869 = vsyncpa [#allocation3], 1 }
 0x563   :  { %3870 = vsyncpa [#allocation6], 1 }
 0x564   :  { %3871 = vsyncpa [#allocation9], 1 }
 0x565   :  { %3872 = vsyncpa [#allocation4], 1 }

</bundles_post_ra>
